<compile_context>
chip_gen: v5e
topology: v5e:2x2
jax: 0.10.0
libtpu: 0.0.40
codegen_flags: <defaults>
</compile_context>

<pallas_src>
import functools

import jax
import jax.numpy as jnp
from jax import lax
from jax.experimental import pallas as pl
from jax.experimental.pallas import tpu as pltpu

SUBLANE = 16     # bf16 sublane packing: batch is padded up to a multiple of this
LANE = 128       # lane width: fc2 output padded to this for a lane-dense store


# ----------------------------------------------------------------------------
# One fused (fwd+bwd) bidirectional LSTM layer; one time chunk per grid step.
# Ref order:
#   [xf_0, xb_0, ..., xf_{S-1}, xb_{S-1}, wih, whh, bias,
#    (out_fwd, out_bwd if emit_seq), (h_n if emit_hn),
#    gx_fwd, gx_bwd, h_carry, c_carry]
#   xf_s / xb_s : (Tc*Bp, D_s) bf16   forward / backward chunk view of input s
#   wih         : (2, sum(D_s), 4H) bf16  pre-transposed, gate order i,f,o,g
#   whh         : (2, H, 4H) bf16
#   bias        : (2, 1, 4H) f32      bias_ih + bias_hh folded together
#   out_fwd/bwd : (Tc*Bp, H) bf16     per-timestep hidden states (original time order)
#   h_n         : (2, Bp, H) f32      final hidden state per direction
#   gx_fwd/bwd  : VMEM (Tc*Bp, 4H) bf16  chunk input projections (bias added per step)
#   h/c carry   : VMEM (2, Bp, H) f32 recurrent state carried across chunks
# ----------------------------------------------------------------------------
def bilstm_layer_kernel(*refs, hidden, chunk, batch, num_feats, emit_seq, emit_hn,
                        unroll):
    H, Tc, Bp, S = hidden, chunk, batch, num_feats

    idx = 0
    xf_refs, xb_refs = [], []
    for _ in range(S):
        xf_refs.append(refs[idx]); xb_refs.append(refs[idx + 1]); idx += 2
    wih_ref, whh_ref, b_ref = refs[idx], refs[idx + 1], refs[idx + 2]; idx += 3
    outf_ref = outb_ref = hn_ref = None
    if emit_seq:
        outf_ref, outb_ref = refs[idx], refs[idx + 1]; idx += 2
    if emit_hn:
        hn_ref = refs[idx]; idx += 1
    gxf_ref, gxb_ref, h_ref, c_ref = (refs[idx], refs[idx + 1],
                                      refs[idx + 2], refs[idx + 3])

    # ---- Phase 1: chunk input projection, one MXU matmul per (direction, input) ----
    wih = wih_ref[...]
    gf = gb = None
    off = 0
    for s in range(S):                                   # static python loop, S in {1,2}
        d = xf_refs[s].shape[-1]
        tf = jnp.dot(xf_refs[s][...], wih[0, off:off + d, :],
                     preferred_element_type=jnp.float32)
        tb = jnp.dot(xb_refs[s][...], wih[1, off:off + d, :],
                     preferred_element_type=jnp.float32)
        gf = tf if gf is None else gf + tf
        gb = tb if gb is None else gb + tb
        off += d
    gxf_ref[...] = gf.astype(jnp.bfloat16)               # bf16 scratch: halves VMEM
    gxb_ref[...] = gb.astype(jnp.bfloat16)

    # ---- Phase 2: recurrence; both directions interleaved in each step ----
    @pl.when(pl.program_id(0) == 0)
    def _():                                             # h0 = c0 = 0 at layer start
        h_ref[...] = jnp.zeros_like(h_ref)
        c_ref[...] = jnp.zeros_like(c_ref)

    bias_f = b_ref[0]                                    # (1, 4H) f32
    bias_b = b_ref[1]
    # Keep W_hh vreg-resident only when both directions fit comfortably (<= 64 KiB);
    # otherwise read per step from VMEM and let Mosaic schedule the loads.
    # TODO(synk): true weight-stationary MXU via pltpu.matmul_push_rhs/acc_lhs/pop.
    hoist_whh = (2 * H * 4 * H * 2) <= (64 * 1024)
    whh_f = whh_ref[0] if hoist_whh else None
    whh_b = whh_ref[1] if hoist_whh else None

    def gates(g):
        # gate order i, f, o, g: one sigmoid over a contiguous (Bp, 3H) slab
        sig = jax.nn.sigmoid(g[:, 0:3 * H])
        return (sig[:, 0:H], sig[:, H:2 * H], sig[:, 2 * H:3 * H],
                jnp.tanh(g[:, 3 * H:4 * H]))

    def step(t, carry):
        hf, cf, hb, cb = carry                           # f32 (Bp, H) x 4
        rowf = pl.multiple_of(t * Bp, Bp)                # fwd: local time t
        rowb = pl.multiple_of((Tc - 1 - t) * Bp, Bp)     # bwd: local time Tc-1-t
        wf = whh_f if hoist_whh else whh_ref[0]
        wb = whh_b if hoist_whh else whh_ref[1]
        gf = (gxf_ref[pl.ds(rowf, Bp), :].astype(jnp.float32) + bias_f
              + jnp.dot(hf.astype(jnp.bfloat16), wf,
                        preferred_element_type=jnp.float32))
        gb = (gxb_ref[pl.ds(rowb, Bp), :].astype(jnp.float32) + bias_b
              + jnp.dot(hb.astype(jnp.bfloat16), wb,
                        preferred_element_type=jnp.float32))
        i_f, f_f, o_f, g_f = gates(gf)
        i_b, f_b, o_b, g_b = gates(gb)
        cf_n = f_f * cf + i_f * g_f
        hf_n = o_f * jnp.tanh(cf_n)
        cb_n = f_b * cb + i_b * g_b
        hb_n = o_b * jnp.tanh(cb_n)
        if emit_seq:                                     # layer 1 skips dead stores
            outf_ref[pl.ds(rowf, Bp), :] = hf_n.astype(outf_ref.dtype)
            outb_ref[pl.ds(rowb, Bp), :] = hb_n.astype(outb_ref.dtype)
        return hf_n, cf_n, hb_n, cb_n

    carry0 = (h_ref[0], c_ref[0], h_ref[1], c_ref[1])
    hf, cf, hb, cb = lax.fori_loop(0, Tc, step, carry0, unroll=unroll)
    h_ref[0] = hf
    c_ref[0] = cf
    h_ref[1] = hb
    c_ref[1] = cb
    if emit_hn:                                          # final value lands on last chunk
        hn_ref[0] = hf
        hn_ref[1] = hb


def _pick_chunk(seq_len, requested=None):
    tc = max(1, min(seq_len, requested if requested else 32))
    while seq_len % tc:
        tc -= 1
    return tc


def _vmem_limit_bytes(dims, hidden, chunk, batch, emit_seq, emit_hn):
    def up(v, m):
        return (v + m - 1) // m * m
    H, Tc, Bp = hidden, chunk, batch
    tcb, g4, hl = Tc * Bp, up(4 * hidden, LANE), up(hidden, LANE)
    b = sum(tcb * up(d, LANE) * 2 for d in dims) * 2 * 2            # x views, dbl-buffer
    b += (2 * sum(dims) * g4 * 2 + 2 * H * g4 * 2 + 2 * g4 * 4) * 2  # weights + bias
    if emit_seq:
        b += 2 * tcb * hl * 2 * 2
    if emit_hn:
        b += 2 * Bp * hl * 4 * 2
    b += 2 * tcb * g4 * 2 + 2 * 2 * Bp * hl * 4                      # gx + h/c scratch
    return int(min(128 << 20, max(32 << 20, 2 * b)))


def run_bilstm_layer(xs, wih, whh, b, *, hidden, seq_len, batch, emit_seq, emit_hn,
                     time_chunk=None):
    """xs: list of (T*Bp, D_s) bf16 feature arrays (layer 0: [emb]; layer 1: [fwd, bwd]).

    Returns a tuple: (out_fwd, out_bwd) bf16 (T*Bp, H) if emit_seq, then (h_n,) f32
    (2, Bp, H) if emit_hn; direction index 0 = forward, 1 = backward.
    """
    H, T, Bp = hidden, seq_len, batch
    assert all(int(x.shape[0]) == T * Bp for x in xs)
    dims = [int(x.shape[-1]) for x in xs]
    Tc = _pick_chunk(T, time_chunk)
    assert T % Tc == 0
    NC = T // Tc
    last = NC - 1

    in_specs, operands = [], []
    for x in xs:
        d = int(x.shape[-1])
        in_specs.append(pl.BlockSpec((Tc * Bp, d), lambda c: (c, 0)))             # fwd view
        in_specs.append(pl.BlockSpec((Tc * Bp, d), lambda c, l=last: (l - c, 0)))  # bwd view
        operands += [x, x]
    in_specs += [
        pl.BlockSpec((2, sum(dims), 4 * H), lambda c: (0, 0, 0)),
        pl.BlockSpec((2, H, 4 * H), lambda c: (0, 0, 0)),
        pl.BlockSpec((2, 1, 4 * H), lambda c: (0, 0, 0)),
    ]
    operands += [wih, whh, b]

    out_specs, out_shape = [], []
    if emit_seq:
        out_specs.append(pl.BlockSpec((Tc * Bp, H), lambda c: (c, 0)))
        out_specs.append(pl.BlockSpec((Tc * Bp, H), lambda c, l=last: (l - c, 0)))
        out_shape += [jax.ShapeDtypeStruct((T * Bp, H), jnp.bfloat16)] * 2
    if emit_hn:
        out_specs.append(pl.BlockSpec((2, Bp, H), lambda c: (0, 0, 0)))
        out_shape.append(jax.ShapeDtypeStruct((2, Bp, H), jnp.float32))

    kern = functools.partial(
        bilstm_layer_kernel, hidden=H, chunk=Tc, batch=Bp, num_feats=len(xs),
        emit_seq=emit_seq, emit_hn=emit_hn, unroll=min(8, Tc))

    res = pl.pallas_call(
        kern,
        grid=(NC,),                                      # time-chunk axis (carries h/c)
        in_specs=in_specs,
        out_specs=tuple(out_specs),
        out_shape=tuple(out_shape),
        scratch_shapes=[
            pltpu.VMEM((Tc * Bp, 4 * H), jnp.bfloat16),  # gx fwd (bf16)
            pltpu.VMEM((Tc * Bp, 4 * H), jnp.bfloat16),  # gx bwd (bf16)
            pltpu.VMEM((2, Bp, H), jnp.float32),         # h carry across chunks
            pltpu.VMEM((2, Bp, H), jnp.float32),         # c carry across chunks
        ],
        compiler_params=pltpu.CompilerParams(
            dimension_semantics=("arbitrary",),
            vmem_limit_bytes=_vmem_limit_bytes(dims, H, Tc, Bp, emit_seq, emit_hn)),
    )(*operands)
    if not isinstance(res, (tuple, list)):
        res = (res,)
    return tuple(res)


# ----------------------------------------------------------------------------
# fc1(concat[h_fw, h_bw]) -> ReLU -> fc2 head. fc2 output padded to 128 lanes.
# ----------------------------------------------------------------------------
def mlp_head_kernel(hN_ref, w1_ref, b1_ref, w2_ref, b2_ref, o_ref, *, hidden):
    H = hidden
    w1 = w1_ref[...]
    # concat([h_fw, h_bw]) @ w1 == h_fw @ w1[:H] + h_bw @ w1[H:]   (no concat needed)
    h1 = (jnp.dot(hN_ref[0], w1[0:H, :], preferred_element_type=jnp.float32)
          + jnp.dot(hN_ref[1], w1[H:2 * H, :], preferred_element_type=jnp.float32)
          + b1_ref[...])
    h1 = jnp.maximum(h1, 0.0)
    o_ref[...] = (jnp.dot(h1, w2_ref[...], preferred_element_type=jnp.float32)
                  + b2_ref[...])


def run_mlp_head(hN, w1, b1, w2p, b2p, *, hidden):
    Bp = hN.shape[1]
    vmem = pl.BlockSpec(memory_space=pltpu.MemorySpace.VMEM)
    return pl.pallas_call(
        functools.partial(mlp_head_kernel, hidden=hidden),
        out_shape=jax.ShapeDtypeStruct((Bp, LANE), jnp.float32),
        in_specs=[vmem] * 5,
        out_specs=vmem,
    )(hN, w1, b1, w2p, b2p)


# ----------------------------------------------------------------------------
# Full forward: embedding lookup + 2-layer bidirectional LSTM + fc head.
# ----------------------------------------------------------------------------
def lstm_model_forward(tokens, params, *, hidden, time_chunk=None):
    B, T = tokens.shape
    H = hidden
    Bp = ((B + SUBLANE - 1) // SUBLANE) * SUBLANE

    # embedding lookup: data-dependent gather, kept as plain JAX glue
    x = params["embedding"][tokens]                      # (B, T, E) f32
    x = jnp.transpose(x, (1, 0, 2))                      # time-major (T, B, E)
    x = jnp.pad(x, ((0, 0), (0, Bp - B), (0, 0)))        # pad batch for bf16 sublanes
    E = x.shape[-1]
    x = x.reshape(T * Bp, E).astype(jnp.bfloat16)        # (T*Bp, E)

    # layer 0: emits only the per-timestep sequence (its hN is dead)
    out_f0, out_b0 = run_bilstm_layer(
        [x], params["wih_l0"], params["whh_l0"], params["b_l0"],
        hidden=H, seq_len=T, batch=Bp, emit_seq=True, emit_hn=False,
        time_chunk=time_chunk)
    # TODO(synk): training-mode inter-layer dropout (p=0.2) not implemented (inference).

    # layer 1: emits only the final hidden states (its per-timestep output is dead);
    # wih_l1 rows [0:H] multiply forward features, rows [H:2H] multiply backward.
    (hN1,) = run_bilstm_layer(
        [out_f0, out_b0], params["wih_l1"], params["whh_l1"], params["b_l1"],
        hidden=H, seq_len=T, batch=Bp, emit_seq=False, emit_hn=True,
        time_chunk=time_chunk)
    # hN1[0] = h_n[-2] (last-layer forward final), hN1[1] = h_n[-1] (backward final)

    # fc1 + ReLU + fc2; fc2 padded to 128 output lanes and sliced back
    nc = params["fc2_w"].shape[1]
    w2p = jnp.pad(params["fc2_w"], ((0, 0), (0, LANE - nc)))
    b2p = jnp.pad(params["fc2_b"], ((0, 0), (0, LANE - nc)))
    logits_p = run_mlp_head(hN1, params["fc1_w"], params["fc1_b"], w2p, b2p, hidden=H)
    return logits_p[:B, :nc]


def init_params(key, vocab, emb_dim, hidden):
    H = hidden
    H4 = 4 * H
    keys = jax.random.split(key, 11)
    bound = 1.0 / (hidden ** 0.5)

    def unif(kk, shape, dtype=jnp.float32):
        return jax.random.uniform(kk, shape, jnp.float32, -bound, bound).astype(dtype)

    return {
        # frozen pretrained word2vec replaced by a random table for the test
        "embedding": jax.random.normal(keys[0], (vocab, emb_dim), jnp.float32),
        # layer 0, stacked [forward, backward]; weights pre-transposed to (D_in, 4H)
        # with gate order i,f,o,g; combined bias (bias_ih + bias_hh) as one row.
        "wih_l0": unif(keys[1], (2, emb_dim, H4), jnp.bfloat16),
        "whh_l0": unif(keys[2], (2, H, H4), jnp.bfloat16),
        "b_l0":   unif(keys[3], (2, 1, H4)),
        # layer 1, input = [fwd, bwd] of layer 0 (rows [0:H] <-> fwd, [H:2H] <-> bwd)
        "wih_l1": unif(keys[4], (2, 2 * H, H4), jnp.bfloat16),
        "whh_l1": unif(keys[5], (2, H, H4), jnp.bfloat16),
        "b_l1":   unif(keys[6], (2, 1, H4)),
        # fc head (pre-transposed to (in, out))
        "fc1_w": unif(keys[7], (2 * H, H)),
        "fc1_b": unif(keys[8], (1, H)),
        "fc2_w": unif(keys[9], (H, 2)),
        "fc2_b": unif(keys[10], (1, 2)),
    }


if __name__ == "__main__":
    B, T = 2, 8
    VOCAB, EMB, HIDDEN = 50, 32, 32

    key = jax.random.PRNGKey(0)
    k_tok, k_par = jax.random.split(key)
    tokens = jax.random.randint(k_tok, (B, T), 0, VOCAB)
    params = init_params(k_par, VOCAB, EMB, HIDDEN)

    fwd = jax.jit(functools.partial(lstm_model_forward, hidden=HIDDEN))
    logits = fwd(tokens, params)
    jax.block_until_ready(logits)
    assert logits.shape == (B, 2)

    # also exercise the time-chunked path (T=8 split into 2 chunks of 4) and verify
    # it matches the single-chunk run: chunking must not change the recurrence.
    fwd_c = jax.jit(functools.partial(lstm_model_forward, hidden=HIDDEN, time_chunk=4))
    logits_c = fwd_c(tokens, params)
    jax.block_until_ready(logits_c)
    assert jnp.allclose(logits, logits_c, atol=1e-3, rtol=1e-3)

    print("KERNEL_OK")
</pallas_src>

<mosaic_0001>
module attributes {stable_mosaic.version = 11 : i64} {
  func.func @bilstm_layer_kernel(%arg0: i32, %arg1: memref<128x32xbf16, #tpu.memory_space<vmem>>, %arg2: memref<128x32xbf16, #tpu.memory_space<vmem>>, %arg3: memref<128x32xbf16, #tpu.memory_space<vmem>>, %arg4: memref<128x32xbf16, #tpu.memory_space<vmem>>, %arg5: memref<2x64x128xbf16, #tpu.memory_space<vmem>>, %arg6: memref<2x32x128xbf16, #tpu.memory_space<vmem>>, %arg7: memref<2x1x128xf32, #tpu.memory_space<vmem>>, %arg8: memref<2x16x32xf32, #tpu.memory_space<vmem>>, %arg9: memref<128x128xbf16, #tpu.memory_space<vmem>>, %arg10: memref<128x128xbf16, #tpu.memory_space<vmem>>, %arg11: memref<2x16x32xf32, #tpu.memory_space<vmem>>, %arg12: memref<2x16x32xf32, #tpu.memory_space<vmem>>) attributes {dimension_semantics = [#tpu.dimension_semantics<arbitrary>], iteration_bounds = array<i64: 1>, scalar_prefetch = 0 : i64, scratch_operands = 4 : i64, tpu.core_type = #tpu.core_type<tc>, window_params = [{transform_indices = @transform_0, window_bounds = array<i64: 128, 32>}, {transform_indices = @transform_1, window_bounds = array<i64: 128, 32>}, {transform_indices = @transform_2, window_bounds = array<i64: 128, 32>}, {transform_indices = @transform_3, window_bounds = array<i64: 128, 32>}, {pipeline_mode = #tpu.pipeline_mode<synchronous>, transform_indices = @transform_4, window_bounds = array<i64: 2, 64, 128>}, {pipeline_mode = #tpu.pipeline_mode<synchronous>, transform_indices = @transform_5, window_bounds = array<i64: 2, 32, 128>}, {pipeline_mode = #tpu.pipeline_mode<synchronous>, transform_indices = @transform_6, window_bounds = array<i64: 2, 1, 128>}, {pipeline_mode = #tpu.pipeline_mode<synchronous>, transform_indices = @transform_7, window_bounds = array<i64: 2, 16, 32>}]} {
    %c0 = arith.constant 0 : index
    %c0_0 = arith.constant 0 : index
    %c0_1 = arith.constant 0 : index
    %0 = vector.load %arg5[%c0, %c0_0, %c0_1] : memref<2x64x128xbf16, #tpu.memory_space<vmem>>, vector<2x64x128xbf16>
    %c0_2 = arith.constant 0 : index
    %c0_3 = arith.constant 0 : index
    %1 = vector.load %arg1[%c0_2, %c0_3] : memref<128x32xbf16, #tpu.memory_space<vmem>>, vector<128x32xbf16>
    %2 = vector.extract_strided_slice %0 {offsets = [0, 0, 0], sizes = [1, 32, 128], strides = [1, 1, 1]} : vector<2x64x128xbf16> to vector<1x32x128xbf16>
    %3 = vector.shape_cast %2 : vector<1x32x128xbf16> to vector<32x128xbf16>
    %cst = arith.constant dense<0.000000e+00> : vector<128x128xf32>
    %4 = tpu.matmul %1, %3, %cst {dimension_numbers = #tpu.dot_dimension_numbers<[1], [0], [0], [1], [0, 0, 1, 1], [], []>} : vector<128x32xbf16>, vector<32x128xbf16>, vector<128x128xf32> -> vector<128x128xf32>
    %c0_4 = arith.constant 0 : index
    %c0_5 = arith.constant 0 : index
    %5 = vector.load %arg2[%c0_4, %c0_5] : memref<128x32xbf16, #tpu.memory_space<vmem>>, vector<128x32xbf16>
    %6 = vector.extract_strided_slice %0 {offsets = [1, 0, 0], sizes = [1, 32, 128], strides = [1, 1, 1]} : vector<2x64x128xbf16> to vector<1x32x128xbf16>
    %7 = vector.shape_cast %6 : vector<1x32x128xbf16> to vector<32x128xbf16>
    %cst_6 = arith.constant dense<0.000000e+00> : vector<128x128xf32>
    %8 = tpu.matmul %5, %7, %cst_6 {dimension_numbers = #tpu.dot_dimension_numbers<[1], [0], [0], [1], [0, 0, 1, 1], [], []>} : vector<128x32xbf16>, vector<32x128xbf16>, vector<128x128xf32> -> vector<128x128xf32>
    %c0_7 = arith.constant 0 : index
    %c0_8 = arith.constant 0 : index
    %9 = vector.load %arg3[%c0_7, %c0_8] : memref<128x32xbf16, #tpu.memory_space<vmem>>, vector<128x32xbf16>
    %10 = vector.extract_strided_slice %0 {offsets = [0, 32, 0], sizes = [1, 32, 128], strides = [1, 1, 1]} : vector<2x64x128xbf16> to vector<1x32x128xbf16>
    %11 = vector.shape_cast %10 : vector<1x32x128xbf16> to vector<32x128xbf16>
    %cst_9 = arith.constant dense<0.000000e+00> : vector<128x128xf32>
    %12 = tpu.matmul %9, %11, %cst_9 {dimension_numbers = #tpu.dot_dimension_numbers<[1], [0], [0], [1], [0, 0, 1, 1], [], []>} : vector<128x32xbf16>, vector<32x128xbf16>, vector<128x128xf32> -> vector<128x128xf32>
    %c0_10 = arith.constant 0 : index
    %c0_11 = arith.constant 0 : index
    %13 = vector.load %arg4[%c0_10, %c0_11] : memref<128x32xbf16, #tpu.memory_space<vmem>>, vector<128x32xbf16>
    %14 = vector.extract_strided_slice %0 {offsets = [1, 32, 0], sizes = [1, 32, 128], strides = [1, 1, 1]} : vector<2x64x128xbf16> to vector<1x32x128xbf16>
    %15 = vector.shape_cast %14 : vector<1x32x128xbf16> to vector<32x128xbf16>
    %cst_12 = arith.constant dense<0.000000e+00> : vector<128x128xf32>
    %16 = tpu.matmul %13, %15, %cst_12 {dimension_numbers = #tpu.dot_dimension_numbers<[1], [0], [0], [1], [0, 0, 1, 1], [], []>} : vector<128x32xbf16>, vector<32x128xbf16>, vector<128x128xf32> -> vector<128x128xf32>
    %17 = arith.addf %4, %12 : vector<128x128xf32>
    %18 = arith.addf %8, %16 : vector<128x128xf32>
    %19 = arith.truncf %17 : vector<128x128xf32> to vector<128x128xbf16>
    %c0_13 = arith.constant 0 : index
    %c0_14 = arith.constant 0 : index
    %20 = vector.load %arg9[%c0_13, %c0_14] : memref<128x128xbf16, #tpu.memory_space<vmem>>, vector<128x128xbf16>
    tpu.vector_store %arg9[%c0_13, %c0_14], %19 {strides = array<i32>} : memref<128x128xbf16, #tpu.memory_space<vmem>>, vector<128x128xbf16>,
    %21 = arith.truncf %18 : vector<128x128xf32> to vector<128x128xbf16>
    %c0_15 = arith.constant 0 : index
    %c0_16 = arith.constant 0 : index
    %22 = vector.load %arg10[%c0_15, %c0_16] : memref<128x128xbf16, #tpu.memory_space<vmem>>, vector<128x128xbf16>
    tpu.vector_store %arg10[%c0_15, %c0_16], %21 {strides = array<i32>} : memref<128x128xbf16, #tpu.memory_space<vmem>>, vector<128x128xbf16>,
    %c0_i32 = arith.constant 0 : i32
    %23 = arith.cmpi eq, %arg0, %c0_i32 : i32
    %24 = arith.extui %23 : i1 to i32
    %c0_i32_17 = arith.constant 0 : i32
    %25 = arith.cmpi ne, %24, %c0_i32_17 : i32
    scf.if %25 {
      %cst_131 = arith.constant 0.000000e+00 : f32
      %484 = vector.broadcast %cst_131 : f32 to vector<2x16x32xf32>
      %c0_132 = arith.constant 0 : index
      %c0_133 = arith.constant 0 : index
      %c0_134 = arith.constant 0 : index
      %485 = vector.load %arg11[%c0_132, %c0_133, %c0_134] : memref<2x16x32xf32, #tpu.memory_space<vmem>>, vector<2x16x32xf32>
      tpu.vector_store %arg11[%c0_132, %c0_133, %c0_134], %484 {strides = array<i32>} : memref<2x16x32xf32, #tpu.memory_space<vmem>>, vector<2x16x32xf32>,
      %cst_135 = arith.constant 0.000000e+00 : f32
      %486 = vector.broadcast %cst_135 : f32 to vector<2x16x32xf32>
      %c0_136 = arith.constant 0 : index
      %c0_137 = arith.constant 0 : index
      %c0_138 = arith.constant 0 : index
      %487 = vector.load %arg12[%c0_136, %c0_137, %c0_138] : memref<2x16x32xf32, #tpu.memory_space<vmem>>, vector<2x16x32xf32>
      tpu.vector_store %arg12[%c0_136, %c0_137, %c0_138], %486 {strides = array<i32>} : memref<2x16x32xf32, #tpu.memory_space<vmem>>, vector<2x16x32xf32>,
    } else {
    }
    %c0_18 = arith.constant 0 : index
    %c0_19 = arith.constant 0 : index
    %c0_20 = arith.constant 0 : index
    %26 = vector.load %arg7[%c0_18, %c0_19, %c0_20] : memref<2x1x128xf32, #tpu.memory_space<vmem>>, vector<1x1x128xf32>
    %27 = vector.shape_cast %26 : vector<1x1x128xf32> to vector<1x128xf32>
    %c1 = arith.constant 1 : index
    %c0_21 = arith.constant 0 : index
    %c0_22 = arith.constant 0 : index
    %28 = vector.load %arg7[%c1, %c0_21, %c0_22] : memref<2x1x128xf32, #tpu.memory_space<vmem>>, vector<1x1x128xf32>
    %29 = vector.shape_cast %28 : vector<1x1x128xf32> to vector<1x128xf32>
    %c0_23 = arith.constant 0 : index
    %c0_24 = arith.constant 0 : index
    %c0_25 = arith.constant 0 : index
    %30 = vector.load %arg6[%c0_23, %c0_24, %c0_25] : memref<2x32x128xbf16, #tpu.memory_space<vmem>>, vector<1x32x128xbf16>
    %31 = vector.shape_cast %30 : vector<1x32x128xbf16> to vector<32x128xbf16>
    %c1_26 = arith.constant 1 : index
    %c0_27 = arith.constant 0 : index
    %c0_28 = arith.constant 0 : index
    %32 = vector.load %arg6[%c1_26, %c0_27, %c0_28] : memref<2x32x128xbf16, #tpu.memory_space<vmem>>, vector<1x32x128xbf16>
    %33 = vector.shape_cast %32 : vector<1x32x128xbf16> to vector<32x128xbf16>
    %c0_29 = arith.constant 0 : index
    %c0_30 = arith.constant 0 : index
    %c0_31 = arith.constant 0 : index
    %34 = vector.load %arg11[%c0_29, %c0_30, %c0_31] : memref<2x16x32xf32, #tpu.memory_space<vmem>>, vector<1x16x32xf32>
    %35 = vector.shape_cast %34 : vector<1x16x32xf32> to vector<16x32xf32>
    %c0_32 = arith.constant 0 : index
    %c0_33 = arith.constant 0 : index
    %c0_34 = arith.constant 0 : index
    %36 = vector.load %arg12[%c0_32, %c0_33, %c0_34] : memref<2x16x32xf32, #tpu.memory_space<vmem>>, vector<1x16x32xf32>
    %37 = vector.shape_cast %36 : vector<1x16x32xf32> to vector<16x32xf32>
    %c1_35 = arith.constant 1 : index
    %c0_36 = arith.constant 0 : index
    %c0_37 = arith.constant 0 : index
    %38 = vector.load %arg11[%c1_35, %c0_36, %c0_37] : memref<2x16x32xf32, #tpu.memory_space<vmem>>, vector<1x16x32xf32>
    %39 = vector.shape_cast %38 : vector<1x16x32xf32> to vector<16x32xf32>
    %c1_38 = arith.constant 1 : index
    %c0_39 = arith.constant 0 : index
    %c0_40 = arith.constant 0 : index
    %40 = vector.load %arg12[%c1_38, %c0_39, %c0_40] : memref<2x16x32xf32, #tpu.memory_space<vmem>>, vector<1x16x32xf32>
    %41 = vector.shape_cast %40 : vector<1x16x32xf32> to vector<16x32xf32>
    %c0_i32_41 = arith.constant 0 : i32
    %c16_i32 = arith.constant 16 : i32
    %42 = arith.muli %c0_i32_41, %c16_i32 : i32
    %43 = tpu.assume_multiple %42, 16 : i32
    %c7_i32 = arith.constant 7 : i32
    %44 = arith.subi %c7_i32, %c0_i32_41 : i32
    %c16_i32_42 = arith.constant 16 : i32
    %45 = arith.muli %44, %c16_i32_42 : i32
    %46 = tpu.assume_multiple %45, 16 : i32
    %47 = arith.index_cast %43 : i32 to index
    %c0_43 = arith.constant 0 : index
    %48 = vector.load %arg9[%47, %c0_43] : memref<128x128xbf16, #tpu.memory_space<vmem>>, vector<16x128xbf16>
    %49 = arith.extf %48 : vector<16x128xbf16> to vector<16x128xf32>
    %50 = vector.broadcast %27 : vector<1x128xf32> to vector<16x128xf32>
    %51 = arith.addf %49, %50 : vector<16x128xf32>
    %52 = arith.truncf %35 : vector<16x32xf32> to vector<16x32xbf16>
    %cst_44 = arith.constant dense<0.000000e+00> : vector<16x128xf32>
    %53 = tpu.matmul %52, %31, %cst_44 {dimension_numbers = #tpu.dot_dimension_numbers<[1], [0], [0], [1], [0, 0, 1, 1], [], []>} : vector<16x32xbf16>, vector<32x128xbf16>, vector<16x128xf32> -> vector<16x128xf32>
    %54 = arith.addf %51, %53 : vector<16x128xf32>
    %55 = arith.index_cast %46 : i32 to index
    %c0_45 = arith.constant 0 : index
    %56 = vector.load %arg10[%55, %c0_45] : memref<128x128xbf16, #tpu.memory_space<vmem>>, vector<16x128xbf16>
    %57 = arith.extf %56 : vector<16x128xbf16> to vector<16x128xf32>
    %58 = vector.broadcast %29 : vector<1x128xf32> to vector<16x128xf32>
    %59 = arith.addf %57, %58 : vector<16x128xf32>
    %60 = arith.truncf %39 : vector<16x32xf32> to vector<16x32xbf16>
    %cst_46 = arith.constant dense<0.000000e+00> : vector<16x128xf32>
    %61 = tpu.matmul %60, %33, %cst_46 {dimension_numbers = #tpu.dot_dimension_numbers<[1], [0], [0], [1], [0, 0, 1, 1], [], []>} : vector<16x32xbf16>, vector<32x128xbf16>, vector<16x128xf32> -> vector<16x128xf32>
    %62 = arith.addf %59, %61 : vector<16x128xf32>
    %63 = vector.extract_strided_slice %54 {offsets = [0, 0], sizes = [16, 96], strides = [1, 1]} : vector<16x128xf32> to vector<16x96xf32>
    %64 = arith.negf %63 : vector<16x96xf32>
    %65 = math.exp %64 : vector<16x96xf32>
    %cst_47 = arith.constant 1.000000e+00 : f32
    %66 = vector.broadcast %cst_47 : f32 to vector<16x96xf32>
    %67 = arith.addf %66, %65 : vector<16x96xf32>
    %68 = arith.divf %66, %67 : vector<16x96xf32>
    %69 = vector.extract_strided_slice %68 {offsets = [0, 0], sizes = [16, 32], strides = [1, 1]} : vector<16x96xf32> to vector<16x32xf32>
    %70 = vector.extract_strided_slice %68 {offsets = [0, 32], sizes = [16, 32], strides = [1, 1]} : vector<16x96xf32> to vector<16x32xf32>
    %71 = vector.extract_strided_slice %68 {offsets = [0, 64], sizes = [16, 32], strides = [1, 1]} : vector<16x96xf32> to vector<16x32xf32>
    %72 = vector.extract_strided_slice %54 {offsets = [0, 96], sizes = [16, 32], strides = [1, 1]} : vector<16x128xf32> to vector<16x32xf32>
    %73 = math.tanh %72 : vector<16x32xf32>
    %74 = vector.extract_strided_slice %62 {offsets = [0, 0], sizes = [16, 96], strides = [1, 1]} : vector<16x128xf32> to vector<16x96xf32>
    %75 = arith.negf %74 : vector<16x96xf32>
    %76 = math.exp %75 : vector<16x96xf32>
    %cst_48 = arith.constant 1.000000e+00 : f32
    %77 = vector.broadcast %cst_48 : f32 to vector<16x96xf32>
    %78 = arith.addf %77, %76 : vector<16x96xf32>
    %79 = arith.divf %77, %78 : vector<16x96xf32>
    %80 = vector.extract_strided_slice %79 {offsets = [0, 0], sizes = [16, 32], strides = [1, 1]} : vector<16x96xf32> to vector<16x32xf32>
    %81 = vector.extract_strided_slice %79 {offsets = [0, 32], sizes = [16, 32], strides = [1, 1]} : vector<16x96xf32> to vector<16x32xf32>
    %82 = vector.extract_strided_slice %79 {offsets = [0, 64], sizes = [16, 32], strides = [1, 1]} : vector<16x96xf32> to vector<16x32xf32>
    %83 = vector.extract_strided_slice %62 {offsets = [0, 96], sizes = [16, 32], strides = [1, 1]} : vector<16x128xf32> to vector<16x32xf32>
    %84 = math.tanh %83 : vector<16x32xf32>
    %85 = arith.mulf %70, %37 : vector<16x32xf32>
    %86 = arith.mulf %69, %73 : vector<16x32xf32>
    %87 = arith.addf %85, %86 : vector<16x32xf32>
    %88 = math.tanh %87 : vector<16x32xf32>
    %89 = arith.mulf %71, %88 : vector<16x32xf32>
    %90 = arith.mulf %81, %41 : vector<16x32xf32>
    %91 = arith.mulf %80, %84 : vector<16x32xf32>
    %92 = arith.addf %90, %91 : vector<16x32xf32>
    %93 = math.tanh %92 : vector<16x32xf32>
    %94 = arith.mulf %82, %93 : vector<16x32xf32>
    %c1_i32 = arith.constant 1 : i32
    %c16_i32_49 = arith.constant 16 : i32
    %95 = arith.muli %c1_i32, %c16_i32_49 : i32
    %96 = tpu.assume_multiple %95, 16 : i32
    %c7_i32_50 = arith.constant 7 : i32
    %97 = arith.subi %c7_i32_50, %c1_i32 : i32
    %c16_i32_51 = arith.constant 16 : i32
    %98 = arith.muli %97, %c16_i32_51 : i32
    %99 = tpu.assume_multiple %98, 16 : i32
    %100 = arith.index_cast %96 : i32 to index
    %c0_52 = arith.constant 0 : index
    %101 = vector.load %arg9[%100, %c0_52] : memref<128x128xbf16, #tpu.memory_space<vmem>>, vector<16x128xbf16>
    %102 = arith.extf %101 : vector<16x128xbf16> to vector<16x128xf32>
    %103 = vector.broadcast %27 : vector<1x128xf32> to vector<16x128xf32>
    %104 = arith.addf %102, %103 : vector<16x128xf32>
    %105 = arith.truncf %89 : vector<16x32xf32> to vector<16x32xbf16>
    %cst_53 = arith.constant dense<0.000000e+00> : vector<16x128xf32>
    %106 = tpu.matmul %105, %31, %cst_53 {dimension_numbers = #tpu.dot_dimension_numbers<[1], [0], [0], [1], [0, 0, 1, 1], [], []>} : vector<16x32xbf16>, vector<32x128xbf16>, vector<16x128xf32> -> vector<16x128xf32>
    %107 = arith.addf %104, %106 : vector<16x128xf32>
    %108 = arith.index_cast %99 : i32 to index
    %c0_54 = arith.constant 0 : index
    %109 = vector.load %arg10[%108, %c0_54] : memref<128x128xbf16, #tpu.memory_space<vmem>>, vector<16x128xbf16>
    %110 = arith.extf %109 : vector<16x128xbf16> to vector<16x128xf32>
    %111 = vector.broadcast %29 : vector<1x128xf32> to vector<16x128xf32>
    %112 = arith.addf %110, %111 : vector<16x128xf32>
    %113 = arith.truncf %94 : vector<16x32xf32> to vector<16x32xbf16>
    %cst_55 = arith.constant dense<0.000000e+00> : vector<16x128xf32>
    %114 = tpu.matmul %113, %33, %cst_55 {dimension_numbers = #tpu.dot_dimension_numbers<[1], [0], [0], [1], [0, 0, 1, 1], [], []>} : vector<16x32xbf16>, vector<32x128xbf16>, vector<16x128xf32> -> vector<16x128xf32>
    %115 = arith.addf %112, %114 : vector<16x128xf32>
    %116 = vector.extract_strided_slice %107 {offsets = [0, 0], sizes = [16, 96], strides = [1, 1]} : vector<16x128xf32> to vector<16x96xf32>
    %117 = arith.negf %116 : vector<16x96xf32>
    %118 = math.exp %117 : vector<16x96xf32>
    %cst_56 = arith.constant 1.000000e+00 : f32
    %119 = vector.broadcast %cst_56 : f32 to vector<16x96xf32>
    %120 = arith.addf %119, %118 : vector<16x96xf32>
    %121 = arith.divf %119, %120 : vector<16x96xf32>
    %122 = vector.extract_strided_slice %121 {offsets = [0, 0], sizes = [16, 32], strides = [1, 1]} : vector<16x96xf32> to vector<16x32xf32>
    %123 = vector.extract_strided_slice %121 {offsets = [0, 32], sizes = [16, 32], strides = [1, 1]} : vector<16x96xf32> to vector<16x32xf32>
    %124 = vector.extract_strided_slice %121 {offsets = [0, 64], sizes = [16, 32], strides = [1, 1]} : vector<16x96xf32> to vector<16x32xf32>
    %125 = vector.extract_strided_slice %107 {offsets = [0, 96], sizes = [16, 32], strides = [1, 1]} : vector<16x128xf32> to vector<16x32xf32>
    %126 = math.tanh %125 : vector<16x32xf32>
    %127 = vector.extract_strided_slice %115 {offsets = [0, 0], sizes = [16, 96], strides = [1, 1]} : vector<16x128xf32> to vector<16x96xf32>
    %128 = arith.negf %127 : vector<16x96xf32>
    %129 = math.exp %128 : vector<16x96xf32>
    %cst_57 = arith.constant 1.000000e+00 : f32
    %130 = vector.broadcast %cst_57 : f32 to vector<16x96xf32>
    %131 = arith.addf %130, %129 : vector<16x96xf32>
    %132 = arith.divf %130, %131 : vector<16x96xf32>
    %133 = vector.extract_strided_slice %132 {offsets = [0, 0], sizes = [16, 32], strides = [1, 1]} : vector<16x96xf32> to vector<16x32xf32>
    %134 = vector.extract_strided_slice %132 {offsets = [0, 32], sizes = [16, 32], strides = [1, 1]} : vector<16x96xf32> to vector<16x32xf32>
    %135 = vector.extract_strided_slice %132 {offsets = [0, 64], sizes = [16, 32], strides = [1, 1]} : vector<16x96xf32> to vector<16x32xf32>
    %136 = vector.extract_strided_slice %115 {offsets = [0, 96], sizes = [16, 32], strides = [1, 1]} : vector<16x128xf32> to vector<16x32xf32>
    %137 = math.tanh %136 : vector<16x32xf32>
    %138 = arith.mulf %123, %87 : vector<16x32xf32>
    %139 = arith.mulf %122, %126 : vector<16x32xf32>
    %140 = arith.addf %138, %139 : vector<16x32xf32>
    %141 = math.tanh %140 : vector<16x32xf32>
    %142 = arith.mulf %124, %141 : vector<16x32xf32>
    %143 = arith.mulf %134, %92 : vector<16x32xf32>
    %144 = arith.mulf %133, %137 : vector<16x32xf32>
    %145 = arith.addf %143, %144 : vector<16x32xf32>
    %146 = math.tanh %145 : vector<16x32xf32>
    %147 = arith.mulf %135, %146 : vector<16x32xf32>
    %c2_i32 = arith.constant 2 : i32
    %c16_i32_58 = arith.constant 16 : i32
    %148 = arith.muli %c2_i32, %c16_i32_58 : i32
    %149 = tpu.assume_multiple %148, 16 : i32
    %c7_i32_59 = arith.constant 7 : i32
    %150 = arith.subi %c7_i32_59, %c2_i32 : i32
    %c16_i32_60 = arith.constant 16 : i32
    %151 = arith.muli %150, %c16_i32_60 : i32
    %152 = tpu.assume_multiple %151, 16 : i32
    %153 = arith.index_cast %149 : i32 to index
    %c0_61 = arith.constant 0 : index
    %154 = vector.load %arg9[%153, %c0_61] : memref<128x128xbf16, #tpu.memory_space<vmem>>, vector<16x128xbf16>
    %155 = arith.extf %154 : vector<16x128xbf16> to vector<16x128xf32>
    %156 = vector.broadcast %27 : vector<1x128xf32> to vector<16x128xf32>
    %157 = arith.addf %155, %156 : vector<16x128xf32>
    %158 = arith.truncf %142 : vector<16x32xf32> to vector<16x32xbf16>
    %cst_62 = arith.constant dense<0.000000e+00> : vector<16x128xf32>
    %159 = tpu.matmul %158, %31, %cst_62 {dimension_numbers = #tpu.dot_dimension_numbers<[1], [0], [0], [1], [0, 0, 1, 1], [], []>} : vector<16x32xbf16>, vector<32x128xbf16>, vector<16x128xf32> -> vector<16x128xf32>
    %160 = arith.addf %157, %159 : vector<16x128xf32>
    %161 = arith.index_cast %152 : i32 to index
    %c0_63 = arith.constant 0 : index
    %162 = vector.load %arg10[%161, %c0_63] : memref<128x128xbf16, #tpu.memory_space<vmem>>, vector<16x128xbf16>
    %163 = arith.extf %162 : vector<16x128xbf16> to vector<16x128xf32>
    %164 = vector.broadcast %29 : vector<1x128xf32> to vector<16x128xf32>
    %165 = arith.addf %163, %164 : vector<16x128xf32>
    %166 = arith.truncf %147 : vector<16x32xf32> to vector<16x32xbf16>
    %cst_64 = arith.constant dense<0.000000e+00> : vector<16x128xf32>
    %167 = tpu.matmul %166, %33, %cst_64 {dimension_numbers = #tpu.dot_dimension_numbers<[1], [0], [0], [1], [0, 0, 1, 1], [], []>} : vector<16x32xbf16>, vector<32x128xbf16>, vector<16x128xf32> -> vector<16x128xf32>
    %168 = arith.addf %165, %167 : vector<16x128xf32>
    %169 = vector.extract_strided_slice %160 {offsets = [0, 0], sizes = [16, 96], strides = [1, 1]} : vector<16x128xf32> to vector<16x96xf32>
    %170 = arith.negf %169 : vector<16x96xf32>
    %171 = math.exp %170 : vector<16x96xf32>
    %cst_65 = arith.constant 1.000000e+00 : f32
    %172 = vector.broadcast %cst_65 : f32 to vector<16x96xf32>
    %173 = arith.addf %172, %171 : vector<16x96xf32>
    %174 = arith.divf %172, %173 : vector<16x96xf32>
    %175 = vector.extract_strided_slice %174 {offsets = [0, 0], sizes = [16, 32], strides = [1, 1]} : vector<16x96xf32> to vector<16x32xf32>
    %176 = vector.extract_strided_slice %174 {offsets = [0, 32], sizes = [16, 32], strides = [1, 1]} : vector<16x96xf32> to vector<16x32xf32>
    %177 = vector.extract_strided_slice %174 {offsets = [0, 64], sizes = [16, 32], strides = [1, 1]} : vector<16x96xf32> to vector<16x32xf32>
    %178 = vector.extract_strided_slice %160 {offsets = [0, 96], sizes = [16, 32], strides = [1, 1]} : vector<16x128xf32> to vector<16x32xf32>
    %179 = math.tanh %178 : vector<16x32xf32>
    %180 = vector.extract_strided_slice %168 {offsets = [0, 0], sizes = [16, 96], strides = [1, 1]} : vector<16x128xf32> to vector<16x96xf32>
    %181 = arith.negf %180 : vector<16x96xf32>
    %182 = math.exp %181 : vector<16x96xf32>
    %cst_66 = arith.constant 1.000000e+00 : f32
    %183 = vector.broadcast %cst_66 : f32 to vector<16x96xf32>
    %184 = arith.addf %183, %182 : vector<16x96xf32>
    %185 = arith.divf %183, %184 : vector<16x96xf32>
    %186 = vector.extract_strided_slice %185 {offsets = [0, 0], sizes = [16, 32], strides = [1, 1]} : vector<16x96xf32> to vector<16x32xf32>
    %187 = vector.extract_strided_slice %185 {offsets = [0, 32], sizes = [16, 32], strides = [1, 1]} : vector<16x96xf32> to vector<16x32xf32>
    %188 = vector.extract_strided_slice %185 {offsets = [0, 64], sizes = [16, 32], strides = [1, 1]} : vector<16x96xf32> to vector<16x32xf32>
    %189 = vector.extract_strided_slice %168 {offsets = [0, 96], sizes = [16, 32], strides = [1, 1]} : vector<16x128xf32> to vector<16x32xf32>
    %190 = math.tanh %189 : vector<16x32xf32>
    %191 = arith.mulf %176, %140 : vector<16x32xf32>
    %192 = arith.mulf %175, %179 : vector<16x32xf32>
    %193 = arith.addf %191, %192 : vector<16x32xf32>
    %194 = math.tanh %193 : vector<16x32xf32>
    %195 = arith.mulf %177, %194 : vector<16x32xf32>
    %196 = arith.mulf %187, %145 : vector<16x32xf32>
    %197 = arith.mulf %186, %190 : vector<16x32xf32>
    %198 = arith.addf %196, %197 : vector<16x32xf32>
    %199 = math.tanh %198 : vector<16x32xf32>
    %200 = arith.mulf %188, %199 : vector<16x32xf32>
    %c3_i32 = arith.constant 3 : i32
    %c16_i32_67 = arith.constant 16 : i32
    %201 = arith.muli %c3_i32, %c16_i32_67 : i32
    %202 = tpu.assume_multiple %201, 16 : i32
    %c7_i32_68 = arith.constant 7 : i32
    %203 = arith.subi %c7_i32_68, %c3_i32 : i32
    %c16_i32_69 = arith.constant 16 : i32
    %204 = arith.muli %203, %c16_i32_69 : i32
    %205 = tpu.assume_multiple %204, 16 : i32
    %206 = arith.index_cast %202 : i32 to index
    %c0_70 = arith.constant 0 : index
    %207 = vector.load %arg9[%206, %c0_70] : memref<128x128xbf16, #tpu.memory_space<vmem>>, vector<16x128xbf16>
    %208 = arith.extf %207 : vector<16x128xbf16> to vector<16x128xf32>
    %209 = vector.broadcast %27 : vector<1x128xf32> to vector<16x128xf32>
    %210 = arith.addf %208, %209 : vector<16x128xf32>
    %211 = arith.truncf %195 : vector<16x32xf32> to vector<16x32xbf16>
    %cst_71 = arith.constant dense<0.000000e+00> : vector<16x128xf32>
    %212 = tpu.matmul %211, %31, %cst_71 {dimension_numbers = #tpu.dot_dimension_numbers<[1], [0], [0], [1], [0, 0, 1, 1], [], []>} : vector<16x32xbf16>, vector<32x128xbf16>, vector<16x128xf32> -> vector<16x128xf32>
    %213 = arith.addf %210, %212 : vector<16x128xf32>
    %214 = arith.index_cast %205 : i32 to index
    %c0_72 = arith.constant 0 : index
    %215 = vector.load %arg10[%214, %c0_72] : memref<128x128xbf16, #tpu.memory_space<vmem>>, vector<16x128xbf16>
    %216 = arith.extf %215 : vector<16x128xbf16> to vector<16x128xf32>
    %217 = vector.broadcast %29 : vector<1x128xf32> to vector<16x128xf32>
    %218 = arith.addf %216, %217 : vector<16x128xf32>
    %219 = arith.truncf %200 : vector<16x32xf32> to vector<16x32xbf16>
    %cst_73 = arith.constant dense<0.000000e+00> : vector<16x128xf32>
    %220 = tpu.matmul %219, %33, %cst_73 {dimension_numbers = #tpu.dot_dimension_numbers<[1], [0], [0], [1], [0, 0, 1, 1], [], []>} : vector<16x32xbf16>, vector<32x128xbf16>, vector<16x128xf32> -> vector<16x128xf32>
    %221 = arith.addf %218, %220 : vector<16x128xf32>
    %222 = vector.extract_strided_slice %213 {offsets = [0, 0], sizes = [16, 96], strides = [1, 1]} : vector<16x128xf32> to vector<16x96xf32>
    %223 = arith.negf %222 : vector<16x96xf32>
    %224 = math.exp %223 : vector<16x96xf32>
    %cst_74 = arith.constant 1.000000e+00 : f32
    %225 = vector.broadcast %cst_74 : f32 to vector<16x96xf32>
    %226 = arith.addf %225, %224 : vector<16x96xf32>
    %227 = arith.divf %225, %226 : vector<16x96xf32>
    %228 = vector.extract_strided_slice %227 {offsets = [0, 0], sizes = [16, 32], strides = [1, 1]} : vector<16x96xf32> to vector<16x32xf32>
    %229 = vector.extract_strided_slice %227 {offsets = [0, 32], sizes = [16, 32], strides = [1, 1]} : vector<16x96xf32> to vector<16x32xf32>
    %230 = vector.extract_strided_slice %227 {offsets = [0, 64], sizes = [16, 32], strides = [1, 1]} : vector<16x96xf32> to vector<16x32xf32>
    %231 = vector.extract_strided_slice %213 {offsets = [0, 96], sizes = [16, 32], strides = [1, 1]} : vector<16x128xf32> to vector<16x32xf32>
    %232 = math.tanh %231 : vector<16x32xf32>
    %233 = vector.extract_strided_slice %221 {offsets = [0, 0], sizes = [16, 96], strides = [1, 1]} : vector<16x128xf32> to vector<16x96xf32>
    %234 = arith.negf %233 : vector<16x96xf32>
    %235 = math.exp %234 : vector<16x96xf32>
    %cst_75 = arith.constant 1.000000e+00 : f32
    %236 = vector.broadcast %cst_75 : f32 to vector<16x96xf32>
    %237 = arith.addf %236, %235 : vector<16x96xf32>
    %238 = arith.divf %236, %237 : vector<16x96xf32>
    %239 = vector.extract_strided_slice %238 {offsets = [0, 0], sizes = [16, 32], strides = [1, 1]} : vector<16x96xf32> to vector<16x32xf32>
    %240 = vector.extract_strided_slice %238 {offsets = [0, 32], sizes = [16, 32], strides = [1, 1]} : vector<16x96xf32> to vector<16x32xf32>
    %241 = vector.extract_strided_slice %238 {offsets = [0, 64], sizes = [16, 32], strides = [1, 1]} : vector<16x96xf32> to vector<16x32xf32>
    %242 = vector.extract_strided_slice %221 {offsets = [0, 96], sizes = [16, 32], strides = [1, 1]} : vector<16x128xf32> to vector<16x32xf32>
    %243 = math.tanh %242 : vector<16x32xf32>
    %244 = arith.mulf %229, %193 : vector<16x32xf32>
    %245 = arith.mulf %228, %232 : vector<16x32xf32>
    %246 = arith.addf %244, %245 : vector<16x32xf32>
    %247 = math.tanh %246 : vector<16x32xf32>
    %248 = arith.mulf %230, %247 : vector<16x32xf32>
    %249 = arith.mulf %240, %198 : vector<16x32xf32>
    %250 = arith.mulf %239, %243 : vector<16x32xf32>
    %251 = arith.addf %249, %250 : vector<16x32xf32>
    %252 = math.tanh %251 : vector<16x32xf32>
    %253 = arith.mulf %241, %252 : vector<16x32xf32>
    %c4_i32 = arith.constant 4 : i32
    %c16_i32_76 = arith.constant 16 : i32
    %254 = arith.muli %c4_i32, %c16_i32_76 : i32
    %255 = tpu.assume_multiple %254, 16 : i32
    %c7_i32_77 = arith.constant 7 : i32
    %256 = arith.subi %c7_i32_77, %c4_i32 : i32
    %c16_i32_78 = arith.constant 16 : i32
    %257 = arith.muli %256, %c16_i32_78 : i32
    %258 = tpu.assume_multiple %257, 16 : i32
    %259 = arith.index_cast %255 : i32 to index
    %c0_79 = arith.constant 0 : index
    %260 = vector.load %arg9[%259, %c0_79] : memref<128x128xbf16, #tpu.memory_space<vmem>>, vector<16x128xbf16>
    %261 = arith.extf %260 : vector<16x128xbf16> to vector<16x128xf32>
    %262 = vector.broadcast %27 : vector<1x128xf32> to vector<16x128xf32>
    %263 = arith.addf %261, %262 : vector<16x128xf32>
    %264 = arith.truncf %248 : vector<16x32xf32> to vector<16x32xbf16>
    %cst_80 = arith.constant dense<0.000000e+00> : vector<16x128xf32>
    %265 = tpu.matmul %264, %31, %cst_80 {dimension_numbers = #tpu.dot_dimension_numbers<[1], [0], [0], [1], [0, 0, 1, 1], [], []>} : vector<16x32xbf16>, vector<32x128xbf16>, vector<16x128xf32> -> vector<16x128xf32>
    %266 = arith.addf %263, %265 : vector<16x128xf32>
    %267 = arith.index_cast %258 : i32 to index
    %c0_81 = arith.constant 0 : index
    %268 = vector.load %arg10[%267, %c0_81] : memref<128x128xbf16, #tpu.memory_space<vmem>>, vector<16x128xbf16>
    %269 = arith.extf %268 : vector<16x128xbf16> to vector<16x128xf32>
    %270 = vector.broadcast %29 : vector<1x128xf32> to vector<16x128xf32>
    %271 = arith.addf %269, %270 : vector<16x128xf32>
    %272 = arith.truncf %253 : vector<16x32xf32> to vector<16x32xbf16>
    %cst_82 = arith.constant dense<0.000000e+00> : vector<16x128xf32>
    %273 = tpu.matmul %272, %33, %cst_82 {dimension_numbers = #tpu.dot_dimension_numbers<[1], [0], [0], [1], [0, 0, 1, 1], [], []>} : vector<16x32xbf16>, vector<32x128xbf16>, vector<16x128xf32> -> vector<16x128xf32>
    %274 = arith.addf %271, %273 : vector<16x128xf32>
    %275 = vector.extract_strided_slice %266 {offsets = [0, 0], sizes = [16, 96], strides = [1, 1]} : vector<16x128xf32> to vector<16x96xf32>
    %276 = arith.negf %275 : vector<16x96xf32>
    %277 = math.exp %276 : vector<16x96xf32>
    %cst_83 = arith.constant 1.000000e+00 : f32
    %278 = vector.broadcast %cst_83 : f32 to vector<16x96xf32>
    %279 = arith.addf %278, %277 : vector<16x96xf32>
    %280 = arith.divf %278, %279 : vector<16x96xf32>
    %281 = vector.extract_strided_slice %280 {offsets = [0, 0], sizes = [16, 32], strides = [1, 1]} : vector<16x96xf32> to vector<16x32xf32>
    %282 = vector.extract_strided_slice %280 {offsets = [0, 32], sizes = [16, 32], strides = [1, 1]} : vector<16x96xf32> to vector<16x32xf32>
    %283 = vector.extract_strided_slice %280 {offsets = [0, 64], sizes = [16, 32], strides = [1, 1]} : vector<16x96xf32> to vector<16x32xf32>
    %284 = vector.extract_strided_slice %266 {offsets = [0, 96], sizes = [16, 32], strides = [1, 1]} : vector<16x128xf32> to vector<16x32xf32>
    %285 = math.tanh %284 : vector<16x32xf32>
    %286 = vector.extract_strided_slice %274 {offsets = [0, 0], sizes = [16, 96], strides = [1, 1]} : vector<16x128xf32> to vector<16x96xf32>
    %287 = arith.negf %286 : vector<16x96xf32>
    %288 = math.exp %287 : vector<16x96xf32>
    %cst_84 = arith.constant 1.000000e+00 : f32
    %289 = vector.broadcast %cst_84 : f32 to vector<16x96xf32>
    %290 = arith.addf %289, %288 : vector<16x96xf32>
    %291 = arith.divf %289, %290 : vector<16x96xf32>
    %292 = vector.extract_strided_slice %291 {offsets = [0, 0], sizes = [16, 32], strides = [1, 1]} : vector<16x96xf32> to vector<16x32xf32>
    %293 = vector.extract_strided_slice %291 {offsets = [0, 32], sizes = [16, 32], strides = [1, 1]} : vector<16x96xf32> to vector<16x32xf32>
    %294 = vector.extract_strided_slice %291 {offsets = [0, 64], sizes = [16, 32], strides = [1, 1]} : vector<16x96xf32> to vector<16x32xf32>
    %295 = vector.extract_strided_slice %274 {offsets = [0, 96], sizes = [16, 32], strides = [1, 1]} : vector<16x128xf32> to vector<16x32xf32>
    %296 = math.tanh %295 : vector<16x32xf32>
    %297 = arith.mulf %282, %246 : vector<16x32xf32>
    %298 = arith.mulf %281, %285 : vector<16x32xf32>
    %299 = arith.addf %297, %298 : vector<16x32xf32>
    %300 = math.tanh %299 : vector<16x32xf32>
    %301 = arith.mulf %283, %300 : vector<16x32xf32>
    %302 = arith.mulf %293, %251 : vector<16x32xf32>
    %303 = arith.mulf %292, %296 : vector<16x32xf32>
    %304 = arith.addf %302, %303 : vector<16x32xf32>
    %305 = math.tanh %304 : vector<16x32xf32>
    %306 = arith.mulf %294, %305 : vector<16x32xf32>
    %c5_i32 = arith.constant 5 : i32
    %c16_i32_85 = arith.constant 16 : i32
    %307 = arith.muli %c5_i32, %c16_i32_85 : i32
    %308 = tpu.assume_multiple %307, 16 : i32
    %c7_i32_86 = arith.constant 7 : i32
    %309 = arith.subi %c7_i32_86, %c5_i32 : i32
    %c16_i32_87 = arith.constant 16 : i32
    %310 = arith.muli %309, %c16_i32_87 : i32
    %311 = tpu.assume_multiple %310, 16 : i32
    %312 = arith.index_cast %308 : i32 to index
    %c0_88 = arith.constant 0 : index
    %313 = vector.load %arg9[%312, %c0_88] : memref<128x128xbf16, #tpu.memory_space<vmem>>, vector<16x128xbf16>
    %314 = arith.extf %313 : vector<16x128xbf16> to vector<16x128xf32>
    %315 = vector.broadcast %27 : vector<1x128xf32> to vector<16x128xf32>
    %316 = arith.addf %314, %315 : vector<16x128xf32>
    %317 = arith.truncf %301 : vector<16x32xf32> to vector<16x32xbf16>
    %cst_89 = arith.constant dense<0.000000e+00> : vector<16x128xf32>
    %318 = tpu.matmul %317, %31, %cst_89 {dimension_numbers = #tpu.dot_dimension_numbers<[1], [0], [0], [1], [0, 0, 1, 1], [], []>} : vector<16x32xbf16>, vector<32x128xbf16>, vector<16x128xf32> -> vector<16x128xf32>
    %319 = arith.addf %316, %318 : vector<16x128xf32>
    %320 = arith.index_cast %311 : i32 to index
    %c0_90 = arith.constant 0 : index
    %321 = vector.load %arg10[%320, %c0_90] : memref<128x128xbf16, #tpu.memory_space<vmem>>, vector<16x128xbf16>
    %322 = arith.extf %321 : vector<16x128xbf16> to vector<16x128xf32>
    %323 = vector.broadcast %29 : vector<1x128xf32> to vector<16x128xf32>
    %324 = arith.addf %322, %323 : vector<16x128xf32>
    %325 = arith.truncf %306 : vector<16x32xf32> to vector<16x32xbf16>
    %cst_91 = arith.constant dense<0.000000e+00> : vector<16x128xf32>
    %326 = tpu.matmul %325, %33, %cst_91 {dimension_numbers = #tpu.dot_dimension_numbers<[1], [0], [0], [1], [0, 0, 1, 1], [], []>} : vector<16x32xbf16>, vector<32x128xbf16>, vector<16x128xf32> -> vector<16x128xf32>
    %327 = arith.addf %324, %326 : vector<16x128xf32>
    %328 = vector.extract_strided_slice %319 {offsets = [0, 0], sizes = [16, 96], strides = [1, 1]} : vector<16x128xf32> to vector<16x96xf32>
    %329 = arith.negf %328 : vector<16x96xf32>
    %330 = math.exp %329 : vector<16x96xf32>
    %cst_92 = arith.constant 1.000000e+00 : f32
    %331 = vector.broadcast %cst_92 : f32 to vector<16x96xf32>
    %332 = arith.addf %331, %330 : vector<16x96xf32>
    %333 = arith.divf %331, %332 : vector<16x96xf32>
    %334 = vector.extract_strided_slice %333 {offsets = [0, 0], sizes = [16, 32], strides = [1, 1]} : vector<16x96xf32> to vector<16x32xf32>
    %335 = vector.extract_strided_slice %333 {offsets = [0, 32], sizes = [16, 32], strides = [1, 1]} : vector<16x96xf32> to vector<16x32xf32>
    %336 = vector.extract_strided_slice %333 {offsets = [0, 64], sizes = [16, 32], strides = [1, 1]} : vector<16x96xf32> to vector<16x32xf32>
    %337 = vector.extract_strided_slice %319 {offsets = [0, 96], sizes = [16, 32], strides = [1, 1]} : vector<16x128xf32> to vector<16x32xf32>
    %338 = math.tanh %337 : vector<16x32xf32>
    %339 = vector.extract_strided_slice %327 {offsets = [0, 0], sizes = [16, 96], strides = [1, 1]} : vector<16x128xf32> to vector<16x96xf32>
    %340 = arith.negf %339 : vector<16x96xf32>
    %341 = math.exp %340 : vector<16x96xf32>
    %cst_93 = arith.constant 1.000000e+00 : f32
    %342 = vector.broadcast %cst_93 : f32 to vector<16x96xf32>
    %343 = arith.addf %342, %341 : vector<16x96xf32>
    %344 = arith.divf %342, %343 : vector<16x96xf32>
    %345 = vector.extract_strided_slice %344 {offsets = [0, 0], sizes = [16, 32], strides = [1, 1]} : vector<16x96xf32> to vector<16x32xf32>
    %346 = vector.extract_strided_slice %344 {offsets = [0, 32], sizes = [16, 32], strides = [1, 1]} : vector<16x96xf32> to vector<16x32xf32>
    %347 = vector.extract_strided_slice %344 {offsets = [0, 64], sizes = [16, 32], strides = [1, 1]} : vector<16x96xf32> to vector<16x32xf32>
    %348 = vector.extract_strided_slice %327 {offsets = [0, 96], sizes = [16, 32], strides = [1, 1]} : vector<16x128xf32> to vector<16x32xf32>
    %349 = math.tanh %348 : vector<16x32xf32>
    %350 = arith.mulf %335, %299 : vector<16x32xf32>
    %351 = arith.mulf %334, %338 : vector<16x32xf32>
    %352 = arith.addf %350, %351 : vector<16x32xf32>
    %353 = math.tanh %352 : vector<16x32xf32>
    %354 = arith.mulf %336, %353 : vector<16x32xf32>
    %355 = arith.mulf %346, %304 : vector<16x32xf32>
    %356 = arith.mulf %345, %349 : vector<16x32xf32>
    %357 = arith.addf %355, %356 : vector<16x32xf32>
    %358 = math.tanh %357 : vector<16x32xf32>
    %359 = arith.mulf %347, %358 : vector<16x32xf32>
    %c6_i32 = arith.constant 6 : i32
    %c16_i32_94 = arith.constant 16 : i32
    %360 = arith.muli %c6_i32, %c16_i32_94 : i32
    %361 = tpu.assume_multiple %360, 16 : i32
    %c7_i32_95 = arith.constant 7 : i32
    %362 = arith.subi %c7_i32_95, %c6_i32 : i32
    %c16_i32_96 = arith.constant 16 : i32
    %363 = arith.muli %362, %c16_i32_96 : i32
    %364 = tpu.assume_multiple %363, 16 : i32
    %365 = arith.index_cast %361 : i32 to index
    %c0_97 = arith.constant 0 : index
    %366 = vector.load %arg9[%365, %c0_97] : memref<128x128xbf16, #tpu.memory_space<vmem>>, vector<16x128xbf16>
    %367 = arith.extf %366 : vector<16x128xbf16> to vector<16x128xf32>
    %368 = vector.broadcast %27 : vector<1x128xf32> to vector<16x128xf32>
    %369 = arith.addf %367, %368 : vector<16x128xf32>
    %370 = arith.truncf %354 : vector<16x32xf32> to vector<16x32xbf16>
    %cst_98 = arith.constant dense<0.000000e+00> : vector<16x128xf32>
    %371 = tpu.matmul %370, %31, %cst_98 {dimension_numbers = #tpu.dot_dimension_numbers<[1], [0], [0], [1], [0, 0, 1, 1], [], []>} : vector<16x32xbf16>, vector<32x128xbf16>, vector<16x128xf32> -> vector<16x128xf32>
    %372 = arith.addf %369, %371 : vector<16x128xf32>
    %373 = arith.index_cast %364 : i32 to index
    %c0_99 = arith.constant 0 : index
    %374 = vector.load %arg10[%373, %c0_99] : memref<128x128xbf16, #tpu.memory_space<vmem>>, vector<16x128xbf16>
    %375 = arith.extf %374 : vector<16x128xbf16> to vector<16x128xf32>
    %376 = vector.broadcast %29 : vector<1x128xf32> to vector<16x128xf32>
    %377 = arith.addf %375, %376 : vector<16x128xf32>
    %378 = arith.truncf %359 : vector<16x32xf32> to vector<16x32xbf16>
    %cst_100 = arith.constant dense<0.000000e+00> : vector<16x128xf32>
    %379 = tpu.matmul %378, %33, %cst_100 {dimension_numbers = #tpu.dot_dimension_numbers<[1], [0], [0], [1], [0, 0, 1, 1], [], []>} : vector<16x32xbf16>, vector<32x128xbf16>, vector<16x128xf32> -> vector<16x128xf32>
    %380 = arith.addf %377, %379 : vector<16x128xf32>
    %381 = vector.extract_strided_slice %372 {offsets = [0, 0], sizes = [16, 96], strides = [1, 1]} : vector<16x128xf32> to vector<16x96xf32>
    %382 = arith.negf %381 : vector<16x96xf32>
    %383 = math.exp %382 : vector<16x96xf32>
    %cst_101 = arith.constant 1.000000e+00 : f32
    %384 = vector.broadcast %cst_101 : f32 to vector<16x96xf32>
    %385 = arith.addf %384, %383 : vector<16x96xf32>
    %386 = arith.divf %384, %385 : vector<16x96xf32>
    %387 = vector.extract_strided_slice %386 {offsets = [0, 0], sizes = [16, 32], strides = [1, 1]} : vector<16x96xf32> to vector<16x32xf32>
    %388 = vector.extract_strided_slice %386 {offsets = [0, 32], sizes = [16, 32], strides = [1, 1]} : vector<16x96xf32> to vector<16x32xf32>
    %389 = vector.extract_strided_slice %386 {offsets = [0, 64], sizes = [16, 32], strides = [1, 1]} : vector<16x96xf32> to vector<16x32xf32>
    %390 = vector.extract_strided_slice %372 {offsets = [0, 96], sizes = [16, 32], strides = [1, 1]} : vector<16x128xf32> to vector<16x32xf32>
    %391 = math.tanh %390 : vector<16x32xf32>
    %392 = vector.extract_strided_slice %380 {offsets = [0, 0], sizes = [16, 96], strides = [1, 1]} : vector<16x128xf32> to vector<16x96xf32>
    %393 = arith.negf %392 : vector<16x96xf32>
    %394 = math.exp %393 : vector<16x96xf32>
    %cst_102 = arith.constant 1.000000e+00 : f32
    %395 = vector.broadcast %cst_102 : f32 to vector<16x96xf32>
    %396 = arith.addf %395, %394 : vector<16x96xf32>
    %397 = arith.divf %395, %396 : vector<16x96xf32>
    %398 = vector.extract_strided_slice %397 {offsets = [0, 0], sizes = [16, 32], strides = [1, 1]} : vector<16x96xf32> to vector<16x32xf32>
    %399 = vector.extract_strided_slice %397 {offsets = [0, 32], sizes = [16, 32], strides = [1, 1]} : vector<16x96xf32> to vector<16x32xf32>
    %400 = vector.extract_strided_slice %397 {offsets = [0, 64], sizes = [16, 32], strides = [1, 1]} : vector<16x96xf32> to vector<16x32xf32>
    %401 = vector.extract_strided_slice %380 {offsets = [0, 96], sizes = [16, 32], strides = [1, 1]} : vector<16x128xf32> to vector<16x32xf32>
    %402 = math.tanh %401 : vector<16x32xf32>
    %403 = arith.mulf %388, %352 : vector<16x32xf32>
    %404 = arith.mulf %387, %391 : vector<16x32xf32>
    %405 = arith.addf %403, %404 : vector<16x32xf32>
    %406 = math.tanh %405 : vector<16x32xf32>
    %407 = arith.mulf %389, %406 : vector<16x32xf32>
    %408 = arith.mulf %399, %357 : vector<16x32xf32>
    %409 = arith.mulf %398, %402 : vector<16x32xf32>
    %410 = arith.addf %408, %409 : vector<16x32xf32>
    %411 = math.tanh %410 : vector<16x32xf32>
    %412 = arith.mulf %400, %411 : vector<16x32xf32>
    %c7_i32_103 = arith.constant 7 : i32
    %c16_i32_104 = arith.constant 16 : i32
    %413 = arith.muli %c7_i32_103, %c16_i32_104 : i32
    %414 = tpu.assume_multiple %413, 16 : i32
    %c7_i32_105 = arith.constant 7 : i32
    %415 = arith.subi %c7_i32_105, %c7_i32_103 : i32
    %c16_i32_106 = arith.constant 16 : i32
    %416 = arith.muli %415, %c16_i32_106 : i32
    %417 = tpu.assume_multiple %416, 16 : i32
    %418 = arith.index_cast %414 : i32 to index
    %c0_107 = arith.constant 0 : index
    %419 = vector.load %arg9[%418, %c0_107] : memref<128x128xbf16, #tpu.memory_space<vmem>>, vector<16x128xbf16>
    %420 = arith.extf %419 : vector<16x128xbf16> to vector<16x128xf32>
    %421 = vector.broadcast %27 : vector<1x128xf32> to vector<16x128xf32>
    %422 = arith.addf %420, %421 : vector<16x128xf32>
    %423 = arith.truncf %407 : vector<16x32xf32> to vector<16x32xbf16>
    %cst_108 = arith.constant dense<0.000000e+00> : vector<16x128xf32>
    %424 = tpu.matmul %423, %31, %cst_108 {dimension_numbers = #tpu.dot_dimension_numbers<[1], [0], [0], [1], [0, 0, 1, 1], [], []>} : vector<16x32xbf16>, vector<32x128xbf16>, vector<16x128xf32> -> vector<16x128xf32>
    %425 = arith.addf %422, %424 : vector<16x128xf32>
    %426 = arith.index_cast %417 : i32 to index
    %c0_109 = arith.constant 0 : index
    %427 = vector.load %arg10[%426, %c0_109] : memref<128x128xbf16, #tpu.memory_space<vmem>>, vector<16x128xbf16>
    %428 = arith.extf %427 : vector<16x128xbf16> to vector<16x128xf32>
    %429 = vector.broadcast %29 : vector<1x128xf32> to vector<16x128xf32>
    %430 = arith.addf %428, %429 : vector<16x128xf32>
    %431 = arith.truncf %412 : vector<16x32xf32> to vector<16x32xbf16>
    %cst_110 = arith.constant dense<0.000000e+00> : vector<16x128xf32>
    %432 = tpu.matmul %431, %33, %cst_110 {dimension_numbers = #tpu.dot_dimension_numbers<[1], [0], [0], [1], [0, 0, 1, 1], [], []>} : vector<16x32xbf16>, vector<32x128xbf16>, vector<16x128xf32> -> vector<16x128xf32>
    %433 = arith.addf %430, %432 : vector<16x128xf32>
    %434 = vector.extract_strided_slice %425 {offsets = [0, 0], sizes = [16, 96], strides = [1, 1]} : vector<16x128xf32> to vector<16x96xf32>
    %435 = arith.negf %434 : vector<16x96xf32>
    %436 = math.exp %435 : vector<16x96xf32>
    %cst_111 = arith.constant 1.000000e+00 : f32
    %437 = vector.broadcast %cst_111 : f32 to vector<16x96xf32>
    %438 = arith.addf %437, %436 : vector<16x96xf32>
    %439 = arith.divf %437, %438 : vector<16x96xf32>
    %440 = vector.extract_strided_slice %439 {offsets = [0, 0], sizes = [16, 32], strides = [1, 1]} : vector<16x96xf32> to vector<16x32xf32>
    %441 = vector.extract_strided_slice %439 {offsets = [0, 32], sizes = [16, 32], strides = [1, 1]} : vector<16x96xf32> to vector<16x32xf32>
    %442 = vector.extract_strided_slice %439 {offsets = [0, 64], sizes = [16, 32], strides = [1, 1]} : vector<16x96xf32> to vector<16x32xf32>
    %443 = vector.extract_strided_slice %425 {offsets = [0, 96], sizes = [16, 32], strides = [1, 1]} : vector<16x128xf32> to vector<16x32xf32>
    %444 = math.tanh %443 : vector<16x32xf32>
    %445 = vector.extract_strided_slice %433 {offsets = [0, 0], sizes = [16, 96], strides = [1, 1]} : vector<16x128xf32> to vector<16x96xf32>
    %446 = arith.negf %445 : vector<16x96xf32>
    %447 = math.exp %446 : vector<16x96xf32>
    %cst_112 = arith.constant 1.000000e+00 : f32
    %448 = vector.broadcast %cst_112 : f32 to vector<16x96xf32>
    %449 = arith.addf %448, %447 : vector<16x96xf32>
    %450 = arith.divf %448, %449 : vector<16x96xf32>
    %451 = vector.extract_strided_slice %450 {offsets = [0, 0], sizes = [16, 32], strides = [1, 1]} : vector<16x96xf32> to vector<16x32xf32>
    %452 = vector.extract_strided_slice %450 {offsets = [0, 32], sizes = [16, 32], strides = [1, 1]} : vector<16x96xf32> to vector<16x32xf32>
    %453 = vector.extract_strided_slice %450 {offsets = [0, 64], sizes = [16, 32], strides = [1, 1]} : vector<16x96xf32> to vector<16x32xf32>
    %454 = vector.extract_strided_slice %433 {offsets = [0, 96], sizes = [16, 32], strides = [1, 1]} : vector<16x128xf32> to vector<16x32xf32>
    %455 = math.tanh %454 : vector<16x32xf32>
    %456 = arith.mulf %441, %405 : vector<16x32xf32>
    %457 = arith.mulf %440, %444 : vector<16x32xf32>
    %458 = arith.addf %456, %457 : vector<16x32xf32>
    %459 = math.tanh %458 : vector<16x32xf32>
    %460 = arith.mulf %442, %459 : vector<16x32xf32>
    %461 = arith.mulf %452, %410 : vector<16x32xf32>
    %462 = arith.mulf %451, %455 : vector<16x32xf32>
    %463 = arith.addf %461, %462 : vector<16x32xf32>
    %464 = math.tanh %463 : vector<16x32xf32>
    %465 = arith.mulf %453, %464 : vector<16x32xf32>
    %c8_i32 = arith.constant 8 : i32
    %c0_113 = arith.constant 0 : index
    %c0_114 = arith.constant 0 : index
    %c0_115 = arith.constant 0 : index
    %466 = vector.load %arg11[%c0_113, %c0_114, %c0_115] : memref<2x16x32xf32, #tpu.memory_space<vmem>>, vector<1x16x32xf32>
    %467 = vector.shape_cast %466 : vector<1x16x32xf32> to vector<16x32xf32>
    %468 = vector.shape_cast %460 : vector<16x32xf32> to vector<1x16x32xf32>
    tpu.vector_store %arg11[%c0_113, %c0_114, %c0_115], %468 {strides = array<i32>} : memref<2x16x32xf32, #tpu.memory_space<vmem>>, vector<1x16x32xf32>,
    %c0_116 = arith.constant 0 : index
    %c0_117 = arith.constant 0 : index
    %c0_118 = arith.constant 0 : index
    %469 = vector.load %arg12[%c0_116, %c0_117, %c0_118] : memref<2x16x32xf32, #tpu.memory_space<vmem>>, vector<1x16x32xf32>
    %470 = vector.shape_cast %469 : vector<1x16x32xf32> to vector<16x32xf32>
    %471 = vector.shape_cast %458 : vector<16x32xf32> to vector<1x16x32xf32>
    tpu.vector_store %arg12[%c0_116, %c0_117, %c0_118], %471 {strides = array<i32>} : memref<2x16x32xf32, #tpu.memory_space<vmem>>, vector<1x16x32xf32>,
    %c1_119 = arith.constant 1 : index
    %c0_120 = arith.constant 0 : index
    %c0_121 = arith.constant 0 : index
    %472 = vector.load %arg11[%c1_119, %c0_120, %c0_121] : memref<2x16x32xf32, #tpu.memory_space<vmem>>, vector<1x16x32xf32>
    %473 = vector.shape_cast %472 : vector<1x16x32xf32> to vector<16x32xf32>
    %474 = vector.shape_cast %465 : vector<16x32xf32> to vector<1x16x32xf32>
    tpu.vector_store %arg11[%c1_119, %c0_120, %c0_121], %474 {strides = array<i32>} : memref<2x16x32xf32, #tpu.memory_space<vmem>>, vector<1x16x32xf32>,
    %c1_122 = arith.constant 1 : index
    %c0_123 = arith.constant 0 : index
    %c0_124 = arith.constant 0 : index
    %475 = vector.load %arg12[%c1_122, %c0_123, %c0_124] : memref<2x16x32xf32, #tpu.memory_space<vmem>>, vector<1x16x32xf32>
    %476 = vector.shape_cast %475 : vector<1x16x32xf32> to vector<16x32xf32>
    %477 = vector.shape_cast %463 : vector<16x32xf32> to vector<1x16x32xf32>
    tpu.vector_store %arg12[%c1_122, %c0_123, %c0_124], %477 {strides = array<i32>} : memref<2x16x32xf32, #tpu.memory_space<vmem>>, vector<1x16x32xf32>,
    %c0_125 = arith.constant 0 : index
    %c0_126 = arith.constant 0 : index
    %c0_127 = arith.constant 0 : index
    %478 = vector.load %arg8[%c0_125, %c0_126, %c0_127] : memref<2x16x32xf32, #tpu.memory_space<vmem>>, vector<1x16x32xf32>
    %479 = vector.shape_cast %478 : vector<1x16x32xf32> to vector<16x32xf32>
    %480 = vector.shape_cast %460 : vector<16x32xf32> to vector<1x16x32xf32>
    tpu.vector_store %arg8[%c0_125, %c0_126, %c0_127], %480 {strides = array<i32>} : memref<2x16x32xf32, #tpu.memory_space<vmem>>, vector<1x16x32xf32>,
    %c1_128 = arith.constant 1 : index
    %c0_129 = arith.constant 0 : index
    %c0_130 = arith.constant 0 : index
    %481 = vector.load %arg8[%c1_128, %c0_129, %c0_130] : memref<2x16x32xf32, #tpu.memory_space<vmem>>, vector<1x16x32xf32>
    %482 = vector.shape_cast %481 : vector<1x16x32xf32> to vector<16x32xf32>
    %483 = vector.shape_cast %465 : vector<16x32xf32> to vector<1x16x32xf32>
    tpu.vector_store %arg8[%c1_128, %c0_129, %c0_130], %483 {strides = array<i32>} : memref<2x16x32xf32, #tpu.memory_space<vmem>>, vector<1x16x32xf32>,
    return
  }
  func.func @transform_0(%arg0: i32) -> (i32, i32) {
    %c0_i32 = arith.constant 0 : i32
    %c0_i32_0 = arith.constant 0 : i32
    return %arg0, %c0_i32 : i32, i32
  }
  func.func @transform_1(%arg0: i32) -> (i32, i32) {
    %c0_i32 = arith.constant 0 : i32
    %0 = arith.subi %c0_i32, %arg0 : i32
    %c0_i32_0 = arith.constant 0 : i32
    %c0_i32_1 = arith.constant 0 : i32
    return %0, %c0_i32_0 : i32, i32
  }
  func.func @transform_2(%arg0: i32) -> (i32, i32) {
    %c0_i32 = arith.constant 0 : i32
    %c0_i32_0 = arith.constant 0 : i32
    return %arg0, %c0_i32 : i32, i32
  }
  func.func @transform_3(%arg0: i32) -> (i32, i32) {
    %c0_i32 = arith.constant 0 : i32
    %0 = arith.subi %c0_i32, %arg0 : i32
    %c0_i32_0 = arith.constant 0 : i32
    %c0_i32_1 = arith.constant 0 : i32
    return %0, %c0_i32_0 : i32, i32
  }
  func.func @transform_4(%arg0: i32) -> (i32, i32, i32) {
    %c0_i32 = arith.constant 0 : i32
    %c0_i32_0 = arith.constant 0 : i32
    %c0_i32_1 = arith.constant 0 : i32
    %c0_i32_2 = arith.constant 0 : i32
    return %c0_i32, %c0_i32_0, %c0_i32_1 : i32, i32, i32
  }
  func.func @transform_5(%arg0: i32) -> (i32, i32, i32) {
    %c0_i32 = arith.constant 0 : i32
    %c0_i32_0 = arith.constant 0 : i32
    %c0_i32_1 = arith.constant 0 : i32
    %c0_i32_2 = arith.constant 0 : i32
    return %c0_i32, %c0_i32_0, %c0_i32_1 : i32, i32, i32
  }
  func.func @transform_6(%arg0: i32) -> (i32, i32, i32) {
    %c0_i32 = arith.constant 0 : i32
    %c0_i32_0 = arith.constant 0 : i32
    %c0_i32_1 = arith.constant 0 : i32
    %c0_i32_2 = arith.constant 0 : i32
    return %c0_i32, %c0_i32_0, %c0_i32_1 : i32, i32, i32
  }
  func.func @transform_7(%arg0: i32) -> (i32, i32, i32) {
    %c0_i32 = arith.constant 0 : i32
    %c0_i32_0 = arith.constant 0 : i32
    %c0_i32_1 = arith.constant 0 : i32
    %c0_i32_2 = arith.constant 0 : i32
    return %c0_i32, %c0_i32_0, %c0_i32_1 : i32, i32, i32
  }
}

module attributes {stable_mosaic.version = 11 : i64} {
  func.func @mlp_head_kernel(%arg0: memref<2x16x32xf32, #tpu.memory_space<vmem>>, %arg1: memref<64x32xf32, #tpu.memory_space<vmem>>, %arg2: memref<1x32xf32, #tpu.memory_space<vmem>>, %arg3: memref<32x128xf32, #tpu.memory_space<vmem>>, %arg4: memref<1x128xf32, #tpu.memory_space<vmem>>, %arg5: memref<16x128xf32, #tpu.memory_space<vmem>>) attributes {dimension_semantics = [], scalar_prefetch = 0 : i64, scratch_operands = 0 : i64, tpu.core_type = #tpu.core_type<tc>} {
    %c0 = arith.constant 0 : index
    %c0_0 = arith.constant 0 : index
    %0 = vector.load %arg1[%c0, %c0_0] : memref<64x32xf32, #tpu.memory_space<vmem>>, vector<64x32xf32>
    %c0_1 = arith.constant 0 : index
    %c0_2 = arith.constant 0 : index
    %c0_3 = arith.constant 0 : index
    %1 = vector.load %arg0[%c0_1, %c0_2, %c0_3] : memref<2x16x32xf32, #tpu.memory_space<vmem>>, vector<1x16x32xf32>
    %2 = vector.shape_cast %1 : vector<1x16x32xf32> to vector<16x32xf32>
    %3 = vector.extract_strided_slice %0 {offsets = [0, 0], sizes = [32, 32], strides = [1, 1]} : vector<64x32xf32> to vector<32x32xf32>
    %cst = arith.constant dense<0.000000e+00> : vector<16x32xf32>
    %4 = tpu.matmul %2, %3, %cst {dimension_numbers = #tpu.dot_dimension_numbers<[1], [0], [0], [1], [0, 0, 1, 1], [], []>} : vector<16x32xf32>, vector<32x32xf32>, vector<16x32xf32> -> vector<16x32xf32>
    %c1 = arith.constant 1 : index
    %c0_4 = arith.constant 0 : index
    %c0_5 = arith.constant 0 : index
    %5 = vector.load %arg0[%c1, %c0_4, %c0_5] : memref<2x16x32xf32, #tpu.memory_space<vmem>>, vector<1x16x32xf32>
    %6 = vector.shape_cast %5 : vector<1x16x32xf32> to vector<16x32xf32>
    %7 = vector.extract_strided_slice %0 {offsets = [32, 0], sizes = [32, 32], strides = [1, 1]} : vector<64x32xf32> to vector<32x32xf32>
    %cst_6 = arith.constant dense<0.000000e+00> : vector<16x32xf32>
    %8 = tpu.matmul %6, %7, %cst_6 {dimension_numbers = #tpu.dot_dimension_numbers<[1], [0], [0], [1], [0, 0, 1, 1], [], []>} : vector<16x32xf32>, vector<32x32xf32>, vector<16x32xf32> -> vector<16x32xf32>
    %9 = arith.addf %4, %8 : vector<16x32xf32>
    %c0_7 = arith.constant 0 : index
    %c0_8 = arith.constant 0 : index
    %10 = vector.load %arg2[%c0_7, %c0_8] : memref<1x32xf32, #tpu.memory_space<vmem>>, vector<1x32xf32>
    %11 = vector.broadcast %10 : vector<1x32xf32> to vector<16x32xf32>
    %12 = arith.addf %9, %11 : vector<16x32xf32>
    %cst_9 = arith.constant 0.000000e+00 : f32
    %13 = vector.broadcast %cst_9 : f32 to vector<16x32xf32>
    %14 = arith.maximumf %12, %13 : vector<16x32xf32>
    %c0_10 = arith.constant 0 : index
    %c0_11 = arith.constant 0 : index
    %15 = vector.load %arg3[%c0_10, %c0_11] : memref<32x128xf32, #tpu.memory_space<vmem>>, vector<32x128xf32>
    %cst_12 = arith.constant dense<0.000000e+00> : vector<16x128xf32>
    %16 = tpu.matmul %14, %15, %cst_12 {dimension_numbers = #tpu.dot_dimension_numbers<[1], [0], [0], [1], [0, 0, 1, 1], [], []>} : vector<16x32xf32>, vector<32x128xf32>, vector<16x128xf32> -> vector<16x128xf32>
    %c0_13 = arith.constant 0 : index
    %c0_14 = arith.constant 0 : index
    %17 = vector.load %arg4[%c0_13, %c0_14] : memref<1x128xf32, #tpu.memory_space<vmem>>, vector<1x128xf32>
    %18 = vector.broadcast %17 : vector<1x128xf32> to vector<16x128xf32>
    %19 = arith.addf %16, %18 : vector<16x128xf32>
    %c0_15 = arith.constant 0 : index
    %c0_16 = arith.constant 0 : index
    %20 = vector.load %arg5[%c0_15, %c0_16] : memref<16x128xf32, #tpu.memory_space<vmem>>, vector<16x128xf32>
    tpu.vector_store %arg5[%c0_15, %c0_16], %19 {strides = array<i32>} : memref<16x128xf32, #tpu.memory_space<vmem>>, vector<16x128xf32>,
    return
  }
}

module attributes {stable_mosaic.version = 11 : i64} {
  func.func @bilstm_layer_kernel(%arg0: i32, %arg1: memref<128x32xbf16, #tpu.memory_space<vmem>>, %arg2: memref<128x32xbf16, #tpu.memory_space<vmem>>, %arg3: memref<2x32x128xbf16, #tpu.memory_space<vmem>>, %arg4: memref<2x32x128xbf16, #tpu.memory_space<vmem>>, %arg5: memref<2x1x128xf32, #tpu.memory_space<vmem>>, %arg6: memref<128x32xbf16, #tpu.memory_space<vmem>>, %arg7: memref<128x32xbf16, #tpu.memory_space<vmem>>, %arg8: memref<128x128xbf16, #tpu.memory_space<vmem>>, %arg9: memref<128x128xbf16, #tpu.memory_space<vmem>>, %arg10: memref<2x16x32xf32, #tpu.memory_space<vmem>>, %arg11: memref<2x16x32xf32, #tpu.memory_space<vmem>>) attributes {dimension_semantics = [#tpu.dimension_semantics<arbitrary>], iteration_bounds = array<i64: 1>, scalar_prefetch = 0 : i64, scratch_operands = 4 : i64, tpu.core_type = #tpu.core_type<tc>, window_params = [{transform_indices = @transform_0, window_bounds = array<i64: 128, 32>}, {transform_indices = @transform_1, window_bounds = array<i64: 128, 32>}, {pipeline_mode = #tpu.pipeline_mode<synchronous>, transform_indices = @transform_2, window_bounds = array<i64: 2, 32, 128>}, {pipeline_mode = #tpu.pipeline_mode<synchronous>, transform_indices = @transform_3, window_bounds = array<i64: 2, 32, 128>}, {pipeline_mode = #tpu.pipeline_mode<synchronous>, transform_indices = @transform_4, window_bounds = array<i64: 2, 1, 128>}, {transform_indices = @transform_5, window_bounds = array<i64: 128, 32>}, {transform_indices = @transform_6, window_bounds = array<i64: 128, 32>}]} {
    %c0 = arith.constant 0 : index
    %c0_0 = arith.constant 0 : index
    %c0_1 = arith.constant 0 : index
    %0 = vector.load %arg3[%c0, %c0_0, %c0_1] : memref<2x32x128xbf16, #tpu.memory_space<vmem>>, vector<2x32x128xbf16>
    %c0_2 = arith.constant 0 : index
    %c0_3 = arith.constant 0 : index
    %1 = vector.load %arg1[%c0_2, %c0_3] : memref<128x32xbf16, #tpu.memory_space<vmem>>, vector<128x32xbf16>
    %2 = vector.extract_strided_slice %0 {offsets = [0, 0, 0], sizes = [1, 32, 128], strides = [1, 1, 1]} : vector<2x32x128xbf16> to vector<1x32x128xbf16>
    %3 = vector.shape_cast %2 : vector<1x32x128xbf16> to vector<32x128xbf16>
    %cst = arith.constant dense<0.000000e+00> : vector<128x128xf32>
    %4 = tpu.matmul %1, %3, %cst {dimension_numbers = #tpu.dot_dimension_numbers<[1], [0], [0], [1], [0, 0, 1, 1], [], []>} : vector<128x32xbf16>, vector<32x128xbf16>, vector<128x128xf32> -> vector<128x128xf32>
    %c0_4 = arith.constant 0 : index
    %c0_5 = arith.constant 0 : index
    %5 = vector.load %arg2[%c0_4, %c0_5] : memref<128x32xbf16, #tpu.memory_space<vmem>>, vector<128x32xbf16>
    %6 = vector.extract_strided_slice %0 {offsets = [1, 0, 0], sizes = [1, 32, 128], strides = [1, 1, 1]} : vector<2x32x128xbf16> to vector<1x32x128xbf16>
    %7 = vector.shape_cast %6 : vector<1x32x128xbf16> to vector<32x128xbf16>
    %cst_6 = arith.constant dense<0.000000e+00> : vector<128x128xf32>
    %8 = tpu.matmul %5, %7, %cst_6 {dimension_numbers = #tpu.dot_dimension_numbers<[1], [0], [0], [1], [0, 0, 1, 1], [], []>} : vector<128x32xbf16>, vector<32x128xbf16>, vector<128x128xf32> -> vector<128x128xf32>
    %9 = arith.truncf %4 : vector<128x128xf32> to vector<128x128xbf16>
    %c0_7 = arith.constant 0 : index
    %c0_8 = arith.constant 0 : index
    %10 = vector.load %arg8[%c0_7, %c0_8] : memref<128x128xbf16, #tpu.memory_space<vmem>>, vector<128x128xbf16>
    tpu.vector_store %arg8[%c0_7, %c0_8], %9 {strides = array<i32>} : memref<128x128xbf16, #tpu.memory_space<vmem>>, vector<128x128xbf16>,
    %11 = arith.truncf %8 : vector<128x128xf32> to vector<128x128xbf16>
    %c0_9 = arith.constant 0 : index
    %c0_10 = arith.constant 0 : index
    %12 = vector.load %arg9[%c0_9, %c0_10] : memref<128x128xbf16, #tpu.memory_space<vmem>>, vector<128x128xbf16>
    tpu.vector_store %arg9[%c0_9, %c0_10], %11 {strides = array<i32>} : memref<128x128xbf16, #tpu.memory_space<vmem>>, vector<128x128xbf16>,
    %c0_i32 = arith.constant 0 : i32
    %13 = arith.cmpi eq, %arg0, %c0_i32 : i32
    %14 = arith.extui %13 : i1 to i32
    %c0_i32_11 = arith.constant 0 : i32
    %15 = arith.cmpi ne, %14, %c0_i32_11 : i32
    scf.if %15 {
      %cst_135 = arith.constant 0.000000e+00 : f32
      %516 = vector.broadcast %cst_135 : f32 to vector<2x16x32xf32>
      %c0_136 = arith.constant 0 : index
      %c0_137 = arith.constant 0 : index
      %c0_138 = arith.constant 0 : index
      %517 = vector.load %arg10[%c0_136, %c0_137, %c0_138] : memref<2x16x32xf32, #tpu.memory_space<vmem>>, vector<2x16x32xf32>
      tpu.vector_store %arg10[%c0_136, %c0_137, %c0_138], %516 {strides = array<i32>} : memref<2x16x32xf32, #tpu.memory_space<vmem>>, vector<2x16x32xf32>,
      %cst_139 = arith.constant 0.000000e+00 : f32
      %518 = vector.broadcast %cst_139 : f32 to vector<2x16x32xf32>
      %c0_140 = arith.constant 0 : index
      %c0_141 = arith.constant 0 : index
      %c0_142 = arith.constant 0 : index
      %519 = vector.load %arg11[%c0_140, %c0_141, %c0_142] : memref<2x16x32xf32, #tpu.memory_space<vmem>>, vector<2x16x32xf32>
      tpu.vector_store %arg11[%c0_140, %c0_141, %c0_142], %518 {strides = array<i32>} : memref<2x16x32xf32, #tpu.memory_space<vmem>>, vector<2x16x32xf32>,
    } else {
    }
    %c0_12 = arith.constant 0 : index
    %c0_13 = arith.constant 0 : index
    %c0_14 = arith.constant 0 : index
    %16 = vector.load %arg5[%c0_12, %c0_13, %c0_14] : memref<2x1x128xf32, #tpu.memory_space<vmem>>, vector<1x1x128xf32>
    %17 = vector.shape_cast %16 : vector<1x1x128xf32> to vector<1x128xf32>
    %c1 = arith.constant 1 : index
    %c0_15 = arith.constant 0 : index
    %c0_16 = arith.constant 0 : index
    %18 = vector.load %arg5[%c1, %c0_15, %c0_16] : memref<2x1x128xf32, #tpu.memory_space<vmem>>, vector<1x1x128xf32>
    %19 = vector.shape_cast %18 : vector<1x1x128xf32> to vector<1x128xf32>
    %c0_17 = arith.constant 0 : index
    %c0_18 = arith.constant 0 : index
    %c0_19 = arith.constant 0 : index
    %20 = vector.load %arg4[%c0_17, %c0_18, %c0_19] : memref<2x32x128xbf16, #tpu.memory_space<vmem>>, vector<1x32x128xbf16>
    %21 = vector.shape_cast %20 : vector<1x32x128xbf16> to vector<32x128xbf16>
    %c1_20 = arith.constant 1 : index
    %c0_21 = arith.constant 0 : index
    %c0_22 = arith.constant 0 : index
    %22 = vector.load %arg4[%c1_20, %c0_21, %c0_22] : memref<2x32x128xbf16, #tpu.memory_space<vmem>>, vector<1x32x128xbf16>
    %23 = vector.shape_cast %22 : vector<1x32x128xbf16> to vector<32x128xbf16>
    %c0_23 = arith.constant 0 : index
    %c0_24 = arith.constant 0 : index
    %c0_25 = arith.constant 0 : index
    %24 = vector.load %arg10[%c0_23, %c0_24, %c0_25] : memref<2x16x32xf32, #tpu.memory_space<vmem>>, vector<1x16x32xf32>
    %25 = vector.shape_cast %24 : vector<1x16x32xf32> to vector<16x32xf32>
    %c0_26 = arith.constant 0 : index
    %c0_27 = arith.constant 0 : index
    %c0_28 = arith.constant 0 : index
    %26 = vector.load %arg11[%c0_26, %c0_27, %c0_28] : memref<2x16x32xf32, #tpu.memory_space<vmem>>, vector<1x16x32xf32>
    %27 = vector.shape_cast %26 : vector<1x16x32xf32> to vector<16x32xf32>
    %c1_29 = arith.constant 1 : index
    %c0_30 = arith.constant 0 : index
    %c0_31 = arith.constant 0 : index
    %28 = vector.load %arg10[%c1_29, %c0_30, %c0_31] : memref<2x16x32xf32, #tpu.memory_space<vmem>>, vector<1x16x32xf32>
    %29 = vector.shape_cast %28 : vector<1x16x32xf32> to vector<16x32xf32>
    %c1_32 = arith.constant 1 : index
    %c0_33 = arith.constant 0 : index
    %c0_34 = arith.constant 0 : index
    %30 = vector.load %arg11[%c1_32, %c0_33, %c0_34] : memref<2x16x32xf32, #tpu.memory_space<vmem>>, vector<1x16x32xf32>
    %31 = vector.shape_cast %30 : vector<1x16x32xf32> to vector<16x32xf32>
    %c0_i32_35 = arith.constant 0 : i32
    %c16_i32 = arith.constant 16 : i32
    %32 = arith.muli %c0_i32_35, %c16_i32 : i32
    %33 = tpu.assume_multiple %32, 16 : i32
    %c7_i32 = arith.constant 7 : i32
    %34 = arith.subi %c7_i32, %c0_i32_35 : i32
    %c16_i32_36 = arith.constant 16 : i32
    %35 = arith.muli %34, %c16_i32_36 : i32
    %36 = tpu.assume_multiple %35, 16 : i32
    %37 = arith.index_cast %33 : i32 to index
    %c0_37 = arith.constant 0 : index
    %38 = vector.load %arg8[%37, %c0_37] : memref<128x128xbf16, #tpu.memory_space<vmem>>, vector<16x128xbf16>
    %39 = arith.extf %38 : vector<16x128xbf16> to vector<16x128xf32>
    %40 = vector.broadcast %17 : vector<1x128xf32> to vector<16x128xf32>
    %41 = arith.addf %39, %40 : vector<16x128xf32>
    %42 = arith.truncf %25 : vector<16x32xf32> to vector<16x32xbf16>
    %cst_38 = arith.constant dense<0.000000e+00> : vector<16x128xf32>
    %43 = tpu.matmul %42, %21, %cst_38 {dimension_numbers = #tpu.dot_dimension_numbers<[1], [0], [0], [1], [0, 0, 1, 1], [], []>} : vector<16x32xbf16>, vector<32x128xbf16>, vector<16x128xf32> -> vector<16x128xf32>
    %44 = arith.addf %41, %43 : vector<16x128xf32>
    %45 = arith.index_cast %36 : i32 to index
    %c0_39 = arith.constant 0 : index
    %46 = vector.load %arg9[%45, %c0_39] : memref<128x128xbf16, #tpu.memory_space<vmem>>, vector<16x128xbf16>
    %47 = arith.extf %46 : vector<16x128xbf16> to vector<16x128xf32>
    %48 = vector.broadcast %19 : vector<1x128xf32> to vector<16x128xf32>
    %49 = arith.addf %47, %48 : vector<16x128xf32>
    %50 = arith.truncf %29 : vector<16x32xf32> to vector<16x32xbf16>
    %cst_40 = arith.constant dense<0.000000e+00> : vector<16x128xf32>
    %51 = tpu.matmul %50, %23, %cst_40 {dimension_numbers = #tpu.dot_dimension_numbers<[1], [0], [0], [1], [0, 0, 1, 1], [], []>} : vector<16x32xbf16>, vector<32x128xbf16>, vector<16x128xf32> -> vector<16x128xf32>
    %52 = arith.addf %49, %51 : vector<16x128xf32>
    %53 = vector.extract_strided_slice %44 {offsets = [0, 0], sizes = [16, 96], strides = [1, 1]} : vector<16x128xf32> to vector<16x96xf32>
    %54 = arith.negf %53 : vector<16x96xf32>
    %55 = math.exp %54 : vector<16x96xf32>
    %cst_41 = arith.constant 1.000000e+00 : f32
    %56 = vector.broadcast %cst_41 : f32 to vector<16x96xf32>
    %57 = arith.addf %56, %55 : vector<16x96xf32>
    %58 = arith.divf %56, %57 : vector<16x96xf32>
    %59 = vector.extract_strided_slice %58 {offsets = [0, 0], sizes = [16, 32], strides = [1, 1]} : vector<16x96xf32> to vector<16x32xf32>
    %60 = vector.extract_strided_slice %58 {offsets = [0, 32], sizes = [16, 32], strides = [1, 1]} : vector<16x96xf32> to vector<16x32xf32>
    %61 = vector.extract_strided_slice %58 {offsets = [0, 64], sizes = [16, 32], strides = [1, 1]} : vector<16x96xf32> to vector<16x32xf32>
    %62 = vector.extract_strided_slice %44 {offsets = [0, 96], sizes = [16, 32], strides = [1, 1]} : vector<16x128xf32> to vector<16x32xf32>
    %63 = math.tanh %62 : vector<16x32xf32>
    %64 = vector.extract_strided_slice %52 {offsets = [0, 0], sizes = [16, 96], strides = [1, 1]} : vector<16x128xf32> to vector<16x96xf32>
    %65 = arith.negf %64 : vector<16x96xf32>
    %66 = math.exp %65 : vector<16x96xf32>
    %cst_42 = arith.constant 1.000000e+00 : f32
    %67 = vector.broadcast %cst_42 : f32 to vector<16x96xf32>
    %68 = arith.addf %67, %66 : vector<16x96xf32>
    %69 = arith.divf %67, %68 : vector<16x96xf32>
    %70 = vector.extract_strided_slice %69 {offsets = [0, 0], sizes = [16, 32], strides = [1, 1]} : vector<16x96xf32> to vector<16x32xf32>
    %71 = vector.extract_strided_slice %69 {offsets = [0, 32], sizes = [16, 32], strides = [1, 1]} : vector<16x96xf32> to vector<16x32xf32>
    %72 = vector.extract_strided_slice %69 {offsets = [0, 64], sizes = [16, 32], strides = [1, 1]} : vector<16x96xf32> to vector<16x32xf32>
    %73 = vector.extract_strided_slice %52 {offsets = [0, 96], sizes = [16, 32], strides = [1, 1]} : vector<16x128xf32> to vector<16x32xf32>
    %74 = math.tanh %73 : vector<16x32xf32>
    %75 = arith.mulf %60, %27 : vector<16x32xf32>
    %76 = arith.mulf %59, %63 : vector<16x32xf32>
    %77 = arith.addf %75, %76 : vector<16x32xf32>
    %78 = math.tanh %77 : vector<16x32xf32>
    %79 = arith.mulf %61, %78 : vector<16x32xf32>
    %80 = arith.mulf %71, %31 : vector<16x32xf32>
    %81 = arith.mulf %70, %74 : vector<16x32xf32>
    %82 = arith.addf %80, %81 : vector<16x32xf32>
    %83 = math.tanh %82 : vector<16x32xf32>
    %84 = arith.mulf %72, %83 : vector<16x32xf32>
    %85 = arith.truncf %79 : vector<16x32xf32> to vector<16x32xbf16>
    %86 = arith.index_cast %33 : i32 to index
    %c0_43 = arith.constant 0 : index
    %87 = vector.load %arg6[%86, %c0_43] : memref<128x32xbf16, #tpu.memory_space<vmem>>, vector<16x32xbf16>
    tpu.vector_store %arg6[%86, %c0_43], %85 {strides = array<i32>} : memref<128x32xbf16, #tpu.memory_space<vmem>>, vector<16x32xbf16>,
    %88 = arith.truncf %84 : vector<16x32xf32> to vector<16x32xbf16>
    %89 = arith.index_cast %36 : i32 to index
    %c0_44 = arith.constant 0 : index
    %90 = vector.load %arg7[%89, %c0_44] : memref<128x32xbf16, #tpu.memory_space<vmem>>, vector<16x32xbf16>
    tpu.vector_store %arg7[%89, %c0_44], %88 {strides = array<i32>} : memref<128x32xbf16, #tpu.memory_space<vmem>>, vector<16x32xbf16>,
    %c1_i32 = arith.constant 1 : i32
    %c16_i32_45 = arith.constant 16 : i32
    %91 = arith.muli %c1_i32, %c16_i32_45 : i32
    %92 = tpu.assume_multiple %91, 16 : i32
    %c7_i32_46 = arith.constant 7 : i32
    %93 = arith.subi %c7_i32_46, %c1_i32 : i32
    %c16_i32_47 = arith.constant 16 : i32
    %94 = arith.muli %93, %c16_i32_47 : i32
    %95 = tpu.assume_multiple %94, 16 : i32
    %96 = arith.index_cast %92 : i32 to index
    %c0_48 = arith.constant 0 : index
    %97 = vector.load %arg8[%96, %c0_48] : memref<128x128xbf16, #tpu.memory_space<vmem>>, vector<16x128xbf16>
    %98 = arith.extf %97 : vector<16x128xbf16> to vector<16x128xf32>
    %99 = vector.broadcast %17 : vector<1x128xf32> to vector<16x128xf32>
    %100 = arith.addf %98, %99 : vector<16x128xf32>
    %101 = arith.truncf %79 : vector<16x32xf32> to vector<16x32xbf16>
    %cst_49 = arith.constant dense<0.000000e+00> : vector<16x128xf32>
    %102 = tpu.matmul %101, %21, %cst_49 {dimension_numbers = #tpu.dot_dimension_numbers<[1], [0], [0], [1], [0, 0, 1, 1], [], []>} : vector<16x32xbf16>, vector<32x128xbf16>, vector<16x128xf32> -> vector<16x128xf32>
    %103 = arith.addf %100, %102 : vector<16x128xf32>
    %104 = arith.index_cast %95 : i32 to index
    %c0_50 = arith.constant 0 : index
    %105 = vector.load %arg9[%104, %c0_50] : memref<128x128xbf16, #tpu.memory_space<vmem>>, vector<16x128xbf16>
    %106 = arith.extf %105 : vector<16x128xbf16> to vector<16x128xf32>
    %107 = vector.broadcast %19 : vector<1x128xf32> to vector<16x128xf32>
    %108 = arith.addf %106, %107 : vector<16x128xf32>
    %109 = arith.truncf %84 : vector<16x32xf32> to vector<16x32xbf16>
    %cst_51 = arith.constant dense<0.000000e+00> : vector<16x128xf32>
    %110 = tpu.matmul %109, %23, %cst_51 {dimension_numbers = #tpu.dot_dimension_numbers<[1], [0], [0], [1], [0, 0, 1, 1], [], []>} : vector<16x32xbf16>, vector<32x128xbf16>, vector<16x128xf32> -> vector<16x128xf32>
    %111 = arith.addf %108, %110 : vector<16x128xf32>
    %112 = vector.extract_strided_slice %103 {offsets = [0, 0], sizes = [16, 96], strides = [1, 1]} : vector<16x128xf32> to vector<16x96xf32>
    %113 = arith.negf %112 : vector<16x96xf32>
    %114 = math.exp %113 : vector<16x96xf32>
    %cst_52 = arith.constant 1.000000e+00 : f32
    %115 = vector.broadcast %cst_52 : f32 to vector<16x96xf32>
    %116 = arith.addf %115, %114 : vector<16x96xf32>
    %117 = arith.divf %115, %116 : vector<16x96xf32>
    %118 = vector.extract_strided_slice %117 {offsets = [0, 0], sizes = [16, 32], strides = [1, 1]} : vector<16x96xf32> to vector<16x32xf32>
    %119 = vector.extract_strided_slice %117 {offsets = [0, 32], sizes = [16, 32], strides = [1, 1]} : vector<16x96xf32> to vector<16x32xf32>
    %120 = vector.extract_strided_slice %117 {offsets = [0, 64], sizes = [16, 32], strides = [1, 1]} : vector<16x96xf32> to vector<16x32xf32>
    %121 = vector.extract_strided_slice %103 {offsets = [0, 96], sizes = [16, 32], strides = [1, 1]} : vector<16x128xf32> to vector<16x32xf32>
    %122 = math.tanh %121 : vector<16x32xf32>
    %123 = vector.extract_strided_slice %111 {offsets = [0, 0], sizes = [16, 96], strides = [1, 1]} : vector<16x128xf32> to vector<16x96xf32>
    %124 = arith.negf %123 : vector<16x96xf32>
    %125 = math.exp %124 : vector<16x96xf32>
    %cst_53 = arith.constant 1.000000e+00 : f32
    %126 = vector.broadcast %cst_53 : f32 to vector<16x96xf32>
    %127 = arith.addf %126, %125 : vector<16x96xf32>
    %128 = arith.divf %126, %127 : vector<16x96xf32>
    %129 = vector.extract_strided_slice %128 {offsets = [0, 0], sizes = [16, 32], strides = [1, 1]} : vector<16x96xf32> to vector<16x32xf32>
    %130 = vector.extract_strided_slice %128 {offsets = [0, 32], sizes = [16, 32], strides = [1, 1]} : vector<16x96xf32> to vector<16x32xf32>
    %131 = vector.extract_strided_slice %128 {offsets = [0, 64], sizes = [16, 32], strides = [1, 1]} : vector<16x96xf32> to vector<16x32xf32>
    %132 = vector.extract_strided_slice %111 {offsets = [0, 96], sizes = [16, 32], strides = [1, 1]} : vector<16x128xf32> to vector<16x32xf32>
    %133 = math.tanh %132 : vector<16x32xf32>
    %134 = arith.mulf %119, %77 : vector<16x32xf32>
    %135 = arith.mulf %118, %122 : vector<16x32xf32>
    %136 = arith.addf %134, %135 : vector<16x32xf32>
    %137 = math.tanh %136 : vector<16x32xf32>
    %138 = arith.mulf %120, %137 : vector<16x32xf32>
    %139 = arith.mulf %130, %82 : vector<16x32xf32>
    %140 = arith.mulf %129, %133 : vector<16x32xf32>
    %141 = arith.addf %139, %140 : vector<16x32xf32>
    %142 = math.tanh %141 : vector<16x32xf32>
    %143 = arith.mulf %131, %142 : vector<16x32xf32>
    %144 = arith.truncf %138 : vector<16x32xf32> to vector<16x32xbf16>
    %145 = arith.index_cast %92 : i32 to index
    %c0_54 = arith.constant 0 : index
    %146 = vector.load %arg6[%145, %c0_54] : memref<128x32xbf16, #tpu.memory_space<vmem>>, vector<16x32xbf16>
    tpu.vector_store %arg6[%145, %c0_54], %144 {strides = array<i32>} : memref<128x32xbf16, #tpu.memory_space<vmem>>, vector<16x32xbf16>,
    %147 = arith.truncf %143 : vector<16x32xf32> to vector<16x32xbf16>
    %148 = arith.index_cast %95 : i32 to index
    %c0_55 = arith.constant 0 : index
    %149 = vector.load %arg7[%148, %c0_55] : memref<128x32xbf16, #tpu.memory_space<vmem>>, vector<16x32xbf16>
    tpu.vector_store %arg7[%148, %c0_55], %147 {strides = array<i32>} : memref<128x32xbf16, #tpu.memory_space<vmem>>, vector<16x32xbf16>,
    %c2_i32 = arith.constant 2 : i32
    %c16_i32_56 = arith.constant 16 : i32
    %150 = arith.muli %c2_i32, %c16_i32_56 : i32
    %151 = tpu.assume_multiple %150, 16 : i32
    %c7_i32_57 = arith.constant 7 : i32
    %152 = arith.subi %c7_i32_57, %c2_i32 : i32
    %c16_i32_58 = arith.constant 16 : i32
    %153 = arith.muli %152, %c16_i32_58 : i32
    %154 = tpu.assume_multiple %153, 16 : i32
    %155 = arith.index_cast %151 : i32 to index
    %c0_59 = arith.constant 0 : index
    %156 = vector.load %arg8[%155, %c0_59] : memref<128x128xbf16, #tpu.memory_space<vmem>>, vector<16x128xbf16>
    %157 = arith.extf %156 : vector<16x128xbf16> to vector<16x128xf32>
    %158 = vector.broadcast %17 : vector<1x128xf32> to vector<16x128xf32>
    %159 = arith.addf %157, %158 : vector<16x128xf32>
    %160 = arith.truncf %138 : vector<16x32xf32> to vector<16x32xbf16>
    %cst_60 = arith.constant dense<0.000000e+00> : vector<16x128xf32>
    %161 = tpu.matmul %160, %21, %cst_60 {dimension_numbers = #tpu.dot_dimension_numbers<[1], [0], [0], [1], [0, 0, 1, 1], [], []>} : vector<16x32xbf16>, vector<32x128xbf16>, vector<16x128xf32> -> vector<16x128xf32>
    %162 = arith.addf %159, %161 : vector<16x128xf32>
    %163 = arith.index_cast %154 : i32 to index
    %c0_61 = arith.constant 0 : index
    %164 = vector.load %arg9[%163, %c0_61] : memref<128x128xbf16, #tpu.memory_space<vmem>>, vector<16x128xbf16>
    %165 = arith.extf %164 : vector<16x128xbf16> to vector<16x128xf32>
    %166 = vector.broadcast %19 : vector<1x128xf32> to vector<16x128xf32>
    %167 = arith.addf %165, %166 : vector<16x128xf32>
    %168 = arith.truncf %143 : vector<16x32xf32> to vector<16x32xbf16>
    %cst_62 = arith.constant dense<0.000000e+00> : vector<16x128xf32>
    %169 = tpu.matmul %168, %23, %cst_62 {dimension_numbers = #tpu.dot_dimension_numbers<[1], [0], [0], [1], [0, 0, 1, 1], [], []>} : vector<16x32xbf16>, vector<32x128xbf16>, vector<16x128xf32> -> vector<16x128xf32>
    %170 = arith.addf %167, %169 : vector<16x128xf32>
    %171 = vector.extract_strided_slice %162 {offsets = [0, 0], sizes = [16, 96], strides = [1, 1]} : vector<16x128xf32> to vector<16x96xf32>
    %172 = arith.negf %171 : vector<16x96xf32>
    %173 = math.exp %172 : vector<16x96xf32>
    %cst_63 = arith.constant 1.000000e+00 : f32
    %174 = vector.broadcast %cst_63 : f32 to vector<16x96xf32>
    %175 = arith.addf %174, %173 : vector<16x96xf32>
    %176 = arith.divf %174, %175 : vector<16x96xf32>
    %177 = vector.extract_strided_slice %176 {offsets = [0, 0], sizes = [16, 32], strides = [1, 1]} : vector<16x96xf32> to vector<16x32xf32>
    %178 = vector.extract_strided_slice %176 {offsets = [0, 32], sizes = [16, 32], strides = [1, 1]} : vector<16x96xf32> to vector<16x32xf32>
    %179 = vector.extract_strided_slice %176 {offsets = [0, 64], sizes = [16, 32], strides = [1, 1]} : vector<16x96xf32> to vector<16x32xf32>
    %180 = vector.extract_strided_slice %162 {offsets = [0, 96], sizes = [16, 32], strides = [1, 1]} : vector<16x128xf32> to vector<16x32xf32>
    %181 = math.tanh %180 : vector<16x32xf32>
    %182 = vector.extract_strided_slice %170 {offsets = [0, 0], sizes = [16, 96], strides = [1, 1]} : vector<16x128xf32> to vector<16x96xf32>
    %183 = arith.negf %182 : vector<16x96xf32>
    %184 = math.exp %183 : vector<16x96xf32>
    %cst_64 = arith.constant 1.000000e+00 : f32
    %185 = vector.broadcast %cst_64 : f32 to vector<16x96xf32>
    %186 = arith.addf %185, %184 : vector<16x96xf32>
    %187 = arith.divf %185, %186 : vector<16x96xf32>
    %188 = vector.extract_strided_slice %187 {offsets = [0, 0], sizes = [16, 32], strides = [1, 1]} : vector<16x96xf32> to vector<16x32xf32>
    %189 = vector.extract_strided_slice %187 {offsets = [0, 32], sizes = [16, 32], strides = [1, 1]} : vector<16x96xf32> to vector<16x32xf32>
    %190 = vector.extract_strided_slice %187 {offsets = [0, 64], sizes = [16, 32], strides = [1, 1]} : vector<16x96xf32> to vector<16x32xf32>
    %191 = vector.extract_strided_slice %170 {offsets = [0, 96], sizes = [16, 32], strides = [1, 1]} : vector<16x128xf32> to vector<16x32xf32>
    %192 = math.tanh %191 : vector<16x32xf32>
    %193 = arith.mulf %178, %136 : vector<16x32xf32>
    %194 = arith.mulf %177, %181 : vector<16x32xf32>
    %195 = arith.addf %193, %194 : vector<16x32xf32>
    %196 = math.tanh %195 : vector<16x32xf32>
    %197 = arith.mulf %179, %196 : vector<16x32xf32>
    %198 = arith.mulf %189, %141 : vector<16x32xf32>
    %199 = arith.mulf %188, %192 : vector<16x32xf32>
    %200 = arith.addf %198, %199 : vector<16x32xf32>
    %201 = math.tanh %200 : vector<16x32xf32>
    %202 = arith.mulf %190, %201 : vector<16x32xf32>
    %203 = arith.truncf %197 : vector<16x32xf32> to vector<16x32xbf16>
    %204 = arith.index_cast %151 : i32 to index
    %c0_65 = arith.constant 0 : index
    %205 = vector.load %arg6[%204, %c0_65] : memref<128x32xbf16, #tpu.memory_space<vmem>>, vector<16x32xbf16>
    tpu.vector_store %arg6[%204, %c0_65], %203 {strides = array<i32>} : memref<128x32xbf16, #tpu.memory_space<vmem>>, vector<16x32xbf16>,
    %206 = arith.truncf %202 : vector<16x32xf32> to vector<16x32xbf16>
    %207 = arith.index_cast %154 : i32 to index
    %c0_66 = arith.constant 0 : index
    %208 = vector.load %arg7[%207, %c0_66] : memref<128x32xbf16, #tpu.memory_space<vmem>>, vector<16x32xbf16>
    tpu.vector_store %arg7[%207, %c0_66], %206 {strides = array<i32>} : memref<128x32xbf16, #tpu.memory_space<vmem>>, vector<16x32xbf16>,
    %c3_i32 = arith.constant 3 : i32
    %c16_i32_67 = arith.constant 16 : i32
    %209 = arith.muli %c3_i32, %c16_i32_67 : i32
    %210 = tpu.assume_multiple %209, 16 : i32
    %c7_i32_68 = arith.constant 7 : i32
    %211 = arith.subi %c7_i32_68, %c3_i32 : i32
    %c16_i32_69 = arith.constant 16 : i32
    %212 = arith.muli %211, %c16_i32_69 : i32
    %213 = tpu.assume_multiple %212, 16 : i32
    %214 = arith.index_cast %210 : i32 to index
    %c0_70 = arith.constant 0 : index
    %215 = vector.load %arg8[%214, %c0_70] : memref<128x128xbf16, #tpu.memory_space<vmem>>, vector<16x128xbf16>
    %216 = arith.extf %215 : vector<16x128xbf16> to vector<16x128xf32>
    %217 = vector.broadcast %17 : vector<1x128xf32> to vector<16x128xf32>
    %218 = arith.addf %216, %217 : vector<16x128xf32>
    %219 = arith.truncf %197 : vector<16x32xf32> to vector<16x32xbf16>
    %cst_71 = arith.constant dense<0.000000e+00> : vector<16x128xf32>
    %220 = tpu.matmul %219, %21, %cst_71 {dimension_numbers = #tpu.dot_dimension_numbers<[1], [0], [0], [1], [0, 0, 1, 1], [], []>} : vector<16x32xbf16>, vector<32x128xbf16>, vector<16x128xf32> -> vector<16x128xf32>
    %221 = arith.addf %218, %220 : vector<16x128xf32>
    %222 = arith.index_cast %213 : i32 to index
    %c0_72 = arith.constant 0 : index
    %223 = vector.load %arg9[%222, %c0_72] : memref<128x128xbf16, #tpu.memory_space<vmem>>, vector<16x128xbf16>
    %224 = arith.extf %223 : vector<16x128xbf16> to vector<16x128xf32>
    %225 = vector.broadcast %19 : vector<1x128xf32> to vector<16x128xf32>
    %226 = arith.addf %224, %225 : vector<16x128xf32>
    %227 = arith.truncf %202 : vector<16x32xf32> to vector<16x32xbf16>
    %cst_73 = arith.constant dense<0.000000e+00> : vector<16x128xf32>
    %228 = tpu.matmul %227, %23, %cst_73 {dimension_numbers = #tpu.dot_dimension_numbers<[1], [0], [0], [1], [0, 0, 1, 1], [], []>} : vector<16x32xbf16>, vector<32x128xbf16>, vector<16x128xf32> -> vector<16x128xf32>
    %229 = arith.addf %226, %228 : vector<16x128xf32>
    %230 = vector.extract_strided_slice %221 {offsets = [0, 0], sizes = [16, 96], strides = [1, 1]} : vector<16x128xf32> to vector<16x96xf32>
    %231 = arith.negf %230 : vector<16x96xf32>
    %232 = math.exp %231 : vector<16x96xf32>
    %cst_74 = arith.constant 1.000000e+00 : f32
    %233 = vector.broadcast %cst_74 : f32 to vector<16x96xf32>
    %234 = arith.addf %233, %232 : vector<16x96xf32>
    %235 = arith.divf %233, %234 : vector<16x96xf32>
    %236 = vector.extract_strided_slice %235 {offsets = [0, 0], sizes = [16, 32], strides = [1, 1]} : vector<16x96xf32> to vector<16x32xf32>
    %237 = vector.extract_strided_slice %235 {offsets = [0, 32], sizes = [16, 32], strides = [1, 1]} : vector<16x96xf32> to vector<16x32xf32>
    %238 = vector.extract_strided_slice %235 {offsets = [0, 64], sizes = [16, 32], strides = [1, 1]} : vector<16x96xf32> to vector<16x32xf32>
    %239 = vector.extract_strided_slice %221 {offsets = [0, 96], sizes = [16, 32], strides = [1, 1]} : vector<16x128xf32> to vector<16x32xf32>
    %240 = math.tanh %239 : vector<16x32xf32>
    %241 = vector.extract_strided_slice %229 {offsets = [0, 0], sizes = [16, 96], strides = [1, 1]} : vector<16x128xf32> to vector<16x96xf32>
    %242 = arith.negf %241 : vector<16x96xf32>
    %243 = math.exp %242 : vector<16x96xf32>
    %cst_75 = arith.constant 1.000000e+00 : f32
    %244 = vector.broadcast %cst_75 : f32 to vector<16x96xf32>
    %245 = arith.addf %244, %243 : vector<16x96xf32>
    %246 = arith.divf %244, %245 : vector<16x96xf32>
    %247 = vector.extract_strided_slice %246 {offsets = [0, 0], sizes = [16, 32], strides = [1, 1]} : vector<16x96xf32> to vector<16x32xf32>
    %248 = vector.extract_strided_slice %246 {offsets = [0, 32], sizes = [16, 32], strides = [1, 1]} : vector<16x96xf32> to vector<16x32xf32>
    %249 = vector.extract_strided_slice %246 {offsets = [0, 64], sizes = [16, 32], strides = [1, 1]} : vector<16x96xf32> to vector<16x32xf32>
    %250 = vector.extract_strided_slice %229 {offsets = [0, 96], sizes = [16, 32], strides = [1, 1]} : vector<16x128xf32> to vector<16x32xf32>
    %251 = math.tanh %250 : vector<16x32xf32>
    %252 = arith.mulf %237, %195 : vector<16x32xf32>
    %253 = arith.mulf %236, %240 : vector<16x32xf32>
    %254 = arith.addf %252, %253 : vector<16x32xf32>
    %255 = math.tanh %254 : vector<16x32xf32>
    %256 = arith.mulf %238, %255 : vector<16x32xf32>
    %257 = arith.mulf %248, %200 : vector<16x32xf32>
    %258 = arith.mulf %247, %251 : vector<16x32xf32>
    %259 = arith.addf %257, %258 : vector<16x32xf32>
    %260 = math.tanh %259 : vector<16x32xf32>
    %261 = arith.mulf %249, %260 : vector<16x32xf32>
    %262 = arith.truncf %256 : vector<16x32xf32> to vector<16x32xbf16>
    %263 = arith.index_cast %210 : i32 to index
    %c0_76 = arith.constant 0 : index
    %264 = vector.load %arg6[%263, %c0_76] : memref<128x32xbf16, #tpu.memory_space<vmem>>, vector<16x32xbf16>
    tpu.vector_store %arg6[%263, %c0_76], %262 {strides = array<i32>} : memref<128x32xbf16, #tpu.memory_space<vmem>>, vector<16x32xbf16>,
    %265 = arith.truncf %261 : vector<16x32xf32> to vector<16x32xbf16>
    %266 = arith.index_cast %213 : i32 to index
    %c0_77 = arith.constant 0 : index
    %267 = vector.load %arg7[%266, %c0_77] : memref<128x32xbf16, #tpu.memory_space<vmem>>, vector<16x32xbf16>
    tpu.vector_store %arg7[%266, %c0_77], %265 {strides = array<i32>} : memref<128x32xbf16, #tpu.memory_space<vmem>>, vector<16x32xbf16>,
    %c4_i32 = arith.constant 4 : i32
    %c16_i32_78 = arith.constant 16 : i32
    %268 = arith.muli %c4_i32, %c16_i32_78 : i32
    %269 = tpu.assume_multiple %268, 16 : i32
    %c7_i32_79 = arith.constant 7 : i32
    %270 = arith.subi %c7_i32_79, %c4_i32 : i32
    %c16_i32_80 = arith.constant 16 : i32
    %271 = arith.muli %270, %c16_i32_80 : i32
    %272 = tpu.assume_multiple %271, 16 : i32
    %273 = arith.index_cast %269 : i32 to index
    %c0_81 = arith.constant 0 : index
    %274 = vector.load %arg8[%273, %c0_81] : memref<128x128xbf16, #tpu.memory_space<vmem>>, vector<16x128xbf16>
    %275 = arith.extf %274 : vector<16x128xbf16> to vector<16x128xf32>
    %276 = vector.broadcast %17 : vector<1x128xf32> to vector<16x128xf32>
    %277 = arith.addf %275, %276 : vector<16x128xf32>
    %278 = arith.truncf %256 : vector<16x32xf32> to vector<16x32xbf16>
    %cst_82 = arith.constant dense<0.000000e+00> : vector<16x128xf32>
    %279 = tpu.matmul %278, %21, %cst_82 {dimension_numbers = #tpu.dot_dimension_numbers<[1], [0], [0], [1], [0, 0, 1, 1], [], []>} : vector<16x32xbf16>, vector<32x128xbf16>, vector<16x128xf32> -> vector<16x128xf32>
    %280 = arith.addf %277, %279 : vector<16x128xf32>
    %281 = arith.index_cast %272 : i32 to index
    %c0_83 = arith.constant 0 : index
    %282 = vector.load %arg9[%281, %c0_83] : memref<128x128xbf16, #tpu.memory_space<vmem>>, vector<16x128xbf16>
    %283 = arith.extf %282 : vector<16x128xbf16> to vector<16x128xf32>
    %284 = vector.broadcast %19 : vector<1x128xf32> to vector<16x128xf32>
    %285 = arith.addf %283, %284 : vector<16x128xf32>
    %286 = arith.truncf %261 : vector<16x32xf32> to vector<16x32xbf16>
    %cst_84 = arith.constant dense<0.000000e+00> : vector<16x128xf32>
    %287 = tpu.matmul %286, %23, %cst_84 {dimension_numbers = #tpu.dot_dimension_numbers<[1], [0], [0], [1], [0, 0, 1, 1], [], []>} : vector<16x32xbf16>, vector<32x128xbf16>, vector<16x128xf32> -> vector<16x128xf32>
    %288 = arith.addf %285, %287 : vector<16x128xf32>
    %289 = vector.extract_strided_slice %280 {offsets = [0, 0], sizes = [16, 96], strides = [1, 1]} : vector<16x128xf32> to vector<16x96xf32>
    %290 = arith.negf %289 : vector<16x96xf32>
    %291 = math.exp %290 : vector<16x96xf32>
    %cst_85 = arith.constant 1.000000e+00 : f32
    %292 = vector.broadcast %cst_85 : f32 to vector<16x96xf32>
    %293 = arith.addf %292, %291 : vector<16x96xf32>
    %294 = arith.divf %292, %293 : vector<16x96xf32>
    %295 = vector.extract_strided_slice %294 {offsets = [0, 0], sizes = [16, 32], strides = [1, 1]} : vector<16x96xf32> to vector<16x32xf32>
    %296 = vector.extract_strided_slice %294 {offsets = [0, 32], sizes = [16, 32], strides = [1, 1]} : vector<16x96xf32> to vector<16x32xf32>
    %297 = vector.extract_strided_slice %294 {offsets = [0, 64], sizes = [16, 32], strides = [1, 1]} : vector<16x96xf32> to vector<16x32xf32>
    %298 = vector.extract_strided_slice %280 {offsets = [0, 96], sizes = [16, 32], strides = [1, 1]} : vector<16x128xf32> to vector<16x32xf32>
    %299 = math.tanh %298 : vector<16x32xf32>
    %300 = vector.extract_strided_slice %288 {offsets = [0, 0], sizes = [16, 96], strides = [1, 1]} : vector<16x128xf32> to vector<16x96xf32>
    %301 = arith.negf %300 : vector<16x96xf32>
    %302 = math.exp %301 : vector<16x96xf32>
    %cst_86 = arith.constant 1.000000e+00 : f32
    %303 = vector.broadcast %cst_86 : f32 to vector<16x96xf32>
    %304 = arith.addf %303, %302 : vector<16x96xf32>
    %305 = arith.divf %303, %304 : vector<16x96xf32>
    %306 = vector.extract_strided_slice %305 {offsets = [0, 0], sizes = [16, 32], strides = [1, 1]} : vector<16x96xf32> to vector<16x32xf32>
    %307 = vector.extract_strided_slice %305 {offsets = [0, 32], sizes = [16, 32], strides = [1, 1]} : vector<16x96xf32> to vector<16x32xf32>
    %308 = vector.extract_strided_slice %305 {offsets = [0, 64], sizes = [16, 32], strides = [1, 1]} : vector<16x96xf32> to vector<16x32xf32>
    %309 = vector.extract_strided_slice %288 {offsets = [0, 96], sizes = [16, 32], strides = [1, 1]} : vector<16x128xf32> to vector<16x32xf32>
    %310 = math.tanh %309 : vector<16x32xf32>
    %311 = arith.mulf %296, %254 : vector<16x32xf32>
    %312 = arith.mulf %295, %299 : vector<16x32xf32>
    %313 = arith.addf %311, %312 : vector<16x32xf32>
    %314 = math.tanh %313 : vector<16x32xf32>
    %315 = arith.mulf %297, %314 : vector<16x32xf32>
    %316 = arith.mulf %307, %259 : vector<16x32xf32>
    %317 = arith.mulf %306, %310 : vector<16x32xf32>
    %318 = arith.addf %316, %317 : vector<16x32xf32>
    %319 = math.tanh %318 : vector<16x32xf32>
    %320 = arith.mulf %308, %319 : vector<16x32xf32>
    %321 = arith.truncf %315 : vector<16x32xf32> to vector<16x32xbf16>
    %322 = arith.index_cast %269 : i32 to index
    %c0_87 = arith.constant 0 : index
    %323 = vector.load %arg6[%322, %c0_87] : memref<128x32xbf16, #tpu.memory_space<vmem>>, vector<16x32xbf16>
    tpu.vector_store %arg6[%322, %c0_87], %321 {strides = array<i32>} : memref<128x32xbf16, #tpu.memory_space<vmem>>, vector<16x32xbf16>,
    %324 = arith.truncf %320 : vector<16x32xf32> to vector<16x32xbf16>
    %325 = arith.index_cast %272 : i32 to index
    %c0_88 = arith.constant 0 : index
    %326 = vector.load %arg7[%325, %c0_88] : memref<128x32xbf16, #tpu.memory_space<vmem>>, vector<16x32xbf16>
    tpu.vector_store %arg7[%325, %c0_88], %324 {strides = array<i32>} : memref<128x32xbf16, #tpu.memory_space<vmem>>, vector<16x32xbf16>,
    %c5_i32 = arith.constant 5 : i32
    %c16_i32_89 = arith.constant 16 : i32
    %327 = arith.muli %c5_i32, %c16_i32_89 : i32
    %328 = tpu.assume_multiple %327, 16 : i32
    %c7_i32_90 = arith.constant 7 : i32
    %329 = arith.subi %c7_i32_90, %c5_i32 : i32
    %c16_i32_91 = arith.constant 16 : i32
    %330 = arith.muli %329, %c16_i32_91 : i32
    %331 = tpu.assume_multiple %330, 16 : i32
    %332 = arith.index_cast %328 : i32 to index
    %c0_92 = arith.constant 0 : index
    %333 = vector.load %arg8[%332, %c0_92] : memref<128x128xbf16, #tpu.memory_space<vmem>>, vector<16x128xbf16>
    %334 = arith.extf %333 : vector<16x128xbf16> to vector<16x128xf32>
    %335 = vector.broadcast %17 : vector<1x128xf32> to vector<16x128xf32>
    %336 = arith.addf %334, %335 : vector<16x128xf32>
    %337 = arith.truncf %315 : vector<16x32xf32> to vector<16x32xbf16>
    %cst_93 = arith.constant dense<0.000000e+00> : vector<16x128xf32>
    %338 = tpu.matmul %337, %21, %cst_93 {dimension_numbers = #tpu.dot_dimension_numbers<[1], [0], [0], [1], [0, 0, 1, 1], [], []>} : vector<16x32xbf16>, vector<32x128xbf16>, vector<16x128xf32> -> vector<16x128xf32>
    %339 = arith.addf %336, %338 : vector<16x128xf32>
    %340 = arith.index_cast %331 : i32 to index
    %c0_94 = arith.constant 0 : index
    %341 = vector.load %arg9[%340, %c0_94] : memref<128x128xbf16, #tpu.memory_space<vmem>>, vector<16x128xbf16>
    %342 = arith.extf %341 : vector<16x128xbf16> to vector<16x128xf32>
    %343 = vector.broadcast %19 : vector<1x128xf32> to vector<16x128xf32>
    %344 = arith.addf %342, %343 : vector<16x128xf32>
    %345 = arith.truncf %320 : vector<16x32xf32> to vector<16x32xbf16>
    %cst_95 = arith.constant dense<0.000000e+00> : vector<16x128xf32>
    %346 = tpu.matmul %345, %23, %cst_95 {dimension_numbers = #tpu.dot_dimension_numbers<[1], [0], [0], [1], [0, 0, 1, 1], [], []>} : vector<16x32xbf16>, vector<32x128xbf16>, vector<16x128xf32> -> vector<16x128xf32>
    %347 = arith.addf %344, %346 : vector<16x128xf32>
    %348 = vector.extract_strided_slice %339 {offsets = [0, 0], sizes = [16, 96], strides = [1, 1]} : vector<16x128xf32> to vector<16x96xf32>
    %349 = arith.negf %348 : vector<16x96xf32>
    %350 = math.exp %349 : vector<16x96xf32>
    %cst_96 = arith.constant 1.000000e+00 : f32
    %351 = vector.broadcast %cst_96 : f32 to vector<16x96xf32>
    %352 = arith.addf %351, %350 : vector<16x96xf32>
    %353 = arith.divf %351, %352 : vector<16x96xf32>
    %354 = vector.extract_strided_slice %353 {offsets = [0, 0], sizes = [16, 32], strides = [1, 1]} : vector<16x96xf32> to vector<16x32xf32>
    %355 = vector.extract_strided_slice %353 {offsets = [0, 32], sizes = [16, 32], strides = [1, 1]} : vector<16x96xf32> to vector<16x32xf32>
    %356 = vector.extract_strided_slice %353 {offsets = [0, 64], sizes = [16, 32], strides = [1, 1]} : vector<16x96xf32> to vector<16x32xf32>
    %357 = vector.extract_strided_slice %339 {offsets = [0, 96], sizes = [16, 32], strides = [1, 1]} : vector<16x128xf32> to vector<16x32xf32>
    %358 = math.tanh %357 : vector<16x32xf32>
    %359 = vector.extract_strided_slice %347 {offsets = [0, 0], sizes = [16, 96], strides = [1, 1]} : vector<16x128xf32> to vector<16x96xf32>
    %360 = arith.negf %359 : vector<16x96xf32>
    %361 = math.exp %360 : vector<16x96xf32>
    %cst_97 = arith.constant 1.000000e+00 : f32
    %362 = vector.broadcast %cst_97 : f32 to vector<16x96xf32>
    %363 = arith.addf %362, %361 : vector<16x96xf32>
    %364 = arith.divf %362, %363 : vector<16x96xf32>
    %365 = vector.extract_strided_slice %364 {offsets = [0, 0], sizes = [16, 32], strides = [1, 1]} : vector<16x96xf32> to vector<16x32xf32>
    %366 = vector.extract_strided_slice %364 {offsets = [0, 32], sizes = [16, 32], strides = [1, 1]} : vector<16x96xf32> to vector<16x32xf32>
    %367 = vector.extract_strided_slice %364 {offsets = [0, 64], sizes = [16, 32], strides = [1, 1]} : vector<16x96xf32> to vector<16x32xf32>
    %368 = vector.extract_strided_slice %347 {offsets = [0, 96], sizes = [16, 32], strides = [1, 1]} : vector<16x128xf32> to vector<16x32xf32>
    %369 = math.tanh %368 : vector<16x32xf32>
    %370 = arith.mulf %355, %313 : vector<16x32xf32>
    %371 = arith.mulf %354, %358 : vector<16x32xf32>
    %372 = arith.addf %370, %371 : vector<16x32xf32>
    %373 = math.tanh %372 : vector<16x32xf32>
    %374 = arith.mulf %356, %373 : vector<16x32xf32>
    %375 = arith.mulf %366, %318 : vector<16x32xf32>
    %376 = arith.mulf %365, %369 : vector<16x32xf32>
    %377 = arith.addf %375, %376 : vector<16x32xf32>
    %378 = math.tanh %377 : vector<16x32xf32>
    %379 = arith.mulf %367, %378 : vector<16x32xf32>
    %380 = arith.truncf %374 : vector<16x32xf32> to vector<16x32xbf16>
    %381 = arith.index_cast %328 : i32 to index
    %c0_98 = arith.constant 0 : index
    %382 = vector.load %arg6[%381, %c0_98] : memref<128x32xbf16, #tpu.memory_space<vmem>>, vector<16x32xbf16>
    tpu.vector_store %arg6[%381, %c0_98], %380 {strides = array<i32>} : memref<128x32xbf16, #tpu.memory_space<vmem>>, vector<16x32xbf16>,
    %383 = arith.truncf %379 : vector<16x32xf32> to vector<16x32xbf16>
    %384 = arith.index_cast %331 : i32 to index
    %c0_99 = arith.constant 0 : index
    %385 = vector.load %arg7[%384, %c0_99] : memref<128x32xbf16, #tpu.memory_space<vmem>>, vector<16x32xbf16>
    tpu.vector_store %arg7[%384, %c0_99], %383 {strides = array<i32>} : memref<128x32xbf16, #tpu.memory_space<vmem>>, vector<16x32xbf16>,
    %c6_i32 = arith.constant 6 : i32
    %c16_i32_100 = arith.constant 16 : i32
    %386 = arith.muli %c6_i32, %c16_i32_100 : i32
    %387 = tpu.assume_multiple %386, 16 : i32
    %c7_i32_101 = arith.constant 7 : i32
    %388 = arith.subi %c7_i32_101, %c6_i32 : i32
    %c16_i32_102 = arith.constant 16 : i32
    %389 = arith.muli %388, %c16_i32_102 : i32
    %390 = tpu.assume_multiple %389, 16 : i32
    %391 = arith.index_cast %387 : i32 to index
    %c0_103 = arith.constant 0 : index
    %392 = vector.load %arg8[%391, %c0_103] : memref<128x128xbf16, #tpu.memory_space<vmem>>, vector<16x128xbf16>
    %393 = arith.extf %392 : vector<16x128xbf16> to vector<16x128xf32>
    %394 = vector.broadcast %17 : vector<1x128xf32> to vector<16x128xf32>
    %395 = arith.addf %393, %394 : vector<16x128xf32>
    %396 = arith.truncf %374 : vector<16x32xf32> to vector<16x32xbf16>
    %cst_104 = arith.constant dense<0.000000e+00> : vector<16x128xf32>
    %397 = tpu.matmul %396, %21, %cst_104 {dimension_numbers = #tpu.dot_dimension_numbers<[1], [0], [0], [1], [0, 0, 1, 1], [], []>} : vector<16x32xbf16>, vector<32x128xbf16>, vector<16x128xf32> -> vector<16x128xf32>
    %398 = arith.addf %395, %397 : vector<16x128xf32>
    %399 = arith.index_cast %390 : i32 to index
    %c0_105 = arith.constant 0 : index
    %400 = vector.load %arg9[%399, %c0_105] : memref<128x128xbf16, #tpu.memory_space<vmem>>, vector<16x128xbf16>
    %401 = arith.extf %400 : vector<16x128xbf16> to vector<16x128xf32>
    %402 = vector.broadcast %19 : vector<1x128xf32> to vector<16x128xf32>
    %403 = arith.addf %401, %402 : vector<16x128xf32>
    %404 = arith.truncf %379 : vector<16x32xf32> to vector<16x32xbf16>
    %cst_106 = arith.constant dense<0.000000e+00> : vector<16x128xf32>
    %405 = tpu.matmul %404, %23, %cst_106 {dimension_numbers = #tpu.dot_dimension_numbers<[1], [0], [0], [1], [0, 0, 1, 1], [], []>} : vector<16x32xbf16>, vector<32x128xbf16>, vector<16x128xf32> -> vector<16x128xf32>
    %406 = arith.addf %403, %405 : vector<16x128xf32>
    %407 = vector.extract_strided_slice %398 {offsets = [0, 0], sizes = [16, 96], strides = [1, 1]} : vector<16x128xf32> to vector<16x96xf32>
    %408 = arith.negf %407 : vector<16x96xf32>
    %409 = math.exp %408 : vector<16x96xf32>
    %cst_107 = arith.constant 1.000000e+00 : f32
    %410 = vector.broadcast %cst_107 : f32 to vector<16x96xf32>
    %411 = arith.addf %410, %409 : vector<16x96xf32>
    %412 = arith.divf %410, %411 : vector<16x96xf32>
    %413 = vector.extract_strided_slice %412 {offsets = [0, 0], sizes = [16, 32], strides = [1, 1]} : vector<16x96xf32> to vector<16x32xf32>
    %414 = vector.extract_strided_slice %412 {offsets = [0, 32], sizes = [16, 32], strides = [1, 1]} : vector<16x96xf32> to vector<16x32xf32>
    %415 = vector.extract_strided_slice %412 {offsets = [0, 64], sizes = [16, 32], strides = [1, 1]} : vector<16x96xf32> to vector<16x32xf32>
    %416 = vector.extract_strided_slice %398 {offsets = [0, 96], sizes = [16, 32], strides = [1, 1]} : vector<16x128xf32> to vector<16x32xf32>
    %417 = math.tanh %416 : vector<16x32xf32>
    %418 = vector.extract_strided_slice %406 {offsets = [0, 0], sizes = [16, 96], strides = [1, 1]} : vector<16x128xf32> to vector<16x96xf32>
    %419 = arith.negf %418 : vector<16x96xf32>
    %420 = math.exp %419 : vector<16x96xf32>
    %cst_108 = arith.constant 1.000000e+00 : f32
    %421 = vector.broadcast %cst_108 : f32 to vector<16x96xf32>
    %422 = arith.addf %421, %420 : vector<16x96xf32>
    %423 = arith.divf %421, %422 : vector<16x96xf32>
    %424 = vector.extract_strided_slice %423 {offsets = [0, 0], sizes = [16, 32], strides = [1, 1]} : vector<16x96xf32> to vector<16x32xf32>
    %425 = vector.extract_strided_slice %423 {offsets = [0, 32], sizes = [16, 32], strides = [1, 1]} : vector<16x96xf32> to vector<16x32xf32>
    %426 = vector.extract_strided_slice %423 {offsets = [0, 64], sizes = [16, 32], strides = [1, 1]} : vector<16x96xf32> to vector<16x32xf32>
    %427 = vector.extract_strided_slice %406 {offsets = [0, 96], sizes = [16, 32], strides = [1, 1]} : vector<16x128xf32> to vector<16x32xf32>
    %428 = math.tanh %427 : vector<16x32xf32>
    %429 = arith.mulf %414, %372 : vector<16x32xf32>
    %430 = arith.mulf %413, %417 : vector<16x32xf32>
    %431 = arith.addf %429, %430 : vector<16x32xf32>
    %432 = math.tanh %431 : vector<16x32xf32>
    %433 = arith.mulf %415, %432 : vector<16x32xf32>
    %434 = arith.mulf %425, %377 : vector<16x32xf32>
    %435 = arith.mulf %424, %428 : vector<16x32xf32>
    %436 = arith.addf %434, %435 : vector<16x32xf32>
    %437 = math.tanh %436 : vector<16x32xf32>
    %438 = arith.mulf %426, %437 : vector<16x32xf32>
    %439 = arith.truncf %433 : vector<16x32xf32> to vector<16x32xbf16>
    %440 = arith.index_cast %387 : i32 to index
    %c0_109 = arith.constant 0 : index
    %441 = vector.load %arg6[%440, %c0_109] : memref<128x32xbf16, #tpu.memory_space<vmem>>, vector<16x32xbf16>
    tpu.vector_store %arg6[%440, %c0_109], %439 {strides = array<i32>} : memref<128x32xbf16, #tpu.memory_space<vmem>>, vector<16x32xbf16>,
    %442 = arith.truncf %438 : vector<16x32xf32> to vector<16x32xbf16>
    %443 = arith.index_cast %390 : i32 to index
    %c0_110 = arith.constant 0 : index
    %444 = vector.load %arg7[%443, %c0_110] : memref<128x32xbf16, #tpu.memory_space<vmem>>, vector<16x32xbf16>
    tpu.vector_store %arg7[%443, %c0_110], %442 {strides = array<i32>} : memref<128x32xbf16, #tpu.memory_space<vmem>>, vector<16x32xbf16>,
    %c7_i32_111 = arith.constant 7 : i32
    %c16_i32_112 = arith.constant 16 : i32
    %445 = arith.muli %c7_i32_111, %c16_i32_112 : i32
    %446 = tpu.assume_multiple %445, 16 : i32
    %c7_i32_113 = arith.constant 7 : i32
    %447 = arith.subi %c7_i32_113, %c7_i32_111 : i32
    %c16_i32_114 = arith.constant 16 : i32
    %448 = arith.muli %447, %c16_i32_114 : i32
    %449 = tpu.assume_multiple %448, 16 : i32
    %450 = arith.index_cast %446 : i32 to index
    %c0_115 = arith.constant 0 : index
    %451 = vector.load %arg8[%450, %c0_115] : memref<128x128xbf16, #tpu.memory_space<vmem>>, vector<16x128xbf16>
    %452 = arith.extf %451 : vector<16x128xbf16> to vector<16x128xf32>
    %453 = vector.broadcast %17 : vector<1x128xf32> to vector<16x128xf32>
    %454 = arith.addf %452, %453 : vector<16x128xf32>
    %455 = arith.truncf %433 : vector<16x32xf32> to vector<16x32xbf16>
    %cst_116 = arith.constant dense<0.000000e+00> : vector<16x128xf32>
    %456 = tpu.matmul %455, %21, %cst_116 {dimension_numbers = #tpu.dot_dimension_numbers<[1], [0], [0], [1], [0, 0, 1, 1], [], []>} : vector<16x32xbf16>, vector<32x128xbf16>, vector<16x128xf32> -> vector<16x128xf32>
    %457 = arith.addf %454, %456 : vector<16x128xf32>
    %458 = arith.index_cast %449 : i32 to index
    %c0_117 = arith.constant 0 : index
    %459 = vector.load %arg9[%458, %c0_117] : memref<128x128xbf16, #tpu.memory_space<vmem>>, vector<16x128xbf16>
    %460 = arith.extf %459 : vector<16x128xbf16> to vector<16x128xf32>
    %461 = vector.broadcast %19 : vector<1x128xf32> to vector<16x128xf32>
    %462 = arith.addf %460, %461 : vector<16x128xf32>
    %463 = arith.truncf %438 : vector<16x32xf32> to vector<16x32xbf16>
    %cst_118 = arith.constant dense<0.000000e+00> : vector<16x128xf32>
    %464 = tpu.matmul %463, %23, %cst_118 {dimension_numbers = #tpu.dot_dimension_numbers<[1], [0], [0], [1], [0, 0, 1, 1], [], []>} : vector<16x32xbf16>, vector<32x128xbf16>, vector<16x128xf32> -> vector<16x128xf32>
    %465 = arith.addf %462, %464 : vector<16x128xf32>
    %466 = vector.extract_strided_slice %457 {offsets = [0, 0], sizes = [16, 96], strides = [1, 1]} : vector<16x128xf32> to vector<16x96xf32>
    %467 = arith.negf %466 : vector<16x96xf32>
    %468 = math.exp %467 : vector<16x96xf32>
    %cst_119 = arith.constant 1.000000e+00 : f32
    %469 = vector.broadcast %cst_119 : f32 to vector<16x96xf32>
    %470 = arith.addf %469, %468 : vector<16x96xf32>
    %471 = arith.divf %469, %470 : vector<16x96xf32>
    %472 = vector.extract_strided_slice %471 {offsets = [0, 0], sizes = [16, 32], strides = [1, 1]} : vector<16x96xf32> to vector<16x32xf32>
    %473 = vector.extract_strided_slice %471 {offsets = [0, 32], sizes = [16, 32], strides = [1, 1]} : vector<16x96xf32> to vector<16x32xf32>
    %474 = vector.extract_strided_slice %471 {offsets = [0, 64], sizes = [16, 32], strides = [1, 1]} : vector<16x96xf32> to vector<16x32xf32>
    %475 = vector.extract_strided_slice %457 {offsets = [0, 96], sizes = [16, 32], strides = [1, 1]} : vector<16x128xf32> to vector<16x32xf32>
    %476 = math.tanh %475 : vector<16x32xf32>
    %477 = vector.extract_strided_slice %465 {offsets = [0, 0], sizes = [16, 96], strides = [1, 1]} : vector<16x128xf32> to vector<16x96xf32>
    %478 = arith.negf %477 : vector<16x96xf32>
    %479 = math.exp %478 : vector<16x96xf32>
    %cst_120 = arith.constant 1.000000e+00 : f32
    %480 = vector.broadcast %cst_120 : f32 to vector<16x96xf32>
    %481 = arith.addf %480, %479 : vector<16x96xf32>
    %482 = arith.divf %480, %481 : vector<16x96xf32>
    %483 = vector.extract_strided_slice %482 {offsets = [0, 0], sizes = [16, 32], strides = [1, 1]} : vector<16x96xf32> to vector<16x32xf32>
    %484 = vector.extract_strided_slice %482 {offsets = [0, 32], sizes = [16, 32], strides = [1, 1]} : vector<16x96xf32> to vector<16x32xf32>
    %485 = vector.extract_strided_slice %482 {offsets = [0, 64], sizes = [16, 32], strides = [1, 1]} : vector<16x96xf32> to vector<16x32xf32>
    %486 = vector.extract_strided_slice %465 {offsets = [0, 96], sizes = [16, 32], strides = [1, 1]} : vector<16x128xf32> to vector<16x32xf32>
    %487 = math.tanh %486 : vector<16x32xf32>
    %488 = arith.mulf %473, %431 : vector<16x32xf32>
    %489 = arith.mulf %472, %476 : vector<16x32xf32>
    %490 = arith.addf %488, %489 : vector<16x32xf32>
    %491 = math.tanh %490 : vector<16x32xf32>
    %492 = arith.mulf %474, %491 : vector<16x32xf32>
    %493 = arith.mulf %484, %436 : vector<16x32xf32>
    %494 = arith.mulf %483, %487 : vector<16x32xf32>
    %495 = arith.addf %493, %494 : vector<16x32xf32>
    %496 = math.tanh %495 : vector<16x32xf32>
    %497 = arith.mulf %485, %496 : vector<16x32xf32>
    %498 = arith.truncf %492 : vector<16x32xf32> to vector<16x32xbf16>
    %499 = arith.index_cast %446 : i32 to index
    %c0_121 = arith.constant 0 : index
    %500 = vector.load %arg6[%499, %c0_121] : memref<128x32xbf16, #tpu.memory_space<vmem>>, vector<16x32xbf16>
    tpu.vector_store %arg6[%499, %c0_121], %498 {strides = array<i32>} : memref<128x32xbf16, #tpu.memory_space<vmem>>, vector<16x32xbf16>,
    %501 = arith.truncf %497 : vector<16x32xf32> to vector<16x32xbf16>
    %502 = arith.index_cast %449 : i32 to index
    %c0_122 = arith.constant 0 : index
    %503 = vector.load %arg7[%502, %c0_122] : memref<128x32xbf16, #tpu.memory_space<vmem>>, vector<16x32xbf16>
    tpu.vector_store %arg7[%502, %c0_122], %501 {strides = array<i32>} : memref<128x32xbf16, #tpu.memory_space<vmem>>, vector<16x32xbf16>,
    %c8_i32 = arith.constant 8 : i32
    %c0_123 = arith.constant 0 : index
    %c0_124 = arith.constant 0 : index
    %c0_125 = arith.constant 0 : index
    %504 = vector.load %arg10[%c0_123, %c0_124, %c0_125] : memref<2x16x32xf32, #tpu.memory_space<vmem>>, vector<1x16x32xf32>
    %505 = vector.shape_cast %504 : vector<1x16x32xf32> to vector<16x32xf32>
    %506 = vector.shape_cast %492 : vector<16x32xf32> to vector<1x16x32xf32>
    tpu.vector_store %arg10[%c0_123, %c0_124, %c0_125], %506 {strides = array<i32>} : memref<2x16x32xf32, #tpu.memory_space<vmem>>, vector<1x16x32xf32>,
    %c0_126 = arith.constant 0 : index
    %c0_127 = arith.constant 0 : index
    %c0_128 = arith.constant 0 : index
    %507 = vector.load %arg11[%c0_126, %c0_127, %c0_128] : memref<2x16x32xf32, #tpu.memory_space<vmem>>, vector<1x16x32xf32>
    %508 = vector.shape_cast %507 : vector<1x16x32xf32> to vector<16x32xf32>
    %509 = vector.shape_cast %490 : vector<16x32xf32> to vector<1x16x32xf32>
    tpu.vector_store %arg11[%c0_126, %c0_127, %c0_128], %509 {strides = array<i32>} : memref<2x16x32xf32, #tpu.memory_space<vmem>>, vector<1x16x32xf32>,
    %c1_129 = arith.constant 1 : index
    %c0_130 = arith.constant 0 : index
    %c0_131 = arith.constant 0 : index
    %510 = vector.load %arg10[%c1_129, %c0_130, %c0_131] : memref<2x16x32xf32, #tpu.memory_space<vmem>>, vector<1x16x32xf32>
    %511 = vector.shape_cast %510 : vector<1x16x32xf32> to vector<16x32xf32>
    %512 = vector.shape_cast %497 : vector<16x32xf32> to vector<1x16x32xf32>
    tpu.vector_store %arg10[%c1_129, %c0_130, %c0_131], %512 {strides = array<i32>} : memref<2x16x32xf32, #tpu.memory_space<vmem>>, vector<1x16x32xf32>,
    %c1_132 = arith.constant 1 : index
    %c0_133 = arith.constant 0 : index
    %c0_134 = arith.constant 0 : index
    %513 = vector.load %arg11[%c1_132, %c0_133, %c0_134] : memref<2x16x32xf32, #tpu.memory_space<vmem>>, vector<1x16x32xf32>
    %514 = vector.shape_cast %513 : vector<1x16x32xf32> to vector<16x32xf32>
    %515 = vector.shape_cast %495 : vector<16x32xf32> to vector<1x16x32xf32>
    tpu.vector_store %arg11[%c1_132, %c0_133, %c0_134], %515 {strides = array<i32>} : memref<2x16x32xf32, #tpu.memory_space<vmem>>, vector<1x16x32xf32>,
    return
  }
  func.func @transform_0(%arg0: i32) -> (i32, i32) {
    %c0_i32 = arith.constant 0 : i32
    %c0_i32_0 = arith.constant 0 : i32
    return %arg0, %c0_i32 : i32, i32
  }
  func.func @transform_1(%arg0: i32) -> (i32, i32) {
    %c0_i32 = arith.constant 0 : i32
    %0 = arith.subi %c0_i32, %arg0 : i32
    %c0_i32_0 = arith.constant 0 : i32
    %c0_i32_1 = arith.constant 0 : i32
    return %0, %c0_i32_0 : i32, i32
  }
  func.func @transform_2(%arg0: i32) -> (i32, i32, i32) {
    %c0_i32 = arith.constant 0 : i32
    %c0_i32_0 = arith.constant 0 : i32
    %c0_i32_1 = arith.constant 0 : i32
    %c0_i32_2 = arith.constant 0 : i32
    return %c0_i32, %c0_i32_0, %c0_i32_1 : i32, i32, i32
  }
  func.func @transform_3(%arg0: i32) -> (i32, i32, i32) {
    %c0_i32 = arith.constant 0 : i32
    %c0_i32_0 = arith.constant 0 : i32
    %c0_i32_1 = arith.constant 0 : i32
    %c0_i32_2 = arith.constant 0 : i32
    return %c0_i32, %c0_i32_0, %c0_i32_1 : i32, i32, i32
  }
  func.func @transform_4(%arg0: i32) -> (i32, i32, i32) {
    %c0_i32 = arith.constant 0 : i32
    %c0_i32_0 = arith.constant 0 : i32
    %c0_i32_1 = arith.constant 0 : i32
    %c0_i32_2 = arith.constant 0 : i32
    return %c0_i32, %c0_i32_0, %c0_i32_1 : i32, i32, i32
  }
  func.func @transform_5(%arg0: i32) -> (i32, i32) {
    %c0_i32 = arith.constant 0 : i32
    %c0_i32_0 = arith.constant 0 : i32
    return %arg0, %c0_i32 : i32, i32
  }
  func.func @transform_6(%arg0: i32) -> (i32, i32) {
    %c0_i32 = arith.constant 0 : i32
    %0 = arith.subi %c0_i32, %arg0 : i32
    %c0_i32_0 = arith.constant 0 : i32
    %c0_i32_1 = arith.constant 0 : i32
    return %0, %c0_i32_0 : i32, i32
  }
}

</mosaic_0001>

<bundles_post_ra>
// kernel: lstm_model_forward.5
= control target key start
LH: loop header
LB: loop body
LE: loop exit
PB: predicated region body
PF: predicated region fallthrough
CT: control target
= control target key end

     0   :  { %vm33_vm0 = vcmask 261120   ;;  %s253_s1 = inlined_call_operand.vmem [shape: f32[64,32], index: 1, kind: input, shape index: {}]   ;;  %s254_s0 = inlined_call_operand.vmem [shape: f32[2,16,32], index: 0, kind: input, shape index: {}]   ;;  %s255_s2 = inlined_call_operand.vmem [shape: f32[1,32], index: 2, kind: input, shape index: {}]   ;;  %s256_s4 = inlined_call_operand.vmem [shape: f32[1,128], index: 4, kind: input, shape index: {}]   ;;  %s257_s3 = inlined_call_operand.vmem [shape: f32[32,128], index: 3, kind: input, shape index: {}]   ;;  %s258_s5 = inlined_call_operand.vmem [shape: f32[16,128], index: 5, kind: output, shape index: {}]  }
   0x1   :  { %v27_v0 = vld [vmem:[%s253_s1 + $0x38] sm:$0xff]  ;;  %v26_v2 = vld [vmem:[%s253_s1 + $0x30] sm:$0xff]  ;;  %v25_v4 = vld [vmem:[%s253_s1 + $0x28] sm:$0xff] }
   0x2   :  { %v23_v1 = vld [vmem:[%s253_s1 + $0x18] sm:$0xff]  ;;  %52 = vmatpush.msra.mxu0 %v27_v0  ;;  %v22_v3 = vld [vmem:[%s253_s1 + $0x10] sm:$0xff]  ;;  %151 = vmatpush.msra.mxu3 %v27_v0  ;;  %v21_v5 = vld [vmem:[%s253_s1 + $0x8] sm:$0xff] }
   0x3   :  { %81 = vmatpush.msra.mxu1 %v23_v1  ;;  %v24_v6 = vld [vmem:[%s253_s1 + $0x20] sm:$0xff]  ;;  %v143_v8 = vld [vmem:[%s254_s0 + $0x10] sm:$0xff]  ;;  %v144_v10 = vld [vmem:[%s254_s0 + $0x18] sm:$0xff] }
   0x4   :  { %53 = vmatpush.msra.mxu0 %v26_v2  ;;  %152 = vmatpush.msra.mxu3 %v26_v2  ;;  %v20_v7 = vld [vmem:[%s253_s1] sm:$0xff]  ;;  %v29_v11 = vld [vmem:[%s254_s0 + $0x8] sm:$0xff]  ;;  %v103_v12 = vld [vmem:[%s257_s3 + $0x18] sm:$0xff] }
   0x5   :  { %82 = vmatpush.msra.mxu1 %v22_v3  ;;  %v28_v9 = vld [vmem:[%s254_s0] sm:$0xff]  ;;  %126 = vmatpush.msra.mxu2 %v103_v12  ;;  %v102_v13 = vld [vmem:[%s257_s3 + $0x10] sm:$0xff]  ;;  %v101_v14 = vld [vmem:[%s257_s3 + $0x8] sm:$0xff] }
   0x6   :  { %54 = vmatpush.msra.mxu0 %v25_v4  ;;  %153 = vmatpush.msra.mxu3 %v25_v4  ;;  %v100_v15 = vld [vmem:[%s257_s3] sm:$0xff] }
   0x7   :  { %83 = vmatpush.msra.mxu1 %v21_v5  ;;  %127 = vmatpush.msra.mxu2 %v102_v13  ;;  %v155_v16 = vld [vmem:[%s255_s2] ss:$0 sm:$0xff] }
   0x8   :  { %55 = vmatpush.msra.mxu0 %v24_v6  ;;  %154 = vmatpush.msra.mxu3 %v24_v6  ;;  %v156_v27 = vld [vmem:[%s256_s4] ss:$0 sm:$0xff] }
   0x9   :  { %84 = vmatpush.msra.mxu1 %v20_v7  ;;  %145 = vmatmul.msk.f32.vlgmr.msra.gmra.mxu0 %vm33_vm0, %v143_v8 }
   0xa   :  { %147 = vmatmul.msk.f32.vlgmr.msra.gmra.mxu1 %vm33_vm0, %v28_v9  ;;  %146 = vmatmul.msk.f32.vlgmr.msra.gmra.mxu3 %vm33_vm0, %v144_v10 }
   0xb   :  { %128 = vmatpush.msra.mxu2 %v101_v14 }
   0xd   :  { %129 = vmatpush.msra.mxu2 %v100_v15 }
  0x12   :  { %148 = vmatmul.msk.f32.gmra.mxu1 %vm33_vm0, %v29_v11 }
  0x86   :  { %v57_v17 = vpop.f32.mrf.mxu0 }
  0x87   :  { %v86_v18 = vpop.f32.mrf.mxu1 }
  0x88   :  { %v87_v19 = vadd.f32 %v86_v18, %v57_v17 }
  0x8a   :  { %v96_v20 = vadd.f32 %v155_v16, %v87_v19 }
  0x8c   :  { %v98_v21 = vmax.f32 %v96_v20, 0.0 }
  0x8d   :  { %v60_v22 = vpop.f32.mrf.mxu3 }
  0x8e   :  { %149 = vmatmul.msk.f32.vlgmr.msra.gmra.mxu2 %vm33_vm0, %v98_v21 }
  0x8f   :  { %v89_v23 = vpop.f32.mrf.mxu1 }
  0x90   :  { %v90_v24 = vadd.f32 %v89_v23, %v60_v22 }
  0x92   :  { %v97_v25 = vadd.f32 %v155_v16, %v90_v24 }
  0x94   :  { %v99_v26 = vmax.f32 %v97_v25, 0.0 }
  0x96   :  { %150 = vmatmul.msk.f32.gmra.mxu2 %vm33_vm0, %v99_v26 }
 0x111   :  { %v131_v28 = vpop.f32.mrf.mxu2 }
 0x112   :  { %v132_v29 = vadd.f32 %v156_v27, %v131_v28 }
 0x114   :  { %137 = vst [vmem:[%s258_s5] sm:$0xff] %v132_v29 }
 0x119   :  { %v134_v30 = vpop.f32.mrf.mxu2 }
 0x11a   :  { %v135_v31 = vadd.f32 %v156_v27, %v134_v30 }
 0x11c   :  { %138 = vst [vmem:[%s258_s5 + $0x8] sm:$0xff] %v135_v31 }

// kernel: lstm_model_forward.4
= control target key start
LH: loop header
LB: loop body
LE: loop exit
PB: predicated region body
PF: predicated region fallthrough
CT: control target
= control target key end

     0   :  { %vm187_vm0 = vcmask 261120   ;;  %v3246_v36 = vmov 0.0   ;;  %s3248_s18 = smov 64   ;;  %s3974_s4 = inlined_call_operand.vmem [shape: bf16[2,64,128], index: 4, kind: input, shape index: {}]   ;;  %s3975_s5 = inlined_call_operand.vmem [shape: bf16[2,32,128], index: 5, kind: input, shape index: {}]   ;;  %s3976_s2 = inlined_call_operand.vmem [shape: bf16[128,32], index: 2, kind: input, shape index: {}, may-alias: {2,3}]   ;;  %s3977_s0 = inlined_call_operand.vmem [shape: bf16[128,32], index: 0, kind: input, shape index: {}, may-alias: {0,1}]   ;;  %s3978_s1 = inlined_call_operand.vmem [shape: bf16[128,32], index: 1, kind: input, shape index: {}, may-alias: {0,1}]   ;;  %s3979_s3 = inlined_call_operand.vmem [shape: bf16[128,32], index: 3, kind: input, shape index: {}, may-alias: {2,3}]   ;;  %s3980_s6 = inlined_call_operand.vmem [shape: f32[2,1,128], index: 6, kind: input, shape index: {}]   ;;  %s3981_s7 = inlined_call_operand.vmem [shape: f32[2,16,32], index: 7, kind: output, shape index: {}]  }
   0x1   :  { %v2779_v0 = vld [vmem:[%s3974_s4 + $0x18] sm:$0xff]  ;;  %v2777_v1 = vld [vmem:[%s3974_s4 + $0x8] sm:$0xff]  ;;  %v2778_v3 = vld [vmem:[%s3974_s4 + $0x10] sm:$0xff]  ;;  %720 = vst.msk [vmem:[#allocation4] sm:$0xff] %vm187_vm0, %v3246_v36 }
   0x2   :  { %v2781_v2 = vld [vmem:[%s3974_s4 + $0x28] sm:$0xff]  ;;  %218 = vmatpush.bf16.msra.mxu0 %v2779_v0  ;;  %484 = vmatpush.bf16.msra.mxu2 %v2777_v1  ;;  %v2776_v4 = vld [vmem:[%s3974_s4] sm:$0xff]  ;;  %v2783_v5 = vld [vmem:[%s3974_s4 + $0x38] sm:$0xff]  ;;  %721 = vst.msk [vmem:[#allocation4 + $0x8] sm:$0xff] %vm187_vm0, %v3246_v36 }
   0x3   :  { %609 = vmatpush.bf16.msra.mxu3 %v2781_v2  ;;  %v2780_v6 = vld [vmem:[%s3974_s4 + $0x20] sm:$0xff]  ;;  %v3314_v7 = vld [vmem:[%s3975_s5 + $0x8] sm:$0xff]  ;;  %359 = vmatpush.bf16.msra.mxu1 %v2783_v5  ;;  %v2782_v8 = vld [vmem:[%s3974_s4 + $0x30] sm:$0xff]  ;;  %722 = vst.msk [vmem:[#allocation4 + $0x10] sm:$0xff] %vm187_vm0, %v3246_v36 }
   0x4   :  { %v2800_v9 = vld [vmem:[%s3976_s2] sm:$0xff]  ;;  %v2801_v13 = vld [vmem:[%s3976_s2 + $0x8] sm:$0xff]  ;;  %v3355_v17 = vld [vmem:[%s3975_s5 + $0x18] sm:$0xff]  ;;  %723 = vst.msk [vmem:[#allocation4 + $0x18] sm:$0xff] %vm187_vm0, %v3246_v36 }
   0x5   :  { %v2784_v10 = vld [vmem:[%s3977_s0] sm:$0xff]  ;;  %v2785_v14 = vld [vmem:[%s3977_s0 + $0x8] sm:$0xff]  ;;  %v2802_v18 = vld [vmem:[%s3976_s2 + $0x10] sm:$0xff]  ;;  %724 = vst.msk [vmem:[#allocation5] sm:$0xff] %vm187_vm0, %v3246_v36 }
   0x6   :  { %219 = vmatpush.bf16.msra.mxu0 %v2778_v3  ;;  %485 = vmatpush.bf16.msra.mxu2 %v2776_v4  ;;  %v2792_v11 = vld [vmem:[%s3978_s1] sm:$0xff]  ;;  %v2793_v15 = vld [vmem:[%s3978_s1 + $0x8] sm:$0xff]  ;;  %v2786_v19 = vld [vmem:[%s3977_s0 + $0x10] sm:$0xff]  ;;  %725 = vst.msk [vmem:[#allocation5 + $0x8] sm:$0xff] %vm187_vm0, %v3246_v36 }
   0x7   :  { %610 = vmatpush.bf16.msra.mxu3 %v2780_v6  ;;  %v2808_v12 = vld [vmem:[%s3979_s3] sm:$0xff]  ;;  %360 = vmatpush.bf16.msra.mxu1 %v2782_v8  ;;  %v2809_v16 = vld [vmem:[%s3979_s3 + $0x8] sm:$0xff]  ;;  %v2794_v20 = vld [vmem:[%s3978_s1 + $0x10] sm:$0xff]  ;;  %726 = vst.msk [vmem:[#allocation5 + $0x10] sm:$0xff] %vm187_vm0, %v3246_v36 }
   0x8   :  { %v2810_v21 = vld [vmem:[%s3979_s3 + $0x10] sm:$0xff]  ;;  %v3378_v22 = vld [vmem:[%s3975_s5] sm:$0xff]  ;;  %v2803_v23 = vld [vmem:[%s3976_s2 + $0x18] sm:$0xff]  ;;  %727 = vst.msk [vmem:[#allocation5 + $0x18] sm:$0xff] %vm187_vm0, %v3246_v36 }
   0x9   :  { %2553 = vmatmul.msk.bf16.vlgmr.msra.gmra.mxu0 %vm187_vm0, %v2800_v9  ;;  %2649 = vmatmul.msk.bf16.vlgmr.msra.gmra.mxu2 %vm187_vm0, %v2784_v10  ;;  %v2787_v24 = vld [vmem:[%s3977_s0 + $0x18] sm:$0xff]  ;;  %v2804_v27 = vld [vmem:[%s3976_s2 + $0x20] sm:$0xff]  ;;  %v2805_v31 = vld [vmem:[%s3976_s2 + $0x28] sm:$0xff] }
   0xa   :  { %781 = vmatpush.bf16.msrb.mxu0 %v3314_v7  ;;  %1017 = vmatpush.bf16.msrb.mxu2 %v3314_v7  ;;  %v2795_v25 = vld [vmem:[%s3978_s1 + $0x18] sm:$0xff]  ;;  %v2788_v28 = vld [vmem:[%s3977_s0 + $0x20] sm:$0xff]  ;;  %v2789_v32 = vld [vmem:[%s3977_s0 + $0x28] sm:$0xff] }
   0xb   :  { %2697 = vmatmul.msk.bf16.vlgmr.msra.gmra.mxu3 %vm187_vm0, %v2792_v11  ;;  %2601 = vmatmul.msk.bf16.vlgmr.msra.gmra.mxu1 %vm187_vm0, %v2808_v12  ;;  %v2811_v26 = vld [vmem:[%s3979_s3 + $0x18] sm:$0xff]  ;;  %v2796_v29 = vld [vmem:[%s3978_s1 + $0x20] sm:$0xff]  ;;  %v2797_v33 = vld [vmem:[%s3978_s1 + $0x28] sm:$0xff] }
   0xc   :  { %823 = vmatpush.bf16.msrb.mxu1 %v3355_v17  ;;  %1047 = vmatpush.bf16.msrb.mxu3 %v3355_v17  ;;  %v2812_v30 = vld [vmem:[%s3979_s3 + $0x20] sm:$0xff]  ;;  %v2813_v34 = vld [vmem:[%s3979_s3 + $0x28] sm:$0xff]  ;;  %v3437_v35 = vld [vmem:[%s3975_s5 + $0x10] sm:$0xff] }
   0xd   :  { %v2806_v37 = vld [vmem:[%s3976_s2 + $0x30] sm:$0xff]  ;;  %v2807_v41 = vld [vmem:[%s3976_s2 + $0x38] sm:$0xff]  ;;  %v740_v45 = vld [vmem:[#allocation4] sm:$0xff] }
   0xe   :  { %782 = vmatpush.bf16.msrb.mxu0 %v3378_v22  ;;  %1018 = vmatpush.bf16.msrb.mxu2 %v3378_v22  ;;  %v2790_v38 = vld [vmem:[%s3977_s0 + $0x30] sm:$0xff]  ;;  %v2791_v42 = vld [vmem:[%s3977_s0 + $0x38] sm:$0xff]  ;;  %v741_v46 = vld [vmem:[#allocation4 + $0x8] sm:$0xff]  ;;  %s3247_s0 = smov 32  }
   0xf   :  { %v2798_v39 = vld [vmem:[%s3978_s1 + $0x30] sm:$0xff]  ;;  %v2799_v43 = vld [vmem:[%s3978_s1 + $0x38] sm:$0xff]  ;;  %v759_v49 = vpack.c.bf16 %v741_v46, %v740_v45 }
  0x10   :  { %824 = vmatpush.bf16.msrb.mxu1 %v3437_v35  ;;  %1048 = vmatpush.bf16.msrb.mxu3 %v3437_v35  ;;  %v2814_v40 = vld [vmem:[%s3979_s3 + $0x30] sm:$0xff]  ;;  %v2815_v44 = vld [vmem:[%s3979_s3 + $0x38] sm:$0xff] }
  0x11   :  { %v745_v47 = vld [vmem:[#allocation4 + $0x10] sm:$0xff]  ;;  %v746_v48 = vld [vmem:[#allocation4 + $0x18] sm:$0xff] }
  0x12   :  { %1225 = vmatpush.bf16.msra.mxu0 %v3314_v7  ;;  %1433 = vmatpush.bf16.msra.mxu2 %v3314_v7  ;;  %v801_v51 = vpack.c.bf16 %v746_v48, %v745_v47 }
  0x14   :  { %1255 = vmatpush.bf16.msra.mxu1 %v3355_v17  ;;  %1463 = vmatpush.bf16.msra.mxu3 %v3355_v17 }
  0x16   :  { %1226 = vmatpush.bf16.msra.mxu0 %v3378_v22  ;;  %1434 = vmatpush.bf16.msra.mxu2 %v3378_v22 }
  0x18   :  { %1256 = vmatpush.bf16.msra.mxu1 %v3437_v35  ;;  %1464 = vmatpush.bf16.msra.mxu3 %v3437_v35 }
  0x19   :  { %2554 = vmatmul.msk.bf16.gmra.mxu0 %vm187_vm0, %v2801_v13  ;;  %2650 = vmatmul.msk.bf16.gmra.mxu2 %vm187_vm0, %v2785_v14 }
  0x1b   :  { %2698 = vmatmul.msk.bf16.gmra.mxu3 %vm187_vm0, %v2793_v15  ;;  %2602 = vmatmul.msk.bf16.gmra.mxu1 %vm187_vm0, %v2809_v16 }
  0x29   :  { %2555 = vmatmul.msk.bf16.gmra.mxu0 %vm187_vm0, %v2802_v18  ;;  %2651 = vmatmul.msk.bf16.gmra.mxu2 %vm187_vm0, %v2786_v19  ;;  %v742_v19 = vld [vmem:[#allocation5] sm:$0xff] }
  0x2a   :  { %915 = vrot.lane.b32.xlu2 %v742_v19, %s3247_s0 }
  0x2b   :  { %2699 = vmatmul.msk.bf16.gmra.mxu3 %vm187_vm0, %v2794_v20  ;;  %2603 = vmatmul.msk.bf16.gmra.mxu1 %vm187_vm0, %v2810_v21 }
  0x39   :  { %2556 = vmatmul.msk.bf16.gmra.mxu0 %vm187_vm0, %v2803_v23  ;;  %2652 = vmatmul.msk.bf16.gmra.mxu2 %vm187_vm0, %v2787_v24 }
  0x3b   :  { %2700 = vmatmul.msk.bf16.gmra.mxu3 %vm187_vm0, %v2795_v25  ;;  %2604 = vmatmul.msk.bf16.gmra.mxu1 %vm187_vm0, %v2811_v26  ;;  %v743_v26 = vld [vmem:[#allocation5 + $0x8] sm:$0xff] }
  0x3c   :  { %917 = vrot.lane.b32.xlu2 %v743_v26, %s3247_s0 }
  0x49   :  { %2557 = vmatmul.msk.bf16.gmra.mxu0 %vm187_vm0, %v2804_v27  ;;  %2653 = vmatmul.msk.bf16.gmra.mxu2 %vm187_vm0, %v2788_v28 }
  0x4b   :  { %2701 = vmatmul.msk.bf16.gmra.mxu3 %vm187_vm0, %v2796_v29  ;;  %2605 = vmatmul.msk.bf16.gmra.mxu1 %vm187_vm0, %v2812_v30 }
  0x59   :  { %2558 = vmatmul.msk.bf16.gmra.mxu0 %vm187_vm0, %v2805_v31  ;;  %2654 = vmatmul.msk.bf16.gmra.mxu2 %vm187_vm0, %v2789_v32 }
  0x5b   :  { %2702 = vmatmul.msk.bf16.gmra.mxu3 %vm187_vm0, %v2797_v33  ;;  %2606 = vmatmul.msk.bf16.gmra.mxu1 %vm187_vm0, %v2813_v34 }
  0x69   :  { %2559 = vmatmul.msk.bf16.gmra.mxu0 %vm187_vm0, %v2806_v37  ;;  %2655 = vmatmul.msk.bf16.gmra.mxu2 %vm187_vm0, %v2790_v38 }
  0x6b   :  { %2703 = vmatmul.msk.bf16.gmra.mxu3 %vm187_vm0, %v2798_v39  ;;  %2607 = vmatmul.msk.bf16.gmra.mxu1 %vm187_vm0, %v2814_v40 }
  0x79   :  { %2560 = vmatmul.msk.bf16.gmra.mxu0 %vm187_vm0, %v2807_v41  ;;  %2656 = vmatmul.msk.bf16.gmra.mxu2 %vm187_vm0, %v2791_v42 }
  0x7b   :  { %2704 = vmatmul.msk.bf16.gmra.mxu3 %vm187_vm0, %v2799_v43  ;;  %2608 = vmatmul.msk.bf16.gmra.mxu1 %vm187_vm0, %v2815_v44 }
  0x86   :  { %v221_v50 = vpop.f32.mrf.mxu0 }
  0x88   :  { %v362_v52 = vpop.f32.mrf.mxu1 }
  0x89   :  { %2718 = vmatmul.msk.bf16.vlgmr.msrb.gmra.mxu0 %vm187_vm0, %v759_v49 }
  0x8a   :  { %1641 = vmatpush.bf16.msrb.mxu0 %v3314_v7 }
  0x8b   :  { %2727 = vmatmul.msk.bf16.vlgmr.msrb.gmra.mxu1 %vm187_vm0, %v801_v51 }
  0x8c   :  { %v487_v53 = vpop.f32.mrf.mxu2  ;;  %1671 = vmatpush.bf16.msrb.mxu1 %v3355_v17 }
  0x8d   :  { %v488_v59 = vadd.f32 %v487_v53, %v221_v50 }
  0x8e   :  { %v612_v54 = vpop.f32.mrf.mxu3  ;;  %v223_v56 = vpop.f32.mrf.mxu0  ;;  %1642 = vmatpush.bf16.msrb.mxu0 %v3378_v22 }
  0x8f   :  { %v613_v55 = vadd.f32 %v612_v54, %v362_v52 }
  0x90   :  { %v364_v57 = vpop.f32.mrf.mxu1  ;;  %1672 = vmatpush.bf16.msrb.mxu1 %v3437_v35 }
  0x94   :  { %v489_v58 = vpop.f32.mrf.mxu2 }
  0x95   :  { %v490_v60 = vadd.f32 %v489_v58, %v223_v56 }
  0x96   :  { %v614_v61 = vpop.f32.mrf.mxu3  ;;  %v226_v63 = vpop.f32.mrf.mxu0 }
  0x97   :  { %v615_v62 = vadd.f32 %v614_v61, %v364_v57  ;;  %v3492_v0 = vpack.c.bf16 %v490_v60, %v488_v59 }
  0x98   :  { %v367_v2 = vpop.f32.mrf.mxu1 }
  0x99   :  { %v3494_v1 = vpack.c.bf16 %v615_v62, %v613_v55 }
  0x9c   :  { %v492_v3 = vpop.f32.mrf.mxu2 }
  0x9d   :  { %v493_v4 = vadd.f32 %v492_v3, %v226_v63 }
  0x9e   :  { %v617_v5 = vpop.f32.mrf.mxu3  ;;  %v228_v8 = vpop.f32.mrf.mxu0 }
  0x9f   :  { %v618_v6 = vadd.f32 %v617_v5, %v367_v2 }
  0xa0   :  { %v369_v9 = vpop.f32.mrf.mxu1 }
  0xa4   :  { %v494_v10 = vpop.f32.mrf.mxu2 }
  0xa5   :  { %v495_v11 = vadd.f32 %v494_v10, %v228_v8 }
  0xa6   :  { %v619_v12 = vpop.f32.mrf.mxu3  ;;  %v231_v14 = vpop.f32.mrf.mxu0 }
  0xa7   :  { %v620_v13 = vadd.f32 %v619_v12, %v369_v9  ;;  %v3496_v15 = vpack.c.bf16 %v495_v11, %v493_v4 }
  0xa8   :  { %v372_v18 = vpop.f32.mrf.mxu1 }
  0xa9   :  { %v3498_v16 = vpack.c.bf16 %v620_v13, %v618_v6 }
  0xac   :  { %v497_v20 = vpop.f32.mrf.mxu2 }
  0xad   :  { %v498_v21 = vadd.f32 %v497_v20, %v231_v14 }
  0xae   :  { %v622_v23 = vpop.f32.mrf.mxu3  ;;  %v233_v25 = vpop.f32.mrf.mxu0 }
  0xaf   :  { %v623_v24 = vadd.f32 %v622_v23, %v372_v18 }
  0xb0   :  { %v374_v27 = vpop.f32.mrf.mxu1 }
  0xb4   :  { %v499_v28 = vpop.f32.mrf.mxu2 }
  0xb5   :  { %v500_v29 = vadd.f32 %v499_v28, %v233_v25 }
  0xb6   :  { %v624_v30 = vpop.f32.mrf.mxu3  ;;  %v236_v32 = vpop.f32.mrf.mxu0 }
  0xb7   :  { %v625_v31 = vadd.f32 %v624_v30, %v374_v27  ;;  %v3502_v33 = vpack.c.bf16 %v500_v29, %v498_v21 }
  0xb8   :  { %v377_v36 = vpop.f32.mrf.mxu1 }
  0xb9   :  { %v3504_v34 = vpack.c.bf16 %v625_v31, %v623_v24 }
  0xbc   :  { %v502_v37 = vpop.f32.mrf.mxu2 }
  0xbd   :  { %v503_v38 = vadd.f32 %v502_v37, %v236_v32 }
  0xbe   :  { %v627_v39 = vpop.f32.mrf.mxu3  ;;  %v238_v41 = vpop.f32.mrf.mxu0 }
  0xbf   :  { %v628_v40 = vadd.f32 %v627_v39, %v377_v36 }
  0xc0   :  { %v379_v42 = vpop.f32.mrf.mxu1 }
  0xc4   :  { %v504_v43 = vpop.f32.mrf.mxu2 }
  0xc5   :  { %v505_v44 = vadd.f32 %v504_v43, %v238_v41 }
  0xc6   :  { %v629_v45 = vpop.f32.mrf.mxu3  ;;  %v241_v47 = vpop.f32.mrf.mxu0 }
  0xc7   :  { %v630_v46 = vadd.f32 %v629_v45, %v379_v42  ;;  %v3506_v48 = vpack.c.bf16 %v505_v44, %v503_v38  ;;  %v2902_v44 = vunpack.c.l.bf16 %v3492_v0  ;;  %v3526_v45 = vld [vmem:[%s3980_s6] ss:$0 sm:$0xff] }
  0xc8   :  { %v382_v50 = vpop.f32.mrf.mxu1 }
  0xc9   :  { %v3508_v49 = vpack.c.bf16 %v630_v46, %v628_v40 }
  0xcc   :  { %v507_v51 = vpop.f32.mrf.mxu2 }
  0xcd   :  { %v508_v52 = vadd.f32 %v507_v51, %v241_v47 }
  0xce   :  { %v632_v53 = vpop.f32.mrf.mxu3  ;;  %v243_v55 = vpop.f32.mrf.mxu0 }
  0xcf   :  { %v633_v54 = vadd.f32 %v632_v53, %v382_v50 }
  0xd0   :  { %v384_v56 = vpop.f32.mrf.mxu1 }
  0xd4   :  { %v509_v57 = vpop.f32.mrf.mxu2 }
  0xd5   :  { %v510_v58 = vadd.f32 %v509_v57, %v243_v55 }
  0xd6   :  { %v634_v59 = vpop.f32.mrf.mxu3  ;;  %v246_v61 = vpop.f32.mrf.mxu0 }
  0xd7   :  { %v635_v60 = vadd.f32 %v634_v59, %v384_v56  ;;  %v3510_v62 = vpack.c.bf16 %v510_v58, %v508_v52  ;;  %v757_v52 = vadd.f32 %v3526_v45, %v2902_v44  ;;  %v2903_v59 = vunpack.c.h.bf16 %v3492_v0 }
  0xd8   :  { %v387_v2 = vpop.f32.mrf.mxu1 }
  0xd9   :  { %v3512_v63 = vpack.c.bf16 %v635_v60, %v633_v54 }
  0xdc   :  { %v512_v3 = vpop.f32.mrf.mxu2 }
  0xdd   :  { %v513_v4 = vadd.f32 %v512_v3, %v246_v61  ;;  %v3535_v61 = vld [vmem:[%s3980_s6 + $0x1] ss:$0 sm:$0xff] }
  0xde   :  { %v637_v5 = vpop.f32.mrf.mxu3  ;;  %v248_v8 = vpop.f32.mrf.mxu0 }
  0xdf   :  { %v638_v6 = vadd.f32 %v637_v5, %v387_v2 }
  0xe0   :  { %v389_v9 = vpop.f32.mrf.mxu1 }
  0xe4   :  { %v514_v10 = vpop.f32.mrf.mxu2 }
  0xe5   :  { %v515_v11 = vadd.f32 %v514_v10, %v248_v8 }
  0xe6   :  { %v639_v12 = vpop.f32.mrf.mxu3  ;;  %v251_v14 = vpop.f32.mrf.mxu0 }
  0xe7   :  { %v640_v13 = vadd.f32 %v639_v12, %v389_v9  ;;  %v3514_v18 = vpack.c.bf16 %v515_v11, %v513_v4  ;;  %v758_v4 = vadd.f32 %v3526_v45, %v2903_v59 }
  0xe8   :  { %v392_v20 = vpop.f32.mrf.mxu1 }
  0xe9   :  { %v3516_v19 = vpack.c.bf16 %v640_v13, %v638_v6 }
  0xec   :  { %v517_v21 = vpop.f32.mrf.mxu2 }
  0xed   :  { %v518_v23 = vadd.f32 %v517_v21, %v251_v14  ;;  %v749_v21 = vld [vmem:[#allocation5 + $0x18] sm:$0xff] }
  0xee   :  { %v642_v24 = vpop.f32.mrf.mxu3  ;;  %v253_v26 = vpop.f32.mrf.mxu0 }
  0xef   :  { %v643_v25 = vadd.f32 %v642_v24, %v392_v20  ;;  %v748_v20 = vld [vmem:[#allocation5 + $0x10] sm:$0xff] }
  0xf0   :  { %v394_v27 = vpop.f32.mrf.mxu1 }
  0xf4   :  { %v519_v28 = vpop.f32.mrf.mxu2 }
  0xf5   :  { %v520_v29 = vadd.f32 %v519_v28, %v253_v26 }
  0xf6   :  { %v644_v30 = vpop.f32.mrf.mxu3  ;;  %v256_v32 = vpop.f32.mrf.mxu0 }
  0xf7   :  { %v645_v31 = vadd.f32 %v644_v30, %v394_v27  ;;  %v3518_v36 = vpack.c.bf16 %v520_v29, %v518_v23 }
  0xf8   :  { %v397_v38 = vpop.f32.mrf.mxu1 }
  0xf9   :  { %v3520_v37 = vpack.c.bf16 %v645_v31, %v643_v25 }
  0xfc   :  { %v522_v39 = vpop.f32.mrf.mxu2 }
  0xfd   :  { %v523_v40 = vadd.f32 %v522_v39, %v256_v32 }
  0xfe   :  { %v647_v41 = vpop.f32.mrf.mxu3  ;;  %v258_v42 = vpop.f32.mrf.mxu0 }
  0xff   :  { %v648_v46 = vadd.f32 %v647_v41, %v397_v38 }
 0x100   :  { %v399_v43 = vpop.f32.mrf.mxu1 }
 0x104   :  { %v524_v47 = vpop.f32.mrf.mxu2 }
 0x105   :  { %v525_v50 = vadd.f32 %v524_v47, %v258_v42 }
 0x106   :  { %v649_v51 = vpop.f32.mrf.mxu3  ;;  %v784_v54 = vpop.f32.mrf.mxu0 }
 0x107   :  { %v650_v53 = vadd.f32 %v649_v51, %v399_v43  ;;  %v3529_v55 = vpack.c.bf16 %v525_v50, %v523_v40  ;;  %v789_v56 = vadd.f32 %v784_v54, %v757_v52 }
 0x108   :  { %v826_v58 = vpop.f32.mrf.mxu1 }
 0x109   :  { %v2898_v57 = vpack.c.bf16 %v650_v53, %v648_v46  ;;  %2984 = vtanh.f32 %v789_v56  ;;  %v2728_v23 = vmul.f32 -1.442695, %v789_v56 }
 0x10b   :  { %v2906_v60 = vunpack.c.l.bf16 %v2898_v57  ;;  %v2907_v2 = vunpack.c.h.bf16 %v2898_v57 }
 0x10d   :  { %v799_v3 = vadd.f32 %v3535_v61, %v2906_v60  ;;  %v800_v8 = vadd.f32 %v3535_v61, %v2907_v2 }
 0x10e   :  { %v786_v6 = vpop.f32.mrf.mxu0 }
 0x10f   :  { %v831_v5 = vadd.f32 %v826_v58, %v799_v3  ;;  %v2985_v9 = vpop.eup %2984  ;;  %v790_v10 = vadd.f32 %v786_v6, %v758_v4 }
 0x110   :  { %925 = vrot.lane.b32.xlu0 %v2985_v9, %s3247_s0  ;;  %v828_v0 = vpop.f32.mrf.mxu1 }
 0x111   :  { %2986 = vtanh.f32 %v831_v5  ;;  %v832_v11 = vadd.f32 %v828_v0, %v800_v8  ;;  %v2730_v24 = vmul.f32 -1.442695, %v831_v5  ;;  %v2729_v25 = vmul.f32 -1.442695, %v790_v10 }
 0x112   :  { %2988 = vtanh.f32 %v790_v10 }
 0x113   :  { %2990 = vtanh.f32 %v832_v11  ;;  %v2731_v28 = vmul.f32 -1.442695, %v832_v11 }
 0x114   :  { %2992 = vpow2.f32 %v2728_v23 }
 0x115   :  { %2994 = vpow2.f32 %v2730_v24 }
 0x116   :  { %2996 = vpow2.f32 %v2729_v25 }
 0x117   :  { %v2987_v12 = vpop.eup %2986 }
 0x118   :  { %v2989_v13 = vpop.eup %2988  ;;  %967 = vrot.lane.b32.xlu1 %v2987_v12, %s3247_s0 }
 0x119   :  { %927 = vrot.lane.b32.xlu0 %v2989_v13, %s3247_s0  ;;  %v2991_v14 = vpop.eup %2990 }
 0x11a   :  { %v2993_v26 = vpop.eup %2992 }
 0x11b   :  { %v839_v27 = vadd.f32 1.0, %v2993_v26  ;;  %v2995_v29 = vpop.eup %2994 }
 0x11c   :  { %v2997_v30 = vpop.eup %2996  ;;  %v879_v31 = vadd.f32 1.0, %v2995_v29 }
 0x11d   :  { %2998 = vrcp.f32 %v839_v27  ;;  %v840_v32 = vadd.f32 1.0, %v2997_v30  ;;  %v852_v56 = vand.u32 2147483648, %v839_v27  ;;  %vm846_vm2 = vweird.f32 %v839_v27 }
 0x11e   :  { %3000 = vpow2.f32 %v2731_v28  ;;  %v850_v57 = vand.u32 2147483647, %v839_v27  ;;  %vm886_vm4 = vweird.f32 %v879_v31  ;;  %v892_v4 = vand.u32 2147483648, %v879_v31 }
 0x11f   :  { %3002 = vrcp.f32 %v879_v31  ;;  %v853_v3 = vor.u32 1.1754944e-38, %v852_v56  ;;  %v890_v9 = vand.u32 2147483647, %v879_v31  ;;  %v867_v13 = vand.u32 2147483648, %v840_v32 }
 0x120   :  { %969 = vrot.lane.b32.xlu1 %v2991_v14, %s3247_s0  ;;  %3004 = vrcp.f32 %v840_v32  ;;  %vm851_vm6 = vcmp.eq.f32.partialorder %v850_v57, 8.507059e+37  ;;  %vm861_vm9 = vweird.f32 %v840_v32  ;;  %v865_v14 = vand.u32 2147483647, %v840_v32 }
 0x121   :  { %957 = vrot.lane.b32.xlu0 %v748_v20, %s3247_s0  ;;  %v893_v20 = vor.u32 1.1754944e-38, %v892_v4  ;;  %vm891_vm11 = vcmp.eq.f32.partialorder %v890_v9, 8.507059e+37  ;;  %v868_v25 = vor.u32 1.1754944e-38, %v867_v13 }
 0x122   :  { %vm866_vm14 = vcmp.eq.f32.partialorder %v865_v14, 8.507059e+37 }
 0x123   :  { %v2999_v38 = vpop.eup %2998 }
 0x124   :  { %v3001_v39 = vpop.eup %3000  ;;  %v842_v40 = vmul.f32 %v2999_v38, %v839_v27  ;;  %vm847_vm1 = vweird.f32 %v2999_v38 }
 0x125   :  { %v3546_v41 = vadd.f32 1.0, %v3001_v39  ;;  %v3003_v42 = vpop.eup %3002  ;;  %vm848_vm3 = vmor %vm846_vm2, %vm847_vm1 }
 0x126   :  { %v843_v43 = vsub.f32 1.0, %v842_v40  ;;  %v3005_v44 = vpop.eup %3004  ;;  %v882_v46 = vmul.f32 %v3003_v42, %v879_v31  ;;  %vm887_vm5 = vweird.f32 %v3003_v42 }
 0x127   :  { %3006 = vrcp.f32 %v3546_v41  ;;  %v857_v50 = vmul.f32 %v3005_v44, %v840_v32  ;;  %vm862_vm7 = vweird.f32 %v3005_v44  ;;  %vm3553_vm8 = vmor %vm886_vm4, %vm887_vm5  ;;  %vm901_vm12 = vweird.f32 %v3546_v41 }
 0x128   :  { %959 = vrot.lane.b32.xlu1 %v749_v21, %s3247_s0  ;;  %v844_v47 = vmul.f32 %v2999_v38, %v843_v43  ;;  %v883_v51 = vsub.f32 1.0, %v882_v46  ;;  %vm863_vm10 = vmor %vm861_vm9, %vm862_vm7  ;;  %v907_v28 = vand.u32 2147483648, %v3546_v41 }
 0x129   :  { %v858_v54 = vsub.f32 1.0, %v857_v50 }
 0x12a   :  { %v845_v53 = vadd.f32 %v2999_v38, %v844_v47  ;;  %v884_v58 = vmul.f32 %v3003_v42, %v883_v51  ;;  %v908_v40 = vor.u32 1.1754944e-38, %v907_v28  ;;  %v916_v47 = vpop.permute.xlu2 %915 }
 0x12b   :  { %v859_v2 = vmul.f32 %v3005_v44, %v858_v54 }
 0x12c   :  { %v849_v60 = vsel %vm848_vm3, %v2999_v38, %v845_v53  ;;  %v885_v8 = vadd.f32 %v3003_v42, %v884_v58  ;;  %v905_v38 = vand.u32 2147483647, %v3546_v41 }
 0x12d   :  { %v3007_v52 = vpop.eup %3006  ;;  %v3550_v5 = vsel %vm851_vm6, %v853_v3, %v849_v60  ;;  %v860_v0 = vadd.f32 %v3005_v44, %v859_v2 }
 0x12e   :  { %v897_v59 = vmul.f32 %v3007_v52, %v3546_v41  ;;  %v889_v21 = vsel %vm3553_vm8, %v3003_v42, %v885_v8  ;;  %vm902_vm13 = vweird.f32 %v3007_v52  ;;  %vm906_vm1 = vcmp.eq.f32.partialorder %v905_v38, 8.507059e+37 }
 0x12f   :  { %v864_v24 = vsel %vm863_vm10, %v3005_v44, %v860_v0  ;;  %v894_v27 = vsel %vm891_vm11, %v893_v20, %v889_v21  ;;  %vm903_vm15 = vmor %vm901_vm12, %vm902_vm13  ;;  %v921_v51 = vmul.f32 %v916_v47, %v3550_v5 }
 0x130   :  { %v898_v10 = vsub.f32 1.0, %v897_v59  ;;  %v869_v29 = vsel %vm866_vm14, %v868_v25, %v864_v24 }
 0x132   :  { %v899_v23 = vmul.f32 %v3007_v52, %v898_v10  ;;  %v918_v50 = vpop.permute.xlu2 %917 }
 0x133   :  { %v922_v3 = vmul.f32 %v918_v50, %v869_v29 }
 0x134   :  { %v900_v32 = vadd.f32 %v3007_v52, %v899_v23 }
 0x136   :  { %v904_v42 = vsel %vm903_vm15, %v3007_v52, %v900_v32 }
 0x137   :  { %v909_v43 = vsel %vm906_vm1, %v908_v40, %v904_v42 }
 0x182   :  { %v926_v6 = vpop.permute.xlu0 %925 }
 0x183   :  { %v931_v11 = vmul.f32 %v926_v6, %v3550_v5 }
 0x185   :  { %935 = vrot.lane.b32.xlu2 %v931_v11, %s3247_s0 }
 0x18a   :  { %v968_v26 = vpop.permute.xlu1 %967 }
 0x18b   :  { %v973_v30 = vmul.f32 %v968_v26, %v894_v27  ;;  %v928_v31 = vpop.permute.xlu0 %927 }
 0x18c   :  { %v932_v39 = vmul.f32 %v928_v31, %v869_v29 }
 0x18d   :  { %977 = vrot.lane.b32.xlu1 %v973_v30, %s3247_s0 }
 0x18e   :  { %937 = vrot.lane.b32.xlu0 %v932_v39, %s3247_s0  ;;  %v2915_v39 = vunpack.c.h.bf16 %v3520_v37 }
 0x192   :  { %v970_v44 = vpop.permute.xlu1 %969 }
 0x193   :  { %v974_v46 = vmul.f32 %v970_v44, %v909_v43  ;;  %v958_v60 = vpop.permute.xlu0 %957 }
 0x194   :  { %v963_v2 = vmul.f32 %v958_v60, %v894_v27 }
 0x195   :  { %979 = vrot.lane.b32.xlu2 %v974_v46, %s3247_s0 }
 0x19a   :  { %v960_v56 = vpop.permute.xlu1 %959 }
 0x19b   :  { %v964_v52 = vmul.f32 %v960_v56, %v909_v43 }
 0x1df   :  { %v936_v53 = vpop.permute.xlu2 %935 }
 0x1e0   :  { %v3567_v41 = vadd.f32 %v936_v53, %v921_v51 }
 0x1e2   :  { %3008 = vtanh.f32 %v3567_v41 }
 0x1e8   :  { %v3009_v54 = vpop.eup %3008 }
 0x1e9   :  { %947 = vrot.lane.b32.xlu0 %v3009_v54, %s3247_s0 }
 0x1ef   :  { %v980_v57 = vpop.permute.xlu2 %979 }
 0x1f0   :  { %v3571_v58 = vadd.f32 %v980_v57, %v964_v52 }
 0x1f2   :  { %3010 = vtanh.f32 %v3571_v58 }
 0x1f8   :  { %v3011_v59 = vpop.eup %3010 }
 0x1f9   :  { %991 = vrot.lane.b32.xlu0 %v3011_v59, %s3247_s0 }
 0x1ff   :  { %v978_v4 = vpop.permute.xlu1 %977 }
 0x200   :  { %v3575_v6 = vadd.f32 %v978_v4, %v963_v2  ;;  %v938_v8 = vpop.permute.xlu0 %937 }
 0x201   :  { %v3577_v9 = vadd.f32 %v938_v8, %v922_v3 }
 0x202   :  { %3012 = vtanh.f32 %v3575_v6 }
 0x203   :  { %3014 = vtanh.f32 %v3577_v9 }
 0x208   :  { %v3013_v10 = vpop.eup %3012 }
 0x209   :  { %v3015_v0 = vpop.eup %3014  ;;  %989 = vrot.lane.b32.xlu2 %v3013_v10, %s3247_s0 }
 0x20a   :  { %949 = vrot.lane.b32.xlu1 %v3015_v0, %s3247_s0 }
 0x25b   :  { %v948_v11 = vpop.permute.xlu0 %947 }
 0x25c   :  { %v953_v24 = vmul.f32 %v948_v11, %v3550_v5  ;;  %v2914_v5 = vunpack.c.l.bf16 %v3520_v37 }
 0x263   :  { %v990_v12 = vpop.permute.xlu2 %989 }
 0x264   :  { %v995_v14 = vmul.f32 %v990_v12, %v894_v27 }
 0x26b   :  { %v992_v13 = vpop.permute.xlu0 %991 }
 0x26c   :  { %v996_v20 = vmul.f32 %v992_v13, %v909_v43  ;;  %v1033_v43 = vadd.f32 %v3535_v61, %v2915_v39 }
 0x26e   :  { %v1034_v21 = vpack.c.bf16 %v996_v20, %v995_v14 }
 0x270   :  { %1036 = vrot.lane.b32.xlu2 %v1034_v21, %s3248_s18 }
 0x27c   :  { %v950_v23 = vpop.permute.xlu1 %949 }
 0x27d   :  { %v954_v25 = vmul.f32 %v950_v23, %v869_v29  ;;  %v1032_v29 = vadd.f32 %v3535_v61, %v2914_v5 }
 0x27f   :  { %v1004_v26 = vpack.c.bf16 %v954_v25, %v953_v24 }
 0x281   :  { %1006 = vrot.lane.b32.xlu1 %v1004_v26, %s3248_s18 }
 0x2ca   :  { %v1037_v28 = vpop.permute.xlu2 %1036 }
 0x2cb   :  { %2733 = vmatmul.msk.bf16.vlgmr.msrb.gmra.mxu3 %vm187_vm0, %v1037_v28 }
 0x2cc   :  { %1879 = vmatpush.bf16.msrb.mxu3 %v3355_v17  ;;  %v2910_v17 = vunpack.c.l.bf16 %v3496_v15 }
 0x2ce   :  { %v1002_v38 = vadd.f32 %v3526_v45, %v2910_v17 }
 0x2d0   :  { %1880 = vmatpush.bf16.msrb.mxu3 %v3437_v35 }
 0x2f3   :  { %v1007_v27 = vpop.permute.xlu1 %1006 }
 0x2f4   :  { %2732 = vmatmul.msk.bf16.vlgmr.msrb.gmra.mxu2 %vm187_vm0, %v1007_v27 }
 0x2f5   :  { %1849 = vmatpush.bf16.msrb.mxu2 %v3314_v7 }
 0x2f9   :  { %1850 = vmatpush.bf16.msrb.mxu2 %v3378_v22  ;;  %v2911_v22 = vunpack.c.h.bf16 %v3496_v15 }
 0x2fb   :  { %v1003_v46 = vadd.f32 %v3526_v45, %v2911_v22 }
 0x34e   :  { %v1050_v30 = vpop.f32.mrf.mxu3 }
 0x34f   :  { %v1055_v31 = vadd.f32 %v1050_v30, %v1032_v29 }
 0x351   :  { %3016 = vtanh.f32 %v1055_v31  ;;  %v2736_v53 = vmul.f32 -1.442695, %v1055_v31 }
 0x356   :  { %v1052_v42 = vpop.f32.mrf.mxu3 }
 0x357   :  { %v3017_v32 = vpop.eup %3016  ;;  %v1056_v44 = vadd.f32 %v1052_v42, %v1033_v43 }
 0x358   :  { %1175 = vrot.lane.b32.xlu2 %v3017_v32, %s3247_s0 }
 0x359   :  { %v2737_v14 = vmul.f32 -1.442695, %v1056_v44 }
 0x377   :  { %v1020_v40 = vpop.f32.mrf.mxu2 }
 0x378   :  { %v1025_v7 = vadd.f32 %v1020_v40, %v1002_v38 }
 0x37a   :  { %3018 = vtanh.f32 %v1025_v7  ;;  %v2734_v13 = vmul.f32 -1.442695, %v1025_v7 }
 0x37b   :  { %3020 = vtanh.f32 %v1056_v44 }
 0x37f   :  { %v1022_v47 = vpop.f32.mrf.mxu2 }
 0x380   :  { %v3019_v50 = vpop.eup %3018  ;;  %v1026_v51 = vadd.f32 %v1022_v47, %v1003_v46 }
 0x381   :  { %1141 = vrot.lane.b32.xlu0 %v3019_v50, %s3247_s0  ;;  %v3021_v37 = vpop.eup %3020 }
 0x382   :  { %3022 = vtanh.f32 %v1026_v51  ;;  %v2735_v20 = vmul.f32 -1.442695, %v1026_v51 }
 0x383   :  { %3024 = vpow2.f32 %v2736_v53 }
 0x388   :  { %v3023_v54 = vpop.eup %3022 }
 0x389   :  { %1143 = vrot.lane.b32.xlu1 %v3023_v54, %s3247_s0  ;;  %1177 = vrot.lane.b32.xlu0 %v3021_v37, %s3247_s0  ;;  %v3025_v15 = vpop.eup %3024 }
 0x38a   :  { %v1103_v56 = vadd.f32 1.0, %v3025_v15 }
 0x38c   :  { %3026 = vrcp.f32 %v1103_v56  ;;  %v1116_v3 = vand.u32 2147483648, %v1103_v56  ;;  %vm1110_vm3 = vweird.f32 %v1103_v56  ;;  %v1114_v4 = vand.u32 2147483647, %v1103_v56 }
 0x38d   :  { %3028 = vpow2.f32 %v2734_v13 }
 0x38e   :  { %v1117_v10 = vor.u32 1.1754944e-38, %v1116_v3  ;;  %vm1115_vm5 = vcmp.eq.f32.partialorder %v1114_v4, 8.507059e+37  ;;  %3030 = vpow2.f32 %v2737_v14 }
 0x38f   :  { %3032 = vpow2.f32 %v2735_v20 }
 0x392   :  { %v3027_v52 = vpop.eup %3026 }
 0x393   :  { %v1106_v57 = vmul.f32 %v3027_v52, %v1103_v56  ;;  %vm1111_vm2 = vweird.f32 %v3027_v52  ;;  %v3029_v21 = vpop.eup %3028 }
 0x394   :  { %vm1112_vm4 = vmor %vm1110_vm3, %vm1111_vm2  ;;  %v1063_v23 = vadd.f32 1.0, %v3029_v21  ;;  %v3031_v24 = vpop.eup %3030 }
 0x395   :  { %v1107_v59 = vsub.f32 1.0, %v1106_v57  ;;  %v3033_v25 = vpop.eup %3032  ;;  %v1104_v26 = vadd.f32 1.0, %v3031_v24 }
 0x396   :  { %3034 = vrcp.f32 %v1063_v23  ;;  %v1064_v28 = vadd.f32 1.0, %v3033_v25  ;;  %v1076_v42 = vand.u32 2147483648, %v1063_v23  ;;  %vm1070_vm7 = vweird.f32 %v1063_v23 }
 0x397   :  { %v1108_v60 = vmul.f32 %v3027_v52, %v1107_v59  ;;  %3036 = vrcp.f32 %v1104_v26  ;;  %v1074_v22 = vand.u32 2147483647, %v1063_v23  ;;  %vm1125_vm12 = vweird.f32 %v1104_v26 }
 0x398   :  { %3038 = vrcp.f32 %v1064_v28  ;;  %v1077_v47 = vor.u32 1.1754944e-38, %v1076_v42  ;;  %v1091_v15 = vand.u32 2147483648, %v1064_v28  ;;  %v1131_v56 = vand.u32 2147483648, %v1104_v26 }
 0x399   :  { %v1109_v2 = vadd.f32 %v3027_v52, %v1108_v60  ;;  %vm1075_vm9 = vcmp.eq.f32.partialorder %v1074_v22, 8.507059e+37  ;;  %vm1085_vm13 = vweird.f32 %v1064_v28  ;;  %v1129_v57 = vand.u32 2147483647, %v1104_v26 }
 0x39a   :  { %v1132_v3 = vor.u32 1.1754944e-38, %v1131_v56 }
 0x39b   :  { %v1113_v8 = vsel %vm1112_vm4, %v3027_v52, %v1109_v2  ;;  %v1089_v52 = vand.u32 2147483647, %v1064_v28  ;;  %v1092_v2 = vor.u32 1.1754944e-38, %v1091_v15  ;;  %vm1130_vm2 = vcmp.eq.f32.partialorder %v1129_v57, 8.507059e+37 }
 0x39c   :  { %v3604_v11 = vsel %vm1115_vm5, %v1117_v10, %v1113_v8  ;;  %v3035_v27 = vpop.eup %3034 }
 0x39d   :  { %v1066_v5 = vmul.f32 %v3035_v27, %v1063_v23  ;;  %v3037_v29 = vpop.eup %3036  ;;  %vm1071_vm6 = vweird.f32 %v3035_v27  ;;  %vm1090_vm1 = vcmp.eq.f32.partialorder %v1089_v52, 8.507059e+37  ;;  %v1171_v14 = vmul.f32 %v3604_v11, %v3575_v6 }
 0x39e   :  { %v3039_v31 = vpop.eup %3038  ;;  %v1121_v38 = vmul.f32 %v3037_v29, %v1104_v26  ;;  %vm1072_vm8 = vmor %vm1070_vm7, %vm1071_vm6  ;;  %vm1126_vm10 = vweird.f32 %v3037_v29 }
 0x39f   :  { %v1067_v30 = vsub.f32 1.0, %v1066_v5  ;;  %v1081_v17 = vmul.f32 %v3039_v31, %v1064_v28  ;;  %vm1086_vm11 = vweird.f32 %v3039_v31  ;;  %vm1127_vm14 = vmor %vm1125_vm12, %vm1126_vm10 }
 0x3a0   :  { %v1122_v7 = vsub.f32 1.0, %v1121_v38  ;;  %vm1087_vm15 = vmor %vm1085_vm13, %vm1086_vm11 }
 0x3a1   :  { %v1068_v32 = vmul.f32 %v3035_v27, %v1067_v30  ;;  %v1082_v40 = vsub.f32 1.0, %v1081_v17 }
 0x3a2   :  { %v1123_v46 = vmul.f32 %v3037_v29, %v1122_v7 }
 0x3a3   :  { %v1069_v39 = vadd.f32 %v3035_v27, %v1068_v32  ;;  %v1083_v44 = vmul.f32 %v3039_v31, %v1082_v40 }
 0x3a4   :  { %v1124_v54 = vadd.f32 %v3037_v29, %v1123_v46 }
 0x3a5   :  { %v1073_v43 = vsel %vm1072_vm8, %v3035_v27, %v1069_v39  ;;  %v1084_v37 = vadd.f32 %v3039_v31, %v1083_v44 }
 0x3a6   :  { %v1078_v50 = vsel %vm1075_vm9, %v1077_v47, %v1073_v43  ;;  %v1128_v60 = vsel %vm1127_vm14, %v3037_v29, %v1124_v54  ;;  %v3640_v47 = vld [vmem:[%s3975_s5 + $0x8] sm:$0xff] }
 0x3a7   :  { %v1088_v59 = vsel %vm1087_vm15, %v3039_v31, %v1084_v37  ;;  %v1133_v10 = vsel %vm1130_vm2, %v1132_v3, %v1128_v60  ;;  %v1137_v6 = vmul.f32 %v1078_v50, %v3567_v41  ;;  %v2923_v60 = vunpack.c.h.bf16 %v3516_v19 }
 0x3a8   :  { %v1093_v8 = vsel %vm1090_vm1, %v1092_v2, %v1088_v59  ;;  %v1172_v29 = vmul.f32 %v1133_v10, %v3571_v58  ;;  %v2919_v59 = vunpack.c.h.bf16 %v3502_v33 }
 0x3a9   :  { %v1138_v24 = vmul.f32 %v1093_v8, %v3577_v9  ;;  %v1241_v2 = vadd.f32 %v3535_v61, %v2923_v60 }
 0x3b2   :  { %v1176_v0 = vpop.permute.xlu2 %1175 }
 0x3b3   :  { %v1181_v12 = vmul.f32 %v1176_v0, %v3604_v11 }
 0x3b5   :  { %1185 = vrot.lane.b32.xlu0 %v1181_v12, %s3247_s0 }
 0x3f3   :  { %v1142_v51 = vpop.permute.xlu0 %1141 }
 0x3f4   :  { %v1147_v53 = vmul.f32 %v1142_v51, %v1078_v50  ;;  %v2918_v51 = vunpack.c.l.bf16 %v3502_v33 }
 0x3f6   :  { %1151 = vrot.lane.b32.xlu1 %v1147_v53, %s3247_s0  ;;  %v2922_v53 = vunpack.c.l.bf16 %v3516_v19  ;;  %v1210_v37 = vadd.f32 %v3526_v45, %v2918_v51 }
 0x3f8   :  { %v1240_v54 = vadd.f32 %v3535_v61, %v2922_v53 }
 0x3fb   :  { %v1144_v4 = vpop.permute.xlu1 %1143  ;;  %v1178_v0 = vpop.permute.xlu0 %1177 }
 0x3fc   :  { %v1148_v12 = vmul.f32 %v1144_v4, %v1093_v8  ;;  %v1182_v13 = vmul.f32 %v1178_v0, %v1133_v10 }
 0x3fe   :  { %1153 = vrot.lane.b32.xlu2 %v1148_v12, %s3247_s0  ;;  %1187 = vrot.lane.b32.xlu1 %v1182_v13, %s3247_s0 }
 0x427   :  { %v1186_v20 = vpop.permute.xlu0 %1185 }
 0x428   :  { %v3613_v21 = vadd.f32 %v1186_v20, %v1171_v14 }
 0x42a   :  { %3040 = vtanh.f32 %v3613_v21 }
 0x430   :  { %v3041_v23 = vpop.eup %3040 }
 0x431   :  { %1197 = vrot.lane.b32.xlu1 %v3041_v23, %s3247_s0 }
 0x458   :  { %v1154_v25 = vpop.permute.xlu2 %1153 }
 0x459   :  { %v3618_v26 = vadd.f32 %v1154_v25, %v1138_v24 }
 0x45b   :  { %3042 = vtanh.f32 %v3618_v26 }
 0x461   :  { %v3043_v28 = vpop.eup %3042 }
 0x462   :  { %1165 = vrot.lane.b32.xlu0 %v3043_v28, %s3247_s0 }
 0x468   :  { %v1152_v27 = vpop.permute.xlu1 %1151 }
 0x469   :  { %v3623_v5 = vadd.f32 %v1152_v27, %v1137_v6 }
 0x46b   :  { %3044 = vtanh.f32 %v3623_v5 }
 0x470   :  { %v1188_v30 = vpop.permute.xlu1 %1187 }
 0x471   :  { %v3045_v31 = vpop.eup %3044  ;;  %v3627_v9 = vadd.f32 %v1188_v30, %v1172_v29 }
 0x472   :  { %1163 = vrot.lane.b32.xlu2 %v3045_v31, %s3247_s0 }
 0x473   :  { %3046 = vtanh.f32 %v3627_v9 }
 0x479   :  { %v3047_v32 = vpop.eup %3046 }
 0x47a   :  { %1199 = vrot.lane.b32.xlu2 %v3047_v32, %s3247_s0 }
 0x4a3   :  { %v1198_v41 = vpop.permute.xlu1 %1197 }
 0x4a4   :  { %v1203_v40 = vmul.f32 %v1198_v41, %v3604_v11  ;;  %v3646_v11 = vld [vmem:[%s3975_s5 + $0x18] sm:$0xff] }
 0x4cc   :  { %v1164_v17 = vpop.permute.xlu2 %1163 }
 0x4cd   :  { %v1169_v7 = vmul.f32 %v1164_v17, %v1078_v50  ;;  %v3652_v50 = vld [vmem:[%s3975_s5] sm:$0xff] }
 0x4d4   :  { %v1200_v38 = vpop.permute.xlu2 %1199  ;;  %v1166_v39 = vpop.permute.xlu0 %1165 }
 0x4d5   :  { %v1204_v42 = vmul.f32 %v1200_v38, %v1133_v10  ;;  %v1170_v58 = vmul.f32 %v1166_v39, %v1093_v8 }
 0x4d7   :  { %v1242_v22 = vpack.c.bf16 %v1204_v42, %v1203_v40  ;;  %v1212_v43 = vpack.c.bf16 %v1170_v58, %v1169_v7 }
 0x4d9   :  { %1244 = vrot.lane.b32.xlu1 %v1242_v22, %s3248_s18  ;;  %1214 = vrot.lane.b32.xlu0 %v1212_v43, %s3248_s18 }
 0x54b   :  { %v1245_v44 = vpop.permute.xlu1 %1244  ;;  %v1215_v46 = vpop.permute.xlu0 %1214 }
 0x54c   :  { %2738 = vmatmul.msk.bf16.vlgmr.msra.gmra.mxu0 %vm187_vm0, %v1215_v46  ;;  %2739 = vmatmul.msk.bf16.vlgmr.msra.gmra.mxu1 %vm187_vm0, %v1245_v44 }
 0x54d   :  { %2057 = vmatpush.bf16.msra.mxu0 %v3640_v47  ;;  %2087 = vmatpush.bf16.msra.mxu1 %v3646_v11 }
 0x551   :  { %2058 = vmatpush.bf16.msra.mxu0 %v3652_v50  ;;  %2088 = vmatpush.bf16.msra.mxu1 %v3437_v35  ;;  %v1211_v35 = vadd.f32 %v3526_v45, %v2919_v59 }
 0x5c9   :  { %v1228_v15 = vpop.f32.mrf.mxu0  ;;  %v1258_v56 = vpop.f32.mrf.mxu1 }
 0x5ca   :  { %v1233_v52 = vadd.f32 %v1228_v15, %v1210_v37  ;;  %v1263_v57 = vadd.f32 %v1258_v56, %v1240_v54 }
 0x5cc   :  { %3048 = vtanh.f32 %v1233_v52  ;;  %v2740_v19 = vmul.f32 -1.442695, %v1233_v52  ;;  %v2742_v6 = vmul.f32 -1.442695, %v1263_v57 }
 0x5cd   :  { %3050 = vtanh.f32 %v1263_v57 }
 0x5d1   :  { %v1230_v3 = vpop.f32.mrf.mxu0  ;;  %v1260_v4 = vpop.f32.mrf.mxu1 }
 0x5d2   :  { %v3049_v8 = vpop.eup %3048  ;;  %v1234_v10 = vadd.f32 %v1230_v3, %v1211_v35  ;;  %v1264_v0 = vadd.f32 %v1260_v4, %v1241_v2 }
 0x5d3   :  { %v3051_v12 = vpop.eup %3050  ;;  %1349 = vrot.lane.b32.xlu2 %v3049_v8, %s3247_s0 }
 0x5d4   :  { %3052 = vtanh.f32 %v1234_v10  ;;  %1383 = vrot.lane.b32.xlu1 %v3051_v12, %s3247_s0  ;;  %v2743_v14 = vmul.f32 -1.442695, %v1264_v0  ;;  %v2741_v31 = vmul.f32 -1.442695, %v1234_v10 }
 0x5d5   :  { %3054 = vtanh.f32 %v1264_v0 }
 0x5d6   :  { %3056 = vpow2.f32 %v2740_v19 }
 0x5d7   :  { %3058 = vpow2.f32 %v2743_v14 }
 0x5da   :  { %v3053_v33 = vpop.eup %3052 }
 0x5db   :  { %v3055_v13 = vpop.eup %3054  ;;  %1351 = vrot.lane.b32.xlu0 %v3053_v33, %s3247_s0 }
 0x5dc   :  { %1385 = vrot.lane.b32.xlu2 %v3055_v13, %s3247_s0  ;;  %v3057_v20 = vpop.eup %3056 }
 0x5dd   :  { %v1271_v23 = vadd.f32 1.0, %v3057_v20  ;;  %v3059_v24 = vpop.eup %3058 }
 0x5de   :  { %v1312_v25 = vadd.f32 1.0, %v3059_v24 }
 0x5df   :  { %3060 = vrcp.f32 %v1271_v23  ;;  %v1284_v40 = vand.u32 2147483648, %v1271_v23  ;;  %vm1278_vm4 = vweird.f32 %v1271_v23  ;;  %v1282_v42 = vand.u32 2147483647, %v1271_v23 }
 0x5e0   :  { %3062 = vrcp.f32 %v1312_v25  ;;  %v1339_v56 = vand.u32 2147483648, %v1312_v25  ;;  %vm1333_vm8 = vweird.f32 %v1312_v25  ;;  %v1337_v52 = vand.u32 2147483647, %v1312_v25 }
 0x5e1   :  { %3064 = vpow2.f32 %v2742_v6  ;;  %v1285_v43 = vor.u32 1.1754944e-38, %v1284_v40  ;;  %vm1283_vm6 = vcmp.eq.f32.partialorder %v1282_v42, 8.507059e+37 }
 0x5e2   :  { %3066 = vpow2.f32 %v2741_v31  ;;  %v1340_v60 = vor.u32 1.1754944e-38, %v1339_v56  ;;  %vm1338_vm10 = vcmp.eq.f32.partialorder %v1337_v52, 8.507059e+37 }
 0x5e5   :  { %v3061_v28 = vpop.eup %3060 }
 0x5e6   :  { %v1274_v27 = vmul.f32 %v3061_v28, %v1271_v23  ;;  %v3063_v30 = vpop.eup %3062  ;;  %vm1279_vm3 = vweird.f32 %v3061_v28 }
 0x5e7   :  { %v3065_v17 = vpop.eup %3064  ;;  %v1329_v41 = vmul.f32 %v3063_v30, %v1312_v25  ;;  %vm1280_vm5 = vmor %vm1278_vm4, %vm1279_vm3  ;;  %vm1334_vm7 = vweird.f32 %v3063_v30 }
 0x5e8   :  { %v1275_v29 = vsub.f32 1.0, %v1274_v27  ;;  %v1311_v38 = vadd.f32 1.0, %v3065_v17  ;;  %v3067_v58 = vpop.eup %3066  ;;  %vm1335_vm9 = vmor %vm1333_vm8, %vm1334_vm7 }
 0x5e9   :  { %v1330_v7 = vsub.f32 1.0, %v1329_v41  ;;  %v1272_v46 = vadd.f32 1.0, %v3067_v58 }
 0x5ea   :  { %v1276_v32 = vmul.f32 %v3061_v28, %v1275_v29  ;;  %3068 = vrcp.f32 %v1311_v38  ;;  %v1324_v13 = vand.u32 2147483648, %v1311_v38  ;;  %vm1318_vm12 = vweird.f32 %v1311_v38 }
 0x5eb   :  { %v1331_v44 = vmul.f32 %v3063_v30, %v1330_v7  ;;  %3070 = vrcp.f32 %v1272_v46  ;;  %v1322_v19 = vand.u32 2147483647, %v1311_v38  ;;  %v1299_v27 = vand.u32 2147483648, %v1272_v46 }
 0x5ec   :  { %v1277_v39 = vadd.f32 %v3061_v28, %v1276_v32  ;;  %v1325_v23 = vor.u32 1.1754944e-38, %v1324_v13  ;;  %vm1293_vm1 = vweird.f32 %v1272_v46  ;;  %v1297_v29 = vand.u32 2147483647, %v1272_v46 }
 0x5ed   :  { %v1332_v54 = vadd.f32 %v3063_v30, %v1331_v44  ;;  %vm1323_vm14 = vcmp.eq.f32.partialorder %v1322_v19, 8.507059e+37  ;;  %v1300_v31 = vor.u32 1.1754944e-38, %v1299_v27 }
 0x5ee   :  { %v1281_v22 = vsel %vm1280_vm5, %v3061_v28, %v1277_v39  ;;  %vm1298_vm3 = vcmp.eq.f32.partialorder %v1297_v29, 8.507059e+37 }
 0x5ef   :  { %v3668_v53 = vsel %vm1283_vm6, %v1285_v43, %v1281_v22  ;;  %v1336_v57 = vsel %vm1335_vm9, %v3063_v30, %v1332_v54 }
 0x5f0   :  { %v3069_v15 = vpop.eup %3068  ;;  %v3672_v35 = vsel %vm1338_vm10, %v1340_v60, %v1336_v57 }
 0x5f1   :  { %v1314_v59 = vmul.f32 %v3069_v15, %v1311_v38  ;;  %v3071_v3 = vpop.eup %3070  ;;  %vm1319_vm11 = vweird.f32 %v3069_v15  ;;  %v1345_v38 = vmul.f32 %v3668_v53, %v3623_v5  ;;  %v1380_v22 = vmul.f32 %v3672_v35, %v3627_v9 }
 0x5f2   :  { %v1289_v10 = vmul.f32 %v3071_v3, %v1272_v46  ;;  %vm1320_vm13 = vmor %vm1318_vm12, %vm1319_vm11  ;;  %vm1294_vm15 = vweird.f32 %v3071_v3 }
 0x5f3   :  { %v1315_v8 = vsub.f32 1.0, %v1314_v59  ;;  %vm1295_vm2 = vmor %vm1293_vm1, %vm1294_vm15 }
 0x5f4   :  { %v1290_v12 = vsub.f32 1.0, %v1289_v10 }
 0x5f5   :  { %v1316_v0 = vmul.f32 %v3069_v15, %v1315_v8 }
 0x5f6   :  { %v1291_v14 = vmul.f32 %v3071_v3, %v1290_v12 }
 0x5f7   :  { %v1317_v33 = vadd.f32 %v3069_v15, %v1316_v0 }
 0x5f8   :  { %v1292_v28 = vadd.f32 %v3071_v3, %v1291_v14 }
 0x5f9   :  { %v1321_v20 = vsel %vm1320_vm13, %v3069_v15, %v1317_v33 }
 0x5fa   :  { %v1326_v25 = vsel %vm1323_vm14, %v1325_v23, %v1321_v20  ;;  %v1296_v30 = vsel %vm1295_vm2, %v3071_v3, %v1292_v28  ;;  %v2930_v20 = vunpack.c.l.bf16 %v3512_v63 }
 0x5fb   :  { %v1301_v17 = vsel %vm1298_vm3, %v1300_v31, %v1296_v30  ;;  %v1379_v39 = vmul.f32 %v1326_v25, %v3613_v21 }
 0x5fc   :  { %v1346_v5 = vmul.f32 %v1301_v17, %v3618_v26  ;;  %v1448_v23 = vadd.f32 %v3535_v61, %v2930_v20 }
 0x62d   :  { %v1350_v51 = vpop.permute.xlu2 %1349 }
 0x62e   :  { %v1355_v37 = vmul.f32 %v1350_v51, %v3668_v53 }
 0x630   :  { %1359 = vrot.lane.b32.xlu0 %v1355_v37, %s3247_s0 }
 0x636   :  { %v1386_v2 = vpop.permute.xlu2 %1385 }
 0x637   :  { %v1390_v4 = vmul.f32 %v1386_v2, %v3672_v35 }
 0x639   :  { %1395 = vrot.lane.b32.xlu0 %v1390_v4, %s3247_s0 }
 0x646   :  { %v1384_v24 = vpop.permute.xlu1 %1383 }
 0x647   :  { %v1389_v6 = vmul.f32 %v1384_v24, %v1326_v25 }
 0x649   :  { %1393 = vrot.lane.b32.xlu2 %v1389_v6, %s3247_s0 }
 0x64d   :  { %v1352_v32 = vpop.permute.xlu0 %1351 }
 0x64e   :  { %v1356_v41 = vmul.f32 %v1352_v32, %v1301_v17 }
 0x650   :  { %1361 = vrot.lane.b32.xlu1 %v1356_v41, %s3247_s0 }
 0x6a2   :  { %v1360_v40 = vpop.permute.xlu0 %1359 }
 0x6a3   :  { %v1394_v7 = vpop.permute.xlu2 %1393  ;;  %v3681_v42 = vadd.f32 %v1360_v40, %v1345_v38 }
 0x6a4   :  { %v3683_v58 = vadd.f32 %v1394_v7, %v1379_v39 }
 0x6a5   :  { %3072 = vtanh.f32 %v3681_v42 }
 0x6a6   :  { %3074 = vtanh.f32 %v3683_v58 }
 0x6ab   :  { %v3073_v43 = vpop.eup %3072  ;;  %v1396_v44 = vpop.permute.xlu0 %1395 }
 0x6ac   :  { %v3075_v46 = vpop.eup %3074  ;;  %v3689_v51 = vadd.f32 %v1396_v44, %v1380_v22  ;;  %1371 = vrot.lane.b32.xlu1 %v3073_v43, %s3247_s0 }
 0x6ad   :  { %1405 = vrot.lane.b32.xlu0 %v3075_v46, %s3247_s0 }
 0x6ae   :  { %3076 = vtanh.f32 %v3689_v51 }
 0x6b4   :  { %v3077_v21 = vpop.eup %3076 }
 0x6b5   :  { %1407 = vrot.lane.b32.xlu1 %v3077_v21, %s3247_s0 }
 0x6c2   :  { %v1362_v37 = vpop.permute.xlu1 %1361 }
 0x6c3   :  { %v3696_v54 = vadd.f32 %v1362_v37, %v1346_v5 }
 0x6c5   :  { %3078 = vtanh.f32 %v3696_v54 }
 0x6cb   :  { %v3079_v9 = vpop.eup %3078 }
 0x6cc   :  { %1373 = vrot.lane.b32.xlu2 %v3079_v9, %s3247_s0 }
 0x71e   :  { %v1372_v15 = vpop.permute.xlu1 %1371 }
 0x71f   :  { %v1406_v56 = vpop.permute.xlu0 %1405  ;;  %v1377_v57 = vmul.f32 %v1372_v15, %v3668_v53  ;;  %v3243_v53 = vld [vmem:[%s3975_s5 + $0x10] sm:$0xff] }
 0x720   :  { %v1411_v2 = vmul.f32 %v1406_v56, %v1326_v25 }
 0x726   :  { %v1374_v52 = vpop.permute.xlu2 %1373 }
 0x727   :  { %v1408_v59 = vpop.permute.xlu1 %1407  ;;  %v1378_v60 = vmul.f32 %v1374_v52, %v1301_v17 }
 0x728   :  { %v1412_v3 = vmul.f32 %v1408_v59, %v3672_v35  ;;  %v2926_v35 = vunpack.c.l.bf16 %v3506_v48 }
 0x729   :  { %v1420_v4 = vpack.c.bf16 %v1378_v60, %v1377_v57 }
 0x72a   :  { %v1450_v26 = vpack.c.bf16 %v1412_v3, %v1411_v2  ;;  %v1418_v0 = vadd.f32 %v3526_v45, %v2926_v35 }
 0x72b   :  { %1422 = vrot.lane.b32.xlu2 %v1420_v4, %s3248_s18 }
 0x72c   :  { %1452 = vrot.lane.b32.xlu0 %v1450_v26, %s3248_s18 }
 0x785   :  { %v1423_v8 = vpop.permute.xlu2 %1422 }
 0x786   :  { %2744 = vmatmul.msk.bf16.vlgmr.msra.gmra.mxu2 %vm187_vm0, %v1423_v8 }
 0x787   :  { %2265 = vmatpush.bf16.msra.mxu2 %v3640_v47  ;;  %v2927_v47 = vunpack.c.h.bf16 %v3506_v48  ;;  %v2931_v48 = vunpack.c.h.bf16 %v3512_v63 }
 0x78b   :  { %2266 = vmatpush.bf16.msra.mxu2 %v3652_v50  ;;  %v1419_v50 = vadd.f32 %v3526_v45, %v2927_v47  ;;  %v1449_v45 = vadd.f32 %v3535_v61, %v2931_v48 }
 0x79e   :  { %v1453_v10 = vpop.permute.xlu0 %1452 }
 0x79f   :  { %2745 = vmatmul.msk.bf16.vlgmr.msra.gmra.mxu3 %vm187_vm0, %v1453_v10 }
 0x7a0   :  { %2294 = vmatpush.bf16.msra.mxu3 %v3646_v11 }
 0x7a4   :  { %2295 = vmatpush.bf16.msra.mxu3 %v3243_v53 }
 0x809   :  { %v1436_v12 = vpop.f32.mrf.mxu2 }
 0x80a   :  { %v1441_v33 = vadd.f32 %v1436_v12, %v1418_v0 }
 0x80c   :  { %3080 = vtanh.f32 %v1441_v33  ;;  %v2746_v17 = vmul.f32 -1.442695, %v1441_v33 }
 0x811   :  { %v1438_v13 = vpop.f32.mrf.mxu2 }
 0x812   :  { %v3081_v19 = vpop.eup %3080  ;;  %v1442_v14 = vadd.f32 %v1438_v13, %v1419_v50 }
 0x813   :  { %1557 = vrot.lane.b32.xlu1 %v3081_v19, %s3247_s0 }
 0x814   :  { %3082 = vtanh.f32 %v1442_v14  ;;  %v2747_v30 = vmul.f32 -1.442695, %v1442_v14 }
 0x81a   :  { %v3083_v11 = vpop.eup %3082 }
 0x81b   :  { %1559 = vrot.lane.b32.xlu2 %v3083_v11, %s3247_s0 }
 0x822   :  { %v1466_v24 = vpop.f32.mrf.mxu3 }
 0x823   :  { %v1471_v25 = vadd.f32 %v1466_v24, %v1448_v23 }
 0x825   :  { %3084 = vtanh.f32 %v1471_v25  ;;  %v2748_v46 = vmul.f32 -1.442695, %v1471_v25 }
 0x82a   :  { %v1468_v28 = vpop.f32.mrf.mxu3 }
 0x82b   :  { %v3085_v6 = vpop.eup %3084  ;;  %v1472_v27 = vadd.f32 %v1468_v28, %v1449_v45 }
 0x82c   :  { %1591 = vrot.lane.b32.xlu0 %v3085_v6, %s3247_s0 }
 0x82d   :  { %3086 = vtanh.f32 %v1472_v27  ;;  %v2749_v57 = vmul.f32 -1.442695, %v1472_v27 }
 0x82e   :  { %3088 = vpow2.f32 %v2747_v30 }
 0x833   :  { %v3087_v29 = vpop.eup %3086 }
 0x834   :  { %1593 = vrot.lane.b32.xlu1 %v3087_v29, %s3247_s0  ;;  %v3089_v31 = vpop.eup %3088 }
 0x835   :  { %v1480_v32 = vadd.f32 1.0, %v3089_v31 }
 0x837   :  { %3090 = vrcp.f32 %v1480_v32  ;;  %v1507_v43 = vand.u32 2147483648, %v1480_v32  ;;  %vm1501_vm5 = vweird.f32 %v1480_v32  ;;  %v1505_v44 = vand.u32 2147483647, %v1480_v32 }
 0x838   :  { %3092 = vpow2.f32 %v2746_v17 }
 0x839   :  { %v1508_v37 = vor.u32 1.1754944e-38, %v1507_v43  ;;  %vm1506_vm7 = vcmp.eq.f32.partialorder %v1505_v44, 8.507059e+37 }
 0x83d   :  { %v3091_v41 = vpop.eup %3090 }
 0x83e   :  { %v3093_v63 = vpop.eup %3092  ;;  %v1497_v38 = vmul.f32 %v3091_v41, %v1480_v32  ;;  %vm1502_vm4 = vweird.f32 %v3091_v41 }
 0x83f   :  { %v1479_v61 = vadd.f32 1.0, %v3093_v63  ;;  %vm1503_vm6 = vmor %vm1501_vm5, %vm1502_vm4 }
 0x840   :  { %v1498_v39 = vsub.f32 1.0, %v1497_v38 }
 0x841   :  { %3094 = vrcp.f32 %v1479_v61  ;;  %v1492_v4 = vand.u32 2147483648, %v1479_v61  ;;  %vm1486_vm9 = vweird.f32 %v1479_v61  ;;  %v1490_v26 = vand.u32 2147483647, %v1479_v61 }
 0x842   :  { %v1499_v40 = vmul.f32 %v3091_v41, %v1498_v39  ;;  %3096 = vpow2.f32 %v2748_v46 }
 0x843   :  { %3098 = vpow2.f32 %v2749_v57  ;;  %v1493_v53 = vor.u32 1.1754944e-38, %v1492_v4  ;;  %vm1491_vm11 = vcmp.eq.f32.partialorder %v1490_v26, 8.507059e+37 }
 0x844   :  { %v1500_v7 = vadd.f32 %v3091_v41, %v1499_v40 }
 0x846   :  { %v1504_v21 = vsel %vm1503_vm6, %v3091_v41, %v1500_v7 }
 0x847   :  { %v3095_v22 = vpop.eup %3094  ;;  %v3724_v15 = vsel %vm1506_vm7, %v1508_v37, %v1504_v21 }
 0x848   :  { %v1482_v5 = vmul.f32 %v3095_v22, %v1479_v61  ;;  %v3097_v60 = vpop.eup %3096  ;;  %vm1487_vm8 = vweird.f32 %v3095_v22 }
 0x849   :  { %v1519_v2 = vadd.f32 1.0, %v3097_v60  ;;  %vm1488_vm10 = vmor %vm1486_vm9, %vm1487_vm8  ;;  %v3099_v10 = vpop.eup %3098 }
 0x84a   :  { %v1483_v52 = vsub.f32 1.0, %v1482_v5  ;;  %v1520_v12 = vadd.f32 1.0, %v3099_v10 }
 0x84b   :  { %3100 = vrcp.f32 %v1519_v2  ;;  %v1532_v24 = vand.u32 2147483648, %v1519_v2  ;;  %vm1526_vm13 = vweird.f32 %v1519_v2  ;;  %v1530_v25 = vand.u32 2147483647, %v1519_v2 }
 0x84c   :  { %v1484_v59 = vmul.f32 %v3095_v22, %v1483_v52  ;;  %3102 = vrcp.f32 %v1520_v12  ;;  %v1547_v31 = vand.u32 2147483648, %v1520_v12  ;;  %vm1541_vm2 = vweird.f32 %v1520_v12 }
 0x84d   :  { %v1533_v28 = vor.u32 1.1754944e-38, %v1532_v24  ;;  %vm1531_vm15 = vcmp.eq.f32.partialorder %v1530_v25, 8.507059e+37  ;;  %v1545_v32 = vand.u32 2147483647, %v1520_v12 }
 0x84e   :  { %v1485_v3 = vadd.f32 %v3095_v22, %v1484_v59  ;;  %v1548_v41 = vor.u32 1.1754944e-38, %v1547_v31 }
 0x84f   :  { %vm1546_vm4 = vcmp.eq.f32.partialorder %v1545_v32, 8.507059e+37 }
 0x850   :  { %v1489_v8 = vsel %vm1488_vm10, %v3095_v22, %v1485_v3  ;;  %v1554_v22 = vmul.f32 %v3724_v15, %v3696_v54 }
 0x851   :  { %v3728_v0 = vsel %vm1491_vm11, %v1493_v53, %v1489_v8  ;;  %v3101_v47 = vpop.eup %3100 }
 0x852   :  { %v1522_v50 = vmul.f32 %v3101_v47, %v1519_v2  ;;  %v3103_v19 = vpop.eup %3102  ;;  %vm1527_vm12 = vweird.f32 %v3101_v47  ;;  %v1553_v39 = vmul.f32 %v3728_v0, %v3681_v42 }
 0x853   :  { %v1537_v11 = vmul.f32 %v3103_v19, %v1520_v12  ;;  %vm1528_vm14 = vmor %vm1526_vm13, %vm1527_vm12  ;;  %vm1542_vm1 = vweird.f32 %v3103_v19  ;;  %v3767_v12 = vld [vmem:[%s3980_s6] ss:$0 sm:$0xff] }
 0x854   :  { %v1523_v13 = vsub.f32 1.0, %v1522_v50  ;;  %vm1543_vm3 = vmor %vm1541_vm2, %vm1542_vm1  ;;  %v3773_v50 = vld [vmem:[%s3980_s6 + $0x1] ss:$0 sm:$0xff]  ;;  %s3249_s6 = smov 96  }
 0x855   :  { %v1538_v23 = vsub.f32 1.0, %v1537_v11 }
 0x856   :  { %v1524_v14 = vmul.f32 %v3101_v47, %v1523_v13 }
 0x857   :  { %v1539_v45 = vmul.f32 %v3103_v19, %v1538_v23  ;;  %v2939_v23 = vunpack.c.h.bf16 %v3508_v49 }
 0x858   :  { %v1525_v20 = vadd.f32 %v3101_v47, %v1524_v14 }
 0x859   :  { %v1540_v30 = vadd.f32 %v3103_v19, %v1539_v45 }
 0x85a   :  { %v1529_v48 = vsel %vm1528_vm14, %v3101_v47, %v1525_v20  ;;  %v2935_v20 = vunpack.c.h.bf16 %v3510_v62 }
 0x85b   :  { %v1534_v27 = vsel %vm1531_vm15, %v1533_v28, %v1529_v48  ;;  %v1544_v17 = vsel %vm1543_vm3, %v3103_v19, %v1540_v30  ;;  %v1657_v48 = vadd.f32 %v3773_v50, %v2939_v23 }
 0x85c   :  { %v1549_v63 = vsel %vm1546_vm4, %v1548_v41, %v1544_v17  ;;  %v1587_v54 = vmul.f32 %v1534_v27, %v3683_v58  ;;  %v1627_v24 = vadd.f32 %v3767_v12, %v2935_v20 }
 0x85d   :  { %v1588_v42 = vmul.f32 %v1549_v63, %v3689_v51 }
 0x875   :  { %v1560_v9 = vpop.permute.xlu2 %1559 }
 0x876   :  { %v1564_v56 = vmul.f32 %v1560_v9, %v3724_v15 }
 0x878   :  { %1569 = vrot.lane.b32.xlu0 %v1564_v56, %s3247_s0 }
 0x885   :  { %v1558_v35 = vpop.permute.xlu1 %1557 }
 0x886   :  { %v1563_v33 = vmul.f32 %v1558_v35, %v3728_v0 }
 0x888   :  { %1567 = vrot.lane.b32.xlu2 %v1563_v33, %s3247_s0 }
 0x89e   :  { %v1592_v6 = vpop.permute.xlu0 %1591 }
 0x89f   :  { %v1597_v29 = vmul.f32 %v1592_v6, %v1534_v27 }
 0x8a1   :  { %1601 = vrot.lane.b32.xlu1 %v1597_v29, %s3247_s0 }
 0x8a6   :  { %v1594_v38 = vpop.permute.xlu1 %1593 }
 0x8a7   :  { %v1598_v61 = vmul.f32 %v1594_v38, %v1549_v63 }
 0x8a9   :  { %1603 = vrot.lane.b32.xlu2 %v1598_v61, %s3247_s0 }
 0x8e2   :  { %v1568_v40 = vpop.permute.xlu2 %1567 }
 0x8e3   :  { %v3736_v7 = vadd.f32 %v1568_v40, %v1553_v39 }
 0x8e5   :  { %3104 = vtanh.f32 %v3736_v7 }
 0x8ea   :  { %v1570_v43 = vpop.permute.xlu0 %1569 }
 0x8eb   :  { %v3105_v44 = vpop.eup %3104  ;;  %v3741_v46 = vadd.f32 %v1570_v43, %v1554_v22 }
 0x8ec   :  { %1579 = vrot.lane.b32.xlu0 %v3105_v44, %s3247_s0 }
 0x8ed   :  { %3106 = vtanh.f32 %v3741_v46 }
 0x8f3   :  { %v3107_v21 = vpop.eup %3106 }
 0x8f4   :  { %1581 = vrot.lane.b32.xlu1 %v3107_v21, %s3247_s0 }
 0x903   :  { %v1604_v5 = vpop.permute.xlu2 %1603 }
 0x904   :  { %v3747_v37 = vadd.f32 %v1604_v5, %v1588_v42 }
 0x906   :  { %3108 = vtanh.f32 %v3747_v37 }
 0x90c   :  { %v3109_v9 = vpop.eup %3108 }
 0x90d   :  { %1615 = vrot.lane.b32.xlu0 %v3109_v9, %s3247_s0 }
 0x913   :  { %v1602_v56 = vpop.permute.xlu1 %1601 }
 0x914   :  { %v3752_v52 = vadd.f32 %v1602_v56, %v1587_v54 }
 0x916   :  { %3110 = vtanh.f32 %v3752_v52 }
 0x91c   :  { %v3111_v57 = vpop.eup %3110 }
 0x91d   :  { %1613 = vrot.lane.b32.xlu2 %v3111_v57, %s3247_s0 }
 0x95e   :  { %v1580_v59 = vpop.permute.xlu0 %1579 }
 0x95f   :  { %v1585_v60 = vmul.f32 %v1580_v59, %v3728_v0  ;;  %v2934_v0 = vunpack.c.l.bf16 %v3510_v62 }
 0x961   :  { %v1626_v33 = vadd.f32 %v3767_v12, %v2934_v0 }
 0x966   :  { %v1582_v51 = vpop.permute.xlu1 %1581 }
 0x967   :  { %v1586_v2 = vmul.f32 %v1582_v51, %v3724_v15  ;;  %v2938_v15 = vunpack.c.l.bf16 %v3508_v49 }
 0x969   :  { %v1628_v3 = vpack.c.bf16 %v1586_v2, %v1585_v60  ;;  %v1656_v13 = vadd.f32 %v3773_v50, %v2938_v15 }
 0x96b   :  { %1630 = vrot.lane.b32.xlu1 %v1628_v3, %s3248_s18 }
 0x977   :  { %v1614_v4 = vpop.permute.xlu2 %1613 }
 0x978   :  { %v1619_v58 = vmul.f32 %v1614_v4, %v1534_v27 }
 0x97f   :  { %v1616_v26 = vpop.permute.xlu0 %1615 }
 0x980   :  { %v1620_v8 = vmul.f32 %v1616_v26, %v1549_v63 }
 0x982   :  { %v1658_v10 = vpack.c.bf16 %v1620_v8, %v1619_v58 }
 0x984   :  { %1660 = vrot.lane.b32.xlu2 %v1658_v10, %s3248_s18 }
 0x9dd   :  { %v1631_v53 = vpop.permute.xlu1 %1630 }
 0x9de   :  { %v1661_v35 = vpop.permute.xlu2 %1660  ;;  %2750 = vmatmul.msk.bf16.vlgmr.msrb.gmra.mxu0 %vm187_vm0, %v1631_v53 }
 0x9df   :  { %2751 = vmatmul.msk.bf16.vlgmr.msrb.gmra.mxu1 %vm187_vm0, %v1661_v35 }
 0xa5b   :  { %v1644_v47 = vpop.f32.mrf.mxu0 }
 0xa5c   :  { %v1649_v19 = vadd.f32 %v1644_v47, %v1626_v33  ;;  %v1674_v14 = vpop.f32.mrf.mxu1 }
 0xa5d   :  { %v1679_v11 = vadd.f32 %v1674_v14, %v1656_v13 }
 0xa5e   :  { %3112 = vtanh.f32 %v1649_v19  ;;  %v2752_v41 = vmul.f32 -1.442695, %v1649_v19 }
 0xa5f   :  { %3114 = vtanh.f32 %v1679_v11  ;;  %v2754_v49 = vmul.f32 -1.442695, %v1679_v11 }
 0xa63   :  { %v1646_v25 = vpop.f32.mrf.mxu0 }
 0xa64   :  { %v3113_v45 = vpop.eup %3112  ;;  %v1650_v28 = vadd.f32 %v1646_v25, %v1627_v24  ;;  %v1676_v6 = vpop.f32.mrf.mxu1 }
 0xa65   :  { %v3115_v27 = vpop.eup %3114  ;;  %v1680_v29 = vadd.f32 %v1676_v6, %v1657_v48  ;;  %1765 = vrot.lane.b32.xlu0 %v3113_v45, %s3247_s0 }
 0xa66   :  { %3116 = vtanh.f32 %v1650_v28  ;;  %1799 = vrot.lane.b32.xlu2 %v3115_v27, %s3247_s0  ;;  %v2753_v61 = vmul.f32 -1.442695, %v1650_v28 }
 0xa67   :  { %3118 = vtanh.f32 %v1680_v29  ;;  %v2755_v39 = vmul.f32 -1.442695, %v1680_v29 }
 0xa68   :  { %3120 = vpow2.f32 %v2754_v49 }
 0xa6c   :  { %v3117_v62 = vpop.eup %3116 }
 0xa6d   :  { %v3119_v30 = vpop.eup %3118  ;;  %1767 = vrot.lane.b32.xlu1 %v3117_v62, %s3247_s0 }
 0xa6e   :  { %1801 = vrot.lane.b32.xlu0 %v3119_v30, %s3247_s0  ;;  %v3121_v31 = vpop.eup %3120 }
 0xa6f   :  { %v1727_v32 = vadd.f32 1.0, %v3121_v31 }
 0xa71   :  { %3122 = vrcp.f32 %v1727_v32  ;;  %v1740_v21 = vand.u32 2147483648, %v1727_v32  ;;  %vm1734_vm6 = vweird.f32 %v1727_v32  ;;  %v1738_v42 = vand.u32 2147483647, %v1727_v32 }
 0xa72   :  { %3124 = vpow2.f32 %v2752_v41 }
 0xa73   :  { %3126 = vpow2.f32 %v2753_v61  ;;  %v1741_v56 = vor.u32 1.1754944e-38, %v1740_v21  ;;  %vm1739_vm8 = vcmp.eq.f32.partialorder %v1738_v42, 8.507059e+37 }
 0xa74   :  { %3128 = vpow2.f32 %v2755_v39 }
 0xa77   :  { %v3123_v17 = vpop.eup %3122 }
 0xa78   :  { %v1730_v63 = vmul.f32 %v3123_v17, %v1727_v32  ;;  %v3125_v40 = vpop.eup %3124  ;;  %vm1735_vm5 = vweird.f32 %v3123_v17 }
 0xa79   :  { %v1687_v43 = vadd.f32 1.0, %v3125_v40  ;;  %v3127_v5 = vpop.eup %3126  ;;  %vm1736_vm7 = vmor %vm1734_vm6, %vm1735_vm5 }
 0xa7a   :  { %v1731_v38 = vsub.f32 1.0, %v1730_v63  ;;  %v3129_v9 = vpop.eup %3128  ;;  %v1688_v57 = vadd.f32 1.0, %v3127_v5 }
 0xa7b   :  { %3130 = vrcp.f32 %v1687_v43  ;;  %v1728_v59 = vadd.f32 1.0, %v3129_v9  ;;  %v1700_v33 = vand.u32 2147483648, %v1687_v43  ;;  %vm1694_vm10 = vweird.f32 %v1687_v43 }
 0xa7c   :  { %v1732_v22 = vmul.f32 %v3123_v17, %v1731_v38  ;;  %3132 = vrcp.f32 %v1688_v57  ;;  %v1698_v13 = vand.u32 2147483647, %v1687_v43  ;;  %v1715_v28 = vand.u32 2147483648, %v1688_v57 }
 0xa7d   :  { %3134 = vrcp.f32 %v1728_v59  ;;  %v1701_v11 = vor.u32 1.1754944e-38, %v1700_v33  ;;  %v1755_v6 = vand.u32 2147483648, %v1728_v59  ;;  %vm1709_vm15 = vweird.f32 %v1688_v57 }
 0xa7e   :  { %v1733_v44 = vadd.f32 %v3123_v17, %v1732_v22  ;;  %vm1699_vm12 = vcmp.eq.f32.partialorder %v1698_v13, 8.507059e+37  ;;  %v1713_v27 = vand.u32 2147483647, %v1688_v57  ;;  %vm1749_vm1 = vweird.f32 %v1728_v59 }
 0xa7f   :  { %v1753_v29 = vand.u32 2147483647, %v1728_v59  ;;  %v1716_v49 = vor.u32 1.1754944e-38, %v1715_v28  ;;  %v1756_v31 = vor.u32 1.1754944e-38, %v1755_v6  ;;  %v2946_v33 = vunpack.c.l.bf16 %v3504_v34 }
 0xa80   :  { %v1737_v54 = vsel %vm1736_vm7, %v3123_v17, %v1733_v44  ;;  %vm1714_vm4 = vcmp.eq.f32.partialorder %v1713_v27, 8.507059e+37 }
 0xa81   :  { %v3784_v60 = vsel %vm1739_vm8, %v1741_v56, %v1737_v54  ;;  %v3131_v2 = vpop.eup %3130  ;;  %vm1754_vm5 = vcmp.eq.f32.partialorder %v1753_v29, 8.507059e+37  ;;  %v1864_v13 = vadd.f32 %v3773_v50, %v2946_v33 }
 0xa82   :  { %v1690_v4 = vmul.f32 %v3131_v2, %v1687_v43  ;;  %v3133_v58 = vpop.eup %3132  ;;  %vm1695_vm9 = vweird.f32 %v3131_v2  ;;  %v1795_v39 = vmul.f32 %v3784_v60, %v3752_v52 }
 0xa83   :  { %v3135_v8 = vpop.eup %3134  ;;  %v1705_v53 = vmul.f32 %v3133_v58, %v1688_v57  ;;  %vm1696_vm11 = vmor %vm1694_vm10, %vm1695_vm9  ;;  %vm1710_vm13 = vweird.f32 %v3133_v58 }
 0xa84   :  { %v1691_v26 = vsub.f32 1.0, %v1690_v4  ;;  %v1745_v35 = vmul.f32 %v3135_v8, %v1728_v59  ;;  %vm1750_vm14 = vweird.f32 %v3135_v8  ;;  %vm1711_vm2 = vmor %vm1709_vm15, %vm1710_vm13 }
 0xa85   :  { %v1706_v15 = vsub.f32 1.0, %v1705_v53  ;;  %vm1751_vm3 = vmor %vm1749_vm1, %vm1750_vm14 }
 0xa86   :  { %v1692_v10 = vmul.f32 %v3131_v2, %v1691_v26  ;;  %v1746_v47 = vsub.f32 1.0, %v1745_v35 }
 0xa87   :  { %v1707_v14 = vmul.f32 %v3133_v58, %v1706_v15  ;;  %v2942_v15 = vunpack.c.l.bf16 %v3514_v18 }
 0xa88   :  { %v1693_v0 = vadd.f32 %v3131_v2, %v1692_v10  ;;  %v1747_v20 = vmul.f32 %v3135_v8, %v1746_v47 }
 0xa89   :  { %v1708_v48 = vadd.f32 %v3133_v58, %v1707_v14  ;;  %v1834_v47 = vadd.f32 %v3767_v12, %v2942_v15 }
 0xa8a   :  { %v1697_v19 = vsel %vm1696_vm11, %v3131_v2, %v1693_v0  ;;  %v1748_v45 = vadd.f32 %v3135_v8, %v1747_v20  ;;  %v2943_v20 = vunpack.c.h.bf16 %v3514_v18 }
 0xa8b   :  { %v1702_v24 = vsel %vm1699_vm12, %v1701_v11, %v1697_v19  ;;  %v1712_v62 = vsel %vm1711_vm2, %v3133_v58, %v1708_v48 }
 0xa8c   :  { %v1752_v30 = vsel %vm1751_vm3, %v3135_v8, %v1748_v45  ;;  %v1717_v17 = vsel %vm1714_vm4, %v1716_v49, %v1712_v62  ;;  %v1761_v52 = vmul.f32 %v1702_v24, %v3736_v7 }
 0xa8d   :  { %v1757_v41 = vsel %vm1754_vm5, %v1756_v31, %v1752_v30  ;;  %v1762_v43 = vmul.f32 %v1717_v17, %v3741_v46 }
 0xa8e   :  { %v1796_v46 = vmul.f32 %v1757_v41, %v3747_v37 }
 0xac0   :  { %v1800_v51 = vpop.permute.xlu2 %1799 }
 0xac1   :  { %v1805_v3 = vmul.f32 %v1800_v51, %v3784_v60 }
 0xac3   :  { %1809 = vrot.lane.b32.xlu0 %v1805_v3, %s3247_s0 }
 0xad7   :  { %v1766_v23 = vpop.permute.xlu0 %1765 }
 0xad8   :  { %v1771_v25 = vmul.f32 %v1766_v23, %v1702_v24  ;;  %v2947_v23 = vunpack.c.h.bf16 %v3504_v34 }
 0xada   :  { %1775 = vrot.lane.b32.xlu1 %v1771_v25, %s3247_s0  ;;  %v1865_v48 = vadd.f32 %v3773_v50, %v2947_v23 }
 0xadf   :  { %v1768_v32 = vpop.permute.xlu1 %1767 }
 0xae0   :  { %v1802_v63 = vpop.permute.xlu0 %1801  ;;  %v1772_v38 = vmul.f32 %v1768_v32, %v1717_v17 }
 0xae1   :  { %v1806_v61 = vmul.f32 %v1802_v63, %v1757_v41 }
 0xae2   :  { %1777 = vrot.lane.b32.xlu2 %v1772_v38, %s3247_s0 }
 0xae3   :  { %1811 = vrot.lane.b32.xlu1 %v1806_v61, %s3247_s0 }
 0xb35   :  { %v1810_v40 = vpop.permute.xlu0 %1809 }
 0xb36   :  { %v3793_v22 = vadd.f32 %v1810_v40, %v1795_v39 }
 0xb38   :  { %3136 = vtanh.f32 %v3793_v22 }
 0xb3c   :  { %v1778_v44 = vpop.permute.xlu2 %1777 }
 0xb3d   :  { %v3797_v21 = vadd.f32 %v1778_v44, %v1762_v43 }
 0xb3e   :  { %v3137_v42 = vpop.eup %3136 }
 0xb3f   :  { %3138 = vtanh.f32 %v3797_v21  ;;  %1821 = vrot.lane.b32.xlu1 %v3137_v42, %s3247_s0 }
 0xb45   :  { %v3139_v5 = vpop.eup %3138 }
 0xb46   :  { %1789 = vrot.lane.b32.xlu0 %v3139_v5, %s3247_s0 }
 0xb4c   :  { %v1776_v9 = vpop.permute.xlu1 %1775 }
 0xb4d   :  { %v3803_v54 = vadd.f32 %v1776_v9, %v1761_v52 }
 0xb4f   :  { %3140 = vtanh.f32 %v3803_v54 }
 0xb55   :  { %v3141_v56 = vpop.eup %3140  ;;  %v1812_v57 = vpop.permute.xlu1 %1811 }
 0xb56   :  { %v3807_v59 = vadd.f32 %v1812_v57, %v1796_v46  ;;  %1787 = vrot.lane.b32.xlu2 %v3141_v56, %s3247_s0 }
 0xb58   :  { %3142 = vtanh.f32 %v3807_v59 }
 0xb5e   :  { %v3143_v51 = vpop.eup %3142 }
 0xb5f   :  { %1823 = vrot.lane.b32.xlu2 %v3143_v51, %s3247_s0 }
 0xbb0   :  { %v1788_v2 = vpop.permute.xlu2 %1787 }
 0xbb1   :  { %v1822_v7 = vpop.permute.xlu1 %1821  ;;  %v1793_v4 = vmul.f32 %v1788_v2, %v1702_v24  ;;  %v1835_v24 = vadd.f32 %v3767_v12, %v2943_v20 }
 0xbb2   :  { %v1827_v8 = vmul.f32 %v1822_v7, %v3784_v60 }
 0xbb8   :  { %v1790_v3 = vpop.permute.xlu0 %1789 }
 0xbb9   :  { %v1824_v26 = vpop.permute.xlu2 %1823  ;;  %v1794_v58 = vmul.f32 %v1790_v3, %v1717_v17 }
 0xbba   :  { %v1828_v37 = vmul.f32 %v1824_v26, %v1757_v41 }
 0xbbb   :  { %v1836_v10 = vpack.c.bf16 %v1794_v58, %v1793_v4 }
 0xbbc   :  { %v1866_v53 = vpack.c.bf16 %v1828_v37, %v1827_v8 }
 0xbbd   :  { %1838 = vrot.lane.b32.xlu0 %v1836_v10, %s3248_s18 }
 0xbbe   :  { %1868 = vrot.lane.b32.xlu1 %v1866_v53, %s3248_s18 }
 0xc2f   :  { %v1839_v35 = vpop.permute.xlu0 %1838 }
 0xc30   :  { %v1869_v0 = vpop.permute.xlu1 %1868  ;;  %2756 = vmatmul.msk.bf16.vlgmr.msrb.gmra.mxu2 %vm187_vm0, %v1839_v35 }
 0xc31   :  { %2757 = vmatmul.msk.bf16.vlgmr.msrb.gmra.mxu3 %vm187_vm0, %v1869_v0 }
 0xcb3   :  { %v1852_v60 = vpop.f32.mrf.mxu2 }
 0xcb4   :  { %v1857_v19 = vadd.f32 %v1852_v60, %v1834_v47  ;;  %v1882_v14 = vpop.f32.mrf.mxu3 }
 0xcb5   :  { %v1887_v11 = vadd.f32 %v1882_v14, %v1864_v13 }
 0xcb6   :  { %3144 = vtanh.f32 %v1857_v19  ;;  %v2758_v34 = vmul.f32 -1.442695, %v1857_v19 }
 0xcb7   :  { %3146 = vtanh.f32 %v1887_v11  ;;  %v2760_v63 = vmul.f32 -1.442695, %v1887_v11 }
 0xcbb   :  { %v1854_v25 = vpop.f32.mrf.mxu2 }
 0xcbc   :  { %v3145_v45 = vpop.eup %3144  ;;  %v1858_v28 = vadd.f32 %v1854_v25, %v1835_v24  ;;  %v1884_v6 = vpop.f32.mrf.mxu3 }
 0xcbd   :  { %v3147_v27 = vpop.eup %3146  ;;  %v1888_v29 = vadd.f32 %v1884_v6, %v1865_v48  ;;  %1973 = vrot.lane.b32.xlu2 %v3145_v45, %s3247_s0 }
 0xcbe   :  { %3148 = vtanh.f32 %v1858_v28  ;;  %2007 = vrot.lane.b32.xlu1 %v3147_v27, %s3247_s0  ;;  %v2759_v40 = vmul.f32 -1.442695, %v1858_v28 }
 0xcbf   :  { %3150 = vtanh.f32 %v1888_v29  ;;  %v2761_v30 = vmul.f32 -1.442695, %v1888_v29 }
 0xcc0   :  { %3152 = vpow2.f32 %v2758_v34 }
 0xcc1   :  { %3154 = vpow2.f32 %v2761_v30 }
 0xcc4   :  { %v3149_v18 = vpop.eup %3148 }
 0xcc5   :  { %v3151_v62 = vpop.eup %3150  ;;  %1975 = vrot.lane.b32.xlu0 %v3149_v18, %s3247_s0 }
 0xcc6   :  { %2009 = vrot.lane.b32.xlu2 %v3151_v62, %s3247_s0  ;;  %v3153_v49 = vpop.eup %3152 }
 0xcc7   :  { %v1895_v31 = vadd.f32 1.0, %v3153_v49  ;;  %v3155_v32 = vpop.eup %3154 }
 0xcc8   :  { %v1936_v17 = vadd.f32 1.0, %v3155_v32 }
 0xcc9   :  { %3156 = vrcp.f32 %v1895_v31  ;;  %v1908_v9 = vand.u32 2147483648, %v1895_v31  ;;  %vm1902_vm7 = vweird.f32 %v1895_v31  ;;  %v1906_v56 = vand.u32 2147483647, %v1895_v31 }
 0xcca   :  { %3158 = vrcp.f32 %v1936_v17  ;;  %v1963_v10 = vand.u32 2147483648, %v1936_v17  ;;  %vm1957_vm11 = vweird.f32 %v1936_v17  ;;  %v1961_v53 = vand.u32 2147483647, %v1936_v17 }
 0xccb   :  { %3160 = vpow2.f32 %v2760_v63  ;;  %v1909_v2 = vor.u32 1.1754944e-38, %v1908_v9  ;;  %vm1907_vm9 = vcmp.eq.f32.partialorder %v1906_v56, 8.507059e+37 }
 0xccc   :  { %3162 = vpow2.f32 %v2759_v40  ;;  %v1964_v15 = vor.u32 1.1754944e-38, %v1963_v10  ;;  %vm1962_vm13 = vcmp.eq.f32.partialorder %v1961_v53, 8.507059e+37  ;;  %v2950_v53 = vunpack.c.l.bf16 %v3518_v36 }
 0xccf   :  { %v3157_v41 = vpop.eup %3156 }
 0xcd0   :  { %v1898_v38 = vmul.f32 %v3157_v41, %v1895_v31  ;;  %v3159_v39 = vpop.eup %3158  ;;  %vm1903_vm6 = vweird.f32 %v3157_v41 }
 0xcd1   :  { %v3161_v44 = vpop.eup %3160  ;;  %v1953_v42 = vmul.f32 %v3159_v39, %v1936_v17  ;;  %vm1904_vm8 = vmor %vm1902_vm7, %vm1903_vm6  ;;  %vm1958_vm10 = vweird.f32 %v3159_v39 }
 0xcd2   :  { %v1899_v61 = vsub.f32 1.0, %v1898_v38  ;;  %v1935_v5 = vadd.f32 1.0, %v3161_v44  ;;  %v3163_v57 = vpop.eup %3162  ;;  %vm1959_vm12 = vmor %vm1957_vm11, %vm1958_vm10 }
 0xcd3   :  { %v1954_v46 = vsub.f32 1.0, %v1953_v42  ;;  %v1896_v3 = vadd.f32 1.0, %v3163_v57 }
 0xcd4   :  { %v1900_v43 = vmul.f32 %v3157_v41, %v1899_v61  ;;  %3164 = vrcp.f32 %v1935_v5  ;;  %v1948_v24 = vand.u32 2147483648, %v1935_v5  ;;  %vm1942_vm15 = vweird.f32 %v1935_v5 }
 0xcd5   :  { %v1955_v7 = vmul.f32 %v3159_v39, %v1954_v46  ;;  %3166 = vrcp.f32 %v1896_v3  ;;  %v1946_v25 = vand.u32 2147483647, %v1935_v5  ;;  %v1923_v62 = vand.u32 2147483648, %v1896_v3 }
 0xcd6   :  { %v1901_v52 = vadd.f32 %v3157_v41, %v1900_v43  ;;  %v1949_v28 = vor.u32 1.1754944e-38, %v1948_v24  ;;  %vm1917_vm4 = vweird.f32 %v1896_v3  ;;  %v1921_v34 = vand.u32 2147483647, %v1896_v3 }
 0xcd7   :  { %v1956_v8 = vadd.f32 %v3159_v39, %v1955_v7  ;;  %vm1947_vm2 = vcmp.eq.f32.partialorder %v1946_v25, 8.507059e+37  ;;  %v1924_v49 = vor.u32 1.1754944e-38, %v1923_v62 }
 0xcd8   :  { %v1905_v51 = vsel %vm1904_vm8, %v3157_v41, %v1901_v52  ;;  %vm1922_vm6 = vcmp.eq.f32.partialorder %v1921_v34, 8.507059e+37 }
 0xcd9   :  { %v3829_v26 = vsel %vm1907_vm9, %v1909_v2, %v1905_v51  ;;  %v1960_v35 = vsel %vm1959_vm12, %v3159_v39, %v1956_v8 }
 0xcda   :  { %v3165_v37 = vpop.eup %3164  ;;  %v3833_v33 = vsel %vm1962_vm13, %v1964_v15, %v1960_v35  ;;  %v1969_v41 = vmul.f32 %v3829_v26, %v3803_v54  ;;  %v2951_v15 = vunpack.c.h.bf16 %v3518_v36  ;;  %v2955_v36 = vunpack.c.h.bf16 %v3498_v16 }
 0xcdb   :  { %v1938_v0 = vmul.f32 %v3165_v37, %v1935_v5  ;;  %v3167_v60 = vpop.eup %3166  ;;  %vm1943_vm14 = vweird.f32 %v3165_v37  ;;  %v2004_v43 = vmul.f32 %v3833_v33, %v3807_v59 }
 0xcdc   :  { %v1913_v14 = vmul.f32 %v3167_v60, %v1896_v3  ;;  %vm1944_vm1 = vmor %vm1942_vm15, %vm1943_vm14  ;;  %vm1918_vm3 = vweird.f32 %v3167_v60  ;;  %v2073_v24 = vadd.f32 %v3773_v50, %v2955_v36 }
 0xcdd   :  { %v1939_v19 = vsub.f32 1.0, %v1938_v0  ;;  %vm1919_vm5 = vmor %vm1917_vm4, %vm1918_vm3 }
 0xcde   :  { %v1914_v20 = vsub.f32 1.0, %v1913_v14  ;;  %v2954_v14 = vunpack.c.l.bf16 %v3498_v16 }
 0xcdf   :  { %v1940_v11 = vmul.f32 %v3165_v37, %v1939_v19 }
 0xce0   :  { %v1915_v48 = vmul.f32 %v3167_v60, %v1914_v20 }
 0xce1   :  { %v1941_v23 = vadd.f32 %v3165_v37, %v1940_v11  ;;  %v2072_v11 = vadd.f32 %v3773_v50, %v2954_v14 }
 0xce2   :  { %v1916_v29 = vadd.f32 %v3167_v60, %v1915_v48 }
 0xce3   :  { %v1945_v45 = vsel %vm1944_vm1, %v3165_v37, %v1941_v23 }
 0xce4   :  { %v1950_v27 = vsel %vm1947_vm2, %v1949_v28, %v1945_v45  ;;  %v1920_v30 = vsel %vm1919_vm5, %v3167_v60, %v1916_v29 }
 0xce5   :  { %v1925_v32 = vsel %vm1922_vm6, %v1924_v49, %v1920_v30  ;;  %v2003_v63 = vmul.f32 %v1950_v27, %v3793_v22 }
 0xce6   :  { %v1970_v54 = vmul.f32 %v1925_v32, %v3797_v21 }
 0xd17   :  { %v1974_v4 = vpop.permute.xlu2 %1973 }
 0xd18   :  { %v1979_v58 = vmul.f32 %v1974_v4, %v3829_v26 }
 0xd1a   :  { %1983 = vrot.lane.b32.xlu0 %v1979_v58, %s3247_s0 }
 0xd20   :  { %v2010_v47 = vpop.permute.xlu2 %2009 }
 0xd21   :  { %v2014_v13 = vmul.f32 %v2010_v47, %v3833_v33 }
 0xd23   :  { %2019 = vrot.lane.b32.xlu0 %v2014_v13, %s3247_s0 }
 0xd30   :  { %v2008_v6 = vpop.permute.xlu1 %2007 }
 0xd31   :  { %v2013_v18 = vmul.f32 %v2008_v6, %v1950_v27 }
 0xd33   :  { %2017 = vrot.lane.b32.xlu2 %v2013_v18, %s3247_s0 }
 0xd37   :  { %v1976_v31 = vpop.permute.xlu0 %1975 }
 0xd38   :  { %v1980_v17 = vmul.f32 %v1976_v31, %v1925_v32 }
 0xd3a   :  { %1985 = vrot.lane.b32.xlu1 %v1980_v17, %s3247_s0 }
 0xd8c   :  { %v1984_v38 = vpop.permute.xlu0 %1983 }
 0xd8d   :  { %v2018_v61 = vpop.permute.xlu2 %2017  ;;  %v3842_v39 = vadd.f32 %v1984_v38, %v1969_v41 }
 0xd8e   :  { %v3844_v40 = vadd.f32 %v2018_v61, %v2003_v63 }
 0xd8f   :  { %3168 = vtanh.f32 %v3842_v39 }
 0xd90   :  { %3170 = vtanh.f32 %v3844_v40 }
 0xd95   :  { %v3169_v44 = vpop.eup %3168  ;;  %v2020_v42 = vpop.permute.xlu0 %2019 }
 0xd96   :  { %v3171_v5 = vpop.eup %3170  ;;  %v3850_v52 = vadd.f32 %v2020_v42, %v2004_v43  ;;  %1995 = vrot.lane.b32.xlu1 %v3169_v44, %s3247_s0 }
 0xd97   :  { %2029 = vrot.lane.b32.xlu0 %v3171_v5, %s3247_s0 }
 0xd98   :  { %3172 = vtanh.f32 %v3850_v52 }
 0xd9e   :  { %v3173_v22 = vpop.eup %3172 }
 0xd9f   :  { %2031 = vrot.lane.b32.xlu1 %v3173_v22, %s3247_s0 }
 0xdac   :  { %v1986_v9 = vpop.permute.xlu1 %1985 }
 0xdad   :  { %v3857_v46 = vadd.f32 %v1986_v9, %v1970_v54 }
 0xdaf   :  { %3174 = vtanh.f32 %v3857_v46 }
 0xdb5   :  { %v3175_v59 = vpop.eup %3174 }
 0xdb6   :  { %1997 = vrot.lane.b32.xlu2 %v3175_v59, %s3247_s0 }
 0xe08   :  { %v1996_v56 = vpop.permute.xlu1 %1995 }
 0xe09   :  { %v2030_v57 = vpop.permute.xlu0 %2029  ;;  %v2001_v2 = vmul.f32 %v1996_v56, %v3829_v26  ;;  %v2042_v26 = vadd.f32 %v3767_v12, %v2950_v53 }
 0xe0a   :  { %v2035_v4 = vmul.f32 %v2030_v57, %v1950_v27 }
 0xe10   :  { %v1998_v51 = vpop.permute.xlu2 %1997 }
 0xe11   :  { %v2032_v7 = vpop.permute.xlu1 %2031  ;;  %v2002_v3 = vmul.f32 %v1998_v51, %v1925_v32 }
 0xe12   :  { %v2036_v58 = vmul.f32 %v2032_v7, %v3833_v33  ;;  %v2043_v33 = vadd.f32 %v3767_v12, %v2951_v15 }
 0xe13   :  { %v2044_v8 = vpack.c.bf16 %v2002_v3, %v2001_v2 }
 0xe14   :  { %v2074_v21 = vpack.c.bf16 %v2036_v58, %v2035_v4 }
 0xe15   :  { %2046 = vrot.lane.b32.xlu2 %v2044_v8, %s3248_s18 }
 0xe16   :  { %2076 = vrot.lane.b32.xlu0 %v2074_v21, %s3248_s18 }
 0xe6f   :  { %v2047_v37 = vpop.permute.xlu2 %2046 }
 0xe70   :  { %2762 = vmatmul.msk.bf16.vlgmr.msra.gmra.mxu0 %vm187_vm0, %v2047_v37 }
 0xe88   :  { %v2077_v10 = vpop.permute.xlu0 %2076 }
 0xe89   :  { %2763 = vmatmul.msk.bf16.vlgmr.msra.gmra.mxu1 %vm187_vm0, %v2077_v10 }
 0xeed   :  { %v2060_v35 = vpop.f32.mrf.mxu0 }
 0xeee   :  { %v2065_v0 = vadd.f32 %v2060_v35, %v2042_v26 }
 0xef0   :  { %3176 = vtanh.f32 %v2065_v0  ;;  %v2764_v18 = vmul.f32 -1.442695, %v2065_v0 }
 0xef5   :  { %v2062_v47 = vpop.f32.mrf.mxu0 }
 0xef6   :  { %v3177_v60 = vpop.eup %3176  ;;  %v2066_v13 = vadd.f32 %v2062_v47, %v2043_v33 }
 0xef7   :  { %2181 = vrot.lane.b32.xlu1 %v3177_v60, %s3247_s0 }
 0xef8   :  { %3178 = vtanh.f32 %v2066_v13  ;;  %v2765_v6 = vmul.f32 -1.442695, %v2066_v13 }
 0xefe   :  { %v3179_v19 = vpop.eup %3178 }
 0xeff   :  { %2183 = vrot.lane.b32.xlu2 %v3179_v19, %s3247_s0 }
 0xf06   :  { %v2090_v20 = vpop.f32.mrf.mxu1 }
 0xf07   :  { %v2095_v23 = vadd.f32 %v2090_v20, %v2072_v11 }
 0xf09   :  { %3180 = vtanh.f32 %v2095_v23  ;;  %v2766_v38 = vmul.f32 -1.442695, %v2095_v23 }
 0xf0e   :  { %v2092_v25 = vpop.f32.mrf.mxu1 }
 0xf0f   :  { %v3181_v48 = vpop.eup %3180  ;;  %v2096_v45 = vadd.f32 %v2092_v25, %v2073_v24 }
 0xf10   :  { %2215 = vrot.lane.b32.xlu0 %v3181_v48, %s3247_s0 }
 0xf11   :  { %3182 = vtanh.f32 %v2096_v45  ;;  %v2767_v9 = vmul.f32 -1.442695, %v2096_v45 }
 0xf12   :  { %3184 = vpow2.f32 %v2765_v6 }
 0xf17   :  { %v3183_v28 = vpop.eup %3182 }
 0xf18   :  { %2217 = vrot.lane.b32.xlu1 %v3183_v28, %s3247_s0  ;;  %v3185_v27 = vpop.eup %3184 }
 0xf19   :  { %v2104_v29 = vadd.f32 1.0, %v3185_v27 }
 0xf1b   :  { %3186 = vrcp.f32 %v2104_v29  ;;  %v2131_v41 = vand.u32 2147483648, %v2104_v29  ;;  %vm2125_vm8 = vweird.f32 %v2104_v29  ;;  %v2129_v63 = vand.u32 2147483647, %v2104_v29 }
 0xf1c   :  { %3188 = vpow2.f32 %v2764_v18 }
 0xf1d   :  { %v2132_v44 = vor.u32 1.1754944e-38, %v2131_v41  ;;  %vm2130_vm10 = vcmp.eq.f32.partialorder %v2129_v63, 8.507059e+37 }
 0xf21   :  { %v3187_v62 = vpop.eup %3186 }
 0xf22   :  { %v3189_v16 = vpop.eup %3188  ;;  %v2121_v34 = vmul.f32 %v3187_v62, %v2104_v29  ;;  %vm2126_vm7 = vweird.f32 %v3187_v62 }
 0xf23   :  { %v2103_v30 = vadd.f32 1.0, %v3189_v16  ;;  %vm2127_vm9 = vmor %vm2125_vm8, %vm2126_vm7 }
 0xf24   :  { %v2122_v49 = vsub.f32 1.0, %v2121_v34 }
 0xf25   :  { %3190 = vrcp.f32 %v2103_v30  ;;  %v2116_v2 = vand.u32 2147483648, %v2103_v30  ;;  %vm2110_vm12 = vweird.f32 %v2103_v30  ;;  %v2114_v7 = vand.u32 2147483647, %v2103_v30 }
 0xf26   :  { %v2123_v31 = vmul.f32 %v3187_v62, %v2122_v49  ;;  %3192 = vpow2.f32 %v2766_v38 }
 0xf27   :  { %3194 = vpow2.f32 %v2767_v9  ;;  %v2117_v58 = vor.u32 1.1754944e-38, %v2116_v2  ;;  %vm2115_vm14 = vcmp.eq.f32.partialorder %v2114_v7, 8.507059e+37 }
 0xf28   :  { %v2124_v32 = vadd.f32 %v3187_v62, %v2123_v31 }
 0xf2a   :  { %v2128_v61 = vsel %vm2127_vm9, %v3187_v62, %v2124_v32 }
 0xf2b   :  { %v3191_v17 = vpop.eup %3190  ;;  %v3879_v5 = vsel %vm2130_vm10, %v2132_v44, %v2128_v61 }
 0xf2c   :  { %v2106_v43 = vmul.f32 %v3191_v17, %v2103_v30  ;;  %v3193_v56 = vpop.eup %3192  ;;  %vm2111_vm11 = vweird.f32 %v3191_v17  ;;  %v2178_v30 = vmul.f32 %v3879_v5, %v3857_v46 }
 0xf2d   :  { %v2143_v57 = vadd.f32 1.0, %v3193_v56  ;;  %vm2112_vm13 = vmor %vm2110_vm12, %vm2111_vm11  ;;  %v3195_v4 = vpop.eup %3194 }
 0xf2e   :  { %v2107_v54 = vsub.f32 1.0, %v2106_v43  ;;  %v2144_v37 = vadd.f32 1.0, %v3195_v4 }
 0xf2f   :  { %3196 = vrcp.f32 %v2143_v57  ;;  %v2156_v13 = vand.u32 2147483648, %v2143_v57  ;;  %vm2150_vm1 = vweird.f32 %v2143_v57  ;;  %v2154_v19 = vand.u32 2147483647, %v2143_v57 }
 0xf30   :  { %v2108_v59 = vmul.f32 %v3191_v17, %v2107_v54  ;;  %3198 = vrcp.f32 %v2144_v37  ;;  %v2171_v48 = vand.u32 2147483648, %v2144_v37  ;;  %vm2165_vm5 = vweird.f32 %v2144_v37 }
 0xf31   :  { %v2157_v20 = vor.u32 1.1754944e-38, %v2156_v13  ;;  %vm2155_vm3 = vcmp.eq.f32.partialorder %v2154_v19, 8.507059e+37  ;;  %v2169_v45 = vand.u32 2147483647, %v2144_v37 }
 0xf32   :  { %v2109_v51 = vadd.f32 %v3191_v17, %v2108_v59  ;;  %v2172_v6 = vor.u32 1.1754944e-38, %v2171_v48 }
 0xf33   :  { %vm2170_vm7 = vcmp.eq.f32.partialorder %v2169_v45, 8.507059e+37 }
 0xf34   :  { %v2113_v3 = vsel %vm2112_vm13, %v3191_v17, %v2109_v51 }
 0xf35   :  { %v3883_v21 = vsel %vm2115_vm14, %v2117_v58, %v2113_v3  ;;  %v3197_v53 = vpop.eup %3196  ;;  %v2958_v3 = vunpack.c.l.bf16 %v3529_v55 }
 0xf36   :  { %v2146_v26 = vmul.f32 %v3197_v53, %v2143_v57  ;;  %v3199_v0 = vpop.eup %3198  ;;  %vm2151_vm15 = vweird.f32 %v3197_v53  ;;  %v2177_v62 = vmul.f32 %v3883_v21, %v3842_v39 }
 0xf37   :  { %v2161_v33 = vmul.f32 %v3199_v0, %v2144_v37  ;;  %vm2152_vm2 = vmor %vm2150_vm1, %vm2151_vm15  ;;  %vm2166_vm4 = vweird.f32 %v3199_v0  ;;  %v2250_v4 = vadd.f32 %v3767_v12, %v2958_v3 }
 0xf38   :  { %v2147_v35 = vsub.f32 1.0, %v2146_v26  ;;  %vm2167_vm6 = vmor %vm2165_vm5, %vm2166_vm4  ;;  %v2963_v26 = vunpack.c.h.bf16 %v3494_v1 }
 0xf39   :  { %v2162_v60 = vsub.f32 1.0, %v2161_v33 }
 0xf3a   :  { %v2148_v15 = vmul.f32 %v3197_v53, %v2147_v35 }
 0xf3b   :  { %v2163_v11 = vmul.f32 %v3199_v0, %v2162_v60 }
 0xf3c   :  { %v2149_v47 = vadd.f32 %v3197_v53, %v2148_v15  ;;  %v2280_v15 = vadd.f32 %v3773_v50, %v2963_v26 }
 0xf3d   :  { %v2164_v25 = vadd.f32 %v3199_v0, %v2163_v11 }
 0xf3e   :  { %v2153_v14 = vsel %vm2152_vm2, %v3197_v53, %v2149_v47  ;;  %v2959_v53 = vunpack.c.h.bf16 %v3529_v55 }
 0xf3f   :  { %v2158_v36 = vsel %vm2155_vm3, %v2157_v20, %v2153_v14  ;;  %v2168_v28 = vsel %vm2167_vm6, %v3199_v0, %v2164_v25 }
 0xf40   :  { %v2173_v27 = vsel %vm2170_vm7, %v2172_v6, %v2168_v28  ;;  %v2211_v46 = vmul.f32 %v2158_v36, %v3844_v40  ;;  %v2251_v35 = vadd.f32 %v3767_v12, %v2959_v53 }
 0xf41   :  { %v2212_v39 = vmul.f32 %v2173_v27, %v3850_v52 }
 0xf59   :  { %v2184_v42 = vpop.permute.xlu2 %2183 }
 0xf5a   :  { %v2188_v22 = vmul.f32 %v2184_v42, %v3879_v5 }
 0xf5c   :  { %2193 = vrot.lane.b32.xlu0 %v2188_v22, %s3247_s0 }
 0xf69   :  { %v2182_v8 = vpop.permute.xlu1 %2181 }
 0xf6a   :  { %v2187_v10 = vmul.f32 %v2182_v8, %v3883_v21 }
 0xf6c   :  { %2191 = vrot.lane.b32.xlu2 %v2187_v10, %s3247_s0 }
 0xf82   :  { %v2216_v23 = vpop.permute.xlu0 %2215 }
 0xf83   :  { %v2221_v24 = vmul.f32 %v2216_v23, %v2158_v36 }
 0xf85   :  { %2225 = vrot.lane.b32.xlu1 %v2221_v24, %s3247_s0 }
 0xf8a   :  { %v2218_v29 = vpop.permute.xlu1 %2217 }
 0xf8b   :  { %v2222_v18 = vmul.f32 %v2218_v29, %v2173_v27 }
 0xf8d   :  { %2227 = vrot.lane.b32.xlu2 %v2222_v18, %s3247_s0 }
 0xfc6   :  { %v2192_v16 = vpop.permute.xlu2 %2191 }
 0xfc7   :  { %v3891_v34 = vadd.f32 %v2192_v16, %v2177_v62 }
 0xfc9   :  { %3200 = vtanh.f32 %v3891_v34 }
 0xfce   :  { %v2194_v49 = vpop.permute.xlu0 %2193 }
 0xfcf   :  { %v3201_v31 = vpop.eup %3200  ;;  %v3896_v32 = vadd.f32 %v2194_v49, %v2178_v30 }
 0xfd0   :  { %2203 = vrot.lane.b32.xlu0 %v3201_v31, %s3247_s0 }
 0xfd1   :  { %3202 = vtanh.f32 %v3896_v32 }
 0xfd7   :  { %v3203_v17 = vpop.eup %3202 }
 0xfd8   :  { %2205 = vrot.lane.b32.xlu1 %v3203_v17, %s3247_s0 }
 0xfe7   :  { %v2228_v41 = vpop.permute.xlu2 %2227 }
 0xfe8   :  { %v3902_v63 = vadd.f32 %v2228_v41, %v2212_v39 }
 0xfea   :  { %3204 = vtanh.f32 %v3902_v63 }
 0xff0   :  { %v3205_v38 = vpop.eup %3204 }
 0xff1   :  { %2239 = vrot.lane.b32.xlu0 %v3205_v38, %s3247_s0 }
 0xff7   :  { %v2226_v61 = vpop.permute.xlu1 %2225 }
 0xff8   :  { %v3907_v43 = vadd.f32 %v2226_v61, %v2211_v46 }
 0xffa   :  { %3206 = vtanh.f32 %v3907_v43 }
0x1000   :  { %v3207_v44 = vpop.eup %3206 }
0x1001   :  { %2237 = vrot.lane.b32.xlu2 %v3207_v44, %s3247_s0 }
0x1042   :  { %v2204_v42 = vpop.permute.xlu0 %2203 }
0x1043   :  { %v2209_v22 = vmul.f32 %v2204_v42, %v3883_v21 }
0x104a   :  { %v2206_v52 = vpop.permute.xlu1 %2205 }
0x104b   :  { %v2210_v54 = vmul.f32 %v2206_v52, %v3879_v5  ;;  %v2962_v5 = vunpack.c.l.bf16 %v3494_v1 }
0x104d   :  { %v2252_v9 = vpack.c.bf16 %v2210_v54, %v2209_v22  ;;  %v2279_v8 = vadd.f32 %v3773_v50, %v2962_v5 }
0x104f   :  { %2254 = vrot.lane.b32.xlu1 %v2252_v9, %s3248_s18 }
0x105b   :  { %v2238_v59 = vpop.permute.xlu2 %2237 }
0x105c   :  { %v2243_v40 = vmul.f32 %v2238_v59, %v2158_v36 }
0x1063   :  { %v2240_v56 = vpop.permute.xlu0 %2239 }
0x1064   :  { %v2244_v57 = vmul.f32 %v2240_v56, %v2173_v27 }
0x1066   :  { %v2281_v51 = vpack.c.bf16 %v2244_v57, %v2243_v40 }
0x1068   :  { %2283 = vrot.lane.b32.xlu2 %v2281_v51, %s3248_s18 }
0x10c1   :  { %v2255_v2 = vpop.permute.xlu1 %2254 }
0x10c2   :  { %v2284_v7 = vpop.permute.xlu2 %2283  ;;  %2768 = vmatmul.msk.bf16.vlgmr.msra.gmra.mxu2 %vm187_vm0, %v2255_v2 }
0x10c3   :  { %2769 = vmatmul.msk.bf16.vlgmr.msra.gmra.mxu3 %vm187_vm0, %v2284_v7 }
0x1145   :  { %v2268_v58 = vpop.f32.mrf.mxu2 }
0x1146   :  { %v2273_v21 = vadd.f32 %v2268_v58, %v2250_v4  ;;  %v2297_v37 = vpop.f32.mrf.mxu3 }
0x1147   :  { %v2302_v10 = vadd.f32 %v2297_v37, %v2279_v8 }
0x1148   :  { %3208 = vtanh.f32 %v2273_v21  ;;  %v2770_v20 = vmul.f32 -1.442695, %v2273_v21 }
0x1149   :  { %3210 = vtanh.f32 %v2302_v10  ;;  %v2772_v1 = vmul.f32 -1.442695, %v2302_v10 }
0x114d   :  { %v2270_v0 = vpop.f32.mrf.mxu2 }
0x114e   :  { %v3209_v33 = vpop.eup %3208  ;;  %v2274_v47 = vadd.f32 %v2270_v0, %v2251_v35  ;;  %v2299_v60 = vpop.f32.mrf.mxu3 }
0x114f   :  { %v3211_v13 = vpop.eup %3210  ;;  %v2303_v19 = vadd.f32 %v2299_v60, %v2280_v15  ;;  %2388 = vrot.lane.b32.xlu0 %v3209_v33, %s3247_s0 }
0x1150   :  { %3212 = vtanh.f32 %v2274_v47  ;;  %2422 = vrot.lane.b32.xlu2 %v3211_v13, %s3247_s0  ;;  %v2771_v24 = vmul.f32 -1.442695, %v2274_v47 }
0x1151   :  { %3214 = vtanh.f32 %v2303_v19  ;;  %v2773_v25 = vmul.f32 -1.442695, %v2303_v19 }
0x1152   :  { %3216 = vpow2.f32 %v2772_v1 }
0x1156   :  { %v3213_v55 = vpop.eup %3212 }
0x1157   :  { %v3215_v14 = vpop.eup %3214  ;;  %2390 = vrot.lane.b32.xlu1 %v3213_v55, %s3247_s0 }
0x1158   :  { %2424 = vrot.lane.b32.xlu0 %v3215_v14, %s3247_s0  ;;  %v3217_v12 = vpop.eup %3216 }
0x1159   :  { %v2350_v50 = vadd.f32 1.0, %v3217_v12 }
0x115b   :  { %3218 = vrcp.f32 %v2350_v50  ;;  %v2363_v27 = vand.u32 2147483648, %v2350_v50  ;;  %vm2357_vm9 = vweird.f32 %v2350_v50  ;;  %v2361_v29 = vand.u32 2147483647, %v2350_v50 }
0x115c   :  { %3220 = vpow2.f32 %v2770_v20 }
0x115d   :  { %3222 = vpow2.f32 %v2771_v24  ;;  %v2364_v30 = vor.u32 1.1754944e-38, %v2363_v27  ;;  %vm2362_vm11 = vcmp.eq.f32.partialorder %v2361_v29, 8.507059e+37 }
0x115e   :  { %3224 = vpow2.f32 %v2773_v25 }
0x1161   :  { %v3219_v11 = vpop.eup %3218 }
0x1162   :  { %v2353_v23 = vmul.f32 %v3219_v11, %v2350_v50  ;;  %v3221_v48 = vpop.eup %3220  ;;  %vm2358_vm8 = vweird.f32 %v3219_v11 }
0x1163   :  { %v2310_v28 = vadd.f32 1.0, %v3221_v48  ;;  %v3223_v18 = vpop.eup %3222  ;;  %vm2359_vm10 = vmor %vm2357_vm9, %vm2358_vm8 }
0x1164   :  { %v2354_v36 = vsub.f32 1.0, %v2353_v23  ;;  %v3225_v62 = vpop.eup %3224  ;;  %v2311_v49 = vadd.f32 1.0, %v3223_v18 }
0x1165   :  { %3226 = vrcp.f32 %v2310_v28  ;;  %v2351_v31 = vadd.f32 1.0, %v3225_v62  ;;  %v2323_v56 = vand.u32 2147483648, %v2310_v28  ;;  %vm2317_vm13 = vweird.f32 %v2310_v28 }
0x1166   :  { %v2355_v45 = vmul.f32 %v3219_v11, %v2354_v36  ;;  %3228 = vrcp.f32 %v2311_v49  ;;  %v2321_v57 = vand.u32 2147483647, %v2310_v28  ;;  %v2338_v37 = vand.u32 2147483648, %v2311_v49 }
0x1167   :  { %3230 = vrcp.f32 %v2351_v31  ;;  %v2324_v7 = vor.u32 1.1754944e-38, %v2323_v56  ;;  %v2378_v10 = vand.u32 2147483648, %v2351_v31  ;;  %vm2332_vm3 = vweird.f32 %v2311_v49 }
0x1168   :  { %v2356_v6 = vadd.f32 %v3219_v11, %v2355_v45  ;;  %vm2322_vm15 = vcmp.eq.f32.partialorder %v2321_v57, 8.507059e+37  ;;  %v2336_v53 = vand.u32 2147483647, %v2311_v49  ;;  %vm2372_vm4 = vweird.f32 %v2351_v31 }
0x1169   :  { %v2376_v26 = vand.u32 2147483647, %v2351_v31  ;;  %v2339_v15 = vor.u32 1.1754944e-38, %v2338_v37  ;;  %v2379_v33 = vor.u32 1.1754944e-38, %v2378_v10 }
0x116a   :  { %v2360_v16 = vsel %vm2359_vm10, %v3219_v11, %v2356_v6  ;;  %vm2337_vm7 = vcmp.eq.f32.partialorder %v2336_v53, 8.507059e+37 }
0x116b   :  { %v3929_v39 = vsel %vm2362_vm11, %v2364_v30, %v2360_v16  ;;  %v3227_v41 = vpop.eup %3226  ;;  %vm2377_vm8 = vcmp.eq.f32.partialorder %v2376_v26, 8.507059e+37 }
0x116c   :  { %v2313_v46 = vmul.f32 %v3227_v41, %v2310_v28  ;;  %v3229_v44 = vpop.eup %3228  ;;  %vm2318_vm12 = vweird.f32 %v3227_v41  ;;  %v2418_v1 = vmul.f32 %v3929_v39, %v3907_v43 }
0x116d   :  { %v3231_v42 = vpop.eup %3230  ;;  %v2328_v22 = vmul.f32 %v3229_v44, %v2311_v49  ;;  %vm2319_vm14 = vmor %vm2317_vm13, %vm2318_vm12  ;;  %vm2333_vm1 = vweird.f32 %v3229_v44 }
0x116e   :  { %v2314_v61 = vsub.f32 1.0, %v2313_v46  ;;  %v2368_v54 = vmul.f32 %v3231_v42, %v2351_v31  ;;  %vm2373_vm2 = vweird.f32 %v3231_v42  ;;  %vm2334_vm5 = vmor %vm2332_vm3, %vm2333_vm1 }
0x116f   :  { %v2329_v59 = vsub.f32 1.0, %v2328_v22  ;;  %vm2374_vm6 = vmor %vm2372_vm4, %vm2373_vm2 }
0x1170   :  { %v2315_v52 = vmul.f32 %v3227_v41, %v2314_v61  ;;  %v2369_v40 = vsub.f32 1.0, %v2368_v54 }
0x1171   :  { %v2330_v2 = vmul.f32 %v3229_v44, %v2329_v59 }
0x1172   :  { %v2316_v9 = vadd.f32 %v3227_v41, %v2315_v52  ;;  %v2370_v3 = vmul.f32 %v3231_v42, %v2369_v40 }
0x1173   :  { %v2331_v8 = vadd.f32 %v3229_v44, %v2330_v2 }
0x1174   :  { %v2320_v51 = vsel %vm2319_vm14, %v3227_v41, %v2316_v9  ;;  %v2371_v21 = vadd.f32 %v3231_v42, %v2370_v3 }
0x1175   :  { %v2325_v4 = vsel %vm2322_vm15, %v2324_v7, %v2320_v51  ;;  %v2335_v35 = vsel %vm2334_vm5, %v3229_v44, %v2331_v8 }
0x1176   :  { %v2375_v0 = vsel %vm2374_vm6, %v3231_v42, %v2371_v21  ;;  %v2340_v60 = vsel %vm2337_vm7, %v2339_v15, %v2335_v35  ;;  %v2384_v25 = vmul.f32 %v2325_v4, %v3891_v34 }
0x1177   :  { %v2380_v13 = vsel %vm2377_vm8, %v2379_v33, %v2375_v0  ;;  %v2385_v11 = vmul.f32 %v2340_v60, %v3896_v32 }
0x1178   :  { %v2419_v43 = vmul.f32 %v2380_v13, %v3902_v63 }
0x11aa   :  { %v2423_v17 = vpop.permute.xlu2 %2422 }
0x11ab   :  { %v2428_v38 = vmul.f32 %v2423_v17, %v3929_v39 }
0x11ad   :  { %2432 = vrot.lane.b32.xlu0 %v2428_v38, %s3247_s0 }
0x11c1   :  { %v2389_v5 = vpop.permute.xlu0 %2388 }
0x11c2   :  { %v2394_v58 = vmul.f32 %v2389_v5, %v2325_v4 }
0x11c4   :  { %2398 = vrot.lane.b32.xlu1 %v2394_v58, %s3247_s0 }
0x11c9   :  { %v2391_v47 = vpop.permute.xlu1 %2390 }
0x11ca   :  { %v2425_v19 = vpop.permute.xlu0 %2424  ;;  %v2395_v55 = vmul.f32 %v2391_v47, %v2340_v60 }
0x11cb   :  { %v2429_v14 = vmul.f32 %v2425_v19, %v2380_v13 }
0x11cc   :  { %2400 = vrot.lane.b32.xlu2 %v2395_v55, %s3247_s0 }
0x11cd   :  { %2434 = vrot.lane.b32.xlu1 %v2429_v14, %s3247_s0 }
0x121f   :  { %v2433_v12 = vpop.permute.xlu0 %2432 }
0x1220   :  { %v2438_v50 = vadd.f32 %v2433_v12, %v2418_v1 }
0x1222   :  { %3232 = vtanh.f32 %v2438_v50 }
0x1226   :  { %v2401_v20 = vpop.permute.xlu2 %2400 }
0x1227   :  { %v2405_v23 = vadd.f32 %v2401_v20, %v2385_v11 }
0x1228   :  { %v3233_v36 = vpop.eup %3232 }
0x1229   :  { %3234 = vtanh.f32 %v2405_v23  ;;  %2444 = vrot.lane.b32.xlu1 %v3233_v36, %s3247_s0 }
0x122f   :  { %v3235_v24 = vpop.eup %3234 }
0x1230   :  { %2412 = vrot.lane.b32.xlu0 %v3235_v24, %s3247_s0 }
0x1236   :  { %v2399_v48 = vpop.permute.xlu1 %2398 }
0x1237   :  { %v2404_v45 = vadd.f32 %v2399_v48, %v2384_v25 }
0x1238   :  { %2466 = vrot.lane.b32.xlu0 %v2405_v23, %s3249_s6 }
0x1239   :  { %3236 = vtanh.f32 %v2404_v45 }
0x123f   :  { %v3237_v28 = vpop.eup %3236  ;;  %v2435_v32 = vpop.permute.xlu1 %2434 }
0x1240   :  { %v2439_v6 = vadd.f32 %v2435_v32, %v2419_v43  ;;  %2410 = vrot.lane.b32.xlu2 %v3237_v28, %s3247_s0 }
0x1242   :  { %3238 = vtanh.f32 %v2439_v6 }
0x1248   :  { %v3239_v27 = vpop.eup %3238 }
0x1249   :  { %2446 = vrot.lane.b32.xlu2 %v3239_v27, %s3247_s0 }
0x1251   :  { %2464 = vrot.lane.b32.xlu2 %v2404_v45, %s3249_s6 }
0x129a   :  { %v2411_v29 = vpop.permute.xlu2 %2410 }
0x129b   :  { %v2445_v18 = vpop.permute.xlu1 %2444  ;;  %v2416_v34 = vmul.f32 %v2411_v29, %v2325_v4 }
0x129c   :  { %v2450_v62 = vmul.f32 %v2445_v18, %v3929_v39 }
0x129d   :  { %2454 = vrot.lane.b32.xlu0 %v2416_v34, %s3248_s18 }
0x129e   :  { %2474 = vrot.lane.b32.xlu1 %v2450_v62, %s3248_s18 }
0x12a2   :  { %v2413_v63 = vpop.permute.xlu0 %2412 }
0x12a3   :  { %v2447_v16 = vpop.permute.xlu2 %2446  ;;  %v2417_v30 = vmul.f32 %v2413_v63, %v2340_v60 }
0x12a4   :  { %v2451_v49 = vmul.f32 %v2447_v16, %v2380_v13 }
0x12a5   :  { %2484 = vrot.lane.b32.xlu0 %v2438_v50, %s3249_s6 }
0x12a6   :  { %2476 = vrot.lane.b32.xlu2 %v2451_v49, %s3248_s18  ;;  %2456 = vrot.lane.b32.xlu1 %v2417_v30, %s3248_s18 }
0x12aa   :  { %v2467_v31 = vpop.permute.xlu0 %2466 }
0x12ab   :  { %v2465_v17 = vpop.permute.xlu2 %2464  ;;  %2471 = vst.msk [vmem:[#allocation5 + $0x8] sm:$0xff] %vm187_vm0, %v2467_v31 }
0x12ac   :  { %2470 = vst.msk [vmem:[#allocation5] sm:$0xff] %vm187_vm0, %v2465_v17 }
0x12ae   :  { %2486 = vrot.lane.b32.xlu1 %v2439_v6, %s3249_s6 }
0x1300   :  { %v2477_v39 = vpop.permute.xlu2 %2476 }
0x1301   :  { %2481 = vst.msk [vmem:[#allocation4 + $0x18] sm:$0xff] %vm187_vm0, %v2477_v39 }
0x1302   :  { %2775 = vst.msk [vmem:[%s3981_s7 + $0x18] sm:$0xff] %vm187_vm0, %v2477_v39 }
0x130f   :  { %v2455_v41 = vpop.permute.xlu0 %2454 }
0x1310   :  { %v2475_v38 = vpop.permute.xlu1 %2474  ;;  %2460 = vst.msk [vmem:[#allocation4] sm:$0xff] %vm187_vm0, %v2455_v41 }
0x1311   :  { %2480 = vst.msk [vmem:[#allocation4 + $0x10] sm:$0xff] %vm187_vm0, %v2475_v38 }
0x1312   :  { %2774 = vst.msk [vmem:[%s3981_s7 + $0x10] sm:$0xff] %vm187_vm0, %v2475_v38 }
0x1313   :  { %2492 = vst.msk [vmem:[%s3981_s7] sm:$0xff] %vm187_vm0, %v2455_v41 }
0x1317   :  { %v2485_v46 = vpop.permute.xlu0 %2484 }
0x1318   :  { %v2457_v61 = vpop.permute.xlu1 %2456  ;;  %2490 = vst.msk [vmem:[#allocation5 + $0x10] sm:$0xff] %vm187_vm0, %v2485_v46 }
0x1319   :  { %2461 = vst.msk [vmem:[#allocation4 + $0x8] sm:$0xff] %vm187_vm0, %v2457_v61 }
0x131a   :  { %2493 = vst.msk [vmem:[%s3981_s7 + $0x8] sm:$0xff] %vm187_vm0, %v2457_v61 }
0x1320   :  { %v2487_v44 = vpop.permute.xlu1 %2486 }
0x1321   :  { %2491 = vst.msk [vmem:[#allocation5 + $0x18] sm:$0xff] %vm187_vm0, %v2487_v44 }

// kernel: lstm_model_forward.3
= control target key start
LH: loop header
LB: loop body
LE: loop exit
PB: predicated region body
PF: predicated region fallthrough
CT: control target
= control target key end

     0   :  { %vm135_vm0 = vcmask 261120   ;;  %v3092_v2 = vmov 0.0   ;;  %s3093_s22 = smov 32   ;;  %s4009_s2 = inlined_call_operand.vmem [shape: bf16[2,32,128], index: 2, kind: input, shape index: {}]   ;;  %s4010_s3 = inlined_call_operand.vmem [shape: bf16[2,32,128], index: 3, kind: input, shape index: {}]   ;;  %s4011_s0 = inlined_call_operand.vmem [shape: bf16[128,32], index: 0, kind: input, shape index: {}, may-alias: {0,1}]   ;;  %s4012_s1 = inlined_call_operand.vmem [shape: bf16[128,32], index: 1, kind: input, shape index: {}, may-alias: {0,1}]   ;;  %s4013_s4 = inlined_call_operand.vmem [shape: f32[2,1,128], index: 4, kind: input, shape index: {}]   ;;  %s4014_s5 = inlined_call_operand.vmem [shape: bf16[128,32], index: 5, kind: output, shape index: {0}]   ;;  %s4015_s6 = inlined_call_operand.vmem [shape: bf16[128,32], index: 6, kind: output, shape index: {1}]  }
   0x1   :  { %v2641_v0 = vld [vmem:[%s4009_s2 + $0x8] sm:$0xff]  ;;  %v2643_v1 = vld [vmem:[%s4009_s2 + $0x18] sm:$0xff]  ;;  %418 = vst.msk [vmem:[#allocation4] sm:$0xff] %vm135_vm0, %v3092_v2  ;;  %v2640_v3 = vld [vmem:[%s4009_s2] sm:$0xff] }
   0x2   :  { %419 = vst.msk [vmem:[#allocation4 + $0x8] sm:$0xff] %vm135_vm0, %v3092_v2  ;;  %166 = vmatpush.bf16.msra.mxu0 %v2641_v0  ;;  %307 = vmatpush.bf16.msra.mxu1 %v2643_v1  ;;  %v2642_v4 = vld [vmem:[%s4009_s2 + $0x10] sm:$0xff]  ;;  %v3148_v5 = vld [vmem:[%s4010_s3 + $0x8] sm:$0xff]  ;;  %v3156_v6 = vld [vmem:[%s4010_s3] sm:$0xff]  ;;  %s3094_s2 = smov 64  }
   0x3   :  { %420 = vst.msk [vmem:[#allocation4 + $0x10] sm:$0xff] %vm135_vm0, %v3092_v2  ;;  %479 = vmatpush.bf16.msra.mxu2 %v3148_v5  ;;  %v2644_v7 = vld [vmem:[%s4011_s0] sm:$0xff]  ;;  %v2653_v12 = vld [vmem:[%s4012_s1 + $0x8] sm:$0xff]  ;;  %v2654_v13 = vld [vmem:[%s4012_s1 + $0x10] sm:$0xff] }
   0x4   :  { %421 = vst.msk [vmem:[#allocation4 + $0x18] sm:$0xff] %vm135_vm0, %v3092_v2  ;;  %v2652_v8 = vld [vmem:[%s4012_s1] sm:$0xff]  ;;  %v2655_v14 = vld [vmem:[%s4012_s1 + $0x18] sm:$0xff]  ;;  %v3202_v18 = vld [vmem:[%s4010_s3 + $0x10] sm:$0xff] }
   0x5   :  { %422 = vst.msk [vmem:[#allocation5] sm:$0xff] %vm135_vm0, %v3092_v2  ;;  %v2656_v15 = vld [vmem:[%s4012_s1 + $0x20] sm:$0xff]  ;;  %v3195_v16 = vld [vmem:[%s4010_s3 + $0x18] sm:$0xff]  ;;  %v2657_v19 = vld [vmem:[%s4012_s1 + $0x28] sm:$0xff] }
   0x6   :  { %423 = vst.msk [vmem:[#allocation5 + $0x8] sm:$0xff] %vm135_vm0, %v3092_v2  ;;  %167 = vmatpush.bf16.msra.mxu0 %v2640_v3  ;;  %308 = vmatpush.bf16.msra.mxu1 %v2642_v4  ;;  %v2658_v24 = vld [vmem:[%s4012_s1 + $0x30] sm:$0xff]  ;;  %v2659_v25 = vld [vmem:[%s4012_s1 + $0x38] sm:$0xff]  ;;  %v3228_v32 = vld [vmem:[%s4013_s4] ss:$0 sm:$0xff]  ;;  %s3095_s1 = smov 96  }
   0x7   :  { %424 = vst.msk [vmem:[#allocation5 + $0x10] sm:$0xff] %vm135_vm0, %v3092_v2  ;;  %480 = vmatpush.bf16.msra.mxu2 %v3156_v6  ;;  %521 = vmatpush.bf16.msra.mxu3 %v3195_v16 }
   0x8   :  { %v438_v9 = vld [vmem:[#allocation4] sm:$0xff]  ;;  %425 = vst.msk [vmem:[#allocation5 + $0x18] sm:$0xff] %vm135_vm0, %v3092_v2 }
   0x9   :  { %v439_v10 = vld [vmem:[#allocation4 + $0x8] sm:$0xff]  ;;  %2487 = vmatmul.msk.bf16.vlgmr.msra.gmra.mxu0 %vm135_vm0, %v2644_v7  ;;  %2535 = vmatmul.msk.bf16.vlgmr.msra.gmra.mxu1 %vm135_vm0, %v2652_v8 }
   0xa   :  { %v457_v11 = vpack.c.bf16 %v439_v10, %v438_v9  ;;  %v443_v20 = vld [vmem:[#allocation4 + $0x10] sm:$0xff] }
   0xb   :  { %742 = vmatpush.bf16.msrb.mxu2 %v3148_v5  ;;  %522 = vmatpush.bf16.msra.mxu3 %v3202_v18  ;;  %v444_v21 = vld [vmem:[#allocation4 + $0x18] sm:$0xff] }
   0xc   :  { %2556 = vmatmul.msk.bf16.vlgmr.msra.gmra.mxu2 %vm135_vm0, %v457_v11  ;;  %v440_v17 = vld [vmem:[#allocation5] sm:$0xff]  ;;  %v499_v22 = vpack.c.bf16 %v444_v21, %v443_v20 }
   0xd   :  { %613 = vrot.lane.b32.xlu2 %v440_v17, %s3093_s22  ;;  %v441_v23 = vld [vmem:[#allocation5 + $0x8] sm:$0xff] }
   0xe   :  { %2565 = vmatmul.msk.bf16.vlgmr.msra.gmra.mxu3 %vm135_vm0, %v499_v22  ;;  %v446_v47 = vld [vmem:[#allocation5 + $0x10] sm:$0xff] }
   0xf   :  { %743 = vmatpush.bf16.msrb.mxu2 %v3156_v6  ;;  %773 = vmatpush.bf16.msrb.mxu3 %v3195_v16 }
  0x13   :  { %978 = vmatpush.bf16.msra.mxu2 %v3148_v5  ;;  %774 = vmatpush.bf16.msrb.mxu3 %v3202_v18 }
  0x15   :  { %615 = vrot.lane.b32.xlu2 %v441_v23, %s3093_s22 }
  0x17   :  { %979 = vmatpush.bf16.msra.mxu2 %v3156_v6  ;;  %1009 = vmatpush.bf16.msra.mxu3 %v3195_v16 }
  0x19   :  { %2536 = vmatmul.msk.bf16.gmra.mxu1 %vm135_vm0, %v2653_v12 }
  0x1b   :  { %1010 = vmatpush.bf16.msra.mxu3 %v3202_v18 }
  0x29   :  { %2537 = vmatmul.msk.bf16.gmra.mxu1 %vm135_vm0, %v2654_v13 }
  0x39   :  { %2538 = vmatmul.msk.bf16.gmra.mxu1 %vm135_vm0, %v2655_v14  ;;  %v3250_v14 = vld [vmem:[%s4013_s4 + $0x1] ss:$0 sm:$0xff] }
  0x49   :  { %2539 = vmatmul.msk.bf16.gmra.mxu1 %vm135_vm0, %v2656_v15 }
  0x59   :  { %2540 = vmatmul.msk.bf16.gmra.mxu1 %vm135_vm0, %v2657_v19 }
  0x69   :  { %2541 = vmatmul.msk.bf16.gmra.mxu1 %vm135_vm0, %v2658_v24 }
  0x79   :  { %2542 = vmatmul.msk.bf16.gmra.mxu1 %vm135_vm0, %v2659_v25 }
  0x86   :  { %v169_v26 = vpop.f32.mrf.mxu0  ;;  %v310_v27 = vpop.f32.mrf.mxu1 }
  0x8e   :  { %v171_v28 = vpop.f32.mrf.mxu0  ;;  %v312_v29 = vpop.f32.mrf.mxu1 }
  0x8f   :  { %v2667_v30 = vpack.c.bf16 %v171_v28, %v169_v26  ;;  %v3223_v31 = vpack.c.bf16 %v312_v29, %v310_v27  ;;  %v482_v33 = vpop.f32.mrf.mxu2 }
  0x91   :  { %v2746_v34 = vunpack.c.l.bf16 %v2667_v30  ;;  %v2747_v35 = vunpack.c.h.bf16 %v2667_v30  ;;  %v524_v10 = vpop.f32.mrf.mxu3 }
  0x93   :  { %v455_v36 = vadd.f32 %v3228_v32, %v2746_v34  ;;  %v456_v38 = vadd.f32 %v3228_v32, %v2747_v35 }
  0x95   :  { %v487_v37 = vadd.f32 %v482_v33, %v455_v36 }
  0x96   :  { %v315_v39 = vpop.f32.mrf.mxu1 }
  0x97   :  { %2828 = vtanh.f32 %v487_v37  ;;  %v484_v40 = vpop.f32.mrf.mxu2  ;;  %v2566_v59 = vmul.f32 -1.442695, %v487_v37 }
  0x98   :  { %v488_v41 = vadd.f32 %v484_v40, %v456_v38 }
  0x99   :  { %v526_v28 = vpop.f32.mrf.mxu3 }
  0x9a   :  { %2830 = vtanh.f32 %v488_v41  ;;  %v2567_v61 = vmul.f32 -1.442695, %v488_v41 }
  0x9b   :  { %2832 = vpow2.f32 %v2566_v59 }
  0x9c   :  { %2834 = vpow2.f32 %v2567_v61 }
  0x9d   :  { %v2829_v42 = vpop.eup %2828 }
  0x9e   :  { %v317_v43 = vpop.f32.mrf.mxu1  ;;  %623 = vrot.lane.b32.xlu0 %v2829_v42, %s3093_s22 }
  0x9f   :  { %v3233_v44 = vpack.c.bf16 %v317_v43, %v315_v39 }
  0xa0   :  { %v2831_v45 = vpop.eup %2830 }
  0xa1   :  { %v2833_v62 = vpop.eup %2832 }
  0xa2   :  { %v537_v1 = vadd.f32 1.0, %v2833_v62  ;;  %v2835_v2 = vpop.eup %2834 }
  0xa3   :  { %v538_v4 = vadd.f32 1.0, %v2835_v2 }
  0xa4   :  { %2836 = vrcp.f32 %v537_v1  ;;  %vm544_vm1 = vweird.f32 %v537_v1  ;;  %v550_v23 = vand.u32 2147483648, %v537_v1  ;;  %v548_v26 = vand.u32 2147483647, %v537_v1 }
  0xa5   :  { %2838 = vrcp.f32 %v538_v4  ;;  %vm559_vm5 = vweird.f32 %v538_v4  ;;  %v565_v37 = vand.u32 2147483648, %v538_v4  ;;  %v563_v40 = vand.u32 2147483647, %v538_v4 }
  0xa6   :  { %v320_v46 = vpop.f32.mrf.mxu1  ;;  %625 = vrot.lane.b32.xlu0 %v2831_v45, %s3093_s22  ;;  %v551_v29 = vor.u32 1.1754944e-38, %v550_v23  ;;  %vm549_vm4 = vcmp.eq.f32.partialorder %v548_v26, 8.507059e+37 }
  0xa7   :  { %v566_v42 = vor.u32 1.1754944e-38, %v565_v37  ;;  %vm564_vm8 = vcmp.eq.f32.partialorder %v563_v40, 8.507059e+37 }
  0xaa   :  { %v2837_v7 = vpop.eup %2836 }
  0xab   :  { %v540_v8 = vmul.f32 %v2837_v7, %v537_v1  ;;  %v2839_v15 = vpop.eup %2838  ;;  %vm545_vm2 = vweird.f32 %v2837_v7 }
  0xac   :  { %v555_v21 = vmul.f32 %v2839_v15, %v538_v4  ;;  %vm546_vm3 = vmor %vm544_vm1, %vm545_vm2  ;;  %vm560_vm6 = vweird.f32 %v2839_v15 }
  0xad   :  { %v541_v12 = vsub.f32 1.0, %v540_v8  ;;  %vm561_vm7 = vmor %vm559_vm5, %vm560_vm6 }
  0xae   :  { %v322_v48 = vpop.f32.mrf.mxu1  ;;  %655 = vrot.lane.b32.xlu0 %v446_v47, %s3093_s22  ;;  %v556_v27 = vsub.f32 1.0, %v555_v21 }
  0xaf   :  { %v3237_v49 = vpack.c.bf16 %v322_v48, %v320_v46  ;;  %v542_v20 = vmul.f32 %v2837_v7, %v541_v12 }
  0xb0   :  { %v557_v34 = vmul.f32 %v2839_v15, %v556_v27 }
  0xb1   :  { %v543_v25 = vadd.f32 %v2837_v7, %v542_v20 }
  0xb2   :  { %v558_v39 = vadd.f32 %v2839_v15, %v557_v34 }
  0xb3   :  { %v547_v33 = vsel %vm546_vm3, %v2837_v7, %v543_v25 }
  0xb4   :  { %v3255_v36 = vsel %vm549_vm4, %v551_v29, %v547_v33  ;;  %v562_v43 = vsel %vm561_vm7, %v2839_v15, %v558_v39 }
  0xb5   :  { %v3260_v46 = vsel %vm564_vm8, %v566_v42, %v562_v43 }
  0xb6   :  { %v325_v50 = vpop.f32.mrf.mxu1 }
  0xbe   :  { %v327_v51 = vpop.f32.mrf.mxu1 }
  0xbf   :  { %v3239_v52 = vpack.c.bf16 %v327_v51, %v325_v50  ;;  %v447_v50 = vld [vmem:[#allocation5 + $0x18] sm:$0xff] }
  0xc6   :  { %v330_v53 = vpop.f32.mrf.mxu1 }
  0xce   :  { %v332_v54 = vpop.f32.mrf.mxu1 }
  0xcf   :  { %v3241_v55 = vpack.c.bf16 %v332_v54, %v330_v53  ;;  %v614_v53 = vpop.permute.xlu2 %613 }
  0xd6   :  { %v335_v56 = vpop.f32.mrf.mxu1 }
  0xd7   :  { %v616_v59 = vpop.permute.xlu2 %615 }
  0xde   :  { %v337_v57 = vpop.f32.mrf.mxu1 }
  0xdf   :  { %v3243_v58 = vpack.c.bf16 %v337_v57, %v335_v56 }
  0xe6   :  { %v340_v60 = vpop.f32.mrf.mxu1 }
  0xee   :  { %v342_v63 = vpop.f32.mrf.mxu1 }
  0xef   :  { %v3245_v0 = vpack.c.bf16 %v342_v63, %v340_v60  ;;  %v619_v63 = vmul.f32 %v614_v53, %v3255_v36 }
  0xf6   :  { %v345_v3 = vpop.f32.mrf.mxu1 }
  0xfe   :  { %v347_v9 = vpop.f32.mrf.mxu1 }
  0xff   :  { %v2742_v11 = vpack.c.bf16 %v347_v9, %v345_v3 }
 0x101   :  { %v2750_v13 = vunpack.c.l.bf16 %v2742_v11  ;;  %v2751_v19 = vunpack.c.h.bf16 %v2742_v11 }
 0x103   :  { %v497_v17 = vadd.f32 %v3250_v14, %v2750_v13  ;;  %v498_v24 = vadd.f32 %v3250_v14, %v2751_v19 }
 0x105   :  { %v529_v22 = vadd.f32 %v524_v10, %v497_v17  ;;  %v530_v30 = vadd.f32 %v526_v28, %v498_v24 }
 0x107   :  { %2840 = vtanh.f32 %v529_v22  ;;  %v2568_v51 = vmul.f32 -1.442695, %v529_v22  ;;  %v2569_v54 = vmul.f32 -1.442695, %v530_v30 }
 0x108   :  { %2842 = vtanh.f32 %v530_v30 }
 0x109   :  { %2844 = vpow2.f32 %v2568_v51 }
 0x10a   :  { %2846 = vpow2.f32 %v2569_v54 }
 0x10d   :  { %v2841_v35 = vpop.eup %2840 }
 0x10e   :  { %665 = vrot.lane.b32.xlu1 %v2841_v35, %s3093_s22  ;;  %v2843_v45 = vpop.eup %2842  ;;  %v620_v35 = vmul.f32 %v616_v59, %v3260_v46 }
 0x10f   :  { %v2845_v56 = vpop.eup %2844 }
 0x110   :  { %v624_v38 = vpop.permute.xlu0 %623  ;;  %v577_v57 = vadd.f32 1.0, %v2845_v56  ;;  %v2847_v60 = vpop.eup %2846 }
 0x111   :  { %v629_v41 = vmul.f32 %v624_v38, %v3255_v36  ;;  %v578_v61 = vadd.f32 1.0, %v2847_v60 }
 0x112   :  { %2848 = vrcp.f32 %v577_v57  ;;  %v590_v13 = vand.u32 2147483648, %v577_v57  ;;  %vm584_vm10 = vweird.f32 %v577_v57  ;;  %v588_v15 = vand.u32 2147483647, %v577_v57 }
 0x113   :  { %633 = vrot.lane.b32.xlu2 %v629_v41, %s3093_s22  ;;  %2850 = vrcp.f32 %v578_v61  ;;  %v605_v25 = vand.u32 2147483648, %v578_v61  ;;  %vm599_vm14 = vweird.f32 %v578_v61  ;;  %v603_v26 = vand.u32 2147483647, %v578_v61 }
 0x114   :  { %v591_v20 = vor.u32 1.1754944e-38, %v590_v13  ;;  %vm589_vm12 = vcmp.eq.f32.partialorder %v588_v15, 8.507059e+37 }
 0x115   :  { %v606_v29 = vor.u32 1.1754944e-38, %v605_v25  ;;  %vm604_vm1 = vcmp.eq.f32.partialorder %v603_v26, 8.507059e+37 }
 0x116   :  { %667 = vrot.lane.b32.xlu1 %v2843_v45, %s3093_s22 }
 0x118   :  { %v626_v47 = vpop.permute.xlu0 %625  ;;  %v2849_v62 = vpop.eup %2848 }
 0x119   :  { %v630_v48 = vmul.f32 %v626_v47, %v3260_v46  ;;  %v580_v2 = vmul.f32 %v2849_v62, %v577_v57  ;;  %v2851_v7 = vpop.eup %2850  ;;  %vm585_vm9 = vweird.f32 %v2849_v62 }
 0x11a   :  { %v595_v10 = vmul.f32 %v2851_v7, %v578_v61  ;;  %vm586_vm11 = vmor %vm584_vm10, %vm585_vm9  ;;  %vm600_vm13 = vweird.f32 %v2851_v7 }
 0x11b   :  { %635 = vrot.lane.b32.xlu0 %v630_v48, %s3093_s22  ;;  %v581_v4 = vsub.f32 1.0, %v580_v2  ;;  %vm601_vm15 = vmor %vm599_vm14, %vm600_vm13 }
 0x11c   :  { %v596_v12 = vsub.f32 1.0, %v595_v10 }
 0x11d   :  { %v582_v9 = vmul.f32 %v2849_v62, %v581_v4 }
 0x11e   :  { %657 = vrot.lane.b32.xlu1 %v447_v50, %s3093_s22  ;;  %v597_v19 = vmul.f32 %v2851_v7, %v596_v12 }
 0x11f   :  { %v583_v11 = vadd.f32 %v2849_v62, %v582_v9 }
 0x120   :  { %v598_v24 = vadd.f32 %v2851_v7, %v597_v19  ;;  %v656_v27 = vpop.permute.xlu0 %655 }
 0x121   :  { %v587_v17 = vsel %vm586_vm11, %v2849_v62, %v583_v11 }
 0x122   :  { %v592_v21 = vsel %vm589_vm12, %v591_v20, %v587_v17  ;;  %v602_v28 = vsel %vm601_vm15, %v2851_v7, %v598_v24 }
 0x123   :  { %v607_v30 = vsel %vm604_vm1, %v606_v29, %v602_v28  ;;  %v661_v47 = vmul.f32 %v656_v27, %v592_v21 }
 0x16d   :  { %v634_v1 = vpop.permute.xlu2 %633 }
 0x16e   :  { %v3266_v3 = vadd.f32 %v634_v1, %v619_v63  ;;  %v2645_v1 = vld [vmem:[%s4011_s0 + $0x8] sm:$0xff] }
 0x16f   :  { %2488 = vmatmul.msk.bf16.gmra.mxu0 %vm135_vm0, %v2645_v1 }
 0x170   :  { %2852 = vtanh.f32 %v3266_v3 }
 0x176   :  { %v2853_v8 = vpop.eup %2852 }
 0x177   :  { %645 = vrot.lane.b32.xlu0 %v2853_v8, %s3093_s22 }
 0x180   :  { %v666_v22 = vpop.permute.xlu1 %665 }
 0x181   :  { %v671_v23 = vmul.f32 %v666_v22, %v592_v21 }
 0x183   :  { %675 = vrot.lane.b32.xlu1 %v671_v23, %s3093_s22 }
 0x188   :  { %v668_v33 = vpop.permute.xlu1 %667 }
 0x189   :  { %v672_v34 = vmul.f32 %v668_v33, %v607_v30 }
 0x18b   :  { %677 = vrot.lane.b32.xlu2 %v672_v34, %s3093_s22 }
 0x18d   :  { %v636_v37 = vpop.permute.xlu0 %635 }
 0x18e   :  { %v3273_v38 = vadd.f32 %v636_v37, %v620_v35  ;;  %v2759_v37 = vunpack.c.h.bf16 %v3245_v0 }
 0x190   :  { %2854 = vtanh.f32 %v3273_v38  ;;  %v658_v40 = vpop.permute.xlu1 %657 }
 0x191   :  { %v662_v41 = vmul.f32 %v658_v40, %v607_v30 }
 0x196   :  { %v2855_v39 = vpop.eup %2854 }
 0x197   :  { %647 = vrot.lane.b32.xlu1 %v2855_v39, %s3093_s22  ;;  %v758_v39 = vadd.f32 %v3250_v14, %v2759_v37 }
 0x1e5   :  { %v678_v42 = vpop.permute.xlu2 %677 }
 0x1e6   :  { %v3277_v43 = vadd.f32 %v678_v42, %v662_v41 }
 0x1e8   :  { %2856 = vtanh.f32 %v3277_v43 }
 0x1e9   :  { %v646_v53 = vpop.permute.xlu0 %645 }
 0x1ea   :  { %v651_v54 = vmul.f32 %v646_v53, %v3255_v36 }
 0x1ec   :  { %v3286_v57 = vpack.c.bf16 %v651_v54, %v651_v54  ;;  %v174_v15 = vpop.f32.mrf.mxu0 }
 0x1ee   :  { %v2857_v45 = vpop.eup %2856  ;;  %v728_v61 = vunpack.c.l.b16 %v3286_v57 }
 0x1ef   :  { %689 = vrot.lane.b32.xlu0 %v2857_v45, %s3093_s22 }
 0x1f4   :  { %v176_v17 = vpop.f32.mrf.mxu0 }
 0x1f5   :  { %v676_v48 = vpop.permute.xlu1 %675  ;;  %v2672_v19 = vpack.c.bf16 %v176_v17, %v174_v15 }
 0x1f6   :  { %v3281_v50 = vadd.f32 %v676_v48, %v661_v47 }
 0x1f7   :  { %v2754_v20 = vunpack.c.l.bf16 %v2672_v19  ;;  %v2755_v23 = vunpack.c.h.bf16 %v2672_v19 }
 0x1f8   :  { %2858 = vtanh.f32 %v3281_v50 }
 0x1f9   :  { %v727_v25 = vadd.f32 %v3228_v32, %v2755_v23 }
 0x1fe   :  { %v2859_v51 = vpop.eup %2858 }
 0x1ff   :  { %687 = vrot.lane.b32.xlu2 %v2859_v51, %s3093_s22 }
 0x209   :  { %v648_v56 = vpop.permute.xlu1 %647 }
 0x20a   :  { %v652_v59 = vmul.f32 %v648_v56, %v3260_v46 }
 0x20c   :  { %v3289_v60 = vpack.c.bf16 %v652_v59, %v652_v59 }
 0x20e   :  { %v729_v62 = vunpack.c.l.b16 %v3289_v60 }
 0x210   :  { %v730_v63 = vpack.c.b16 %v729_v62, %v728_v61 }
 0x212   :  { %731 = vrot.lane.b32.xlu1 %v730_v63, %s3094_s2 }
 0x259   :  { %v688_v36 = vpop.permute.xlu2 %687 }
 0x25a   :  { %v693_v2 = vmul.f32 %v688_v36, %v592_v21  ;;  %v726_v21 = vadd.f32 %v3228_v32, %v2754_v20 }
 0x25c   :  { %v3298_v46 = vpack.c.bf16 %v693_v2, %v693_v2 }
 0x25e   :  { %v759_v9 = vunpack.c.l.b16 %v3298_v46 }
 0x261   :  { %v690_v4 = vpop.permute.xlu0 %689 }
 0x262   :  { %v694_v7 = vmul.f32 %v690_v4, %v607_v30  ;;  %v2758_v30 = vunpack.c.l.bf16 %v3245_v0 }
 0x264   :  { %v3300_v8 = vpack.c.bf16 %v694_v7, %v694_v7  ;;  %v757_v33 = vadd.f32 %v3250_v14, %v2758_v30 }
 0x266   :  { %v760_v10 = vunpack.c.l.b16 %v3300_v8 }
 0x268   :  { %v761_v11 = vpack.c.b16 %v760_v10, %v759_v9 }
 0x26a   :  { %762 = vrot.lane.b32.xlu2 %v761_v11, %s3094_s2 }
 0x284   :  { %v732_v12 = vpop.permute.xlu1 %731 }
 0x285   :  { %2572 = vmatmul.msk.bf16.vlgmr.msrb.gmra.mxu2 %vm135_vm0, %v732_v12 }
 0x286   :  { %1214 = vmatpush.bf16.msrb.mxu2 %v3148_v5 }
 0x28a   :  { %1215 = vmatpush.bf16.msrb.mxu2 %v3156_v6 }
 0x2c4   :  { %v763_v13 = vpop.permute.xlu2 %762 }
 0x2c5   :  { %2573 = vmatmul.msk.bf16.vlgmr.msrb.gmra.mxu3 %vm135_vm0, %v763_v13 }
 0x2c6   :  { %1245 = vmatpush.bf16.msrb.mxu3 %v3195_v16 }
 0x2ca   :  { %1246 = vmatpush.bf16.msrb.mxu3 %v3202_v18 }
 0x308   :  { %v745_v22 = vpop.f32.mrf.mxu2 }
 0x309   :  { %v750_v24 = vadd.f32 %v745_v22, %v726_v21 }
 0x30b   :  { %2860 = vtanh.f32 %v750_v24  ;;  %v2574_v45 = vmul.f32 -1.442695, %v750_v24 }
 0x310   :  { %v747_v26 = vpop.f32.mrf.mxu2 }
 0x311   :  { %v2861_v27 = vpop.eup %2860  ;;  %v751_v28 = vadd.f32 %v747_v26, %v727_v25 }
 0x312   :  { %867 = vrot.lane.b32.xlu0 %v2861_v27, %s3093_s22 }
 0x313   :  { %2862 = vtanh.f32 %v751_v28  ;;  %v2575_v48 = vmul.f32 -1.442695, %v751_v28 }
 0x319   :  { %v2863_v29 = vpop.eup %2862 }
 0x31a   :  { %869 = vrot.lane.b32.xlu1 %v2863_v29, %s3093_s22 }
 0x348   :  { %v776_v34 = vpop.f32.mrf.mxu3 }
 0x349   :  { %v781_v35 = vadd.f32 %v776_v34, %v757_v33 }
 0x34b   :  { %2864 = vtanh.f32 %v781_v35  ;;  %v2576_v9 = vmul.f32 -1.442695, %v781_v35 }
 0x350   :  { %v778_v40 = vpop.f32.mrf.mxu3 }
 0x351   :  { %v2865_v41 = vpop.eup %2864  ;;  %v782_v42 = vadd.f32 %v778_v40, %v758_v39 }
 0x352   :  { %901 = vrot.lane.b32.xlu2 %v2865_v41, %s3093_s22 }
 0x353   :  { %2866 = vtanh.f32 %v782_v42  ;;  %v2577_v34 = vmul.f32 -1.442695, %v782_v42 }
 0x354   :  { %2868 = vpow2.f32 %v2574_v45 }
 0x355   :  { %2870 = vpow2.f32 %v2575_v48 }
 0x359   :  { %v2867_v47 = vpop.eup %2866 }
 0x35a   :  { %903 = vrot.lane.b32.xlu0 %v2867_v47, %s3093_s22  ;;  %v2869_v51 = vpop.eup %2868 }
 0x35b   :  { %v789_v53 = vadd.f32 1.0, %v2869_v51  ;;  %v2871_v0 = vpop.eup %2870 }
 0x35c   :  { %v790_v54 = vadd.f32 1.0, %v2871_v0 }
 0x35d   :  { %2872 = vrcp.f32 %v789_v53  ;;  %v802_v4 = vand.u32 2147483648, %v789_v53  ;;  %vm796_vm3 = vweird.f32 %v789_v53  ;;  %v800_v7 = vand.u32 2147483647, %v789_v53 }
 0x35e   :  { %2874 = vrcp.f32 %v790_v54  ;;  %v817_v20 = vand.u32 2147483648, %v790_v54  ;;  %vm811_vm7 = vweird.f32 %v790_v54  ;;  %v815_v21 = vand.u32 2147483647, %v790_v54 }
 0x35f   :  { %v803_v12 = vor.u32 1.1754944e-38, %v802_v4  ;;  %vm801_vm5 = vcmp.eq.f32.partialorder %v800_v7, 8.507059e+37  ;;  %2876 = vpow2.f32 %v2576_v9 }
 0x360   :  { %v818_v24 = vor.u32 1.1754944e-38, %v817_v20  ;;  %vm816_vm9 = vcmp.eq.f32.partialorder %v815_v21, 8.507059e+37 }
 0x363   :  { %v2873_v56 = vpop.eup %2872 }
 0x364   :  { %v792_v59 = vmul.f32 %v2873_v56, %v789_v53  ;;  %v2875_v62 = vpop.eup %2874  ;;  %vm797_vm2 = vweird.f32 %v2873_v56 }
 0x365   :  { %v807_v1 = vmul.f32 %v2875_v62, %v790_v54  ;;  %vm798_vm4 = vmor %vm796_vm3, %vm797_vm2  ;;  %vm812_vm6 = vweird.f32 %v2875_v62  ;;  %v2877_v23 = vpop.eup %2876 }
 0x366   :  { %v793_v61 = vsub.f32 1.0, %v792_v59  ;;  %vm813_vm8 = vmor %vm811_vm7, %vm812_vm6  ;;  %v829_v27 = vadd.f32 1.0, %v2877_v23 }
 0x367   :  { %v808_v2 = vsub.f32 1.0, %v807_v1 }
 0x368   :  { %v794_v63 = vmul.f32 %v2873_v56, %v793_v61  ;;  %2878 = vrcp.f32 %v829_v27  ;;  %v842_v39 = vand.u32 2147483648, %v829_v27  ;;  %vm836_vm11 = vweird.f32 %v829_v27 }
 0x369   :  { %v809_v11 = vmul.f32 %v2875_v62, %v808_v2  ;;  %2880 = vpow2.f32 %v2577_v34  ;;  %v840_v40 = vand.u32 2147483647, %v829_v27 }
 0x36a   :  { %v795_v36 = vadd.f32 %v2873_v56, %v794_v63  ;;  %v843_v47 = vor.u32 1.1754944e-38, %v842_v39  ;;  %v2646_v39 = vld [vmem:[%s4011_s0 + $0x10] sm:$0xff] }
 0x36b   :  { %v810_v19 = vadd.f32 %v2875_v62, %v809_v11  ;;  %vm841_vm13 = vcmp.eq.f32.partialorder %v840_v40, 8.507059e+37  ;;  %2489 = vmatmul.msk.bf16.gmra.mxu0 %vm135_vm0, %v2646_v39 }
 0x36c   :  { %v799_v10 = vsel %vm798_vm4, %v2873_v56, %v795_v36 }
 0x36d   :  { %v3321_v15 = vsel %vm801_vm5, %v803_v12, %v799_v10  ;;  %v814_v22 = vsel %vm813_vm8, %v2875_v62, %v810_v19 }
 0x36e   :  { %v3325_v26 = vsel %vm816_vm9, %v818_v24, %v814_v22  ;;  %v2879_v29 = vpop.eup %2878 }
 0x36f   :  { %v832_v30 = vmul.f32 %v2879_v29, %v829_v27  ;;  %vm837_vm10 = vweird.f32 %v2879_v29  ;;  %v2881_v41 = vpop.eup %2880  ;;  %v864_v9 = vmul.f32 %v3325_v26, %v3273_v38 }
 0x370   :  { %vm838_vm12 = vmor %vm836_vm11, %vm837_vm10  ;;  %v830_v48 = vadd.f32 1.0, %v2881_v41 }
 0x371   :  { %v833_v33 = vsub.f32 1.0, %v832_v30 }
 0x372   :  { %2882 = vrcp.f32 %v830_v48  ;;  %v857_v62 = vand.u32 2147483648, %v830_v48  ;;  %vm851_vm15 = vweird.f32 %v830_v48  ;;  %v855_v63 = vand.u32 2147483647, %v830_v48 }
 0x373   :  { %v834_v35 = vmul.f32 %v2879_v29, %v833_v33 }
 0x374   :  { %v858_v36 = vor.u32 1.1754944e-38, %v857_v62  ;;  %vm856_vm2 = vcmp.eq.f32.partialorder %v855_v63, 8.507059e+37 }
 0x375   :  { %v835_v37 = vadd.f32 %v2879_v29, %v834_v35 }
 0x377   :  { %v839_v45 = vsel %vm838_vm12, %v2879_v29, %v835_v37 }
 0x378   :  { %v844_v53 = vsel %vm841_vm13, %v843_v47, %v839_v45  ;;  %v2883_v42 = vpop.eup %2882 }
 0x379   :  { %v847_v54 = vmul.f32 %v2883_v42, %v830_v48  ;;  %vm852_vm14 = vweird.f32 %v2883_v42  ;;  %v897_v38 = vmul.f32 %v844_v53, %v3281_v50 }
 0x37a   :  { %vm853_vm1 = vmor %vm851_vm15, %vm852_vm14 }
 0x37b   :  { %v848_v56 = vsub.f32 1.0, %v847_v54 }
 0x37d   :  { %v849_v59 = vmul.f32 %v2883_v42, %v848_v56 }
 0x37f   :  { %v850_v61 = vadd.f32 %v2883_v42, %v849_v59 }
 0x381   :  { %v854_v1 = vsel %vm853_vm1, %v2883_v42, %v850_v61 }
 0x382   :  { %v859_v2 = vsel %vm856_vm2, %v858_v36, %v854_v1 }
 0x384   :  { %v868_v13 = vpop.permute.xlu0 %867 }
 0x385   :  { %v873_v17 = vmul.f32 %v868_v13, %v3321_v15  ;;  %v863_v13 = vmul.f32 %v3321_v15, %v3266_v3  ;;  %v898_v3 = vmul.f32 %v859_v2, %v3277_v43 }
 0x387   :  { %877 = vrot.lane.b32.xlu1 %v873_v17, %s3093_s22 }
 0x38c   :  { %v870_v25 = vpop.permute.xlu1 %869 }
 0x38d   :  { %v874_v28 = vmul.f32 %v870_v25, %v3325_v26 }
 0x38f   :  { %879 = vrot.lane.b32.xlu2 %v874_v28, %s3093_s22 }
 0x3ac   :  { %v902_v51 = vpop.permute.xlu2 %901 }
 0x3ad   :  { %v907_v0 = vmul.f32 %v902_v51, %v844_v53 }
 0x3af   :  { %911 = vrot.lane.b32.xlu0 %v907_v0, %s3093_s22 }
 0x3cc   :  { %v904_v4 = vpop.permute.xlu0 %903 }
 0x3cd   :  { %v908_v7 = vmul.f32 %v904_v4, %v859_v2 }
 0x3cf   :  { %913 = vrot.lane.b32.xlu1 %v908_v7, %s3093_s22  ;;  %v2766_v7 = vunpack.c.l.bf16 %v3243_v58 }
 0x3e8   :  { %v179_v54 = vpop.f32.mrf.mxu0 }
 0x3e9   :  { %v880_v10 = vpop.permute.xlu2 %879 }
 0x3ea   :  { %v3333_v11 = vadd.f32 %v880_v10, %v864_v9  ;;  %v993_v9 = vadd.f32 %v3250_v14, %v2766_v7 }
 0x3ec   :  { %2884 = vtanh.f32 %v3333_v11 }
 0x3f0   :  { %v181_v56 = vpop.f32.mrf.mxu0 }
 0x3f1   :  { %v2677_v59 = vpack.c.bf16 %v181_v56, %v179_v54 }
 0x3f2   :  { %v2885_v12 = vpop.eup %2884 }
 0x3f3   :  { %891 = vrot.lane.b32.xlu0 %v2885_v12, %s3093_s22  ;;  %v2762_v61 = vunpack.c.l.bf16 %v2677_v59  ;;  %v2763_v1 = vunpack.c.h.bf16 %v2677_v59 }
 0x3f5   :  { %v962_v62 = vadd.f32 %v3228_v32, %v2762_v61 }
 0x3f9   :  { %v878_v17 = vpop.permute.xlu1 %877 }
 0x3fa   :  { %v3339_v19 = vadd.f32 %v878_v17, %v863_v13 }
 0x3fc   :  { %2886 = vtanh.f32 %v3339_v19 }
 0x402   :  { %v2887_v20 = vpop.eup %2886 }
 0x403   :  { %889 = vrot.lane.b32.xlu2 %v2887_v20, %s3093_s22 }
 0x421   :  { %v912_v21 = vpop.permute.xlu0 %911 }
 0x422   :  { %v3344_v22 = vadd.f32 %v912_v21, %v897_v38 }
 0x424   :  { %2888 = vtanh.f32 %v3344_v22 }
 0x42a   :  { %v2889_v23 = vpop.eup %2888 }
 0x42b   :  { %923 = vrot.lane.b32.xlu1 %v2889_v23, %s3093_s22 }
 0x441   :  { %v914_v24 = vpop.permute.xlu1 %913 }
 0x442   :  { %v3349_v25 = vadd.f32 %v914_v24, %v898_v3 }
 0x444   :  { %2890 = vtanh.f32 %v3349_v25 }
 0x44a   :  { %v2891_v27 = vpop.eup %2890 }
 0x44b   :  { %925 = vrot.lane.b32.xlu2 %v2891_v27, %s3093_s22 }
 0x45d   :  { %v890_v28 = vpop.permute.xlu2 %889 }
 0x45e   :  { %v895_v50 = vmul.f32 %v890_v28, %v3321_v15 }
 0x460   :  { %v3354_v30 = vpack.c.bf16 %v895_v50, %v895_v50 }
 0x462   :  { %v964_v43 = vunpack.c.l.b16 %v3354_v30 }
 0x465   :  { %v892_v29 = vpop.permute.xlu0 %891 }
 0x466   :  { %v896_v33 = vmul.f32 %v892_v29, %v3325_v26 }
 0x468   :  { %v3357_v34 = vpack.c.bf16 %v896_v33, %v896_v33 }
 0x46a   :  { %v965_v35 = vunpack.c.l.b16 %v3357_v34 }
 0x46c   :  { %v966_v37 = vpack.c.b16 %v965_v35, %v964_v43 }
 0x46e   :  { %967 = vrot.lane.b32.xlu0 %v966_v37, %s3094_s2 }
 0x49d   :  { %v924_v15 = vpop.permute.xlu1 %923 }
 0x49e   :  { %v929_v40 = vmul.f32 %v924_v15, %v844_v53 }
 0x4a0   :  { %v3366_v45 = vpack.c.bf16 %v929_v40, %v929_v40 }
 0x4a2   :  { %v995_v48 = vunpack.c.l.b16 %v3366_v45 }
 0x4a5   :  { %v926_v41 = vpop.permute.xlu2 %925 }
 0x4a6   :  { %v930_v26 = vmul.f32 %v926_v41, %v859_v2 }
 0x4a8   :  { %v3368_v47 = vpack.c.bf16 %v930_v26, %v930_v26 }
 0x4aa   :  { %v996_v51 = vunpack.c.l.b16 %v3368_v47 }
 0x4ac   :  { %v997_v0 = vpack.c.b16 %v996_v51, %v995_v48 }
 0x4ae   :  { %998 = vrot.lane.b32.xlu1 %v997_v0, %s3094_s2 }
 0x4e0   :  { %v968_v42 = vpop.permute.xlu0 %967 }
 0x4e1   :  { %2582 = vmatmul.msk.bf16.vlgmr.msra.gmra.mxu2 %vm135_vm0, %v968_v42 }
 0x4e2   :  { %1450 = vmatpush.bf16.msra.mxu2 %v3148_v5  ;;  %v963_v5 = vadd.f32 %v3228_v32, %v2763_v1  ;;  %v2767_v32 = vunpack.c.h.bf16 %v3243_v58 }
 0x4e4   :  { %v994_v20 = vadd.f32 %v3250_v14, %v2767_v32 }
 0x4e6   :  { %1451 = vmatpush.bf16.msra.mxu2 %v3156_v6 }
 0x520   :  { %v999_v53 = vpop.permute.xlu1 %998 }
 0x521   :  { %2583 = vmatmul.msk.bf16.vlgmr.msra.gmra.mxu3 %vm135_vm0, %v999_v53 }
 0x522   :  { %1481 = vmatpush.bf16.msra.mxu3 %v3195_v16 }
 0x526   :  { %1482 = vmatpush.bf16.msra.mxu3 %v3202_v18 }
 0x564   :  { %v981_v63 = vpop.f32.mrf.mxu2 }
 0x565   :  { %v986_v36 = vadd.f32 %v981_v63, %v962_v62 }
 0x567   :  { %2892 = vtanh.f32 %v986_v36  ;;  %v2584_v18 = vmul.f32 -1.442695, %v986_v36 }
 0x56c   :  { %v983_v6 = vpop.f32.mrf.mxu2 }
 0x56d   :  { %v2893_v2 = vpop.eup %2892  ;;  %v987_v4 = vadd.f32 %v983_v6, %v963_v5 }
 0x56e   :  { %1103 = vrot.lane.b32.xlu2 %v2893_v2, %s3093_s22 }
 0x56f   :  { %2894 = vtanh.f32 %v987_v4  ;;  %v2585_v50 = vmul.f32 -1.442695, %v987_v4 }
 0x570   :  { %2896 = vpow2.f32 %v2584_v18 }
 0x575   :  { %v2895_v16 = vpop.eup %2894 }
 0x576   :  { %1105 = vrot.lane.b32.xlu0 %v2895_v16, %s3093_s22  ;;  %v2897_v10 = vpop.eup %2896 }
 0x577   :  { %v1025_v17 = vadd.f32 1.0, %v2897_v10 }
 0x579   :  { %v1038_v33 = vand.u32 2147483648, %v1025_v17  ;;  %vm1032_vm4 = vweird.f32 %v1025_v17  ;;  %v1036_v14 = vand.u32 2147483647, %v1025_v17 }
 0x57b   :  { %v1039_v37 = vor.u32 1.1754944e-38, %v1038_v33  ;;  %vm1037_vm6 = vcmp.eq.f32.partialorder %v1036_v14, 8.507059e+37 }
 0x5a4   :  { %v1012_v12 = vpop.f32.mrf.mxu3 }
 0x5a5   :  { %v1017_v13 = vadd.f32 %v1012_v12, %v993_v9 }
 0x5a7   :  { %2898 = vtanh.f32 %v1017_v13  ;;  %v2586_v6 = vmul.f32 -1.442695, %v1017_v13 }
 0x5a8   :  { %2900 = vrcp.f32 %v1025_v17 }
 0x5ac   :  { %v1014_v38 = vpop.f32.mrf.mxu3 }
 0x5ad   :  { %v2899_v21 = vpop.eup %2898  ;;  %v1018_v23 = vadd.f32 %v1014_v38, %v994_v20 }
 0x5ae   :  { %1137 = vrot.lane.b32.xlu1 %v2899_v21, %s3093_s22  ;;  %v2901_v3 = vpop.eup %2900 }
 0x5af   :  { %2902 = vtanh.f32 %v1018_v23  ;;  %v1028_v24 = vmul.f32 %v2901_v3, %v1025_v17  ;;  %vm1033_vm3 = vweird.f32 %v2901_v3  ;;  %v2587_v56 = vmul.f32 -1.442695, %v1018_v23 }
 0x5b0   :  { %2904 = vpow2.f32 %v2585_v50  ;;  %vm1034_vm5 = vmor %vm1032_vm4, %vm1033_vm3 }
 0x5b1   :  { %v1029_v28 = vsub.f32 1.0, %v1028_v24 }
 0x5b3   :  { %v1030_v29 = vmul.f32 %v2901_v3, %v1029_v28 }
 0x5b5   :  { %v2903_v27 = vpop.eup %2902  ;;  %v1031_v58 = vadd.f32 %v2901_v3, %v1030_v29 }
 0x5b6   :  { %1139 = vrot.lane.b32.xlu2 %v2903_v27, %s3093_s22  ;;  %v2905_v43 = vpop.eup %2904 }
 0x5b7   :  { %v1035_v35 = vsel %vm1034_vm5, %v2901_v3, %v1031_v58  ;;  %v1026_v39 = vadd.f32 1.0, %v2905_v43 }
 0x5b8   :  { %v3389_v40 = vsel %vm1037_vm6, %v1039_v37, %v1035_v35 }
 0x5b9   :  { %2906 = vrcp.f32 %v1026_v39  ;;  %v1053_v53 = vand.u32 2147483648, %v1026_v39  ;;  %vm1047_vm8 = vweird.f32 %v1026_v39  ;;  %v1051_v54 = vand.u32 2147483647, %v1026_v39 }
 0x5ba   :  { %2908 = vpow2.f32 %v2587_v56  ;;  %v1099_v37 = vmul.f32 %v3389_v40, %v3339_v19 }
 0x5bb   :  { %v1054_v61 = vor.u32 1.1754944e-38, %v1053_v53  ;;  %vm1052_vm10 = vcmp.eq.f32.partialorder %v1051_v54, 8.507059e+37 }
 0x5bf   :  { %v2907_v26 = vpop.eup %2906 }
 0x5c0   :  { %v1043_v48 = vmul.f32 %v2907_v26, %v1026_v39  ;;  %vm1048_vm7 = vweird.f32 %v2907_v26  ;;  %v2909_v36 = vpop.eup %2908 }
 0x5c1   :  { %vm1049_vm9 = vmor %vm1047_vm8, %vm1048_vm7  ;;  %v1066_v5 = vadd.f32 1.0, %v2909_v36 }
 0x5c2   :  { %v1044_v51 = vsub.f32 1.0, %v1043_v48 }
 0x5c3   :  { %2910 = vrcp.f32 %v1066_v5  ;;  %v1093_v32 = vand.u32 2147483648, %v1066_v5  ;;  %vm1087_vm12 = vweird.f32 %v1066_v5  ;;  %v1091_v17 = vand.u32 2147483647, %v1066_v5 }
 0x5c4   :  { %v1045_v0 = vmul.f32 %v2907_v26, %v1044_v51  ;;  %2912 = vpow2.f32 %v2586_v6 }
 0x5c5   :  { %v1094_v21 = vor.u32 1.1754944e-38, %v1093_v32  ;;  %vm1092_vm14 = vcmp.eq.f32.partialorder %v1091_v17, 8.507059e+37 }
 0x5c6   :  { %v1046_v42 = vadd.f32 %v2907_v26, %v1045_v0 }
 0x5c8   :  { %v1104_v15 = vpop.permute.xlu2 %1103  ;;  %v1050_v59 = vsel %vm1049_vm9, %v2907_v26, %v1046_v42 }
 0x5c9   :  { %v1109_v41 = vmul.f32 %v1104_v15, %v3389_v40  ;;  %v3393_v63 = vsel %vm1052_vm10, %v1054_v61, %v1050_v59  ;;  %v2911_v2 = vpop.eup %2910 }
 0x5ca   :  { %v2913_v4 = vpop.eup %2912  ;;  %v1083_v16 = vmul.f32 %v2911_v2, %v1066_v5  ;;  %vm1088_vm11 = vweird.f32 %v2911_v2  ;;  %v1100_v26 = vmul.f32 %v3393_v63, %v3333_v11 }
 0x5cb   :  { %1113 = vrot.lane.b32.xlu0 %v1109_v41, %s3093_s22  ;;  %v1065_v18 = vadd.f32 1.0, %v2913_v4  ;;  %vm1089_vm13 = vmor %vm1087_vm12, %vm1088_vm11 }
 0x5cc   :  { %v1084_v7 = vsub.f32 1.0, %v1083_v16  ;;  %v2647_v16 = vld [vmem:[%s4011_s0 + $0x18] sm:$0xff] }
 0x5cd   :  { %2914 = vrcp.f32 %v1065_v18  ;;  %v1078_v50 = vand.u32 2147483648, %v1065_v18  ;;  %vm1072_vm1 = vweird.f32 %v1065_v18  ;;  %v1076_v29 = vand.u32 2147483647, %v1065_v18  ;;  %2490 = vmatmul.msk.bf16.gmra.mxu0 %vm135_vm0, %v2647_v16 }
 0x5ce   :  { %v1085_v9 = vmul.f32 %v2911_v2, %v1084_v7 }
 0x5cf   :  { %v1079_v33 = vor.u32 1.1754944e-38, %v1078_v50  ;;  %vm1077_vm3 = vcmp.eq.f32.partialorder %v1076_v29, 8.507059e+37  ;;  %v3470_v29 = vld [vmem:[%s4013_s4] ss:$0 sm:$0xff] }
 0x5d0   :  { %v1086_v10 = vadd.f32 %v2911_v2, %v1085_v9 }
 0x5d2   :  { %v1090_v20 = vsel %vm1089_vm13, %v2911_v2, %v1086_v10 }
 0x5d3   :  { %v2915_v12 = vpop.eup %2914  ;;  %v1095_v13 = vsel %vm1092_vm14, %v1094_v21, %v1090_v20  ;;  %v3451_v21 = vld [vmem:[%s4010_s3] sm:$0xff] }
 0x5d4   :  { %v1068_v38 = vmul.f32 %v2915_v12, %v1065_v18  ;;  %vm1073_vm15 = vweird.f32 %v2915_v12  ;;  %v1134_v54 = vmul.f32 %v1095_v13, %v3349_v25 }
 0x5d5   :  { %vm1074_vm2 = vmor %vm1072_vm1, %vm1073_vm15 }
 0x5d6   :  { %v1069_v24 = vsub.f32 1.0, %v1068_v38  ;;  %v3445_v38 = vld [vmem:[%s4010_s3 + $0x8] sm:$0xff] }
 0x5d8   :  { %v1070_v27 = vmul.f32 %v2915_v12, %v1069_v24 }
 0x5da   :  { %v1071_v28 = vadd.f32 %v2915_v12, %v1070_v27 }
 0x5dc   :  { %v1075_v58 = vsel %vm1074_vm2, %v2915_v12, %v1071_v28 }
 0x5dd   :  { %v1080_v43 = vsel %vm1077_vm3, %v1079_v33, %v1075_v58 }
 0x5de   :  { %v1133_v19 = vmul.f32 %v1080_v43, %v3344_v22 }
 0x5e8   :  { %v1106_v62 = vpop.permute.xlu0 %1105 }
 0x5e9   :  { %v1110_v1 = vmul.f32 %v1106_v62, %v3393_v63 }
 0x5eb   :  { %1115 = vrot.lane.b32.xlu1 %v1110_v1, %s3093_s22 }
 0x610   :  { %v1140_v23 = vpop.permute.xlu2 %1139 }
 0x611   :  { %v1144_v3 = vmul.f32 %v1140_v23, %v1095_v13  ;;  %v3458_v23 = vld [vmem:[%s4010_s3 + $0x18] sm:$0xff] }
 0x613   :  { %1149 = vrot.lane.b32.xlu0 %v1144_v3, %s3093_s22  ;;  %v3464_v3 = vld [vmem:[%s4010_s3 + $0x10] sm:$0xff] }
 0x620   :  { %v1138_v14 = vpop.permute.xlu1 %1137 }
 0x621   :  { %v1143_v35 = vmul.f32 %v1138_v14, %v1080_v43 }
 0x623   :  { %1147 = vrot.lane.b32.xlu2 %v1143_v35, %s3093_s22 }
 0x63d   :  { %v1114_v39 = vpop.permute.xlu0 %1113 }
 0x63e   :  { %v3401_v15 = vadd.f32 %v1114_v39, %v1099_v37 }
 0x640   :  { %2916 = vtanh.f32 %v3401_v15 }
 0x646   :  { %v2917_v41 = vpop.eup %2916 }
 0x647   :  { %1125 = vrot.lane.b32.xlu1 %v2917_v41, %s3093_s22 }
 0x64a   :  { %v184_v24 = vpop.f32.mrf.mxu0 }
 0x652   :  { %v186_v27 = vpop.f32.mrf.mxu0 }
 0x653   :  { %v2682_v28 = vpack.c.bf16 %v186_v27, %v184_v24 }
 0x655   :  { %v2770_v50 = vunpack.c.l.bf16 %v2682_v28  ;;  %v2771_v14 = vunpack.c.h.bf16 %v2682_v28 }
 0x657   :  { %v1198_v58 = vadd.f32 %v3470_v29, %v2770_v50  ;;  %v1199_v35 = vadd.f32 %v3470_v29, %v2771_v14 }
 0x65d   :  { %v1116_v48 = vpop.permute.xlu1 %1115 }
 0x65e   :  { %v3407_v51 = vadd.f32 %v1116_v48, %v1100_v26 }
 0x660   :  { %2918 = vtanh.f32 %v3407_v51 }
 0x666   :  { %v2919_v0 = vpop.eup %2918 }
 0x667   :  { %1127 = vrot.lane.b32.xlu2 %v2919_v0, %s3093_s22 }
 0x67d   :  { %v1148_v42 = vpop.permute.xlu2 %1147 }
 0x67e   :  { %v3412_v53 = vadd.f32 %v1148_v42, %v1133_v19 }
 0x680   :  { %2920 = vtanh.f32 %v3412_v53 }
 0x685   :  { %v1150_v56 = vpop.permute.xlu0 %1149 }
 0x686   :  { %v2921_v59 = vpop.eup %2920  ;;  %v3416_v11 = vadd.f32 %v1150_v56, %v1134_v54  ;;  %v2774_v54 = vunpack.c.l.bf16 %v3241_v55 }
 0x687   :  { %1159 = vrot.lane.b32.xlu0 %v2921_v59, %s3093_s22  ;;  %v3480_v59 = vld [vmem:[%s4013_s4 + $0x1] ss:$0 sm:$0xff] }
 0x688   :  { %2922 = vtanh.f32 %v3416_v11 }
 0x68e   :  { %v2923_v61 = vpop.eup %2922 }
 0x68f   :  { %1161 = vrot.lane.b32.xlu1 %v2923_v61, %s3093_s22  ;;  %v1229_v61 = vadd.f32 %v3480_v59, %v2774_v54 }
 0x6b9   :  { %v1126_v62 = vpop.permute.xlu1 %1125 }
 0x6ba   :  { %v1131_v22 = vmul.f32 %v1126_v62, %v3389_v40 }
 0x6bc   :  { %v3422_v36 = vpack.c.bf16 %v1131_v22, %v1131_v22 }
 0x6be   :  { %v1200_v6 = vunpack.c.l.b16 %v3422_v36 }
 0x6c1   :  { %v1128_v1 = vpop.permute.xlu2 %1127 }
 0x6c2   :  { %v1132_v5 = vmul.f32 %v1128_v1, %v3393_v63 }
 0x6c4   :  { %v3425_v25 = vpack.c.bf16 %v1132_v5, %v1132_v5 }
 0x6c6   :  { %v1201_v2 = vunpack.c.l.b16 %v3425_v25 }
 0x6c8   :  { %v1202_v4 = vpack.c.b16 %v1201_v2, %v1200_v6  ;;  %v2775_v6 = vunpack.c.h.bf16 %v3241_v55 }
 0x6ca   :  { %1203 = vrot.lane.b32.xlu2 %v1202_v4, %s3094_s2  ;;  %v1230_v16 = vadd.f32 %v3480_v59, %v2775_v6 }
 0x6f9   :  { %v1160_v40 = vpop.permute.xlu0 %1159 }
 0x6fa   :  { %v1165_v18 = vmul.f32 %v1160_v40, %v1080_v43 }
 0x6fc   :  { %v3434_v9 = vpack.c.bf16 %v1165_v18, %v1165_v18 }
 0x6fe   :  { %v1231_v12 = vunpack.c.l.b16 %v3434_v9 }
 0x701   :  { %v1162_v7 = vpop.permute.xlu1 %1161 }
 0x702   :  { %v1166_v63 = vmul.f32 %v1162_v7, %v1095_v13 }
 0x704   :  { %v3436_v10 = vpack.c.bf16 %v1166_v63, %v1166_v63 }
 0x706   :  { %v1232_v32 = vunpack.c.l.b16 %v3436_v10 }
 0x708   :  { %v1233_v17 = vpack.c.b16 %v1232_v32, %v1231_v12 }
 0x70a   :  { %1234 = vrot.lane.b32.xlu0 %v1233_v17, %s3094_s2 }
 0x724   :  { %v1204_v20 = vpop.permute.xlu2 %1203 }
 0x725   :  { %2592 = vmatmul.msk.bf16.vlgmr.msrb.gmra.mxu2 %vm135_vm0, %v1204_v20 }
 0x726   :  { %1686 = vmatpush.bf16.msrb.mxu2 %v3445_v38 }
 0x72a   :  { %1687 = vmatpush.bf16.msrb.mxu2 %v3451_v21 }
 0x77c   :  { %v1235_v13 = vpop.permute.xlu0 %1234 }
 0x77d   :  { %2593 = vmatmul.msk.bf16.vlgmr.msrb.gmra.mxu3 %vm135_vm0, %v1235_v13 }
 0x77e   :  { %1717 = vmatpush.bf16.msrb.mxu3 %v3458_v23 }
 0x782   :  { %1718 = vmatpush.bf16.msrb.mxu3 %v3464_v3 }
 0x7a8   :  { %v1217_v33 = vpop.f32.mrf.mxu2 }
 0x7a9   :  { %v1222_v43 = vadd.f32 %v1217_v33, %v1198_v58 }
 0x7ab   :  { %2924 = vtanh.f32 %v1222_v43  ;;  %v2594_v42 = vmul.f32 -1.442695, %v1222_v43 }
 0x7b0   :  { %v1219_v37 = vpop.f32.mrf.mxu2 }
 0x7b1   :  { %v2925_v39 = vpop.eup %2924  ;;  %v1223_v41 = vadd.f32 %v1219_v37, %v1199_v35 }
 0x7b2   :  { %1339 = vrot.lane.b32.xlu1 %v2925_v39, %s3093_s22 }
 0x7b3   :  { %2926 = vtanh.f32 %v1223_v41  ;;  %v2595_v48 = vmul.f32 -1.442695, %v1223_v41 }
 0x7b5   :  { %2928 = vpow2.f32 %v2595_v48 }
 0x7b9   :  { %v2927_v26 = vpop.eup %2926 }
 0x7ba   :  { %1341 = vrot.lane.b32.xlu2 %v2927_v26, %s3093_s22 }
 0x7bb   :  { %v2929_v0 = vpop.eup %2928 }
 0x7bc   :  { %v1262_v19 = vadd.f32 1.0, %v2929_v0 }
 0x7be   :  { %2930 = vrcp.f32 %v1262_v19  ;;  %v1289_v17 = vand.u32 2147483648, %v1262_v19  ;;  %vm1283_vm5 = vweird.f32 %v1262_v19  ;;  %v1287_v20 = vand.u32 2147483647, %v1262_v19 }
 0x7bf   :  { %2932 = vpow2.f32 %v2594_v42 }
 0x7c0   :  { %v1290_v27 = vor.u32 1.1754944e-38, %v1289_v17  ;;  %vm1288_vm7 = vcmp.eq.f32.partialorder %v1287_v20, 8.507059e+37 }
 0x7c4   :  { %v2931_v56 = vpop.eup %2930 }
 0x7c5   :  { %v2933_v62 = vpop.eup %2932  ;;  %v1279_v1 = vmul.f32 %v2931_v56, %v1262_v19  ;;  %vm1284_vm4 = vweird.f32 %v2931_v56 }
 0x7c6   :  { %v1261_v2 = vadd.f32 1.0, %v2933_v62  ;;  %vm1285_vm6 = vmor %vm1283_vm5, %vm1284_vm4 }
 0x7c7   :  { %v1280_v4 = vsub.f32 1.0, %v1279_v1 }
 0x7c8   :  { %v1274_v35 = vand.u32 2147483648, %v1261_v2  ;;  %vm1268_vm9 = vweird.f32 %v1261_v2  ;;  %v1272_v37 = vand.u32 2147483647, %v1261_v2 }
 0x7c9   :  { %v1281_v18 = vmul.f32 %v2931_v56, %v1280_v4 }
 0x7ca   :  { %v1275_v41 = vor.u32 1.1754944e-38, %v1274_v35  ;;  %vm1273_vm11 = vcmp.eq.f32.partialorder %v1272_v37, 8.507059e+37 }
 0x7cb   :  { %v1282_v12 = vadd.f32 %v2931_v56, %v1281_v18 }
 0x7cd   :  { %v1286_v55 = vsel %vm1285_vm6, %v2931_v56, %v1282_v12 }
 0x7ce   :  { %v3487_v50 = vsel %vm1288_vm7, %v1290_v27, %v1286_v55 }
 0x800   :  { %v1248_v22 = vpop.f32.mrf.mxu3 }
 0x801   :  { %v1253_v5 = vadd.f32 %v1248_v22, %v1229_v61 }
 0x803   :  { %2934 = vtanh.f32 %v1253_v5  ;;  %v2596_v19 = vmul.f32 -1.442695, %v1253_v5 }
 0x804   :  { %2936 = vrcp.f32 %v1261_v2 }
 0x808   :  { %v1250_v40 = vpop.f32.mrf.mxu3 }
 0x809   :  { %v2935_v7 = vpop.eup %2934  ;;  %v1254_v63 = vadd.f32 %v1250_v40, %v1230_v16 }
 0x80a   :  { %1373 = vrot.lane.b32.xlu0 %v2935_v7, %s3093_s22  ;;  %v2937_v32 = vpop.eup %2936 }
 0x80b   :  { %2938 = vtanh.f32 %v1254_v63  ;;  %v1264_v13 = vmul.f32 %v2937_v32, %v1261_v2  ;;  %vm1269_vm8 = vweird.f32 %v2937_v32  ;;  %v2597_v42 = vmul.f32 -1.442695, %v1254_v63 }
 0x80c   :  { %vm1270_vm10 = vmor %vm1268_vm9, %vm1269_vm8  ;;  %2940 = vpow2.f32 %v2596_v19 }
 0x80d   :  { %v1265_v33 = vsub.f32 1.0, %v1264_v13  ;;  %2942 = vpow2.f32 %v2597_v42 }
 0x80f   :  { %v1266_v14 = vmul.f32 %v2937_v32, %v1265_v33 }
 0x811   :  { %v2939_v24 = vpop.eup %2938  ;;  %v1267_v43 = vadd.f32 %v2937_v32, %v1266_v14 }
 0x812   :  { %1375 = vrot.lane.b32.xlu1 %v2939_v24, %s3093_s22  ;;  %v2941_v54 = vpop.eup %2940 }
 0x813   :  { %v1271_v39 = vsel %vm1270_vm10, %v2937_v32, %v1267_v43  ;;  %v1301_v56 = vadd.f32 1.0, %v2941_v54  ;;  %v2943_v61 = vpop.eup %2942 }
 0x814   :  { %v1342_v28 = vpop.permute.xlu2 %1341  ;;  %v3491_v48 = vsel %vm1273_vm11, %v1275_v41, %v1271_v39  ;;  %v1302_v62 = vadd.f32 1.0, %v2943_v61  ;;  %v1336_v41 = vmul.f32 %v3487_v50, %v3407_v51 }
 0x815   :  { %v1346_v58 = vmul.f32 %v1342_v28, %v3487_v50  ;;  %2944 = vrcp.f32 %v1301_v56  ;;  %v1314_v7 = vand.u32 2147483648, %v1301_v56  ;;  %vm1308_vm13 = vweird.f32 %v1301_v56 }
 0x816   :  { %2946 = vrcp.f32 %v1302_v62  ;;  %v1312_v5 = vand.u32 2147483647, %v1301_v56  ;;  %v1329_v24 = vand.u32 2147483648, %v1302_v62  ;;  %v1335_v27 = vmul.f32 %v3491_v48, %v3401_v15 }
 0x817   :  { %1351 = vrot.lane.b32.xlu0 %v1346_v58, %s3093_s22  ;;  %v1315_v32 = vor.u32 1.1754944e-38, %v1314_v7  ;;  %vm1323_vm2 = vweird.f32 %v1302_v62  ;;  %v1327_v28 = vand.u32 2147483647, %v1302_v62 }
 0x818   :  { %vm1313_vm15 = vcmp.eq.f32.partialorder %v1312_v5, 8.507059e+37  ;;  %v1330_v43 = vor.u32 1.1754944e-38, %v1329_v24  ;;  %v2648_v5 = vld [vmem:[%s4011_s0 + $0x20] sm:$0xff] }
 0x819   :  { %vm1328_vm4 = vcmp.eq.f32.partialorder %v1327_v28, 8.507059e+37  ;;  %2491 = vmatmul.msk.bf16.gmra.mxu0 %vm135_vm0, %v2648_v5 }
 0x81b   :  { %v2945_v22 = vpop.eup %2944 }
 0x81c   :  { %v1304_v1 = vmul.f32 %v2945_v22, %v1301_v56  ;;  %v2947_v2 = vpop.eup %2946  ;;  %vm1309_vm12 = vweird.f32 %v2945_v22 }
 0x81d   :  { %v1319_v16 = vmul.f32 %v2947_v2, %v1302_v62  ;;  %vm1310_vm14 = vmor %vm1308_vm13, %vm1309_vm12  ;;  %vm1324_vm1 = vweird.f32 %v2947_v2 }
 0x81e   :  { %v1305_v6 = vsub.f32 1.0, %v1304_v1  ;;  %vm1325_vm3 = vmor %vm1323_vm2, %vm1324_vm1 }
 0x81f   :  { %v1320_v18 = vsub.f32 1.0, %v1319_v16 }
 0x820   :  { %v1306_v4 = vmul.f32 %v2945_v22, %v1305_v6 }
 0x821   :  { %v1321_v12 = vmul.f32 %v2947_v2, %v1320_v18 }
 0x822   :  { %v1307_v40 = vadd.f32 %v2945_v22, %v1306_v4 }
 0x823   :  { %v1322_v13 = vadd.f32 %v2947_v2, %v1321_v12 }
 0x824   :  { %v1340_v26 = vpop.permute.xlu1 %1339  ;;  %v1311_v63 = vsel %vm1310_vm14, %v2945_v22, %v1307_v40 }
 0x825   :  { %v1345_v0 = vmul.f32 %v1340_v26, %v3491_v48  ;;  %v1316_v20 = vsel %vm1313_vm15, %v1315_v32, %v1311_v63  ;;  %v1326_v14 = vsel %vm1325_vm3, %v2947_v2, %v1322_v13 }
 0x826   :  { %v1331_v35 = vsel %vm1328_vm4, %v1330_v43, %v1326_v14  ;;  %v1369_v51 = vmul.f32 %v1316_v20, %v3412_v53 }
 0x827   :  { %1349 = vrot.lane.b32.xlu2 %v1345_v0, %s3093_s22  ;;  %v1370_v42 = vmul.f32 %v1331_v35, %v3416_v11 }
 0x87c   :  { %v1374_v17 = vpop.permute.xlu0 %1373 }
 0x87d   :  { %v1379_v55 = vmul.f32 %v1374_v17, %v1316_v20 }
 0x87f   :  { %1383 = vrot.lane.b32.xlu1 %v1379_v55, %s3093_s22 }
 0x881   :  { %v1350_v58 = vpop.permute.xlu2 %1349 }
 0x882   :  { %v3498_v33 = vadd.f32 %v1350_v58, %v1335_v27 }
 0x884   :  { %2948 = vtanh.f32 %v3498_v33  ;;  %v1376_v37 = vpop.permute.xlu1 %1375 }
 0x885   :  { %v1380_v39 = vmul.f32 %v1376_v37, %v1331_v35 }
 0x887   :  { %1385 = vrot.lane.b32.xlu2 %v1380_v39, %s3093_s22 }
 0x889   :  { %v1352_v15 = vpop.permute.xlu0 %1351 }
 0x88a   :  { %v2949_v26 = vpop.eup %2948  ;;  %v3504_v0 = vadd.f32 %v1352_v15, %v1336_v41 }
 0x88b   :  { %1361 = vrot.lane.b32.xlu0 %v2949_v26, %s3093_s22 }
 0x88c   :  { %2950 = vtanh.f32 %v3504_v0 }
 0x892   :  { %v2951_v19 = vpop.eup %2950 }
 0x893   :  { %1363 = vrot.lane.b32.xlu1 %v2951_v19, %s3093_s22 }
 0x896   :  { %v189_v28 = vpop.f32.mrf.mxu0 }
 0x89e   :  { %v191_v58 = vpop.f32.mrf.mxu0 }
 0x89f   :  { %v2687_v14 = vpack.c.bf16 %v191_v58, %v189_v28 }
 0x8a1   :  { %v2778_v43 = vunpack.c.l.bf16 %v2687_v14  ;;  %v2779_v39 = vunpack.c.h.bf16 %v2687_v14 }
 0x8a3   :  { %v1435_v15 = vadd.f32 %v3470_v29, %v2779_v39 }
 0x8e1   :  { %v1386_v54 = vpop.permute.xlu2 %1385 }
 0x8e2   :  { %v3510_v56 = vadd.f32 %v1386_v54, %v1370_v42 }
 0x8e4   :  { %2952 = vtanh.f32 %v3510_v56 }
 0x8ea   :  { %v2953_v61 = vpop.eup %2952 }
 0x8eb   :  { %1397 = vrot.lane.b32.xlu0 %v2953_v61, %s3093_s22  ;;  %v2782_v61 = vunpack.c.l.bf16 %v3239_v52 }
 0x8f1   :  { %v1384_v62 = vpop.permute.xlu1 %1383 }
 0x8f2   :  { %v3515_v22 = vadd.f32 %v1384_v62, %v1369_v51  ;;  %v1465_v51 = vadd.f32 %v3480_v59, %v2782_v61 }
 0x8f4   :  { %2954 = vtanh.f32 %v3515_v22 }
 0x8fa   :  { %v2955_v1 = vpop.eup %2954 }
 0x8fb   :  { %1395 = vrot.lane.b32.xlu2 %v2955_v1, %s3093_s22 }
 0x8fd   :  { %v1362_v6 = vpop.permute.xlu0 %1361 }
 0x8fe   :  { %v1367_v11 = vmul.f32 %v1362_v6, %v3491_v48  ;;  %v2783_v6 = vunpack.c.h.bf16 %v3239_v52 }
 0x900   :  { %v3520_v4 = vpack.c.bf16 %v1367_v11, %v1367_v11  ;;  %v1466_v11 = vadd.f32 %v3480_v59, %v2783_v6 }
 0x902   :  { %v1436_v53 = vunpack.c.l.b16 %v3520_v4 }
 0x905   :  { %v1364_v2 = vpop.permute.xlu1 %1363 }
 0x906   :  { %v1368_v16 = vmul.f32 %v1364_v2, %v3487_v50 }
 0x908   :  { %v3523_v40 = vpack.c.bf16 %v1368_v16, %v1368_v16 }
 0x90a   :  { %v1437_v18 = vunpack.c.l.b16 %v3523_v40 }
 0x90c   :  { %v1438_v7 = vpack.c.b16 %v1437_v18, %v1436_v53 }
 0x90e   :  { %1439 = vrot.lane.b32.xlu1 %v1438_v7, %s3094_s2 }
 0x955   :  { %v1396_v48 = vpop.permute.xlu2 %1395 }
 0x956   :  { %v1401_v63 = vmul.f32 %v1396_v48, %v1316_v20 }
 0x958   :  { %v3532_v32 = vpack.c.bf16 %v1401_v63, %v1401_v63 }
 0x95a   :  { %v1467_v55 = vunpack.c.l.b16 %v3532_v32 }
 0x95d   :  { %v1398_v12 = vpop.permute.xlu0 %1397 }
 0x95e   :  { %v1402_v50 = vmul.f32 %v1398_v12, %v1331_v35  ;;  %v1434_v35 = vadd.f32 %v3470_v29, %v2778_v43 }
 0x960   :  { %v3534_v17 = vpack.c.bf16 %v1402_v50, %v1402_v50 }
 0x962   :  { %v1468_v13 = vunpack.c.l.b16 %v3534_v17 }
 0x964   :  { %v1469_v24 = vpack.c.b16 %v1468_v13, %v1467_v55 }
 0x966   :  { %1470 = vrot.lane.b32.xlu2 %v1469_v24, %s3094_s2 }
 0x980   :  { %v1440_v27 = vpop.permute.xlu1 %1439 }
 0x981   :  { %2602 = vmatmul.msk.bf16.vlgmr.msra.gmra.mxu2 %vm135_vm0, %v1440_v27 }
 0x982   :  { %1922 = vmatpush.bf16.msra.mxu2 %v3445_v38 }
 0x986   :  { %1923 = vmatpush.bf16.msra.mxu2 %v3451_v21 }
 0x9c0   :  { %v1471_v20 = vpop.permute.xlu2 %1470 }
 0x9c1   :  { %2603 = vmatmul.msk.bf16.vlgmr.msra.gmra.mxu3 %vm135_vm0, %v1471_v20 }
 0x9c2   :  { %1953 = vmatpush.bf16.msra.mxu3 %v3458_v23 }
 0x9c6   :  { %1954 = vmatpush.bf16.msra.mxu3 %v3464_v3 }
 0xa04   :  { %v1453_v37 = vpop.f32.mrf.mxu2 }
 0xa05   :  { %v1458_v41 = vadd.f32 %v1453_v37, %v1434_v35 }
 0xa07   :  { %2956 = vtanh.f32 %v1458_v41  ;;  %v2604_v18 = vmul.f32 -1.442695, %v1458_v41 }
 0xa0c   :  { %v1455_v26 = vpop.f32.mrf.mxu2 }
 0xa0d   :  { %v2957_v19 = vpop.eup %2956  ;;  %v1459_v42 = vadd.f32 %v1455_v26, %v1435_v15 }
 0xa0e   :  { %1575 = vrot.lane.b32.xlu0 %v2957_v19, %s3093_s22 }
 0xa0f   :  { %2958 = vtanh.f32 %v1459_v42  ;;  %v2605_v5 = vmul.f32 -1.442695, %v1459_v42 }
 0xa15   :  { %v2959_v54 = vpop.eup %2958 }
 0xa16   :  { %1577 = vrot.lane.b32.xlu1 %v2959_v54, %s3093_s22 }
 0xa44   :  { %v1484_v62 = vpop.f32.mrf.mxu3 }
 0xa45   :  { %v1489_v1 = vadd.f32 %v1484_v62, %v1465_v51 }
 0xa47   :  { %2960 = vtanh.f32 %v1489_v1  ;;  %v2606_v35 = vmul.f32 -1.442695, %v1489_v1 }
 0xa4c   :  { %v1486_v2 = vpop.f32.mrf.mxu3 }
 0xa4d   :  { %v2961_v16 = vpop.eup %2960  ;;  %v1490_v53 = vadd.f32 %v1486_v2, %v1466_v11 }
 0xa4e   :  { %1609 = vrot.lane.b32.xlu2 %v2961_v16, %s3093_s22 }
 0xa4f   :  { %2962 = vtanh.f32 %v1490_v53 }
 0xa50   :  { %2964 = vpow2.f32 %v2604_v18 }
 0xa51   :  { %2966 = vpow2.f32 %v2605_v5 }
 0xa55   :  { %v2963_v7 = vpop.eup %2962 }
 0xa56   :  { %1611 = vrot.lane.b32.xlu0 %v2963_v7, %s3093_s22  ;;  %v2965_v48 = vpop.eup %2964 }
 0xa57   :  { %v1497_v63 = vadd.f32 1.0, %v2965_v48  ;;  %v2967_v52 = vpop.eup %2966  ;;  %v2607_v48 = vmul.f32 -1.442695, %v1490_v53 }
 0xa58   :  { %v1498_v12 = vadd.f32 1.0, %v2967_v52 }
 0xa59   :  { %2968 = vrcp.f32 %v1497_v63  ;;  %v1510_v14 = vand.u32 2147483648, %v1497_v63  ;;  %vm1504_vm6 = vweird.f32 %v1497_v63  ;;  %v1508_v43 = vand.u32 2147483647, %v1497_v63 }
 0xa5a   :  { %2970 = vrcp.f32 %v1498_v12  ;;  %v1525_v54 = vand.u32 2147483648, %v1498_v12  ;;  %vm1519_vm10 = vweird.f32 %v1498_v12  ;;  %v1523_v61 = vand.u32 2147483647, %v1498_v12 }
 0xa5b   :  { %v1511_v41 = vor.u32 1.1754944e-38, %v1510_v14  ;;  %vm1509_vm8 = vcmp.eq.f32.partialorder %v1508_v43, 8.507059e+37  ;;  %2972 = vpow2.f32 %v2606_v35 }
 0xa5c   :  { %v1526_v1 = vor.u32 1.1754944e-38, %v1525_v54  ;;  %vm1524_vm12 = vcmp.eq.f32.partialorder %v1523_v61, 8.507059e+37 }
 0xa5f   :  { %v2969_v50 = vpop.eup %2968 }
 0xa60   :  { %v1500_v55 = vmul.f32 %v2969_v50, %v1497_v63  ;;  %v2971_v24 = vpop.eup %2970  ;;  %vm1505_vm5 = vweird.f32 %v2969_v50 }
 0xa61   :  { %v1515_v20 = vmul.f32 %v2971_v24, %v1498_v12  ;;  %vm1506_vm7 = vmor %vm1504_vm6, %vm1505_vm5  ;;  %vm1520_vm9 = vweird.f32 %v2971_v24  ;;  %v2973_v62 = vpop.eup %2972 }
 0xa62   :  { %v1501_v13 = vsub.f32 1.0, %v1500_v55  ;;  %vm1521_vm11 = vmor %vm1519_vm10, %vm1520_vm9  ;;  %v1537_v2 = vadd.f32 1.0, %v2973_v62 }
 0xa63   :  { %v1516_v58 = vsub.f32 1.0, %v1515_v20 }
 0xa64   :  { %v1502_v27 = vmul.f32 %v2969_v50, %v1501_v13  ;;  %2974 = vrcp.f32 %v1537_v2  ;;  %v1550_v12 = vand.u32 2147483648, %v1537_v2  ;;  %vm1544_vm14 = vweird.f32 %v1537_v2 }
 0xa65   :  { %v1517_v39 = vmul.f32 %v2971_v24, %v1516_v58  ;;  %2976 = vpow2.f32 %v2607_v48 }
 0xa66   :  { %v1503_v28 = vadd.f32 %v2969_v50, %v1502_v27 }
 0xa67   :  { %v1518_v42 = vadd.f32 %v2971_v24, %v1517_v39 }
 0xa68   :  { %v1507_v37 = vsel %vm1506_vm7, %v2969_v50, %v1503_v28  ;;  %v1548_v50 = vand.u32 2147483647, %v1537_v2 }
 0xa69   :  { %v3555_v26 = vsel %vm1509_vm8, %v1511_v41, %v1507_v37  ;;  %v1522_v51 = vsel %vm1521_vm11, %v2971_v24, %v1518_v42  ;;  %v1551_v24 = vor.u32 1.1754944e-38, %v1550_v12 }
 0xa6a   :  { %v3559_v11 = vsel %vm1524_vm12, %v1526_v1, %v1522_v51  ;;  %v2975_v18 = vpop.eup %2974  ;;  %vm1549_vm1 = vcmp.eq.f32.partialorder %v1548_v50, 8.507059e+37 }
 0xa6b   :  { %v1540_v7 = vmul.f32 %v2975_v18, %v1537_v2  ;;  %vm1545_vm13 = vweird.f32 %v2975_v18  ;;  %v2977_v55 = vpop.eup %2976  ;;  %v1572_v51 = vmul.f32 %v3559_v11, %v3504_v0  ;;  %v1571_v2 = vmul.f32 %v3555_v26, %v3498_v33 }
 0xa6c   :  { %vm1546_vm15 = vmor %vm1544_vm14, %vm1545_vm13  ;;  %v1538_v27 = vadd.f32 1.0, %v2977_v55 }
 0xa6d   :  { %v1541_v5 = vsub.f32 1.0, %v1540_v7 }
 0xa6e   :  { %2978 = vrcp.f32 %v1538_v27  ;;  %v1565_v39 = vand.u32 2147483648, %v1538_v27  ;;  %vm1559_vm3 = vweird.f32 %v1538_v27  ;;  %v1563_v41 = vand.u32 2147483647, %v1538_v27 }
 0xa6f   :  { %v1542_v63 = vmul.f32 %v2975_v18, %v1541_v5 }
 0xa70   :  { %vm1564_vm5 = vcmp.eq.f32.partialorder %v1563_v41, 8.507059e+37 }
 0xa71   :  { %v1543_v52 = vadd.f32 %v2975_v18, %v1542_v63 }
 0xa73   :  { %v1547_v13 = vsel %vm1546_vm15, %v2975_v18, %v1543_v52 }
 0xa74   :  { %v1552_v28 = vsel %vm1549_vm1, %v1551_v24, %v1547_v13  ;;  %v2979_v53 = vpop.eup %2978 }
 0xa75   :  { %v1555_v14 = vmul.f32 %v2979_v53, %v1538_v27  ;;  %vm1560_vm2 = vweird.f32 %v2979_v53  ;;  %v1605_v0 = vmul.f32 %v1552_v28, %v3515_v22 }
 0xa76   :  { %vm1561_vm4 = vmor %vm1559_vm3, %vm1560_vm2 }
 0xa77   :  { %v1556_v43 = vsub.f32 1.0, %v1555_v14  ;;  %v2649_v14 = vld [vmem:[%s4011_s0 + $0x28] sm:$0xff] }
 0xa78   :  { %2492 = vmatmul.msk.bf16.gmra.mxu0 %vm135_vm0, %v2649_v14 }
 0xa79   :  { %v1557_v35 = vmul.f32 %v2979_v53, %v1556_v43 }
 0xa7b   :  { %v1558_v37 = vadd.f32 %v2979_v53, %v1557_v35 }
 0xa80   :  { %v1576_v15 = vpop.permute.xlu0 %1575 }
 0xa81   :  { %v1581_v19 = vmul.f32 %v1576_v15, %v3555_v26  ;;  %v1562_v15 = vsel %vm1561_vm4, %v2979_v53, %v1558_v37 }
 0xa83   :  { %1585 = vrot.lane.b32.xlu1 %v1581_v19, %s3093_s22  ;;  %v1566_v19 = vor.u32 1.1754944e-38, %v1565_v39 }
 0xa85   :  { %v1567_v42 = vsel %vm1564_vm5, %v1566_v19, %v1562_v15 }
 0xa86   :  { %v1606_v33 = vmul.f32 %v1567_v42, %v3510_v56 }
 0xa88   :  { %v1578_v6 = vpop.permute.xlu1 %1577 }
 0xa89   :  { %v1582_v16 = vmul.f32 %v1578_v6, %v3559_v11 }
 0xa8b   :  { %1587 = vrot.lane.b32.xlu2 %v1582_v16, %s3093_s22 }
 0xaa8   :  { %v1610_v20 = vpop.permute.xlu2 %1609 }
 0xaa9   :  { %v1615_v58 = vmul.f32 %v1610_v20, %v1552_v28 }
 0xaab   :  { %1619 = vrot.lane.b32.xlu0 %v1615_v58, %s3093_s22 }
 0xac8   :  { %v1612_v54 = vpop.permute.xlu0 %1611 }
 0xac9   :  { %v1616_v61 = vmul.f32 %v1612_v54, %v1567_v42 }
 0xacb   :  { %1621 = vrot.lane.b32.xlu1 %v1616_v61, %s3093_s22 }
 0xae5   :  { %v1588_v62 = vpop.permute.xlu2 %1587 }
 0xae6   :  { %v3567_v1 = vadd.f32 %v1588_v62, %v1572_v51 }
 0xae8   :  { %2980 = vtanh.f32 %v3567_v1 }
 0xaee   :  { %v2981_v6 = vpop.eup %2980 }
 0xaef   :  { %1599 = vrot.lane.b32.xlu0 %v2981_v6, %s3093_s22 }
 0xaf5   :  { %v1586_v16 = vpop.permute.xlu1 %1585 }
 0xaf6   :  { %v3573_v18 = vadd.f32 %v1586_v16, %v1571_v2 }
 0xaf8   :  { %2982 = vtanh.f32 %v3573_v18 }
 0xafe   :  { %v2983_v7 = vpop.eup %2982 }
 0xaff   :  { %1597 = vrot.lane.b32.xlu2 %v2983_v7, %s3093_s22 }
 0xb1d   :  { %v1620_v5 = vpop.permute.xlu0 %1619 }
 0xb1e   :  { %v3578_v48 = vadd.f32 %v1620_v5, %v1605_v0 }
 0xb20   :  { %2984 = vtanh.f32 %v3578_v48 }
 0xb26   :  { %v2985_v63 = vpop.eup %2984 }
 0xb27   :  { %1631 = vrot.lane.b32.xlu1 %v2985_v63, %s3093_s22  ;;  %v2790_v63 = vunpack.c.l.bf16 %v3237_v49 }
 0xb3d   :  { %v1622_v52 = vpop.permute.xlu1 %1621 }
 0xb3e   :  { %v3583_v12 = vadd.f32 %v1622_v52, %v1606_v33  ;;  %v1701_v33 = vadd.f32 %v3480_v59, %v2790_v63 }
 0xb40   :  { %2986 = vtanh.f32 %v3583_v12 }
 0xb46   :  { %v2987_v50 = vpop.eup %2986 }
 0xb47   :  { %1633 = vrot.lane.b32.xlu2 %v2987_v50, %s3093_s22 }
 0xb59   :  { %v1598_v55 = vpop.permute.xlu2 %1597 }
 0xb5a   :  { %v1603_v22 = vmul.f32 %v1598_v55, %v3555_v26 }
 0xb5c   :  { %v3588_v24 = vpack.c.bf16 %v1603_v22, %v1603_v22 }
 0xb5e   :  { %v1672_v56 = vunpack.c.l.b16 %v3588_v24 }
 0xb61   :  { %v1600_v13 = vpop.permute.xlu0 %1599 }
 0xb62   :  { %v1604_v27 = vmul.f32 %v1600_v13, %v3559_v11 }
 0xb64   :  { %v3591_v20 = vpack.c.bf16 %v1604_v27, %v1604_v27 }
 0xb66   :  { %v1673_v58 = vunpack.c.l.b16 %v3591_v20 }
 0xb68   :  { %v1674_v53 = vpack.c.b16 %v1673_v58, %v1672_v56 }
 0xb6a   :  { %1675 = vrot.lane.b32.xlu0 %v1674_v53, %s3094_s2 }
 0xb99   :  { %v1632_v26 = vpop.permute.xlu1 %1631 }
 0xb9a   :  { %v1637_v43 = vmul.f32 %v1632_v26, %v1552_v28 }
 0xb9c   :  { %v3600_v37 = vpack.c.bf16 %v1637_v43, %v1637_v43 }
 0xb9e   :  { %v1703_v41 = vunpack.c.l.b16 %v3600_v37 }
 0xba1   :  { %v1634_v35 = vpop.permute.xlu2 %1633 }
 0xba2   :  { %v1638_v11 = vmul.f32 %v1634_v35, %v1567_v42  ;;  %v194_v42 = vpop.f32.mrf.mxu0 }
 0xba4   :  { %v3602_v39 = vpack.c.bf16 %v1638_v11, %v1638_v11 }
 0xba6   :  { %v1704_v15 = vunpack.c.l.b16 %v3602_v39 }
 0xba8   :  { %v1705_v19 = vpack.c.b16 %v1704_v15, %v1703_v41 }
 0xbaa   :  { %1706 = vrot.lane.b32.xlu1 %v1705_v19, %s3094_s2  ;;  %v196_v61 = vpop.f32.mrf.mxu0 }
 0xbab   :  { %v2692_v51 = vpack.c.bf16 %v196_v61, %v194_v42 }
 0xbad   :  { %v2786_v62 = vunpack.c.l.bf16 %v2692_v51  ;;  %v2787_v16 = vunpack.c.h.bf16 %v2692_v51 }
 0xbaf   :  { %v1670_v6 = vadd.f32 %v3470_v29, %v2786_v62 }
 0xbdc   :  { %v1676_v54 = vpop.permute.xlu0 %1675 }
 0xbdd   :  { %2612 = vmatmul.msk.bf16.vlgmr.msrb.gmra.mxu2 %vm135_vm0, %v1676_v54 }
 0xbde   :  { %2158 = vmatpush.bf16.msrb.mxu2 %v3445_v38  ;;  %v1671_v38 = vadd.f32 %v3470_v29, %v2787_v16  ;;  %v2791_v29 = vunpack.c.h.bf16 %v3237_v49 }
 0xbe0   :  { %v1702_v13 = vadd.f32 %v3480_v59, %v2791_v29 }
 0xbe2   :  { %2159 = vmatpush.bf16.msrb.mxu2 %v3451_v21 }
 0xc1c   :  { %v1707_v28 = vpop.permute.xlu1 %1706 }
 0xc1d   :  { %2613 = vmatmul.msk.bf16.vlgmr.msrb.gmra.mxu3 %vm135_vm0, %v1707_v28 }
 0xc1e   :  { %2188 = vmatpush.bf16.msrb.mxu3 %v3458_v23 }
 0xc22   :  { %2189 = vmatpush.bf16.msrb.mxu3 %v3464_v3 }
 0xc60   :  { %v1689_v2 = vpop.f32.mrf.mxu2 }
 0xc61   :  { %v1694_v7 = vadd.f32 %v1689_v2, %v1670_v6 }
 0xc63   :  { %2988 = vtanh.f32 %v1694_v7  ;;  %v2614_v3 = vmul.f32 -1.442695, %v1694_v7 }
 0xc68   :  { %v1691_v21 = vpop.f32.mrf.mxu2 }
 0xc69   :  { %v2989_v0 = vpop.eup %2988  ;;  %v1695_v5 = vadd.f32 %v1691_v21, %v1671_v38 }
 0xc6a   :  { %1811 = vrot.lane.b32.xlu2 %v2989_v0, %s3093_s22 }
 0xc6b   :  { %2990 = vtanh.f32 %v1695_v5  ;;  %v2615_v35 = vmul.f32 -1.442695, %v1695_v5 }
 0xc6c   :  { %2992 = vpow2.f32 %v2614_v3 }
 0xc71   :  { %v2991_v23 = vpop.eup %2990 }
 0xc72   :  { %1813 = vrot.lane.b32.xlu0 %v2991_v23, %s3093_s22  ;;  %v2993_v52 = vpop.eup %2992 }
 0xc73   :  { %v1733_v22 = vadd.f32 1.0, %v2993_v52 }
 0xc75   :  { %v1746_v41 = vand.u32 2147483648, %v1733_v22  ;;  %vm1740_vm7 = vweird.f32 %v1733_v22  ;;  %v1744_v59 = vand.u32 2147483647, %v1733_v22 }
 0xc77   :  { %v1747_v54 = vor.u32 1.1754944e-38, %v1746_v41  ;;  %vm1745_vm9 = vcmp.eq.f32.partialorder %v1744_v59, 8.507059e+37 }
 0xca0   :  { %v1720_v50 = vpop.f32.mrf.mxu3 }
 0xca1   :  { %v1725_v55 = vadd.f32 %v1720_v50, %v1701_v33 }
 0xca3   :  { %2994 = vtanh.f32 %v1725_v55  ;;  %v2616_v29 = vmul.f32 -1.442695, %v1725_v55 }
 0xca4   :  { %2996 = vrcp.f32 %v1733_v22 }
 0xca8   :  { %v1722_v27 = vpop.f32.mrf.mxu3 }
 0xca9   :  { %v2995_v56 = vpop.eup %2994  ;;  %v1726_v58 = vadd.f32 %v1722_v27, %v1702_v13 }
 0xcaa   :  { %1845 = vrot.lane.b32.xlu1 %v2995_v56, %s3093_s22  ;;  %v2997_v53 = vpop.eup %2996 }
 0xcab   :  { %2998 = vtanh.f32 %v1726_v58  ;;  %v1736_v14 = vmul.f32 %v2997_v53, %v1733_v22  ;;  %vm1741_vm6 = vweird.f32 %v2997_v53  ;;  %v2617_v0 = vmul.f32 -1.442695, %v1726_v58 }
 0xcac   :  { %3000 = vpow2.f32 %v2615_v35  ;;  %vm1742_vm8 = vmor %vm1740_vm7, %vm1741_vm6 }
 0xcad   :  { %v1737_v43 = vsub.f32 1.0, %v1736_v14 }
 0xcaf   :  { %v1738_v11 = vmul.f32 %v2997_v53, %v1737_v43 }
 0xcb1   :  { %v2999_v26 = vpop.eup %2998  ;;  %v1739_v49 = vadd.f32 %v2997_v53, %v1738_v11 }
 0xcb2   :  { %1847 = vrot.lane.b32.xlu2 %v2999_v26, %s3093_s22  ;;  %v3001_v15 = vpop.eup %3000 }
 0xcb3   :  { %v1743_v19 = vsel %vm1742_vm8, %v2997_v53, %v1739_v49  ;;  %v1734_v28 = vadd.f32 1.0, %v3001_v15 }
 0xcb4   :  { %v3623_v61 = vsel %vm1745_vm9, %v1747_v54, %v1743_v19 }
 0xcb5   :  { %3002 = vrcp.f32 %v1734_v28  ;;  %v1761_v38 = vand.u32 2147483648, %v1734_v28  ;;  %vm1755_vm11 = vweird.f32 %v1734_v28  ;;  %v1759_v21 = vand.u32 2147483647, %v1734_v28 }
 0xcb6   :  { %3004 = vpow2.f32 %v2617_v0 }
 0xcb7   :  { %v1762_v23 = vor.u32 1.1754944e-38, %v1761_v38  ;;  %vm1760_vm13 = vcmp.eq.f32.partialorder %v1759_v21, 8.507059e+37  ;;  %v1807_v38 = vmul.f32 %v3623_v61, %v3573_v18 }
 0xcbb   :  { %v3003_v62 = vpop.eup %3002 }
 0xcbc   :  { %v1751_v6 = vmul.f32 %v3003_v62, %v1734_v28  ;;  %vm1756_vm10 = vweird.f32 %v3003_v62  ;;  %v3005_v52 = vpop.eup %3004 }
 0xcbd   :  { %vm1757_vm12 = vmor %vm1755_vm11, %vm1756_vm10  ;;  %v1774_v50 = vadd.f32 1.0, %v3005_v52 }
 0xcbe   :  { %v1752_v2 = vsub.f32 1.0, %v1751_v6 }
 0xcbf   :  { %3006 = vrcp.f32 %v1774_v50  ;;  %v1801_v43 = vand.u32 2147483648, %v1774_v50  ;;  %vm1795_vm15 = vweird.f32 %v1774_v50  ;;  %v1799_v35 = vand.u32 2147483647, %v1774_v50 }
 0xcc0   :  { %v1753_v16 = vmul.f32 %v3003_v62, %v1752_v2  ;;  %3008 = vpow2.f32 %v2616_v29 }
 0xcc1   :  { %v1802_v41 = vor.u32 1.1754944e-38, %v1801_v43  ;;  %vm1800_vm2 = vcmp.eq.f32.partialorder %v1799_v35, 8.507059e+37 }
 0xcc2   :  { %v1754_v7 = vadd.f32 %v3003_v62, %v1753_v16 }
 0xcc4   :  { %v1812_v42 = vpop.permute.xlu2 %1811  ;;  %v1758_v5 = vsel %vm1757_vm12, %v3003_v62, %v1754_v7 }
 0xcc5   :  { %v1817_v51 = vmul.f32 %v1812_v42, %v3623_v61  ;;  %v3627_v63 = vsel %vm1760_vm13, %v1762_v23, %v1758_v5  ;;  %v3007_v22 = vpop.eup %3006 }
 0xcc6   :  { %v3009_v13 = vpop.eup %3008  ;;  %v1791_v27 = vmul.f32 %v3007_v22, %v1774_v50  ;;  %vm1796_vm14 = vweird.f32 %v3007_v22  ;;  %v1808_v23 = vmul.f32 %v3627_v63, %v3567_v1 }
 0xcc7   :  { %1821 = vrot.lane.b32.xlu0 %v1817_v51, %s3093_s22  ;;  %v1773_v56 = vadd.f32 1.0, %v3009_v13  ;;  %vm1797_vm1 = vmor %vm1795_vm15, %vm1796_vm14 }
 0xcc8   :  { %v1792_v58 = vsub.f32 1.0, %v1791_v27 }
 0xcc9   :  { %3010 = vrcp.f32 %v1773_v56  ;;  %v1786_v42 = vand.u32 2147483648, %v1773_v56  ;;  %vm1780_vm4 = vweird.f32 %v1773_v56  ;;  %v1784_v51 = vand.u32 2147483647, %v1773_v56 }
 0xcca   :  { %v1793_v53 = vmul.f32 %v3007_v22, %v1792_v58 }
 0xccb   :  { %v1787_v6 = vor.u32 1.1754944e-38, %v1786_v42  ;;  %vm1785_vm6 = vcmp.eq.f32.partialorder %v1784_v51, 8.507059e+37 }
 0xccc   :  { %v1794_v14 = vadd.f32 %v3007_v22, %v1793_v53 }
 0xcce   :  { %v1798_v11 = vsel %vm1797_vm1, %v3007_v22, %v1794_v14 }
 0xccf   :  { %v3011_v26 = vpop.eup %3010  ;;  %v1803_v55 = vsel %vm1800_vm2, %v1802_v41, %v1798_v11 }
 0xcd0   :  { %v1776_v49 = vmul.f32 %v3011_v26, %v1773_v56  ;;  %vm1781_vm3 = vweird.f32 %v3011_v26  ;;  %v1842_v22 = vmul.f32 %v1803_v55, %v3583_v12 }
 0xcd1   :  { %vm1782_vm5 = vmor %vm1780_vm4, %vm1781_vm3 }
 0xcd2   :  { %v1777_v19 = vsub.f32 1.0, %v1776_v49  ;;  %v2650_v49 = vld [vmem:[%s4011_s0 + $0x30] sm:$0xff] }
 0xcd3   :  { %2493 = vmatmul.msk.bf16.gmra.mxu0 %vm135_vm0, %v2650_v49 }
 0xcd4   :  { %v1778_v54 = vmul.f32 %v3011_v26, %v1777_v19 }
 0xcd6   :  { %v1779_v28 = vadd.f32 %v3011_v26, %v1778_v54 }
 0xcd8   :  { %v1783_v62 = vsel %vm1782_vm5, %v3011_v26, %v1779_v28 }
 0xcd9   :  { %v1788_v16 = vsel %vm1785_vm6, %v1787_v6, %v1783_v62 }
 0xcda   :  { %v1841_v18 = vmul.f32 %v1788_v16, %v3578_v48 }
 0xce4   :  { %v1814_v3 = vpop.permute.xlu0 %1813 }
 0xce5   :  { %v1818_v33 = vmul.f32 %v1814_v3, %v3627_v63 }
 0xce7   :  { %1823 = vrot.lane.b32.xlu1 %v1818_v33, %s3093_s22 }
 0xd0c   :  { %v1848_v59 = vpop.permute.xlu2 %1847 }
 0xd0d   :  { %v1852_v15 = vmul.f32 %v1848_v59, %v1803_v55 }
 0xd0f   :  { %1857 = vrot.lane.b32.xlu0 %v1852_v15, %s3093_s22 }
 0xd1c   :  { %v1846_v2 = vpop.permute.xlu1 %1845 }
 0xd1d   :  { %v1851_v7 = vmul.f32 %v1846_v2, %v1788_v16 }
 0xd1f   :  { %1855 = vrot.lane.b32.xlu2 %v1851_v7, %s3093_s22 }
 0xd39   :  { %v1822_v21 = vpop.permute.xlu0 %1821 }
 0xd3a   :  { %v3635_v0 = vadd.f32 %v1822_v21, %v1807_v38 }
 0xd3c   :  { %3012 = vtanh.f32 %v3635_v0 }
 0xd42   :  { %v3013_v5 = vpop.eup %3012 }
 0xd43   :  { %1833 = vrot.lane.b32.xlu1 %v3013_v5, %s3093_s22 }
 0xd50   :  { %v199_v6 = vpop.f32.mrf.mxu0 }
 0xd58   :  { %v201_v2 = vpop.f32.mrf.mxu0 }
 0xd59   :  { %v1824_v3 = vpop.permute.xlu1 %1823 }
 0xd5a   :  { %v3641_v33 = vadd.f32 %v1824_v3, %v1808_v23 }
 0xd5c   :  { %3014 = vtanh.f32 %v3641_v33 }
 0xd62   :  { %v3015_v52 = vpop.eup %3014 }
 0xd63   :  { %1835 = vrot.lane.b32.xlu2 %v3015_v52, %s3093_s22 }
 0xd79   :  { %v1856_v50 = vpop.permute.xlu2 %1855 }
 0xd7a   :  { %v3646_v29 = vadd.f32 %v1856_v50, %v1841_v18 }
 0xd7c   :  { %3016 = vtanh.f32 %v3646_v29 }
 0xd81   :  { %v1858_v13 = vpop.permute.xlu0 %1857 }
 0xd82   :  { %v3017_v27 = vpop.eup %3016  ;;  %v3650_v1 = vadd.f32 %v1858_v13, %v1842_v22 }
 0xd83   :  { %1867 = vrot.lane.b32.xlu0 %v3017_v27, %s3093_s22 }
 0xd84   :  { %3018 = vtanh.f32 %v3650_v1 }
 0xd8a   :  { %v3019_v56 = vpop.eup %3018 }
 0xd8b   :  { %1869 = vrot.lane.b32.xlu1 %v3019_v56, %s3093_s22 }
 0xdb5   :  { %v1834_v58 = vpop.permute.xlu1 %1833 }
 0xdb6   :  { %v1839_v48 = vmul.f32 %v1834_v58, %v3623_v61 }
 0xdb8   :  { %v3656_v14 = vpack.c.bf16 %v1839_v48, %v1839_v48  ;;  %v2798_v48 = vunpack.c.l.bf16 %v3233_v44 }
 0xdba   :  { %v1908_v43 = vunpack.c.l.b16 %v3656_v14 }
 0xdbd   :  { %v1836_v53 = vpop.permute.xlu2 %1835 }
 0xdbe   :  { %v1840_v26 = vmul.f32 %v1836_v53, %v3627_v63 }
 0xdc0   :  { %v3659_v12 = vpack.c.bf16 %v1840_v26, %v1840_v26  ;;  %v3690_v26 = vld [vmem:[%s4013_s4 + $0x1] ss:$0 sm:$0xff] }
 0xdc2   :  { %v1909_v35 = vunpack.c.l.b16 %v3659_v12 }
 0xdc4   :  { %v1910_v11 = vpack.c.b16 %v1909_v35, %v1908_v43  ;;  %v1937_v43 = vadd.f32 %v3690_v26, %v2798_v48 }
 0xdc6   :  { %1911 = vrot.lane.b32.xlu2 %v1910_v11, %s3094_s2 }
 0xdf5   :  { %v1868_v61 = vpop.permute.xlu0 %1867 }
 0xdf6   :  { %v1873_v41 = vmul.f32 %v1868_v61, %v1788_v16  ;;  %v2697_v16 = vpack.c.bf16 %v201_v2, %v199_v6 }
 0xdf8   :  { %v3668_v15 = vpack.c.bf16 %v1873_v41, %v1873_v41  ;;  %v2794_v7 = vunpack.c.l.bf16 %v2697_v16  ;;  %v2795_v5 = vunpack.c.h.bf16 %v2697_v16  ;;  %v2799_v41 = vunpack.c.h.bf16 %v3233_v44 }
 0xdfa   :  { %v1939_v54 = vunpack.c.l.b16 %v3668_v15 }
 0xdfd   :  { %v1870_v59 = vpop.permute.xlu1 %1869 }
 0xdfe   :  { %v1874_v63 = vmul.f32 %v1870_v59, %v1803_v55  ;;  %v3680_v55 = vld [vmem:[%s4013_s4] ss:$0 sm:$0xff] }
 0xdff   :  { %v1906_v38 = vadd.f32 %v3680_v55, %v2794_v7  ;;  %v1907_v3 = vadd.f32 %v3680_v55, %v2795_v5 }
 0xe00   :  { %v3670_v19 = vpack.c.bf16 %v1874_v63, %v1874_v63 }
 0xe02   :  { %v1940_v28 = vunpack.c.l.b16 %v3670_v19 }
 0xe04   :  { %v1941_v42 = vpack.c.b16 %v1940_v28, %v1939_v54  ;;  %v1938_v54 = vadd.f32 %v3690_v26, %v2799_v41 }
 0xe06   :  { %1942 = vrot.lane.b32.xlu0 %v1941_v42, %s3094_s2 }
 0xe20   :  { %v1912_v51 = vpop.permute.xlu2 %1911 }
 0xe21   :  { %2622 = vmatmul.msk.bf16.vlgmr.msra.gmra.mxu2 %vm135_vm0, %v1912_v51 }
 0xe78   :  { %v1943_v62 = vpop.permute.xlu0 %1942 }
 0xe79   :  { %2623 = vmatmul.msk.bf16.vlgmr.msra.gmra.mxu3 %vm135_vm0, %v1943_v62 }
 0xea4   :  { %v1925_v21 = vpop.f32.mrf.mxu2 }
 0xea5   :  { %v1930_v23 = vadd.f32 %v1925_v21, %v1906_v38 }
 0xea7   :  { %3020 = vtanh.f32 %v1930_v23  ;;  %v2624_v58 = vmul.f32 -1.442695, %v1930_v23 }
 0xeac   :  { %v1927_v52 = vpop.f32.mrf.mxu2 }
 0xead   :  { %v3021_v18 = vpop.eup %3020  ;;  %v1931_v50 = vadd.f32 %v1927_v52, %v1907_v3 }
 0xeae   :  { %2047 = vrot.lane.b32.xlu1 %v3021_v18, %s3093_s22 }
 0xeaf   :  { %3022 = vtanh.f32 %v1931_v50  ;;  %v2625_v13 = vmul.f32 -1.442695, %v1931_v50 }
 0xeb1   :  { %3024 = vpow2.f32 %v2625_v13 }
 0xeb5   :  { %v3023_v22 = vpop.eup %3022 }
 0xeb6   :  { %2049 = vrot.lane.b32.xlu2 %v3023_v22, %s3093_s22 }
 0xeb7   :  { %v3025_v27 = vpop.eup %3024 }
 0xeb8   :  { %v1970_v56 = vadd.f32 1.0, %v3025_v27 }
 0xeba   :  { %3026 = vrcp.f32 %v1970_v56  ;;  %v1997_v16 = vand.u32 2147483648, %v1970_v56  ;;  %vm1991_vm8 = vweird.f32 %v1970_v56  ;;  %v1995_v7 = vand.u32 2147483647, %v1970_v56 }
 0xebb   :  { %3028 = vpow2.f32 %v2624_v58 }
 0xebc   :  { %v1998_v5 = vor.u32 1.1754944e-38, %v1997_v16  ;;  %vm1996_vm10 = vcmp.eq.f32.partialorder %v1995_v7, 8.507059e+37 }
 0xec0   :  { %v3027_v53 = vpop.eup %3026 }
 0xec1   :  { %v3029_v35 = vpop.eup %3028  ;;  %v1987_v49 = vmul.f32 %v3027_v53, %v1970_v56  ;;  %vm1992_vm7 = vweird.f32 %v3027_v53 }
 0xec2   :  { %v1969_v59 = vadd.f32 1.0, %v3029_v35  ;;  %vm1993_vm9 = vmor %vm1991_vm8, %vm1992_vm7 }
 0xec3   :  { %v1988_v63 = vsub.f32 1.0, %v1987_v49 }
 0xec4   :  { %v1982_v13 = vand.u32 2147483648, %v1969_v59  ;;  %vm1976_vm12 = vweird.f32 %v1969_v59  ;;  %v1980_v27 = vand.u32 2147483647, %v1969_v59 }
 0xec5   :  { %v1989_v42 = vmul.f32 %v3027_v53, %v1988_v63 }
 0xec6   :  { %v1983_v58 = vor.u32 1.1754944e-38, %v1982_v13  ;;  %vm1981_vm14 = vcmp.eq.f32.partialorder %v1980_v27, 8.507059e+37 }
 0xec7   :  { %v1990_v6 = vadd.f32 %v3027_v53, %v1989_v42 }
 0xec9   :  { %v1994_v44 = vsel %vm1993_vm9, %v3027_v53, %v1990_v6 }
 0xeca   :  { %v3697_v3 = vsel %vm1996_vm10, %v1998_v5, %v1994_v44 }
 0xefc   :  { %v1956_v11 = vpop.f32.mrf.mxu3 }
 0xefd   :  { %v1961_v61 = vadd.f32 %v1956_v11, %v1937_v43 }
 0xeff   :  { %3030 = vtanh.f32 %v1961_v61  ;;  %v2626_v35 = vmul.f32 -1.442695, %v1961_v61 }
 0xf00   :  { %3032 = vrcp.f32 %v1969_v59 }
 0xf04   :  { %v1958_v28 = vpop.f32.mrf.mxu3 }
 0xf05   :  { %v3031_v51 = vpop.eup %3030  ;;  %v1962_v62 = vadd.f32 %v1958_v28, %v1938_v54 }
 0xf06   :  { %2081 = vrot.lane.b32.xlu0 %v3031_v51, %s3093_s22  ;;  %v3033_v2 = vpop.eup %3032 }
 0xf07   :  { %3034 = vtanh.f32 %v1962_v62  ;;  %v1972_v38 = vmul.f32 %v3033_v2, %v1969_v59  ;;  %vm1977_vm11 = vweird.f32 %v3033_v2  ;;  %v2627_v11 = vmul.f32 -1.442695, %v1962_v62 }
 0xf08   :  { %vm1978_vm13 = vmor %vm1976_vm12, %vm1977_vm11  ;;  %3036 = vpow2.f32 %v2626_v35 }
 0xf09   :  { %v1973_v18 = vsub.f32 1.0, %v1972_v38  ;;  %3038 = vpow2.f32 %v2627_v11 }
 0xf0b   :  { %v1974_v50 = vmul.f32 %v3033_v2, %v1973_v18 }
 0xf0d   :  { %v3035_v21 = vpop.eup %3034  ;;  %v1975_v22 = vadd.f32 %v3033_v2, %v1974_v50 }
 0xf0e   :  { %2083 = vrot.lane.b32.xlu1 %v3035_v21, %s3093_s22  ;;  %v3037_v49 = vpop.eup %3036 }
 0xf0f   :  { %v1979_v56 = vsel %vm1978_vm13, %v3033_v2, %v1975_v22  ;;  %v2009_v41 = vadd.f32 1.0, %v3037_v49  ;;  %v3039_v63 = vpop.eup %3038  ;;  %v2044_v49 = vmul.f32 %v3697_v3, %v3641_v33 }
 0xf10   :  { %v2050_v23 = vpop.permute.xlu2 %2049  ;;  %v3701_v53 = vsel %vm1981_vm14, %v1983_v58, %v1979_v56  ;;  %v2010_v59 = vadd.f32 1.0, %v3039_v63 }
 0xf11   :  { %v2054_v52 = vmul.f32 %v2050_v23, %v3697_v3  ;;  %3040 = vrcp.f32 %v2009_v41  ;;  %v2022_v44 = vand.u32 2147483648, %v2009_v41  ;;  %vm2016_vm1 = vweird.f32 %v2009_v41 }
 0xf12   :  { %3042 = vrcp.f32 %v2010_v59  ;;  %v2020_v61 = vand.u32 2147483647, %v2009_v41  ;;  %v2037_v50 = vand.u32 2147483648, %v2010_v59  ;;  %v2043_v22 = vmul.f32 %v3701_v53, %v3635_v0 }
 0xf13   :  { %2059 = vrot.lane.b32.xlu0 %v2054_v52, %s3093_s22  ;;  %v2023_v21 = vor.u32 1.1754944e-38, %v2022_v44  ;;  %vm2031_vm5 = vweird.f32 %v2010_v59  ;;  %v2035_v13 = vand.u32 2147483647, %v2010_v59 }
 0xf14   :  { %vm2021_vm3 = vcmp.eq.f32.partialorder %v2020_v61, 8.507059e+37 }
 0xf15   :  { %vm2036_vm7 = vcmp.eq.f32.partialorder %v2035_v13, 8.507059e+37 }
 0xf17   :  { %v3041_v54 = vpop.eup %3040 }
 0xf18   :  { %v2012_v28 = vmul.f32 %v3041_v54, %v2009_v41  ;;  %v3043_v51 = vpop.eup %3042  ;;  %vm2017_vm15 = vweird.f32 %v3041_v54 }
 0xf19   :  { %v2027_v2 = vmul.f32 %v3043_v51, %v2010_v59  ;;  %vm2018_vm2 = vmor %vm2016_vm1, %vm2017_vm15  ;;  %vm2032_vm4 = vweird.f32 %v3043_v51  ;;  %vm705_vm1 = vcmask 257024  }
 0xf1a   :  { %v2013_v42 = vsub.f32 1.0, %v2012_v28  ;;  %vm2033_vm6 = vmor %vm2031_vm5, %vm2032_vm4 }
 0xf1b   :  { %v2028_v7 = vsub.f32 1.0, %v2027_v2 }
 0xf1c   :  { %v2014_v6 = vmul.f32 %v3041_v54, %v2013_v42 }
 0xf1d   :  { %v2029_v38 = vmul.f32 %v3043_v51, %v2028_v7 }
 0xf1e   :  { %v2015_v16 = vadd.f32 %v3041_v54, %v2014_v6 }
 0xf1f   :  { %v2030_v18 = vadd.f32 %v3043_v51, %v2029_v38 }
 0xf20   :  { %v2048_v48 = vpop.permute.xlu1 %2047  ;;  %v2019_v62 = vsel %vm2018_vm2, %v3041_v54, %v2015_v16 }
 0xf21   :  { %v2053_v43 = vmul.f32 %v2048_v48, %v3701_v53  ;;  %v2024_v23 = vsel %vm2021_vm3, %v2023_v21, %v2019_v62  ;;  %v2034_v58 = vsel %vm2033_vm6, %v3043_v51, %v2030_v18  ;;  %v2038_v48 = vor.u32 1.1754944e-38, %v2037_v50 }
 0xf22   :  { %v2077_v33 = vmul.f32 %v2024_v23, %v3646_v29 }
 0xf23   :  { %2057 = vrot.lane.b32.xlu2 %v2053_v43, %s3093_s22  ;;  %v2039_v43 = vsel %vm2036_vm7, %v2038_v48, %v2034_v58 }
 0xf24   :  { %v2078_v54 = vmul.f32 %v2039_v43, %v3650_v1 }
 0xf78   :  { %v2082_v5 = vpop.permute.xlu0 %2081 }
 0xf79   :  { %v2087_v52 = vmul.f32 %v2082_v5, %v2024_v23 }
 0xf7b   :  { %2091 = vrot.lane.b32.xlu1 %v2087_v52, %s3093_s22  ;;  %v2651_v52 = vld [vmem:[%s4011_s0 + $0x38] sm:$0xff] }
 0xf7c   :  { %2494 = vmatmul.msk.bf16.gmra.mxu0 %vm135_vm0, %v2651_v52 }
 0xf7d   :  { %v2058_v27 = vpop.permute.xlu2 %2057 }
 0xf7e   :  { %v3708_v56 = vadd.f32 %v2058_v27, %v2043_v22 }
 0xf80   :  { %3044 = vtanh.f32 %v3708_v56  ;;  %v2084_v35 = vpop.permute.xlu1 %2083 }
 0xf81   :  { %v2088_v11 = vmul.f32 %v2084_v35, %v2039_v43 }
 0xf83   :  { %2093 = vrot.lane.b32.xlu2 %v2088_v11, %s3093_s22 }
 0xf85   :  { %v2060_v0 = vpop.permute.xlu0 %2059 }
 0xf86   :  { %v3045_v41 = vpop.eup %3044  ;;  %v3714_v63 = vadd.f32 %v2060_v0, %v2044_v49 }
 0xf87   :  { %2069 = vrot.lane.b32.xlu0 %v3045_v41, %s3093_s22 }
 0xf88   :  { %3046 = vtanh.f32 %v3714_v63 }
 0xf8e   :  { %v3047_v59 = vpop.eup %3046 }
 0xf8f   :  { %2071 = vrot.lane.b32.xlu1 %v3047_v59, %s3093_s22 }
 0xfdd   :  { %v2094_v28 = vpop.permute.xlu2 %2093 }
 0xfde   :  { %v3720_v42 = vadd.f32 %v2094_v28, %v2078_v54 }
 0xfe0   :  { %3048 = vtanh.f32 %v3720_v42 }
 0xfe6   :  { %v3049_v51 = vpop.eup %3048 }
 0xfe7   :  { %2105 = vrot.lane.b32.xlu0 %v3049_v51, %s3093_s22 }
 0xfed   :  { %v2092_v6 = vpop.permute.xlu1 %2091 }
 0xfee   :  { %v3725_v2 = vadd.f32 %v2092_v6, %v2077_v33 }
 0xff0   :  { %3050 = vtanh.f32 %v3725_v2 }
 0xff6   :  { %v3051_v16 = vpop.eup %3050 }
 0xff7   :  { %2103 = vrot.lane.b32.xlu2 %v3051_v16, %s3093_s22 }
 0xff9   :  { %v2070_v7 = vpop.permute.xlu0 %2069 }
 0xffa   :  { %v2075_v1 = vmul.f32 %v2070_v7, %v3701_v53 }
 0xffc   :  { %v3730_v61 = vpack.c.bf16 %v2075_v1, %v2075_v1 }
 0xffe   :  { %v2144_v29 = vunpack.c.l.b16 %v3730_v61 }
0x1001   :  { %v2072_v44 = vpop.permute.xlu1 %2071 }
0x1002   :  { %v2076_v62 = vmul.f32 %v2072_v44, %v3697_v3 }
0x1004   :  { %v3733_v38 = vpack.c.bf16 %v2076_v62, %v2076_v62 }
0x1006   :  { %v2145_v21 = vunpack.c.l.b16 %v3733_v38 }
0x1008   :  { %v2146_v5 = vpack.c.b16 %v2145_v21, %v2144_v29  ;;  %v2807_v29 = vunpack.c.h.bf16 %v3223_v31 }
0x100a   :  { %2147 = vrot.lane.b32.xlu1 %v2146_v5, %s3094_s2  ;;  %v2173_v21 = vadd.f32 %v3690_v26, %v2807_v29 }
0x1051   :  { %v2104_v53 = vpop.permute.xlu2 %2103 }
0x1052   :  { %v2109_v18 = vmul.f32 %v2104_v53, %v2024_v23  ;;  %v204_v23 = vpop.f32.mrf.mxu0 }
0x1054   :  { %v3742_v22 = vpack.c.bf16 %v2109_v18, %v2109_v18 }
0x1056   :  { %v2174_v27 = vunpack.c.l.b16 %v3742_v22 }
0x1059   :  { %v2106_v50 = vpop.permute.xlu0 %2105 }
0x105a   :  { %v2110_v3 = vmul.f32 %v2106_v50, %v2039_v43  ;;  %v206_v49 = vpop.f32.mrf.mxu0 }
0x105b   :  { %v2702_v0 = vpack.c.bf16 %v206_v49, %v204_v23 }
0x105c   :  { %v3744_v13 = vpack.c.bf16 %v2110_v3, %v2110_v3 }
0x105d   :  { %v2802_v41 = vunpack.c.l.bf16 %v2702_v0  ;;  %v2803_v54 = vunpack.c.h.bf16 %v2702_v0 }
0x105e   :  { %v2175_v58 = vunpack.c.l.b16 %v3744_v13 }
0x105f   :  { %v2142_v43 = vadd.f32 %v3680_v55, %v2802_v41  ;;  %v2143_v51 = vadd.f32 %v3680_v55, %v2803_v54  ;;  %v2806_v55 = vunpack.c.l.bf16 %v3223_v31 }
0x1060   :  { %v2176_v48 = vpack.c.b16 %v2175_v58, %v2174_v27 }
0x1061   :  { %v2172_v1 = vadd.f32 %v3690_v26, %v2806_v55 }
0x1062   :  { %2177 = vrot.lane.b32.xlu2 %v2176_v48, %s3094_s2 }
0x107c   :  { %v2148_v35 = vpop.permute.xlu1 %2147 }
0x107d   :  { %2632 = vmatmul.msk.bf16.vlgmr.msrb.gmra.mxu2 %vm135_vm0, %v2148_v35 }
0x10bc   :  { %v2178_v11 = vpop.permute.xlu2 %2177 }
0x10bd   :  { %2633 = vmatmul.msk.bf16.vlgmr.msrb.gmra.mxu3 %vm135_vm0, %v2178_v11 }
0x1100   :  { %v2161_v59 = vpop.f32.mrf.mxu2 }
0x1101   :  { %v2166_v28 = vadd.f32 %v2161_v59, %v2142_v43 }
0x1103   :  { %3052 = vtanh.f32 %v2166_v28 }
0x1108   :  { %v2163_v33 = vpop.f32.mrf.mxu2 }
0x1109   :  { %v3053_v6 = vpop.eup %3052  ;;  %v2167_v16 = vadd.f32 %v2163_v33, %v2143_v51 }
0x110a   :  { %2282 = vrot.lane.b32.xlu0 %v3053_v6, %s3093_s22 }
0x110b   :  { %3054 = vtanh.f32 %v2167_v16  ;;  %v2635_v31 = vmul.f32 -1.442695, %v2167_v16 }
0x1111   :  { %v3055_v7 = vpop.eup %3054 }
0x1112   :  { %2284 = vrot.lane.b32.xlu1 %v3055_v7, %s3093_s22 }
0x111a   :  { %699 = vrot.lane.b32.xlu1 %v3286_v57, %s3094_s2 }
0x1122   :  { %714 = vrot.lane.b32.xlu1 %v3300_v8, %s3094_s2  ;;  %v2634_v8 = vmul.f32 -1.442695, %v2166_v28 }
0x112a   :  { %937 = vrot.lane.b32.xlu1 %v3357_v34, %s3094_s2 }
0x1140   :  { %v2191_v44 = vpop.f32.mrf.mxu3 }
0x1141   :  { %v2196_v62 = vadd.f32 %v2191_v44, %v2172_v1 }
0x1143   :  { %3056 = vtanh.f32 %v2196_v62  ;;  %v2636_v49 = vmul.f32 -1.442695, %v2196_v62 }
0x1148   :  { %v2193_v5 = vpop.f32.mrf.mxu3 }
0x1149   :  { %v3057_v52 = vpop.eup %3056  ;;  %v3765_v57 = vadd.f32 %v2193_v5, %v2173_v21 }
0x114a   :  { %2316 = vrot.lane.b32.xlu2 %v3057_v52, %s3093_s22 }
0x114b   :  { %3058 = vtanh.f32 %v3765_v57 }
0x114c   :  { %3060 = vpow2.f32 %v2634_v8  ;;  %v2637_v8 = vmul.f32 -1.442695, %v3765_v57 }
0x114d   :  { %3062 = vpow2.f32 %v2635_v31 }
0x1151   :  { %v3059_v34 = vpop.eup %3058 }
0x1152   :  { %701 = vrot.lane.b32.xlu2 %v3289_v60, %s3094_s2  ;;  %2318 = vrot.lane.b32.xlu0 %v3059_v34, %s3093_s22  ;;  %v3061_v53 = vpop.eup %3060 }
0x1153   :  { %v2204_v26 = vadd.f32 1.0, %v3061_v53  ;;  %v3063_v18 = vpop.eup %3062 }
0x1154   :  { %v2205_v50 = vadd.f32 1.0, %v3063_v18 }
0x1155   :  { %3064 = vrcp.f32 %v2204_v26  ;;  %v2217_v23 = vand.u32 2147483648, %v2204_v26  ;;  %vm2211_vm9 = vweird.f32 %v2204_v26 }
0x1156   :  { %3066 = vrcp.f32 %v2205_v50  ;;  %v2232_v51 = vand.u32 2147483648, %v2205_v50  ;;  %vm2226_vm13 = vweird.f32 %v2205_v50  ;;  %v2230_v33 = vand.u32 2147483647, %v2205_v50 }
0x1157   :  { %v2218_v43 = vor.u32 1.1754944e-38, %v2217_v23  ;;  %3068 = vpow2.f32 %v2636_v49 }
0x1158   :  { %v2233_v7 = vor.u32 1.1754944e-38, %v2232_v51  ;;  %vm2231_vm15 = vcmp.eq.f32.partialorder %v2230_v33, 8.507059e+37 }
0x115a   :  { %935 = vrot.lane.b32.xlu2 %v3354_v30, %s3094_s2  ;;  %712 = vrot.lane.b32.xlu0 %v3298_v46, %s3094_s2  ;;  %v2215_v46 = vand.u32 2147483647, %v2204_v26 }
0x115b   :  { %v3065_v3 = vpop.eup %3064 }
0x115c   :  { %v2207_v60 = vmul.f32 %v3065_v3, %v2204_v26  ;;  %v3067_v58 = vpop.eup %3066  ;;  %vm2212_vm8 = vweird.f32 %v3065_v3  ;;  %vm2216_vm11 = vcmp.eq.f32.partialorder %v2215_v46, 8.507059e+37 }
0x115d   :  { %v2222_v35 = vmul.f32 %v3067_v58, %v2205_v50  ;;  %vm2213_vm10 = vmor %vm2211_vm9, %vm2212_vm8  ;;  %vm2227_vm12 = vweird.f32 %v3067_v58  ;;  %v3069_v16 = vpop.eup %3068 }
0x115e   :  { %v2208_v27 = vsub.f32 1.0, %v2207_v60  ;;  %vm2228_vm14 = vmor %vm2226_vm13, %vm2227_vm12  ;;  %v2244_v44 = vadd.f32 1.0, %v3069_v16 }
0x115f   :  { %v2223_v30 = vsub.f32 1.0, %v2222_v35 }
0x1160   :  { %v2209_v48 = vmul.f32 %v3065_v3, %v2208_v27  ;;  %3070 = vrcp.f32 %v2244_v44  ;;  %v2257_v53 = vand.u32 2147483648, %v2244_v44  ;;  %vm2251_vm3 = vweird.f32 %v2244_v44 }
0x1161   :  { %v2224_v41 = vmul.f32 %v3067_v58, %v2223_v30  ;;  %3072 = vpow2.f32 %v2637_v8  ;;  %v2255_v26 = vand.u32 2147483647, %v2244_v44 }
0x1162   :  { %948 = vrot.lane.b32.xlu2 %v3366_v45, %s3094_s2  ;;  %v2210_v11 = vadd.f32 %v3065_v3, %v2209_v48  ;;  %v2258_v57 = vor.u32 1.1754944e-38, %v2257_v53 }
0x1163   :  { %v2225_v28 = vadd.f32 %v3067_v58, %v2224_v41  ;;  %vm2256_vm5 = vcmp.eq.f32.partialorder %v2255_v26, 8.507059e+37 }
0x1164   :  { %v2214_v0 = vsel %vm2213_vm10, %v3065_v3, %v2210_v11 }
0x1165   :  { %v3778_v59 = vsel %vm2216_vm11, %v2218_v43, %v2214_v0  ;;  %v2229_v6 = vsel %vm2228_vm14, %v3067_v58, %v2225_v28 }
0x1166   :  { %v3782_v1 = vsel %vm2231_vm15, %v2233_v7, %v2229_v6  ;;  %v3071_v21 = vpop.eup %3070 }
0x1167   :  { %v2247_v5 = vmul.f32 %v3071_v21, %v2244_v44  ;;  %vm2252_vm2 = vweird.f32 %v3071_v21 }
0x1168   :  { %vm2253_vm4 = vmor %vm2251_vm3, %vm2252_vm2 }
0x117c   :  { %v2283_v45 = vpop.permute.xlu0 %2282 }
0x117d   :  { %v2288_v54 = vmul.f32 %v2283_v45, %v3778_v59 }
0x117f   :  { %2292 = vrot.lane.b32.xlu0 %v2288_v54, %s3093_s22 }
0x1184   :  { %v2285_v55 = vpop.permute.xlu1 %2284 }
0x1185   :  { %v2289_v62 = vmul.f32 %v2285_v55, %v3782_v1 }
0x1187   :  { %2294 = vrot.lane.b32.xlu1 %v2289_v62, %s3093_s22  ;;  %950 = vrot.lane.b32.xlu0 %v3368_v47, %s3094_s2  ;;  %v2248_v47 = vsub.f32 1.0, %v2247_v5 }
0x1189   :  { %v2249_v34 = vmul.f32 %v3071_v21, %v2248_v47 }
0x118c   :  { %v700_v29 = vpop.permute.xlu1 %699 }
0x118d   :  { %706 = vst.msk [vmem:[%s4014_s5] sm:$0xf] %vm705_vm1, %v700_v29 }
0x118f   :  { %1171 = vrot.lane.b32.xlu1 %v3422_v36, %s3094_s2  ;;  %v2250_v36 = vadd.f32 %v3071_v21, %v2249_v34 }
0x1191   :  { %v2254_v18 = vsel %vm2253_vm4, %v3071_v21, %v2250_v36 }
0x1192   :  { %v3807_v60 = vsel %vm2256_vm5, %v2258_v57, %v2254_v18 }
0x1194   :  { %v715_v52 = vpop.permute.xlu1 %714 }
0x1195   :  { %2571 = vst.msk [vmem:[%s4015_s6 + $0x3c] sm:$0xf] %vm705_vm1, %v715_v52 }
0x1197   :  { %1186 = vrot.lane.b32.xlu1 %v3436_v10, %s3094_s2  ;;  %v3073_v10 = vpop.eup %3072 }
0x1198   :  { %v2245_v50 = vadd.f32 1.0, %v3073_v10 }
0x119a   :  { %3074 = vrcp.f32 %v2245_v50  ;;  %vm2266_vm7 = vweird.f32 %v2245_v50  ;;  %v2270_v46 = vand.u32 2147483647, %v2245_v50 }
0x119c   :  { %v938_v31 = vpop.permute.xlu1 %937  ;;  %vm2271_vm9 = vcmp.eq.f32.partialorder %v2270_v46, 8.507059e+37 }
0x119d   :  { %2579 = vst.msk [vmem:[%s4014_s5 + $0xc] sm:$0xf] %vm705_vm1, %v938_v31 }
0x119f   :  { %1420 = vrot.lane.b32.xlu1 %v3532_v32, %s3094_s2 }
0x11a0   :  { %v3075_v58 = vpop.eup %3074 }
0x11a1   :  { %v2262_v48 = vmul.f32 %v3075_v58, %v2245_v50  ;;  %vm2267_vm6 = vweird.f32 %v3075_v58 }
0x11a2   :  { %vm2268_vm8 = vmor %vm2266_vm7, %vm2267_vm6 }
0x11a4   :  { %v2317_v3 = vpop.permute.xlu2 %2316 }
0x11a5   :  { %v2322_v27 = vmul.f32 %v2317_v3, %v3807_v60 }
0x11a7   :  { %1658 = vrot.lane.b32.xlu1 %v3602_v39, %s3094_s2  ;;  %2326 = vrot.lane.b32.xlu2 %v2322_v27, %s3093_s22  ;;  %v2263_v39 = vsub.f32 1.0, %v2262_v48 }
0x11a9   :  { %v2264_v11 = vmul.f32 %v3075_v58, %v2263_v39 }
0x11ab   :  { %v2265_v23 = vadd.f32 %v3075_v58, %v2264_v11 }
0x11ac   :  { %v702_v32 = vpop.permute.xlu2 %701 }
0x11ad   :  { %707 = vst.msk [vmem:[%s4014_s5 + $0x4] sm:$0xf] %vm705_vm1, %v702_v32  ;;  %v2269_v49 = vsel %vm2268_vm8, %v3075_v58, %v2265_v23 }
0x11af   :  { %1173 = vrot.lane.b32.xlu2 %v3425_v25, %s3094_s2  ;;  %v2272_v25 = vand.u32 2147483648, %v2245_v50 }
0x11b1   :  { %v2273_v0 = vor.u32 1.1754944e-38, %v2272_v25 }
0x11b4   :  { %v936_v35 = vpop.permute.xlu2 %935 }
0x11b5   :  { %2578 = vst.msk [vmem:[%s4014_s5 + $0x8] sm:$0xf] %vm705_vm1, %v936_v35 }
0x11b7   :  { %1407 = vrot.lane.b32.xlu2 %v3520_v4, %s3094_s2  ;;  %v3831_v4 = vsel %vm2271_vm9, %v2273_v0, %v2269_v49 }
0x11bc   :  { %v949_v30 = vpop.permute.xlu2 %948 }
0x11bd   :  { %2580 = vst.msk [vmem:[%s4015_s6 + $0x30] sm:$0xf] %vm705_vm1, %v949_v30 }
0x11bf   :  { %1422 = vrot.lane.b32.xlu2 %v3534_v17, %s3094_s2  ;;  %v2278_v17 = vmul.f32 %v3778_v59, %v3708_v56 }
0x11c4   :  { %v2319_v41 = vpop.permute.xlu0 %2318 }
0x11c5   :  { %v2323_v43 = vmul.f32 %v2319_v41, %v3831_v4 }
0x11c7   :  { %1645 = vrot.lane.b32.xlu2 %v3591_v20, %s3094_s2  ;;  %2328 = vrot.lane.b32.xlu0 %v2323_v43, %s3093_s22 }
0x11cc   :  { %v713_v45 = vpop.permute.xlu0 %712 }
0x11cd   :  { %2570 = vst.msk [vmem:[%s4015_s6 + $0x38] sm:$0xf] %vm705_vm1, %v713_v45 }
0x11cf   :  { %1879 = vrot.lane.b32.xlu2 %v3656_v14, %s3094_s2  ;;  %1184 = vrot.lane.b32.xlu0 %v3434_v9, %s3094_s2  ;;  %v2279_v9 = vmul.f32 %v3782_v1, %v3714_v63 }
0x11d7   :  { %1409 = vrot.lane.b32.xlu0 %v3523_v40, %s3094_s2 }
0x11df   :  { %1643 = vrot.lane.b32.xlu0 %v3588_v24, %s3094_s2 }
0x11e7   :  { %1656 = vrot.lane.b32.xlu0 %v3600_v37, %s3094_s2  ;;  %v2312_v37 = vmul.f32 %v3807_v60, %v3725_v2 }
0x11ef   :  { %1881 = vrot.lane.b32.xlu0 %v3659_v12, %s3094_s2 }
0x11f1   :  { %v2293_v20 = vpop.permute.xlu0 %2292 }
0x11f2   :  { %v3855_v14 = vadd.f32 %v2293_v20, %v2278_v17 }
0x11f4   :  { %3076 = vtanh.f32 %v3855_v14 }
0x11f9   :  { %v2295_v40 = vpop.permute.xlu1 %2294  ;;  %v951_v54 = vpop.permute.xlu0 %950 }
0x11fa   :  { %v3077_v24 = vpop.eup %3076  ;;  %v3860_v28 = vadd.f32 %v2295_v40, %v2279_v9  ;;  %2581 = vst.msk [vmem:[%s4015_s6 + $0x34] sm:$0xf] %vm705_vm1, %v951_v54 }
0x11fb   :  { %2304 = vrot.lane.b32.xlu1 %v3077_v24, %s3093_s22 }
0x11fc   :  { %3078 = vtanh.f32 %v3860_v28 }
0x1201   :  { %v1172_v12 = vpop.permute.xlu1 %1171  ;;  %v2327_v63 = vpop.permute.xlu2 %2326 }
0x1202   :  { %v3079_v56 = vpop.eup %3078  ;;  %2588 = vst.msk [vmem:[%s4014_s5 + $0x10] sm:$0xf] %vm705_vm1, %v1172_v12  ;;  %v3874_v51 = vadd.f32 %v2327_v63, %v2312_v37 }
0x1203   :  { %2306 = vrot.lane.b32.xlu2 %v3079_v56, %s3093_s22 }
0x1204   :  { %3080 = vtanh.f32 %v3874_v51 }
0x1209   :  { %v1187_v33 = vpop.permute.xlu1 %1186  ;;  %v1174_v6 = vpop.permute.xlu2 %1173 }
0x120a   :  { %2591 = vst.msk [vmem:[%s4015_s6 + $0x2c] sm:$0xf] %vm705_vm1, %v1187_v33  ;;  %v3081_v2 = vpop.eup %3080 }
0x120b   :  { %2589 = vst.msk [vmem:[%s4014_s5 + $0x14] sm:$0xf] %vm705_vm1, %v1174_v6  ;;  %1894 = vrot.lane.b32.xlu2 %v3670_v19, %s3094_s2  ;;  %2338 = vrot.lane.b32.xlu0 %v3081_v2, %s3093_s22 }
0x1211   :  { %v1421_v16 = vpop.permute.xlu1 %1420  ;;  %v1408_v7 = vpop.permute.xlu2 %1407 }
0x1212   :  { %2600 = vst.msk [vmem:[%s4015_s6 + $0x20] sm:$0xf] %vm705_vm1, %v1421_v16 }
0x1213   :  { %2598 = vst.msk [vmem:[%s4014_s5 + $0x18] sm:$0xf] %vm705_vm1, %v1408_v7  ;;  %2128 = vrot.lane.b32.xlu2 %v3742_v22, %s3094_s2  ;;  %2115 = vrot.lane.b32.xlu0 %v3730_v61, %s3094_s2  ;;  %v2313_v22 = vmul.f32 %v3831_v4, %v3720_v42 }
0x1219   :  { %v1659_v19 = vpop.permute.xlu1 %1658  ;;  %v1423_v55 = vpop.permute.xlu2 %1422 }
0x121a   :  { %2611 = vst.msk [vmem:[%s4015_s6 + $0x1c] sm:$0xf] %vm705_vm1, %v1659_v19 }
0x121b   :  { %2601 = vst.msk [vmem:[%s4015_s6 + $0x24] sm:$0xf] %vm705_vm1, %v1423_v55  ;;  %2130 = vrot.lane.b32.xlu0 %v3744_v13, %s3094_s2 }
0x1221   :  { %v1646_v44 = vpop.permute.xlu2 %1645 }
0x1222   :  { %2609 = vst.msk [vmem:[%s4014_s5 + $0x24] sm:$0xf] %vm705_vm1, %v1646_v44 }
0x1229   :  { %v1880_v61 = vpop.permute.xlu2 %1879 }
0x122a   :  { %2618 = vst.msk [vmem:[%s4014_s5 + $0x28] sm:$0xf] %vm705_vm1, %v1880_v61 }
0x1239   :  { %v2329_v62 = vpop.permute.xlu0 %2328 }
0x123a   :  { %v2333_v29 = vadd.f32 %v2329_v62, %v2313_v22 }
0x123c   :  { %3082 = vtanh.f32 %v2333_v29 }
0x1241   :  { %v1185_v21 = vpop.permute.xlu0 %1184 }
0x1242   :  { %v3083_v13 = vpop.eup %3082  ;;  %2590 = vst.msk [vmem:[%s4015_s6 + $0x28] sm:$0xf] %vm705_vm1, %v1185_v21 }
0x1243   :  { %2340 = vrot.lane.b32.xlu1 %v3083_v13, %s3093_s22 }
0x1249   :  { %v1410_v5 = vpop.permute.xlu0 %1409 }
0x124a   :  { %2599 = vst.msk [vmem:[%s4014_s5 + $0x1c] sm:$0xf] %vm705_vm1, %v1410_v5 }
0x124b   :  { %1892 = vrot.lane.b32.xlu1 %v3668_v15, %s3094_s2 }
0x1251   :  { %v1644_v42 = vpop.permute.xlu0 %1643 }
0x1252   :  { %2608 = vst.msk [vmem:[%s4014_s5 + $0x20] sm:$0xf] %vm705_vm1, %v1644_v42 }
0x1253   :  { %2117 = vrot.lane.b32.xlu1 %v3733_v38, %s3094_s2 }
0x1259   :  { %v1657_v52 = vpop.permute.xlu0 %1656 }
0x125a   :  { %2610 = vst.msk [vmem:[%s4015_s6 + $0x18] sm:$0xf] %vm705_vm1, %v1657_v52 }
0x125d   :  { %v2307_v47 = vpop.permute.xlu2 %2306 }
0x125e   :  { %v2311_v8 = vmul.f32 %v2307_v47, %v3782_v1 }
0x1260   :  { %2375 = vrot.lane.b32.xlu0 %v2311_v8, %s3094_s2  ;;  %v2347_v53 = vpack.c.bf16 %v2311_v8, %v2311_v8 }
0x1261   :  { %v1882_v15 = vpop.permute.xlu0 %1881 }
0x1262   :  { %2619 = vst.msk [vmem:[%s4014_s5 + $0x2c] sm:$0xf] %vm705_vm1, %v1882_v15 }
0x1265   :  { %v1895_v34 = vpop.permute.xlu2 %1894 }
0x1266   :  { %2621 = vst.msk [vmem:[%s4015_s6 + $0x14] sm:$0xf] %vm705_vm1, %v1895_v34 }
0x126d   :  { %v2129_v38 = vpop.permute.xlu2 %2128  ;;  %v2305_v31 = vpop.permute.xlu1 %2304 }
0x126e   :  { %2630 = vst.msk [vmem:[%s4015_s6 + $0x8] sm:$0xf] %vm705_vm1, %v2129_v38  ;;  %v2310_v1 = vmul.f32 %v2305_v31, %v3778_v59 }
0x1270   :  { %v2346_v36 = vpack.c.bf16 %v2310_v1, %v2310_v1  ;;  %2373 = vrot.lane.b32.xlu2 %v2310_v1, %s3094_s2 }
0x1272   :  { %2350 = vrot.lane.b32.xlu1 %v2346_v36, %s3094_s2 }
0x1278   :  { %2385 = vrot.lane.b32.xlu2 %v3860_v28, %s3095_s1 }
0x127a   :  { %2383 = vrot.lane.b32.xlu1 %v3855_v14, %s3095_s1 }
0x127d   :  { %v2339_v26 = vpop.permute.xlu0 %2338 }
0x127e   :  { %v2344_v10 = vmul.f32 %v2339_v26, %v3807_v60 }
0x1280   :  { %2352 = vrot.lane.b32.xlu2 %v2347_v53, %s3094_s2  ;;  %2393 = vrot.lane.b32.xlu0 %v2344_v10, %s3094_s2  ;;  %v2359_v59 = vpack.c.bf16 %v2344_v10, %v2344_v10 }
0x1285   :  { %v2116_v18 = vpop.permute.xlu0 %2115 }
0x1286   :  { %2628 = vst.msk [vmem:[%s4014_s5 + $0x30] sm:$0xf] %vm705_vm1, %v2116_v18 }
0x1288   :  { %2403 = vrot.lane.b32.xlu2 %v3874_v51, %s3095_s1  ;;  %2363 = vrot.lane.b32.xlu0 %v2359_v59, %s3094_s2 }
0x128d   :  { %v2131_v57 = vpop.permute.xlu0 %2130 }
0x128e   :  { %2631 = vst.msk [vmem:[%s4015_s6 + $0xc] sm:$0xf] %vm705_vm1, %v2131_v57 }
0x1290   :  { %2405 = vrot.lane.b32.xlu0 %v2333_v29, %s3095_s1 }
0x12b5   :  { %v2341_v50 = vpop.permute.xlu1 %2340 }
0x12b6   :  { %v2345_v3 = vmul.f32 %v2341_v50, %v3831_v4 }
0x12b8   :  { %v2360_v60 = vpack.c.bf16 %v2345_v3, %v2345_v3 }
0x12ba   :  { %2365 = vrot.lane.b32.xlu1 %v2360_v60, %s3094_s2 }
0x12bd   :  { %v1893_v27 = vpop.permute.xlu1 %1892 }
0x12be   :  { %2620 = vst.msk [vmem:[%s4015_s6 + $0x10] sm:$0xf] %vm705_vm1, %v1893_v27 }
0x12c2   :  { %2395 = vrot.lane.b32.xlu1 %v2345_v3, %s3094_s2 }
0x12c5   :  { %v2118_v32 = vpop.permute.xlu1 %2117 }
0x12c6   :  { %2629 = vst.msk [vmem:[%s4014_s5 + $0x34] sm:$0xf] %vm705_vm1, %v2118_v32 }
0x12ca   :  { %v2374_v58 = vpop.permute.xlu2 %2373 }
0x12cb   :  { %2379 = vst.msk [vmem:[#allocation4] sm:$0xff] %vm135_vm0, %v2374_v58 }
0x12d2   :  { %v2376_v48 = vpop.permute.xlu0 %2375  ;;  %v2386_v35 = vpop.permute.xlu2 %2385 }
0x12d3   :  { %2380 = vst.msk [vmem:[#allocation4 + $0x8] sm:$0xff] %vm135_vm0, %v2376_v48 }
0x12d4   :  { %2390 = vst.msk [vmem:[#allocation5 + $0x8] sm:$0xff] %vm135_vm0, %v2386_v35 }
0x12da   :  { %v2353_v39 = vpop.permute.xlu2 %2352 }
0x12db   :  { %2639 = vst.msk [vmem:[%s4014_s5 + $0x3c] sm:$0xf] %vm705_vm1, %v2353_v39 }
0x12e2   :  { %v2404_v11 = vpop.permute.xlu2 %2403 }
0x12e3   :  { %2409 = vst.msk [vmem:[#allocation5 + $0x10] sm:$0xff] %vm135_vm0, %v2404_v11 }
0x12e4   :  { %v2351_v30 = vpop.permute.xlu1 %2350 }
0x12e5   :  { %2638 = vst.msk [vmem:[%s4014_s5 + $0x38] sm:$0xf] %vm705_vm1, %v2351_v30 }
0x12ec   :  { %v2384_v23 = vpop.permute.xlu1 %2383 }
0x12ed   :  { %2389 = vst.msk [vmem:[#allocation5] sm:$0xff] %vm135_vm0, %v2384_v23 }
0x12f2   :  { %v2394_v25 = vpop.permute.xlu0 %2393 }
0x12f3   :  { %2399 = vst.msk [vmem:[#allocation4 + $0x10] sm:$0xff] %vm135_vm0, %v2394_v25 }
0x12fa   :  { %v2364_v46 = vpop.permute.xlu0 %2363 }
0x12fb   :  { %2369 = vst.msk [vmem:[%s4015_s6] sm:$0xf] %vm705_vm1, %v2364_v46 }
0x1302   :  { %v2406_v49 = vpop.permute.xlu0 %2405 }
0x1303   :  { %2410 = vst.msk [vmem:[#allocation5 + $0x18] sm:$0xff] %vm135_vm0, %v2406_v49 }
0x132c   :  { %v2366_v0 = vpop.permute.xlu1 %2365 }
0x132d   :  { %2370 = vst.msk [vmem:[%s4015_s6 + $0x4] sm:$0xf] %vm705_vm1, %v2366_v0 }
0x1334   :  { %v2396_v4 = vpop.permute.xlu1 %2395 }
0x1335   :  { %2400 = vst.msk [vmem:[#allocation4 + $0x18] sm:$0xff] %vm135_vm0, %v2396_v4 }

</bundles_post_ra>
